<compile_context>
chip_gen: v7x
topology: tpu7x:2x2x1
jax: 0.10.0
libtpu: 0.0.40
codegen_flags: <defaults>
</compile_context>

<pallas_src>
import functools

import jax
import jax.numpy as jnp
from jax import lax
from jax.experimental import pallas as pl
from jax.experimental.pallas import tpu as pltpu

_EPS = 1e-5
# Scoped VMEM request: comfortably below v7x's 64 MiB/TC physical VMEM and far
# below v5e/v6e's 128 MiB; actual per-call use with the blocks below is small.
_VMEM_LIMIT = 32 * 1024 * 1024


def _pick_tm(M, K, elem_bytes=2, max_block_bytes=3 << 20):
    """M-tile: multiple of 8 (128..512) so one bf16 input block stays <=3 MiB,
    or M itself when M is small (block == full dim is always legal)."""
    cap = 512
    while cap > 128 and cap * K * elem_bytes > max_block_bytes:
        cap //= 2
    return M if M <= cap else cap


def _bn_scale_bias(b, bn):
    """Eval-mode BatchNorm as per-output-channel (scale, bias), conv bias folded in."""
    gamma, beta, mean, var = bn
    scale = gamma / jnp.sqrt(var + _EPS)
    return scale, (b - mean) * scale + beta


def fold_bn(w2, b, bn):
    """Fold eval-mode BatchNorm into matmul weights. w2:(K,OC), b:(OC,)."""
    scale, bias = _bn_scale_bias(b, bn)
    return w2 * scale[None, :], bias


# --------------------------------------------------------------------------
# Generic tiled matmul + bias (+ReLU) kernel (Conv_H fused branch, dense layers)
# --------------------------------------------------------------------------
def _mm_kernel(x_ref, w_ref, b_ref, o_ref, *, relu):
    acc = jnp.dot(x_ref[...], w_ref[...], preferred_element_type=jnp.float32)
    acc = acc + b_ref[...]
    if relu:
        acc = jnp.maximum(acc, 0.0)
    o_ref[...] = acc


def matmul_bias_act(x, w, b, *, relu=False):
    """out = [relu](x @ w + b).  x:(M,K) bf16, w:(K,N) bf16 resident, out f32."""
    M, K = x.shape
    _, N = w.shape
    x = x.astype(jnp.bfloat16)
    w = w.astype(jnp.bfloat16)
    b2 = b.reshape(1, N).astype(jnp.float32)
    tm = _pick_tm(M, K)
    return pl.pallas_call(
        functools.partial(_mm_kernel, relu=relu),
        grid=(pl.cdiv(M, tm),),
        in_specs=[pl.BlockSpec((tm, K), lambda i: (i, 0)),
                  pl.BlockSpec((K, N), lambda i: (0, 0)),   # resident
                  pl.BlockSpec((1, N), lambda i: (0, 0))],  # resident
        out_specs=pl.BlockSpec((tm, N), lambda i: (i, 0)),
        out_shape=jax.ShapeDtypeStruct((M, N), jnp.float32),
        compiler_params=pltpu.CompilerParams(
            dimension_semantics=("parallel",),
            vmem_limit_bytes=_VMEM_LIMIT),
    )(x, w, b2)


# --------------------------------------------------------------------------
# Conv_V: freq-im2col matmul with in-kernel time taps + fused freq max-pool
# --------------------------------------------------------------------------
def _convv_kernel(x_ref, w_ref, b_ref, o_ref, acc_ref, *, kw, wo):
    """One (batch b, freq-offset h) step: 7 shifted matmuls over the time axis,
    bias + ReLU, running max over h in a VMEM accumulator."""
    h = pl.program_id(1)
    y = jnp.dot(x_ref[0, 0, 0:wo, :], w_ref[0],
                preferred_element_type=jnp.float32)
    for dw in range(1, kw):
        y = y + jnp.dot(x_ref[0, 0, dw:dw + wo, :], w_ref[dw],
                        preferred_element_type=jnp.float32)
    y = jnp.maximum(y + b_ref[...], 0.0)

    @pl.when(h == 0)
    def _():
        acc_ref[...] = jnp.full_like(acc_ref, -jnp.inf)

    acc_ref[...] = jnp.maximum(acc_ref[...], y[None])

    @pl.when(h == pl.num_programs(1) - 1)
    def _():
        o_ref[...] = acc_ref[...]


def conv_v(x_bn_bf16, W, b, bn, kh):
    """Conv_V: Conv2d((kh,7), pad=(0,3)) + eval-BN + ReLU + max-pool over freq.

    Only the frequency window im2col is materialized (in bf16); the 7 time taps
    and the frequency max are handled inside the Pallas kernel.  Output is
    channels-last (B, T, OC) f32.
    """
    B, C, H, T = x_bn_bf16.shape
    kw, pw = 7, 3
    Ho = H - kh + 1
    Wp = T + 2 * pw
    OC = W.shape[0]
    K = C * kh

    # frequency-only im2col: (B, Ho, Wp, C*kh), feature order (c, dh)
    xp = jnp.pad(x_bn_bf16, ((0, 0), (0, 0), (0, 0), (pw, pw)))
    hi = jnp.arange(Ho)[:, None] + jnp.arange(kh)[None, :]       # (Ho, kh)
    patches = xp[:, :, hi, :]                                    # (B,C,Ho,kh,Wp)
    patches = patches.transpose(0, 2, 4, 1, 3)                   # (B,Ho,Wp,C,kh)
    xf = patches.reshape(B, Ho, Wp, K)

    # weights per time tap: (kw, C*kh, OC), eval-BN folded
    scale, bias = _bn_scale_bias(b, bn)
    wr = W.transpose(3, 1, 2, 0).reshape(kw, K, OC) * scale[None, None, :]
    wr = wr.astype(jnp.bfloat16)
    b2 = bias.reshape(1, OC).astype(jnp.float32)

    return pl.pallas_call(
        functools.partial(_convv_kernel, kw=kw, wo=T),
        grid=(B, Ho),
        in_specs=[pl.BlockSpec((1, 1, Wp, K), lambda bi, h: (bi, h, 0, 0)),
                  pl.BlockSpec((kw, K, OC), lambda bi, h: (0, 0, 0)),  # resident
                  pl.BlockSpec((1, OC), lambda bi, h: (0, 0))],        # resident
        out_specs=pl.BlockSpec((1, T, OC), lambda bi, h: (bi, 0, 0)),
        out_shape=jax.ShapeDtypeStruct((B, T, OC), jnp.float32),
        scratch_shapes=[pltpu.VMEM((1, T, OC), jnp.float32)],
        compiler_params=pltpu.CompilerParams(
            dimension_semantics=("parallel", "arbitrary"),
            vmem_limit_bytes=_VMEM_LIMIT),
    )(xf, wr, b2)


# --------------------------------------------------------------------------
# Back-end Conv_1d: im2col-free time conv + fused ReLU / residual / pooling
# --------------------------------------------------------------------------
def _conv1d_kernel(x_ref, w_ref, b_ref, o_ref, mx_ref, av_ref, *, k, t):
    y = jnp.dot(x_ref[0, 0:t, :], w_ref[0], preferred_element_type=jnp.float32)
    for dw in range(1, k):
        y = y + jnp.dot(x_ref[0, dw:dw + t, :], w_ref[dw],
                        preferred_element_type=jnp.float32)
    y = jnp.maximum(y + b_ref[...], 0.0)
    o_ref[...] = y[None]
    mx_ref[...] = jnp.max(y, axis=0, keepdims=True)[None]
    av_ref[...] = (jnp.sum(y, axis=0, keepdims=True) * (1.0 / t))[None]


def _conv1d_res_kernel(x_ref, w_ref, b_ref, r_ref, o_ref, mx_ref, av_ref, *, k, t):
    y = jnp.dot(x_ref[0, 0:t, :], w_ref[0], preferred_element_type=jnp.float32)
    for dw in range(1, k):
        y = y + jnp.dot(x_ref[0, dw:dw + t, :], w_ref[dw],
                        preferred_element_type=jnp.float32)
    y = jnp.maximum(y + b_ref[...], 0.0) + r_ref[0]
    o_ref[...] = y[None]
    mx_ref[...] = jnp.max(y, axis=0, keepdims=True)[None]
    av_ref[...] = (jnp.sum(y, axis=0, keepdims=True) * (1.0 / t))[None]


def conv1d_block(x, W, b, bn, k, residual=None):
    """Conv_1d: Conv1d(k, pad=k//2) + eval-BN + ReLU (+ MaxPool1d(1)=identity)
    [+ residual], with the global max / average pooling over time fused in.

    x / residual: channels-last (B, T, C) f32.  Returns (y (B,T,OC),
    max (B,OC), avg (B,OC))."""
    B, T, Cin = x.shape
    OC = W.shape[0]
    p = k // 2
    xpad = jnp.pad(x, ((0, 0), (p, p), (0, 0))).astype(jnp.bfloat16)  # (B,T+2p,Cin)
    scale, bias = _bn_scale_bias(b, bn)
    wr = (W.transpose(2, 1, 0) * scale[None, None, :]).astype(jnp.bfloat16)
    b2 = bias.reshape(1, OC).astype(jnp.float32)

    in_specs = [pl.BlockSpec((1, T + 2 * p, Cin), lambda bi: (bi, 0, 0)),
                pl.BlockSpec((k, Cin, OC), lambda bi: (0, 0, 0)),   # resident
                pl.BlockSpec((1, OC), lambda bi: (0, 0))]           # resident
    args = [xpad, wr, b2]
    if residual is None:
        kern = functools.partial(_conv1d_kernel, k=k, t=T)
    else:
        kern = functools.partial(_conv1d_res_kernel, k=k, t=T)
        in_specs.append(pl.BlockSpec((1, T, OC), lambda bi: (bi, 0, 0)))
        args.append(residual.astype(jnp.float32))

    y, mx, av = pl.pallas_call(
        kern,
        grid=(B,),
        in_specs=in_specs,
        out_specs=(pl.BlockSpec((1, T, OC), lambda bi: (bi, 0, 0)),
                   pl.BlockSpec((1, 1, OC), lambda bi: (bi, 0, 0)),
                   pl.BlockSpec((1, 1, OC), lambda bi: (bi, 0, 0))),
        out_shape=(jax.ShapeDtypeStruct((B, T, OC), jnp.float32),
                   jax.ShapeDtypeStruct((B, 1, OC), jnp.float32),
                   jax.ShapeDtypeStruct((B, 1, OC), jnp.float32)),
        compiler_params=pltpu.CompilerParams(
            dimension_semantics=("parallel",),
            vmem_limit_bytes=_VMEM_LIMIT),
    )(*args)
    return y, mx.reshape(B, OC), av.reshape(B, OC)


# --------------------------------------------------------------------------
# Fused global max + average pooling over time (for the front-end features)
# --------------------------------------------------------------------------
def _pool_kernel(x_ref, max_ref, sum_ref, *, T_total, tt):
    t = pl.program_id(0)

    @pl.when(t == 0)
    def _():
        max_ref[...] = jnp.full_like(max_ref, -jnp.inf)
        sum_ref[...] = jnp.zeros_like(sum_ref)

    x = x_ref[...]                                        # (B, tt, C) f32
    valid = T_total - t * tt                              # mask ragged last tile
    row = lax.broadcasted_iota(jnp.int32, x.shape, 1)
    in_range = row < valid
    max_ref[...] = jnp.maximum(
        max_ref[...], jnp.max(jnp.where(in_range, x, -jnp.inf), axis=1))
    sum_ref[...] = sum_ref[...] + jnp.sum(jnp.where(in_range, x, 0.0), axis=1)

    @pl.when(t == pl.num_programs(0) - 1)
    def _():
        sum_ref[...] = sum_ref[...] * (1.0 / T_total)


def global_max_avg_pool(x):
    """x: (B, T, C) f32 -> (max (B,C), mean (B,C)) in one pass over HBM."""
    B, T, C = x.shape
    tt = T if T <= 256 else 256
    return pl.pallas_call(
        functools.partial(_pool_kernel, T_total=T, tt=tt),
        grid=(pl.cdiv(T, tt),),
        in_specs=[pl.BlockSpec((B, tt, C), lambda t: (0, t, 0))],
        out_specs=(pl.BlockSpec((B, C), lambda t: (0, 0)),
                   pl.BlockSpec((B, C), lambda t: (0, 0))),
        out_shape=(jax.ShapeDtypeStruct((B, C), jnp.float32),
                   jax.ShapeDtypeStruct((B, C), jnp.float32)),
        compiler_params=pltpu.CompilerParams(
            dimension_semantics=("arbitrary",),
            vmem_limit_bytes=_VMEM_LIMIT),
    )(x.astype(jnp.float32))


# --------------------------------------------------------------------------
# Conv_H branches (fused into one matmul)
# --------------------------------------------------------------------------
def im2col1d_cl(x, k):
    """Channels-last 1-D im2col. x:(B,T,C) -> (B*T, k*C), feature order (tap, C),
    zero padding k//2 on the time axis."""
    B, T, C = x.shape
    p = k // 2
    xp = jnp.pad(x, ((0, 0), (p, p), (0, 0)))
    ti = jnp.arange(T)[:, None] + jnp.arange(k)[None, :]        # (T, k)
    patches = xp[:, ti, :]                                      # (B, T, k, C)
    return patches.reshape(B * T, k * C)


def conv_h_fused(x_bn, p3, p4, p5):
    """Fused Conv_H m3/m4/m5: one shared freq average-pool, one Conv1d matmul
    with the k=65/k=33 kernels zero-embedded (centered) into the k=129 tap axis.
    Exact w.r.t. running the three branches separately."""
    B, C, H, T = x_bn.shape
    xa = jnp.mean(x_bn, axis=2).transpose(0, 2, 1)              # (B, T, C)
    patches = im2col1d_cl(xa, 129).astype(jnp.bfloat16)         # (B*T, 129*C)

    def branch(Wb, bb, bn, k):
        OC = Wb.shape[0]
        off = (129 - k) // 2
        Wfull = jnp.zeros((OC, C, 129), jnp.float32).at[:, :, off:off + k].set(Wb)
        w2 = Wfull.transpose(2, 1, 0).reshape(129 * C, OC)      # (tap*C, OC)
        return fold_bn(w2, bb, bn)

    w3, b3 = branch(*p3, 129)
    w4, b4 = branch(*p4, 65)
    w5, b5 = branch(*p5, 33)
    w = jnp.concatenate([w3, w4, w5], axis=1)                   # (387, 153)
    b = jnp.concatenate([b3, b4, b5])
    y = matmul_bias_act(patches, w, b, relu=True)               # (B*T, 153)
    return y.reshape(B, T, w.shape[1])


# --------------------------------------------------------------------------
# Full forward pass
# --------------------------------------------------------------------------
def musicnn_forward(x, params):
    B, C, H, T = x.shape

    # spec_bn (eval-mode BatchNorm2d(3)): exact per-channel affine on the input.
    g, be, mu, va = params["spec_bn"]
    scale = g / jnp.sqrt(va + _EPS)
    shift = be - mu * scale
    x_bn = x * scale[None, :, None, None] + shift[None, :, None, None]
    x_bn_bf16 = x_bn.astype(jnp.bfloat16)

    # front-end branches, channels-last (B, T, OC)
    v1 = conv_v(x_bn_bf16, *params["m1"], kh=int(0.7 * 96))     # (B, T, 204)
    v2 = conv_v(x_bn_bf16, *params["m2"], kh=int(0.4 * 96))     # (B, T, 204)
    hb = conv_h_fused(x_bn, params["m3"], params["m4"], params["m5"])  # (B,T,153)
    front = jnp.concatenate([v1, v2, hb], axis=-1)              # (B, T, 561)

    # back-end 1-D conv stack; ReLU, residual adds and global max/avg pooling
    # over time are fused into the conv kernels.
    res1, mp1, ap1 = conv1d_block(front, *params["layer1"], k=7)
    res2, mp2, ap2 = conv1d_block(res1, *params["layer2"], k=7, residual=res1)
    res3, mp3, ap3 = conv1d_block(res2, *params["layer3"], k=7, residual=res2)

    # pooling of the front-end features; res1/2/3 pooling already fused above,
    # so the big (B, T, 753) concat of the reference never materializes.
    mpf, apf = global_max_avg_pool(front)                       # (B, 561) each
    feat = jnp.concatenate([mpf, mp1, mp2, mp3, apf, ap1, ap2, ap3], axis=1)

    # dense1 + BN1d + ReLU (BN folded into the matmul)
    Wd1, bd1, bn1 = params["dense1"]
    w2, b2 = fold_bn(Wd1.T, bd1, bn1)
    h = matmul_bias_act(feat, w2, b2, relu=True)                # (B, 200)

    # TODO(synk): Dropout(0.5) is identity in inference mode; training-mode
    # random masking is not implemented.
    Wd2, bd2 = params["dense2"]
    logits = matmul_bias_act(h, Wd2.T, bd2, relu=False)         # (B, num_classes)
    # CFG.loss == 'CCE' assumed -> no sigmoid
    return logits


# --------------------------------------------------------------------------
# Deterministic parameter initialization (synthetic; shapes match __init__)
# --------------------------------------------------------------------------
def init_params(key, num_classes=10, backend=64, dense=200):
    keys = iter(jax.random.split(key, 64))

    def bn_p(c):
        g = 1.0 + 0.1 * jax.random.normal(next(keys), (c,), jnp.float32)
        be = 0.1 * jax.random.normal(next(keys), (c,), jnp.float32)
        mu = 0.1 * jax.random.normal(next(keys), (c,), jnp.float32)
        va = 1.0 + 0.1 * jnp.abs(jax.random.normal(next(keys), (c,), jnp.float32))
        return (g, be, mu, va)

    def conv2d_p(oc, ic, kh, kw):
        w = 0.05 * jax.random.normal(next(keys), (oc, ic, kh, kw), jnp.float32)
        b = 0.05 * jax.random.normal(next(keys), (oc,), jnp.float32)
        return (w, b, bn_p(oc))

    def conv1d_p(oc, ic, k):
        w = 0.05 * jax.random.normal(next(keys), (oc, ic, k), jnp.float32)
        b = 0.05 * jax.random.normal(next(keys), (oc,), jnp.float32)
        return (w, b, bn_p(oc))

    params = {}
    params["spec_bn"] = bn_p(3)
    params["m1"] = conv2d_p(204, 3, int(0.7 * 96), 7)
    params["m2"] = conv2d_p(204, 3, int(0.4 * 96), 7)
    params["m3"] = conv1d_p(51, 3, 129)
    params["m4"] = conv1d_p(51, 3, 65)
    params["m5"] = conv1d_p(51, 3, 33)
    params["layer1"] = conv1d_p(backend, 561, 7)
    params["layer2"] = conv1d_p(backend, backend, 7)
    params["layer3"] = conv1d_p(backend, backend, 7)
    in_feat = (561 + backend * 3) * 2
    params["dense1"] = (
        0.05 * jax.random.normal(next(keys), (dense, in_feat), jnp.float32),
        0.05 * jax.random.normal(next(keys), (dense,), jnp.float32),
        bn_p(dense),
    )
    params["dense2"] = (
        0.05 * jax.random.normal(next(keys), (num_classes, dense), jnp.float32),
        0.05 * jax.random.normal(next(keys), (num_classes,), jnp.float32),
    )
    return params


if __name__ == "__main__":
    key = jax.random.PRNGKey(0)
    kx, kp = jax.random.split(key)
    B, C, H, T = 2, 3, 96, 16   # freq must stay 96 (kernel heights are 67 / 38)
    x = jax.random.normal(kx, (B, C, H, T), jnp.float32)
    params = init_params(kp, num_classes=10)

    fwd = jax.jit(musicnn_forward)
    out = fwd(x, params)
    out = jax.block_until_ready(out)

    assert out.shape == (B, 10), out.shape
    assert bool(jnp.all(jnp.isfinite(out)))
    print("KERNEL_OK")
</pallas_src>

<mosaic_0001>
module attributes {stable_mosaic.version = 11 : i64} {
  func.func @_mm_kernel(%arg0: i32, %arg1: memref<32x387xbf16, #tpu.memory_space<vmem>>, %arg2: memref<387x153xbf16, #tpu.memory_space<vmem>>, %arg3: memref<1x153xf32, #tpu.memory_space<vmem>>, %arg4: memref<32x153xf32, #tpu.memory_space<vmem>>) attributes {dimension_semantics = [#tpu.dimension_semantics<parallel>], iteration_bounds = array<i64: 1>, scalar_prefetch = 0 : i64, scratch_operands = 0 : i64, tpu.core_type = #tpu.core_type<tc>, window_params = [{transform_indices = @transform_0, window_bounds = array<i64: 32, 387>}, {pipeline_mode = #tpu.pipeline_mode<synchronous>, transform_indices = @transform_1, window_bounds = array<i64: 387, 153>}, {pipeline_mode = #tpu.pipeline_mode<synchronous>, transform_indices = @transform_2, window_bounds = array<i64: 1, 153>}, {transform_indices = @transform_3, window_bounds = array<i64: 32, 153>}]} {
    %c0 = arith.constant 0 : index
    %c0_0 = arith.constant 0 : index
    %0 = vector.load %arg1[%c0, %c0_0] : memref<32x387xbf16, #tpu.memory_space<vmem>>, vector<32x387xbf16>
    %c0_1 = arith.constant 0 : index
    %c0_2 = arith.constant 0 : index
    %1 = vector.load %arg2[%c0_1, %c0_2] : memref<387x153xbf16, #tpu.memory_space<vmem>>, vector<387x153xbf16>
    %cst = arith.constant dense<0.000000e+00> : vector<32x153xf32>
    %2 = tpu.matmul %0, %1, %cst {dimension_numbers = #tpu.dot_dimension_numbers<[1], [0], [0], [1], [0, 0, 1, 1], [], []>} : vector<32x387xbf16>, vector<387x153xbf16>, vector<32x153xf32> -> vector<32x153xf32>
    %c0_3 = arith.constant 0 : index
    %c0_4 = arith.constant 0 : index
    %3 = vector.load %arg3[%c0_3, %c0_4] : memref<1x153xf32, #tpu.memory_space<vmem>>, vector<1x153xf32>
    %4 = vector.broadcast %3 : vector<1x153xf32> to vector<32x153xf32>
    %5 = arith.addf %2, %4 : vector<32x153xf32>
    %cst_5 = arith.constant 0.000000e+00 : f32
    %6 = vector.broadcast %cst_5 : f32 to vector<32x153xf32>
    %7 = arith.maximumf %5, %6 : vector<32x153xf32>
    %c0_6 = arith.constant 0 : index
    %c0_7 = arith.constant 0 : index
    %8 = vector.load %arg4[%c0_6, %c0_7] : memref<32x153xf32, #tpu.memory_space<vmem>>, vector<32x153xf32>
    tpu.vector_store %arg4[%c0_6, %c0_7], %7 {strides = array<i32>} : memref<32x153xf32, #tpu.memory_space<vmem>>, vector<32x153xf32>,
    return
  }
  func.func @transform_0(%arg0: i32) -> (i32, i32) {
    %c0_i32 = arith.constant 0 : i32
    %c0_i32_0 = arith.constant 0 : i32
    return %arg0, %c0_i32 : i32, i32
  }
  func.func @transform_1(%arg0: i32) -> (i32, i32) {
    %c0_i32 = arith.constant 0 : i32
    %c0_i32_0 = arith.constant 0 : i32
    %c0_i32_1 = arith.constant 0 : i32
    return %c0_i32, %c0_i32_0 : i32, i32
  }
  func.func @transform_2(%arg0: i32) -> (i32, i32) {
    %c0_i32 = arith.constant 0 : i32
    %c0_i32_0 = arith.constant 0 : i32
    %c0_i32_1 = arith.constant 0 : i32
    return %c0_i32, %c0_i32_0 : i32, i32
  }
  func.func @transform_3(%arg0: i32) -> (i32, i32) {
    %c0_i32 = arith.constant 0 : i32
    %c0_i32_0 = arith.constant 0 : i32
    return %arg0, %c0_i32 : i32, i32
  }
}

module attributes {stable_mosaic.version = 11 : i64} {
  func.func @_convv_kernel(%arg0: i32, %arg1: i32, %arg2: memref<1x1x22x114xbf16, #tpu.memory_space<vmem>>, %arg3: memref<7x114x204xbf16, #tpu.memory_space<vmem>>, %arg4: memref<1x204xf32, #tpu.memory_space<vmem>>, %arg5: memref<1x16x204xf32, #tpu.memory_space<vmem>>, %arg6: memref<1x16x204xf32, #tpu.memory_space<vmem>>) attributes {dimension_semantics = [#tpu.dimension_semantics<parallel>, #tpu.dimension_semantics<arbitrary>], iteration_bounds = array<i64: 2, 59>, scalar_prefetch = 0 : i64, scratch_operands = 1 : i64, tpu.core_type = #tpu.core_type<tc>, window_params = [{transform_indices = @transform_0, window_bounds = array<i64: 1, 1, 22, 114>}, {pipeline_mode = #tpu.pipeline_mode<synchronous>, transform_indices = @transform_1, window_bounds = array<i64: 7, 114, 204>}, {pipeline_mode = #tpu.pipeline_mode<synchronous>, transform_indices = @transform_2, window_bounds = array<i64: 1, 204>}, {transform_indices = @transform_3, window_bounds = array<i64: 1, 16, 204>}]} {
    %c0 = arith.constant 0 : index
    %c0_0 = arith.constant 0 : index
    %c0_1 = arith.constant 0 : index
    %c0_2 = arith.constant 0 : index
    %0 = vector.load %arg2[%c0, %c0_0, %c0_1, %c0_2] : memref<1x1x22x114xbf16, #tpu.memory_space<vmem>>, vector<1x1x16x114xbf16>
    %1 = vector.shape_cast %0 : vector<1x1x16x114xbf16> to vector<16x114xbf16>
    %c0_3 = arith.constant 0 : index
    %c0_4 = arith.constant 0 : index
    %c0_5 = arith.constant 0 : index
    %2 = vector.load %arg3[%c0_3, %c0_4, %c0_5] : memref<7x114x204xbf16, #tpu.memory_space<vmem>>, vector<1x114x204xbf16>
    %3 = vector.shape_cast %2 : vector<1x114x204xbf16> to vector<114x204xbf16>
    %cst = arith.constant dense<0.000000e+00> : vector<16x204xf32>
    %4 = tpu.matmul %1, %3, %cst {dimension_numbers = #tpu.dot_dimension_numbers<[1], [0], [0], [1], [0, 0, 1, 1], [], []>} : vector<16x114xbf16>, vector<114x204xbf16>, vector<16x204xf32> -> vector<16x204xf32>
    %c0_6 = arith.constant 0 : index
    %c0_7 = arith.constant 0 : index
    %c1 = arith.constant 1 : index
    %c0_8 = arith.constant 0 : index
    %5 = vector.load %arg2[%c0_6, %c0_7, %c1, %c0_8] : memref<1x1x22x114xbf16, #tpu.memory_space<vmem>>, vector<1x1x16x114xbf16>
    %6 = vector.shape_cast %5 : vector<1x1x16x114xbf16> to vector<16x114xbf16>
    %c1_9 = arith.constant 1 : index
    %c0_10 = arith.constant 0 : index
    %c0_11 = arith.constant 0 : index
    %7 = vector.load %arg3[%c1_9, %c0_10, %c0_11] : memref<7x114x204xbf16, #tpu.memory_space<vmem>>, vector<1x114x204xbf16>
    %8 = vector.shape_cast %7 : vector<1x114x204xbf16> to vector<114x204xbf16>
    %cst_12 = arith.constant dense<0.000000e+00> : vector<16x204xf32>
    %9 = tpu.matmul %6, %8, %cst_12 {dimension_numbers = #tpu.dot_dimension_numbers<[1], [0], [0], [1], [0, 0, 1, 1], [], []>} : vector<16x114xbf16>, vector<114x204xbf16>, vector<16x204xf32> -> vector<16x204xf32>
    %10 = arith.addf %4, %9 : vector<16x204xf32>
    %c0_13 = arith.constant 0 : index
    %c0_14 = arith.constant 0 : index
    %c2 = arith.constant 2 : index
    %c0_15 = arith.constant 0 : index
    %11 = vector.load %arg2[%c0_13, %c0_14, %c2, %c0_15] : memref<1x1x22x114xbf16, #tpu.memory_space<vmem>>, vector<1x1x16x114xbf16>
    %12 = vector.shape_cast %11 : vector<1x1x16x114xbf16> to vector<16x114xbf16>
    %c2_16 = arith.constant 2 : index
    %c0_17 = arith.constant 0 : index
    %c0_18 = arith.constant 0 : index
    %13 = vector.load %arg3[%c2_16, %c0_17, %c0_18] : memref<7x114x204xbf16, #tpu.memory_space<vmem>>, vector<1x114x204xbf16>
    %14 = vector.shape_cast %13 : vector<1x114x204xbf16> to vector<114x204xbf16>
    %cst_19 = arith.constant dense<0.000000e+00> : vector<16x204xf32>
    %15 = tpu.matmul %12, %14, %cst_19 {dimension_numbers = #tpu.dot_dimension_numbers<[1], [0], [0], [1], [0, 0, 1, 1], [], []>} : vector<16x114xbf16>, vector<114x204xbf16>, vector<16x204xf32> -> vector<16x204xf32>
    %16 = arith.addf %10, %15 : vector<16x204xf32>
    %c0_20 = arith.constant 0 : index
    %c0_21 = arith.constant 0 : index
    %c3 = arith.constant 3 : index
    %c0_22 = arith.constant 0 : index
    %17 = vector.load %arg2[%c0_20, %c0_21, %c3, %c0_22] : memref<1x1x22x114xbf16, #tpu.memory_space<vmem>>, vector<1x1x16x114xbf16>
    %18 = vector.shape_cast %17 : vector<1x1x16x114xbf16> to vector<16x114xbf16>
    %c3_23 = arith.constant 3 : index
    %c0_24 = arith.constant 0 : index
    %c0_25 = arith.constant 0 : index
    %19 = vector.load %arg3[%c3_23, %c0_24, %c0_25] : memref<7x114x204xbf16, #tpu.memory_space<vmem>>, vector<1x114x204xbf16>
    %20 = vector.shape_cast %19 : vector<1x114x204xbf16> to vector<114x204xbf16>
    %cst_26 = arith.constant dense<0.000000e+00> : vector<16x204xf32>
    %21 = tpu.matmul %18, %20, %cst_26 {dimension_numbers = #tpu.dot_dimension_numbers<[1], [0], [0], [1], [0, 0, 1, 1], [], []>} : vector<16x114xbf16>, vector<114x204xbf16>, vector<16x204xf32> -> vector<16x204xf32>
    %22 = arith.addf %16, %21 : vector<16x204xf32>
    %c0_27 = arith.constant 0 : index
    %c0_28 = arith.constant 0 : index
    %c4 = arith.constant 4 : index
    %c0_29 = arith.constant 0 : index
    %23 = vector.load %arg2[%c0_27, %c0_28, %c4, %c0_29] : memref<1x1x22x114xbf16, #tpu.memory_space<vmem>>, vector<1x1x16x114xbf16>
    %24 = vector.shape_cast %23 : vector<1x1x16x114xbf16> to vector<16x114xbf16>
    %c4_30 = arith.constant 4 : index
    %c0_31 = arith.constant 0 : index
    %c0_32 = arith.constant 0 : index
    %25 = vector.load %arg3[%c4_30, %c0_31, %c0_32] : memref<7x114x204xbf16, #tpu.memory_space<vmem>>, vector<1x114x204xbf16>
    %26 = vector.shape_cast %25 : vector<1x114x204xbf16> to vector<114x204xbf16>
    %cst_33 = arith.constant dense<0.000000e+00> : vector<16x204xf32>
    %27 = tpu.matmul %24, %26, %cst_33 {dimension_numbers = #tpu.dot_dimension_numbers<[1], [0], [0], [1], [0, 0, 1, 1], [], []>} : vector<16x114xbf16>, vector<114x204xbf16>, vector<16x204xf32> -> vector<16x204xf32>
    %28 = arith.addf %22, %27 : vector<16x204xf32>
    %c0_34 = arith.constant 0 : index
    %c0_35 = arith.constant 0 : index
    %c5 = arith.constant 5 : index
    %c0_36 = arith.constant 0 : index
    %29 = vector.load %arg2[%c0_34, %c0_35, %c5, %c0_36] : memref<1x1x22x114xbf16, #tpu.memory_space<vmem>>, vector<1x1x16x114xbf16>
    %30 = vector.shape_cast %29 : vector<1x1x16x114xbf16> to vector<16x114xbf16>
    %c5_37 = arith.constant 5 : index
    %c0_38 = arith.constant 0 : index
    %c0_39 = arith.constant 0 : index
    %31 = vector.load %arg3[%c5_37, %c0_38, %c0_39] : memref<7x114x204xbf16, #tpu.memory_space<vmem>>, vector<1x114x204xbf16>
    %32 = vector.shape_cast %31 : vector<1x114x204xbf16> to vector<114x204xbf16>
    %cst_40 = arith.constant dense<0.000000e+00> : vector<16x204xf32>
    %33 = tpu.matmul %30, %32, %cst_40 {dimension_numbers = #tpu.dot_dimension_numbers<[1], [0], [0], [1], [0, 0, 1, 1], [], []>} : vector<16x114xbf16>, vector<114x204xbf16>, vector<16x204xf32> -> vector<16x204xf32>
    %34 = arith.addf %28, %33 : vector<16x204xf32>
    %c0_41 = arith.constant 0 : index
    %c0_42 = arith.constant 0 : index
    %c6 = arith.constant 6 : index
    %c0_43 = arith.constant 0 : index
    %35 = vector.load %arg2[%c0_41, %c0_42, %c6, %c0_43] : memref<1x1x22x114xbf16, #tpu.memory_space<vmem>>, vector<1x1x16x114xbf16>
    %36 = vector.shape_cast %35 : vector<1x1x16x114xbf16> to vector<16x114xbf16>
    %c6_44 = arith.constant 6 : index
    %c0_45 = arith.constant 0 : index
    %c0_46 = arith.constant 0 : index
    %37 = vector.load %arg3[%c6_44, %c0_45, %c0_46] : memref<7x114x204xbf16, #tpu.memory_space<vmem>>, vector<1x114x204xbf16>
    %38 = vector.shape_cast %37 : vector<1x114x204xbf16> to vector<114x204xbf16>
    %cst_47 = arith.constant dense<0.000000e+00> : vector<16x204xf32>
    %39 = tpu.matmul %36, %38, %cst_47 {dimension_numbers = #tpu.dot_dimension_numbers<[1], [0], [0], [1], [0, 0, 1, 1], [], []>} : vector<16x114xbf16>, vector<114x204xbf16>, vector<16x204xf32> -> vector<16x204xf32>
    %40 = arith.addf %34, %39 : vector<16x204xf32>
    %c0_48 = arith.constant 0 : index
    %c0_49 = arith.constant 0 : index
    %41 = vector.load %arg4[%c0_48, %c0_49] : memref<1x204xf32, #tpu.memory_space<vmem>>, vector<1x204xf32>
    %42 = vector.broadcast %41 : vector<1x204xf32> to vector<16x204xf32>
    %43 = arith.addf %40, %42 : vector<16x204xf32>
    %cst_50 = arith.constant 0.000000e+00 : f32
    %44 = vector.broadcast %cst_50 : f32 to vector<16x204xf32>
    %45 = arith.maximumf %43, %44 : vector<16x204xf32>
    %c0_i32 = arith.constant 0 : i32
    %46 = arith.cmpi eq, %arg1, %c0_i32 : i32
    %47 = arith.extui %46 : i1 to i32
    %c0_i32_51 = arith.constant 0 : i32
    %48 = arith.cmpi ne, %47, %c0_i32_51 : i32
    scf.if %48 {
      %cst_59 = arith.constant 0xFF800000 : f32
      %56 = vector.broadcast %cst_59 : f32 to vector<1x16x204xf32>
      %c0_60 = arith.constant 0 : index
      %c0_61 = arith.constant 0 : index
      %c0_62 = arith.constant 0 : index
      %57 = vector.load %arg6[%c0_60, %c0_61, %c0_62] : memref<1x16x204xf32, #tpu.memory_space<vmem>>, vector<1x16x204xf32>
      tpu.vector_store %arg6[%c0_60, %c0_61, %c0_62], %56 {strides = array<i32>} : memref<1x16x204xf32, #tpu.memory_space<vmem>>, vector<1x16x204xf32>,
    } else {
    }
    %c0_52 = arith.constant 0 : index
    %c0_53 = arith.constant 0 : index
    %c0_54 = arith.constant 0 : index
    %49 = vector.load %arg6[%c0_52, %c0_53, %c0_54] : memref<1x16x204xf32, #tpu.memory_space<vmem>>, vector<1x16x204xf32>
    %50 = vector.shape_cast %45 : vector<16x204xf32> to vector<1x16x204xf32>
    %51 = arith.maximumf %49, %50 : vector<1x16x204xf32>
    %c0_55 = arith.constant 0 : index
    %c0_56 = arith.constant 0 : index
    %c0_57 = arith.constant 0 : index
    %52 = vector.load %arg6[%c0_55, %c0_56, %c0_57] : memref<1x16x204xf32, #tpu.memory_space<vmem>>, vector<1x16x204xf32>
    tpu.vector_store %arg6[%c0_55, %c0_56, %c0_57], %51 {strides = array<i32>} : memref<1x16x204xf32, #tpu.memory_space<vmem>>, vector<1x16x204xf32>,
    %c58_i32 = arith.constant 58 : i32
    %53 = arith.cmpi eq, %arg1, %c58_i32 : i32
    %54 = arith.extui %53 : i1 to i32
    %c0_i32_58 = arith.constant 0 : i32
    %55 = arith.cmpi ne, %54, %c0_i32_58 : i32
    scf.if %55 {
      %c0_59 = arith.constant 0 : index
      %c0_60 = arith.constant 0 : index
      %c0_61 = arith.constant 0 : index
      %56 = vector.load %arg6[%c0_59, %c0_60, %c0_61] : memref<1x16x204xf32, #tpu.memory_space<vmem>>, vector<1x16x204xf32>
      %c0_62 = arith.constant 0 : index
      %c0_63 = arith.constant 0 : index
      %c0_64 = arith.constant 0 : index
      %57 = vector.load %arg5[%c0_62, %c0_63, %c0_64] : memref<1x16x204xf32, #tpu.memory_space<vmem>>, vector<1x16x204xf32>
      tpu.vector_store %arg5[%c0_62, %c0_63, %c0_64], %56 {strides = array<i32>} : memref<1x16x204xf32, #tpu.memory_space<vmem>>, vector<1x16x204xf32>,
    } else {
    }
    return
  }
  func.func @transform_0(%arg0: i32, %arg1: i32) -> (i32, i32, i32, i32) {
    %c0_i32 = arith.constant 0 : i32
    %c0_i32_0 = arith.constant 0 : i32
    %c0_i32_1 = arith.constant 0 : i32
    return %arg0, %arg1, %c0_i32, %c0_i32_0 : i32, i32, i32, i32
  }
  func.func @transform_1(%arg0: i32, %arg1: i32) -> (i32, i32, i32) {
    %c0_i32 = arith.constant 0 : i32
    %c0_i32_0 = arith.constant 0 : i32
    %c0_i32_1 = arith.constant 0 : i32
    %c0_i32_2 = arith.constant 0 : i32
    return %c0_i32, %c0_i32_0, %c0_i32_1 : i32, i32, i32
  }
  func.func @transform_2(%arg0: i32, %arg1: i32) -> (i32, i32) {
    %c0_i32 = arith.constant 0 : i32
    %c0_i32_0 = arith.constant 0 : i32
    %c0_i32_1 = arith.constant 0 : i32
    return %c0_i32, %c0_i32_0 : i32, i32
  }
  func.func @transform_3(%arg0: i32, %arg1: i32) -> (i32, i32, i32) {
    %c0_i32 = arith.constant 0 : i32
    %c0_i32_0 = arith.constant 0 : i32
    %c0_i32_1 = arith.constant 0 : i32
    return %arg0, %c0_i32, %c0_i32_0 : i32, i32, i32
  }
}

module attributes {stable_mosaic.version = 11 : i64} {
  func.func @_convv_kernel(%arg0: i32, %arg1: i32, %arg2: memref<1x1x22x201xbf16, #tpu.memory_space<vmem>>, %arg3: memref<7x201x204xbf16, #tpu.memory_space<vmem>>, %arg4: memref<1x204xf32, #tpu.memory_space<vmem>>, %arg5: memref<1x16x204xf32, #tpu.memory_space<vmem>>, %arg6: memref<1x16x204xf32, #tpu.memory_space<vmem>>) attributes {dimension_semantics = [#tpu.dimension_semantics<parallel>, #tpu.dimension_semantics<arbitrary>], iteration_bounds = array<i64: 2, 30>, scalar_prefetch = 0 : i64, scratch_operands = 1 : i64, tpu.core_type = #tpu.core_type<tc>, window_params = [{transform_indices = @transform_0, window_bounds = array<i64: 1, 1, 22, 201>}, {pipeline_mode = #tpu.pipeline_mode<synchronous>, transform_indices = @transform_1, window_bounds = array<i64: 7, 201, 204>}, {pipeline_mode = #tpu.pipeline_mode<synchronous>, transform_indices = @transform_2, window_bounds = array<i64: 1, 204>}, {transform_indices = @transform_3, window_bounds = array<i64: 1, 16, 204>}]} {
    %c0 = arith.constant 0 : index
    %c0_0 = arith.constant 0 : index
    %c0_1 = arith.constant 0 : index
    %c0_2 = arith.constant 0 : index
    %0 = vector.load %arg2[%c0, %c0_0, %c0_1, %c0_2] : memref<1x1x22x201xbf16, #tpu.memory_space<vmem>>, vector<1x1x16x201xbf16>
    %1 = vector.shape_cast %0 : vector<1x1x16x201xbf16> to vector<16x201xbf16>
    %c0_3 = arith.constant 0 : index
    %c0_4 = arith.constant 0 : index
    %c0_5 = arith.constant 0 : index
    %2 = vector.load %arg3[%c0_3, %c0_4, %c0_5] : memref<7x201x204xbf16, #tpu.memory_space<vmem>>, vector<1x201x204xbf16>
    %3 = vector.shape_cast %2 : vector<1x201x204xbf16> to vector<201x204xbf16>
    %cst = arith.constant dense<0.000000e+00> : vector<16x204xf32>
    %4 = tpu.matmul %1, %3, %cst {dimension_numbers = #tpu.dot_dimension_numbers<[1], [0], [0], [1], [0, 0, 1, 1], [], []>} : vector<16x201xbf16>, vector<201x204xbf16>, vector<16x204xf32> -> vector<16x204xf32>
    %c0_6 = arith.constant 0 : index
    %c0_7 = arith.constant 0 : index
    %c1 = arith.constant 1 : index
    %c0_8 = arith.constant 0 : index
    %5 = vector.load %arg2[%c0_6, %c0_7, %c1, %c0_8] : memref<1x1x22x201xbf16, #tpu.memory_space<vmem>>, vector<1x1x16x201xbf16>
    %6 = vector.shape_cast %5 : vector<1x1x16x201xbf16> to vector<16x201xbf16>
    %c1_9 = arith.constant 1 : index
    %c0_10 = arith.constant 0 : index
    %c0_11 = arith.constant 0 : index
    %7 = vector.load %arg3[%c1_9, %c0_10, %c0_11] : memref<7x201x204xbf16, #tpu.memory_space<vmem>>, vector<1x201x204xbf16>
    %8 = vector.shape_cast %7 : vector<1x201x204xbf16> to vector<201x204xbf16>
    %cst_12 = arith.constant dense<0.000000e+00> : vector<16x204xf32>
    %9 = tpu.matmul %6, %8, %cst_12 {dimension_numbers = #tpu.dot_dimension_numbers<[1], [0], [0], [1], [0, 0, 1, 1], [], []>} : vector<16x201xbf16>, vector<201x204xbf16>, vector<16x204xf32> -> vector<16x204xf32>
    %10 = arith.addf %4, %9 : vector<16x204xf32>
    %c0_13 = arith.constant 0 : index
    %c0_14 = arith.constant 0 : index
    %c2 = arith.constant 2 : index
    %c0_15 = arith.constant 0 : index
    %11 = vector.load %arg2[%c0_13, %c0_14, %c2, %c0_15] : memref<1x1x22x201xbf16, #tpu.memory_space<vmem>>, vector<1x1x16x201xbf16>
    %12 = vector.shape_cast %11 : vector<1x1x16x201xbf16> to vector<16x201xbf16>
    %c2_16 = arith.constant 2 : index
    %c0_17 = arith.constant 0 : index
    %c0_18 = arith.constant 0 : index
    %13 = vector.load %arg3[%c2_16, %c0_17, %c0_18] : memref<7x201x204xbf16, #tpu.memory_space<vmem>>, vector<1x201x204xbf16>
    %14 = vector.shape_cast %13 : vector<1x201x204xbf16> to vector<201x204xbf16>
    %cst_19 = arith.constant dense<0.000000e+00> : vector<16x204xf32>
    %15 = tpu.matmul %12, %14, %cst_19 {dimension_numbers = #tpu.dot_dimension_numbers<[1], [0], [0], [1], [0, 0, 1, 1], [], []>} : vector<16x201xbf16>, vector<201x204xbf16>, vector<16x204xf32> -> vector<16x204xf32>
    %16 = arith.addf %10, %15 : vector<16x204xf32>
    %c0_20 = arith.constant 0 : index
    %c0_21 = arith.constant 0 : index
    %c3 = arith.constant 3 : index
    %c0_22 = arith.constant 0 : index
    %17 = vector.load %arg2[%c0_20, %c0_21, %c3, %c0_22] : memref<1x1x22x201xbf16, #tpu.memory_space<vmem>>, vector<1x1x16x201xbf16>
    %18 = vector.shape_cast %17 : vector<1x1x16x201xbf16> to vector<16x201xbf16>
    %c3_23 = arith.constant 3 : index
    %c0_24 = arith.constant 0 : index
    %c0_25 = arith.constant 0 : index
    %19 = vector.load %arg3[%c3_23, %c0_24, %c0_25] : memref<7x201x204xbf16, #tpu.memory_space<vmem>>, vector<1x201x204xbf16>
    %20 = vector.shape_cast %19 : vector<1x201x204xbf16> to vector<201x204xbf16>
    %cst_26 = arith.constant dense<0.000000e+00> : vector<16x204xf32>
    %21 = tpu.matmul %18, %20, %cst_26 {dimension_numbers = #tpu.dot_dimension_numbers<[1], [0], [0], [1], [0, 0, 1, 1], [], []>} : vector<16x201xbf16>, vector<201x204xbf16>, vector<16x204xf32> -> vector<16x204xf32>
    %22 = arith.addf %16, %21 : vector<16x204xf32>
    %c0_27 = arith.constant 0 : index
    %c0_28 = arith.constant 0 : index
    %c4 = arith.constant 4 : index
    %c0_29 = arith.constant 0 : index
    %23 = vector.load %arg2[%c0_27, %c0_28, %c4, %c0_29] : memref<1x1x22x201xbf16, #tpu.memory_space<vmem>>, vector<1x1x16x201xbf16>
    %24 = vector.shape_cast %23 : vector<1x1x16x201xbf16> to vector<16x201xbf16>
    %c4_30 = arith.constant 4 : index
    %c0_31 = arith.constant 0 : index
    %c0_32 = arith.constant 0 : index
    %25 = vector.load %arg3[%c4_30, %c0_31, %c0_32] : memref<7x201x204xbf16, #tpu.memory_space<vmem>>, vector<1x201x204xbf16>
    %26 = vector.shape_cast %25 : vector<1x201x204xbf16> to vector<201x204xbf16>
    %cst_33 = arith.constant dense<0.000000e+00> : vector<16x204xf32>
    %27 = tpu.matmul %24, %26, %cst_33 {dimension_numbers = #tpu.dot_dimension_numbers<[1], [0], [0], [1], [0, 0, 1, 1], [], []>} : vector<16x201xbf16>, vector<201x204xbf16>, vector<16x204xf32> -> vector<16x204xf32>
    %28 = arith.addf %22, %27 : vector<16x204xf32>
    %c0_34 = arith.constant 0 : index
    %c0_35 = arith.constant 0 : index
    %c5 = arith.constant 5 : index
    %c0_36 = arith.constant 0 : index
    %29 = vector.load %arg2[%c0_34, %c0_35, %c5, %c0_36] : memref<1x1x22x201xbf16, #tpu.memory_space<vmem>>, vector<1x1x16x201xbf16>
    %30 = vector.shape_cast %29 : vector<1x1x16x201xbf16> to vector<16x201xbf16>
    %c5_37 = arith.constant 5 : index
    %c0_38 = arith.constant 0 : index
    %c0_39 = arith.constant 0 : index
    %31 = vector.load %arg3[%c5_37, %c0_38, %c0_39] : memref<7x201x204xbf16, #tpu.memory_space<vmem>>, vector<1x201x204xbf16>
    %32 = vector.shape_cast %31 : vector<1x201x204xbf16> to vector<201x204xbf16>
    %cst_40 = arith.constant dense<0.000000e+00> : vector<16x204xf32>
    %33 = tpu.matmul %30, %32, %cst_40 {dimension_numbers = #tpu.dot_dimension_numbers<[1], [0], [0], [1], [0, 0, 1, 1], [], []>} : vector<16x201xbf16>, vector<201x204xbf16>, vector<16x204xf32> -> vector<16x204xf32>
    %34 = arith.addf %28, %33 : vector<16x204xf32>
    %c0_41 = arith.constant 0 : index
    %c0_42 = arith.constant 0 : index
    %c6 = arith.constant 6 : index
    %c0_43 = arith.constant 0 : index
    %35 = vector.load %arg2[%c0_41, %c0_42, %c6, %c0_43] : memref<1x1x22x201xbf16, #tpu.memory_space<vmem>>, vector<1x1x16x201xbf16>
    %36 = vector.shape_cast %35 : vector<1x1x16x201xbf16> to vector<16x201xbf16>
    %c6_44 = arith.constant 6 : index
    %c0_45 = arith.constant 0 : index
    %c0_46 = arith.constant 0 : index
    %37 = vector.load %arg3[%c6_44, %c0_45, %c0_46] : memref<7x201x204xbf16, #tpu.memory_space<vmem>>, vector<1x201x204xbf16>
    %38 = vector.shape_cast %37 : vector<1x201x204xbf16> to vector<201x204xbf16>
    %cst_47 = arith.constant dense<0.000000e+00> : vector<16x204xf32>
    %39 = tpu.matmul %36, %38, %cst_47 {dimension_numbers = #tpu.dot_dimension_numbers<[1], [0], [0], [1], [0, 0, 1, 1], [], []>} : vector<16x201xbf16>, vector<201x204xbf16>, vector<16x204xf32> -> vector<16x204xf32>
    %40 = arith.addf %34, %39 : vector<16x204xf32>
    %c0_48 = arith.constant 0 : index
    %c0_49 = arith.constant 0 : index
    %41 = vector.load %arg4[%c0_48, %c0_49] : memref<1x204xf32, #tpu.memory_space<vmem>>, vector<1x204xf32>
    %42 = vector.broadcast %41 : vector<1x204xf32> to vector<16x204xf32>
    %43 = arith.addf %40, %42 : vector<16x204xf32>
    %cst_50 = arith.constant 0.000000e+00 : f32
    %44 = vector.broadcast %cst_50 : f32 to vector<16x204xf32>
    %45 = arith.maximumf %43, %44 : vector<16x204xf32>
    %c0_i32 = arith.constant 0 : i32
    %46 = arith.cmpi eq, %arg1, %c0_i32 : i32
    %47 = arith.extui %46 : i1 to i32
    %c0_i32_51 = arith.constant 0 : i32
    %48 = arith.cmpi ne, %47, %c0_i32_51 : i32
    scf.if %48 {
      %cst_59 = arith.constant 0xFF800000 : f32
      %56 = vector.broadcast %cst_59 : f32 to vector<1x16x204xf32>
      %c0_60 = arith.constant 0 : index
      %c0_61 = arith.constant 0 : index
      %c0_62 = arith.constant 0 : index
      %57 = vector.load %arg6[%c0_60, %c0_61, %c0_62] : memref<1x16x204xf32, #tpu.memory_space<vmem>>, vector<1x16x204xf32>
      tpu.vector_store %arg6[%c0_60, %c0_61, %c0_62], %56 {strides = array<i32>} : memref<1x16x204xf32, #tpu.memory_space<vmem>>, vector<1x16x204xf32>,
    } else {
    }
    %c0_52 = arith.constant 0 : index
    %c0_53 = arith.constant 0 : index
    %c0_54 = arith.constant 0 : index
    %49 = vector.load %arg6[%c0_52, %c0_53, %c0_54] : memref<1x16x204xf32, #tpu.memory_space<vmem>>, vector<1x16x204xf32>
    %50 = vector.shape_cast %45 : vector<16x204xf32> to vector<1x16x204xf32>
    %51 = arith.maximumf %49, %50 : vector<1x16x204xf32>
    %c0_55 = arith.constant 0 : index
    %c0_56 = arith.constant 0 : index
    %c0_57 = arith.constant 0 : index
    %52 = vector.load %arg6[%c0_55, %c0_56, %c0_57] : memref<1x16x204xf32, #tpu.memory_space<vmem>>, vector<1x16x204xf32>
    tpu.vector_store %arg6[%c0_55, %c0_56, %c0_57], %51 {strides = array<i32>} : memref<1x16x204xf32, #tpu.memory_space<vmem>>, vector<1x16x204xf32>,
    %c29_i32 = arith.constant 29 : i32
    %53 = arith.cmpi eq, %arg1, %c29_i32 : i32
    %54 = arith.extui %53 : i1 to i32
    %c0_i32_58 = arith.constant 0 : i32
    %55 = arith.cmpi ne, %54, %c0_i32_58 : i32
    scf.if %55 {
      %c0_59 = arith.constant 0 : index
      %c0_60 = arith.constant 0 : index
      %c0_61 = arith.constant 0 : index
      %56 = vector.load %arg6[%c0_59, %c0_60, %c0_61] : memref<1x16x204xf32, #tpu.memory_space<vmem>>, vector<1x16x204xf32>
      %c0_62 = arith.constant 0 : index
      %c0_63 = arith.constant 0 : index
      %c0_64 = arith.constant 0 : index
      %57 = vector.load %arg5[%c0_62, %c0_63, %c0_64] : memref<1x16x204xf32, #tpu.memory_space<vmem>>, vector<1x16x204xf32>
      tpu.vector_store %arg5[%c0_62, %c0_63, %c0_64], %56 {strides = array<i32>} : memref<1x16x204xf32, #tpu.memory_space<vmem>>, vector<1x16x204xf32>,
    } else {
    }
    return
  }
  func.func @transform_0(%arg0: i32, %arg1: i32) -> (i32, i32, i32, i32) {
    %c0_i32 = arith.constant 0 : i32
    %c0_i32_0 = arith.constant 0 : i32
    %c0_i32_1 = arith.constant 0 : i32
    return %arg0, %arg1, %c0_i32, %c0_i32_0 : i32, i32, i32, i32
  }
  func.func @transform_1(%arg0: i32, %arg1: i32) -> (i32, i32, i32) {
    %c0_i32 = arith.constant 0 : i32
    %c0_i32_0 = arith.constant 0 : i32
    %c0_i32_1 = arith.constant 0 : i32
    %c0_i32_2 = arith.constant 0 : i32
    return %c0_i32, %c0_i32_0, %c0_i32_1 : i32, i32, i32
  }
  func.func @transform_2(%arg0: i32, %arg1: i32) -> (i32, i32) {
    %c0_i32 = arith.constant 0 : i32
    %c0_i32_0 = arith.constant 0 : i32
    %c0_i32_1 = arith.constant 0 : i32
    return %c0_i32, %c0_i32_0 : i32, i32
  }
  func.func @transform_3(%arg0: i32, %arg1: i32) -> (i32, i32, i32) {
    %c0_i32 = arith.constant 0 : i32
    %c0_i32_0 = arith.constant 0 : i32
    %c0_i32_1 = arith.constant 0 : i32
    return %arg0, %c0_i32, %c0_i32_0 : i32, i32, i32
  }
}

module attributes {stable_mosaic.version = 11 : i64} {
  func.func @_conv1d_kernel(%arg0: i32, %arg1: memref<1x22x561xbf16, #tpu.memory_space<vmem>>, %arg2: memref<7x561x64xbf16, #tpu.memory_space<vmem>>, %arg3: memref<1x64xf32, #tpu.memory_space<vmem>>, %arg4: memref<1x16x64xf32, #tpu.memory_space<vmem>>, %arg5: memref<1x1x64xf32, #tpu.memory_space<vmem>>, %arg6: memref<1x1x64xf32, #tpu.memory_space<vmem>>) attributes {dimension_semantics = [#tpu.dimension_semantics<parallel>], iteration_bounds = array<i64: 2>, scalar_prefetch = 0 : i64, scratch_operands = 0 : i64, tpu.core_type = #tpu.core_type<tc>, window_params = [{transform_indices = @transform_0, window_bounds = array<i64: 1, 22, 561>}, {pipeline_mode = #tpu.pipeline_mode<synchronous>, transform_indices = @transform_1, window_bounds = array<i64: 7, 561, 64>}, {pipeline_mode = #tpu.pipeline_mode<synchronous>, transform_indices = @transform_2, window_bounds = array<i64: 1, 64>}, {transform_indices = @transform_3, window_bounds = array<i64: 1, 16, 64>}, {transform_indices = @transform_4, window_bounds = array<i64: 1, 1, 64>}, {transform_indices = @transform_5, window_bounds = array<i64: 1, 1, 64>}]} {
    %c0 = arith.constant 0 : index
    %c0_0 = arith.constant 0 : index
    %c0_1 = arith.constant 0 : index
    %0 = vector.load %arg1[%c0, %c0_0, %c0_1] : memref<1x22x561xbf16, #tpu.memory_space<vmem>>, vector<1x16x561xbf16>
    %1 = vector.shape_cast %0 : vector<1x16x561xbf16> to vector<16x561xbf16>
    %c0_2 = arith.constant 0 : index
    %c0_3 = arith.constant 0 : index
    %c0_4 = arith.constant 0 : index
    %2 = vector.load %arg2[%c0_2, %c0_3, %c0_4] : memref<7x561x64xbf16, #tpu.memory_space<vmem>>, vector<1x561x64xbf16>
    %3 = vector.shape_cast %2 : vector<1x561x64xbf16> to vector<561x64xbf16>
    %cst = arith.constant dense<0.000000e+00> : vector<16x64xf32>
    %4 = tpu.matmul %1, %3, %cst {dimension_numbers = #tpu.dot_dimension_numbers<[1], [0], [0], [1], [0, 0, 1, 1], [], []>} : vector<16x561xbf16>, vector<561x64xbf16>, vector<16x64xf32> -> vector<16x64xf32>
    %c0_5 = arith.constant 0 : index
    %c1 = arith.constant 1 : index
    %c0_6 = arith.constant 0 : index
    %5 = vector.load %arg1[%c0_5, %c1, %c0_6] : memref<1x22x561xbf16, #tpu.memory_space<vmem>>, vector<1x16x561xbf16>
    %6 = vector.shape_cast %5 : vector<1x16x561xbf16> to vector<16x561xbf16>
    %c1_7 = arith.constant 1 : index
    %c0_8 = arith.constant 0 : index
    %c0_9 = arith.constant 0 : index
    %7 = vector.load %arg2[%c1_7, %c0_8, %c0_9] : memref<7x561x64xbf16, #tpu.memory_space<vmem>>, vector<1x561x64xbf16>
    %8 = vector.shape_cast %7 : vector<1x561x64xbf16> to vector<561x64xbf16>
    %cst_10 = arith.constant dense<0.000000e+00> : vector<16x64xf32>
    %9 = tpu.matmul %6, %8, %cst_10 {dimension_numbers = #tpu.dot_dimension_numbers<[1], [0], [0], [1], [0, 0, 1, 1], [], []>} : vector<16x561xbf16>, vector<561x64xbf16>, vector<16x64xf32> -> vector<16x64xf32>
    %10 = arith.addf %4, %9 : vector<16x64xf32>
    %c0_11 = arith.constant 0 : index
    %c2 = arith.constant 2 : index
    %c0_12 = arith.constant 0 : index
    %11 = vector.load %arg1[%c0_11, %c2, %c0_12] : memref<1x22x561xbf16, #tpu.memory_space<vmem>>, vector<1x16x561xbf16>
    %12 = vector.shape_cast %11 : vector<1x16x561xbf16> to vector<16x561xbf16>
    %c2_13 = arith.constant 2 : index
    %c0_14 = arith.constant 0 : index
    %c0_15 = arith.constant 0 : index
    %13 = vector.load %arg2[%c2_13, %c0_14, %c0_15] : memref<7x561x64xbf16, #tpu.memory_space<vmem>>, vector<1x561x64xbf16>
    %14 = vector.shape_cast %13 : vector<1x561x64xbf16> to vector<561x64xbf16>
    %cst_16 = arith.constant dense<0.000000e+00> : vector<16x64xf32>
    %15 = tpu.matmul %12, %14, %cst_16 {dimension_numbers = #tpu.dot_dimension_numbers<[1], [0], [0], [1], [0, 0, 1, 1], [], []>} : vector<16x561xbf16>, vector<561x64xbf16>, vector<16x64xf32> -> vector<16x64xf32>
    %16 = arith.addf %10, %15 : vector<16x64xf32>
    %c0_17 = arith.constant 0 : index
    %c3 = arith.constant 3 : index
    %c0_18 = arith.constant 0 : index
    %17 = vector.load %arg1[%c0_17, %c3, %c0_18] : memref<1x22x561xbf16, #tpu.memory_space<vmem>>, vector<1x16x561xbf16>
    %18 = vector.shape_cast %17 : vector<1x16x561xbf16> to vector<16x561xbf16>
    %c3_19 = arith.constant 3 : index
    %c0_20 = arith.constant 0 : index
    %c0_21 = arith.constant 0 : index
    %19 = vector.load %arg2[%c3_19, %c0_20, %c0_21] : memref<7x561x64xbf16, #tpu.memory_space<vmem>>, vector<1x561x64xbf16>
    %20 = vector.shape_cast %19 : vector<1x561x64xbf16> to vector<561x64xbf16>
    %cst_22 = arith.constant dense<0.000000e+00> : vector<16x64xf32>
    %21 = tpu.matmul %18, %20, %cst_22 {dimension_numbers = #tpu.dot_dimension_numbers<[1], [0], [0], [1], [0, 0, 1, 1], [], []>} : vector<16x561xbf16>, vector<561x64xbf16>, vector<16x64xf32> -> vector<16x64xf32>
    %22 = arith.addf %16, %21 : vector<16x64xf32>
    %c0_23 = arith.constant 0 : index
    %c4 = arith.constant 4 : index
    %c0_24 = arith.constant 0 : index
    %23 = vector.load %arg1[%c0_23, %c4, %c0_24] : memref<1x22x561xbf16, #tpu.memory_space<vmem>>, vector<1x16x561xbf16>
    %24 = vector.shape_cast %23 : vector<1x16x561xbf16> to vector<16x561xbf16>
    %c4_25 = arith.constant 4 : index
    %c0_26 = arith.constant 0 : index
    %c0_27 = arith.constant 0 : index
    %25 = vector.load %arg2[%c4_25, %c0_26, %c0_27] : memref<7x561x64xbf16, #tpu.memory_space<vmem>>, vector<1x561x64xbf16>
    %26 = vector.shape_cast %25 : vector<1x561x64xbf16> to vector<561x64xbf16>
    %cst_28 = arith.constant dense<0.000000e+00> : vector<16x64xf32>
    %27 = tpu.matmul %24, %26, %cst_28 {dimension_numbers = #tpu.dot_dimension_numbers<[1], [0], [0], [1], [0, 0, 1, 1], [], []>} : vector<16x561xbf16>, vector<561x64xbf16>, vector<16x64xf32> -> vector<16x64xf32>
    %28 = arith.addf %22, %27 : vector<16x64xf32>
    %c0_29 = arith.constant 0 : index
    %c5 = arith.constant 5 : index
    %c0_30 = arith.constant 0 : index
    %29 = vector.load %arg1[%c0_29, %c5, %c0_30] : memref<1x22x561xbf16, #tpu.memory_space<vmem>>, vector<1x16x561xbf16>
    %30 = vector.shape_cast %29 : vector<1x16x561xbf16> to vector<16x561xbf16>
    %c5_31 = arith.constant 5 : index
    %c0_32 = arith.constant 0 : index
    %c0_33 = arith.constant 0 : index
    %31 = vector.load %arg2[%c5_31, %c0_32, %c0_33] : memref<7x561x64xbf16, #tpu.memory_space<vmem>>, vector<1x561x64xbf16>
    %32 = vector.shape_cast %31 : vector<1x561x64xbf16> to vector<561x64xbf16>
    %cst_34 = arith.constant dense<0.000000e+00> : vector<16x64xf32>
    %33 = tpu.matmul %30, %32, %cst_34 {dimension_numbers = #tpu.dot_dimension_numbers<[1], [0], [0], [1], [0, 0, 1, 1], [], []>} : vector<16x561xbf16>, vector<561x64xbf16>, vector<16x64xf32> -> vector<16x64xf32>
    %34 = arith.addf %28, %33 : vector<16x64xf32>
    %c0_35 = arith.constant 0 : index
    %c6 = arith.constant 6 : index
    %c0_36 = arith.constant 0 : index
    %35 = vector.load %arg1[%c0_35, %c6, %c0_36] : memref<1x22x561xbf16, #tpu.memory_space<vmem>>, vector<1x16x561xbf16>
    %36 = vector.shape_cast %35 : vector<1x16x561xbf16> to vector<16x561xbf16>
    %c6_37 = arith.constant 6 : index
    %c0_38 = arith.constant 0 : index
    %c0_39 = arith.constant 0 : index
    %37 = vector.load %arg2[%c6_37, %c0_38, %c0_39] : memref<7x561x64xbf16, #tpu.memory_space<vmem>>, vector<1x561x64xbf16>
    %38 = vector.shape_cast %37 : vector<1x561x64xbf16> to vector<561x64xbf16>
    %cst_40 = arith.constant dense<0.000000e+00> : vector<16x64xf32>
    %39 = tpu.matmul %36, %38, %cst_40 {dimension_numbers = #tpu.dot_dimension_numbers<[1], [0], [0], [1], [0, 0, 1, 1], [], []>} : vector<16x561xbf16>, vector<561x64xbf16>, vector<16x64xf32> -> vector<16x64xf32>
    %40 = arith.addf %34, %39 : vector<16x64xf32>
    %c0_41 = arith.constant 0 : index
    %c0_42 = arith.constant 0 : index
    %41 = vector.load %arg3[%c0_41, %c0_42] : memref<1x64xf32, #tpu.memory_space<vmem>>, vector<1x64xf32>
    %42 = vector.broadcast %41 : vector<1x64xf32> to vector<16x64xf32>
    %43 = arith.addf %40, %42 : vector<16x64xf32>
    %cst_43 = arith.constant 0.000000e+00 : f32
    %44 = vector.broadcast %cst_43 : f32 to vector<16x64xf32>
    %45 = arith.maximumf %43, %44 : vector<16x64xf32>
    %46 = vector.shape_cast %45 : vector<16x64xf32> to vector<1x16x64xf32>
    %c0_44 = arith.constant 0 : index
    %c0_45 = arith.constant 0 : index
    %c0_46 = arith.constant 0 : index
    %47 = vector.load %arg4[%c0_44, %c0_45, %c0_46] : memref<1x16x64xf32, #tpu.memory_space<vmem>>, vector<1x16x64xf32>
    tpu.vector_store %arg4[%c0_44, %c0_45, %c0_46], %46 {strides = array<i32>} : memref<1x16x64xf32, #tpu.memory_space<vmem>>, vector<1x16x64xf32>,
    %cst_47 = arith.constant dense<0xFF800000> : vector<64xf32>
    %48 = vector.multi_reduction <maximumf>, %45, %cst_47 [0] : vector<16x64xf32> to vector<64xf32>
    %49 = vector.shape_cast %48 : vector<64xf32> to vector<1x64xf32>
    %50 = vector.shape_cast %49 : vector<1x64xf32> to vector<1x1x64xf32>
    %c0_48 = arith.constant 0 : index
    %c0_49 = arith.constant 0 : index
    %c0_50 = arith.constant 0 : index
    %51 = vector.load %arg5[%c0_48, %c0_49, %c0_50] : memref<1x1x64xf32, #tpu.memory_space<vmem>>, vector<1x1x64xf32>
    tpu.vector_store %arg5[%c0_48, %c0_49, %c0_50], %50 {strides = array<i32>} : memref<1x1x64xf32, #tpu.memory_space<vmem>>, vector<1x1x64xf32>,
    %cst_51 = arith.constant dense<0.000000e+00> : vector<64xf32>
    %52 = vector.multi_reduction <add>, %45, %cst_51 [0] : vector<16x64xf32> to vector<64xf32>
    %53 = vector.shape_cast %52 : vector<64xf32> to vector<1x64xf32>
    %cst_52 = arith.constant 6.250000e-02 : f32
    %54 = vector.broadcast %cst_52 : f32 to vector<1x64xf32>
    %55 = arith.mulf %53, %54 : vector<1x64xf32>
    %56 = vector.shape_cast %55 : vector<1x64xf32> to vector<1x1x64xf32>
    %c0_53 = arith.constant 0 : index
    %c0_54 = arith.constant 0 : index
    %c0_55 = arith.constant 0 : index
    %57 = vector.load %arg6[%c0_53, %c0_54, %c0_55] : memref<1x1x64xf32, #tpu.memory_space<vmem>>, vector<1x1x64xf32>
    tpu.vector_store %arg6[%c0_53, %c0_54, %c0_55], %56 {strides = array<i32>} : memref<1x1x64xf32, #tpu.memory_space<vmem>>, vector<1x1x64xf32>,
    return
  }
  func.func @transform_0(%arg0: i32) -> (i32, i32, i32) {
    %c0_i32 = arith.constant 0 : i32
    %c0_i32_0 = arith.constant 0 : i32
    %c0_i32_1 = arith.constant 0 : i32
    return %arg0, %c0_i32, %c0_i32_0 : i32, i32, i32
  }
  func.func @transform_1(%arg0: i32) -> (i32, i32, i32) {
    %c0_i32 = arith.constant 0 : i32
    %c0_i32_0 = arith.constant 0 : i32
    %c0_i32_1 = arith.constant 0 : i32
    %c0_i32_2 = arith.constant 0 : i32
    return %c0_i32, %c0_i32_0, %c0_i32_1 : i32, i32, i32
  }
  func.func @transform_2(%arg0: i32) -> (i32, i32) {
    %c0_i32 = arith.constant 0 : i32
    %c0_i32_0 = arith.constant 0 : i32
    %c0_i32_1 = arith.constant 0 : i32
    return %c0_i32, %c0_i32_0 : i32, i32
  }
  func.func @transform_3(%arg0: i32) -> (i32, i32, i32) {
    %c0_i32 = arith.constant 0 : i32
    %c0_i32_0 = arith.constant 0 : i32
    %c0_i32_1 = arith.constant 0 : i32
    return %arg0, %c0_i32, %c0_i32_0 : i32, i32, i32
  }
  func.func @transform_4(%arg0: i32) -> (i32, i32, i32) {
    %c0_i32 = arith.constant 0 : i32
    %c0_i32_0 = arith.constant 0 : i32
    %c0_i32_1 = arith.constant 0 : i32
    return %arg0, %c0_i32, %c0_i32_0 : i32, i32, i32
  }
  func.func @transform_5(%arg0: i32) -> (i32, i32, i32) {
    %c0_i32 = arith.constant 0 : i32
    %c0_i32_0 = arith.constant 0 : i32
    %c0_i32_1 = arith.constant 0 : i32
    return %arg0, %c0_i32, %c0_i32_0 : i32, i32, i32
  }
}

module attributes {stable_mosaic.version = 11 : i64} {
  func.func @_conv1d_res_kernel(%arg0: i32, %arg1: memref<1x22x64xbf16, #tpu.memory_space<vmem>>, %arg2: memref<7x64x64xbf16, #tpu.memory_space<vmem>>, %arg3: memref<1x64xf32, #tpu.memory_space<vmem>>, %arg4: memref<1x16x64xf32, #tpu.memory_space<vmem>>, %arg5: memref<1x16x64xf32, #tpu.memory_space<vmem>>, %arg6: memref<1x1x64xf32, #tpu.memory_space<vmem>>, %arg7: memref<1x1x64xf32, #tpu.memory_space<vmem>>) attributes {dimension_semantics = [#tpu.dimension_semantics<parallel>], iteration_bounds = array<i64: 2>, scalar_prefetch = 0 : i64, scratch_operands = 0 : i64, tpu.core_type = #tpu.core_type<tc>, window_params = [{transform_indices = @transform_0, window_bounds = array<i64: 1, 22, 64>}, {pipeline_mode = #tpu.pipeline_mode<synchronous>, transform_indices = @transform_1, window_bounds = array<i64: 7, 64, 64>}, {pipeline_mode = #tpu.pipeline_mode<synchronous>, transform_indices = @transform_2, window_bounds = array<i64: 1, 64>}, {transform_indices = @transform_3, window_bounds = array<i64: 1, 16, 64>}, {transform_indices = @transform_4, window_bounds = array<i64: 1, 16, 64>}, {transform_indices = @transform_5, window_bounds = array<i64: 1, 1, 64>}, {transform_indices = @transform_6, window_bounds = array<i64: 1, 1, 64>}]} {
    %c0 = arith.constant 0 : index
    %c0_0 = arith.constant 0 : index
    %c0_1 = arith.constant 0 : index
    %0 = vector.load %arg1[%c0, %c0_0, %c0_1] : memref<1x22x64xbf16, #tpu.memory_space<vmem>>, vector<1x16x64xbf16>
    %1 = vector.shape_cast %0 : vector<1x16x64xbf16> to vector<16x64xbf16>
    %c0_2 = arith.constant 0 : index
    %c0_3 = arith.constant 0 : index
    %c0_4 = arith.constant 0 : index
    %2 = vector.load %arg2[%c0_2, %c0_3, %c0_4] : memref<7x64x64xbf16, #tpu.memory_space<vmem>>, vector<1x64x64xbf16>
    %3 = vector.shape_cast %2 : vector<1x64x64xbf16> to vector<64x64xbf16>
    %cst = arith.constant dense<0.000000e+00> : vector<16x64xf32>
    %4 = tpu.matmul %1, %3, %cst {dimension_numbers = #tpu.dot_dimension_numbers<[1], [0], [0], [1], [0, 0, 1, 1], [], []>} : vector<16x64xbf16>, vector<64x64xbf16>, vector<16x64xf32> -> vector<16x64xf32>
    %c0_5 = arith.constant 0 : index
    %c1 = arith.constant 1 : index
    %c0_6 = arith.constant 0 : index
    %5 = vector.load %arg1[%c0_5, %c1, %c0_6] : memref<1x22x64xbf16, #tpu.memory_space<vmem>>, vector<1x16x64xbf16>
    %6 = vector.shape_cast %5 : vector<1x16x64xbf16> to vector<16x64xbf16>
    %c1_7 = arith.constant 1 : index
    %c0_8 = arith.constant 0 : index
    %c0_9 = arith.constant 0 : index
    %7 = vector.load %arg2[%c1_7, %c0_8, %c0_9] : memref<7x64x64xbf16, #tpu.memory_space<vmem>>, vector<1x64x64xbf16>
    %8 = vector.shape_cast %7 : vector<1x64x64xbf16> to vector<64x64xbf16>
    %cst_10 = arith.constant dense<0.000000e+00> : vector<16x64xf32>
    %9 = tpu.matmul %6, %8, %cst_10 {dimension_numbers = #tpu.dot_dimension_numbers<[1], [0], [0], [1], [0, 0, 1, 1], [], []>} : vector<16x64xbf16>, vector<64x64xbf16>, vector<16x64xf32> -> vector<16x64xf32>
    %10 = arith.addf %4, %9 : vector<16x64xf32>
    %c0_11 = arith.constant 0 : index
    %c2 = arith.constant 2 : index
    %c0_12 = arith.constant 0 : index
    %11 = vector.load %arg1[%c0_11, %c2, %c0_12] : memref<1x22x64xbf16, #tpu.memory_space<vmem>>, vector<1x16x64xbf16>
    %12 = vector.shape_cast %11 : vector<1x16x64xbf16> to vector<16x64xbf16>
    %c2_13 = arith.constant 2 : index
    %c0_14 = arith.constant 0 : index
    %c0_15 = arith.constant 0 : index
    %13 = vector.load %arg2[%c2_13, %c0_14, %c0_15] : memref<7x64x64xbf16, #tpu.memory_space<vmem>>, vector<1x64x64xbf16>
    %14 = vector.shape_cast %13 : vector<1x64x64xbf16> to vector<64x64xbf16>
    %cst_16 = arith.constant dense<0.000000e+00> : vector<16x64xf32>
    %15 = tpu.matmul %12, %14, %cst_16 {dimension_numbers = #tpu.dot_dimension_numbers<[1], [0], [0], [1], [0, 0, 1, 1], [], []>} : vector<16x64xbf16>, vector<64x64xbf16>, vector<16x64xf32> -> vector<16x64xf32>
    %16 = arith.addf %10, %15 : vector<16x64xf32>
    %c0_17 = arith.constant 0 : index
    %c3 = arith.constant 3 : index
    %c0_18 = arith.constant 0 : index
    %17 = vector.load %arg1[%c0_17, %c3, %c0_18] : memref<1x22x64xbf16, #tpu.memory_space<vmem>>, vector<1x16x64xbf16>
    %18 = vector.shape_cast %17 : vector<1x16x64xbf16> to vector<16x64xbf16>
    %c3_19 = arith.constant 3 : index
    %c0_20 = arith.constant 0 : index
    %c0_21 = arith.constant 0 : index
    %19 = vector.load %arg2[%c3_19, %c0_20, %c0_21] : memref<7x64x64xbf16, #tpu.memory_space<vmem>>, vector<1x64x64xbf16>
    %20 = vector.shape_cast %19 : vector<1x64x64xbf16> to vector<64x64xbf16>
    %cst_22 = arith.constant dense<0.000000e+00> : vector<16x64xf32>
    %21 = tpu.matmul %18, %20, %cst_22 {dimension_numbers = #tpu.dot_dimension_numbers<[1], [0], [0], [1], [0, 0, 1, 1], [], []>} : vector<16x64xbf16>, vector<64x64xbf16>, vector<16x64xf32> -> vector<16x64xf32>
    %22 = arith.addf %16, %21 : vector<16x64xf32>
    %c0_23 = arith.constant 0 : index
    %c4 = arith.constant 4 : index
    %c0_24 = arith.constant 0 : index
    %23 = vector.load %arg1[%c0_23, %c4, %c0_24] : memref<1x22x64xbf16, #tpu.memory_space<vmem>>, vector<1x16x64xbf16>
    %24 = vector.shape_cast %23 : vector<1x16x64xbf16> to vector<16x64xbf16>
    %c4_25 = arith.constant 4 : index
    %c0_26 = arith.constant 0 : index
    %c0_27 = arith.constant 0 : index
    %25 = vector.load %arg2[%c4_25, %c0_26, %c0_27] : memref<7x64x64xbf16, #tpu.memory_space<vmem>>, vector<1x64x64xbf16>
    %26 = vector.shape_cast %25 : vector<1x64x64xbf16> to vector<64x64xbf16>
    %cst_28 = arith.constant dense<0.000000e+00> : vector<16x64xf32>
    %27 = tpu.matmul %24, %26, %cst_28 {dimension_numbers = #tpu.dot_dimension_numbers<[1], [0], [0], [1], [0, 0, 1, 1], [], []>} : vector<16x64xbf16>, vector<64x64xbf16>, vector<16x64xf32> -> vector<16x64xf32>
    %28 = arith.addf %22, %27 : vector<16x64xf32>
    %c0_29 = arith.constant 0 : index
    %c5 = arith.constant 5 : index
    %c0_30 = arith.constant 0 : index
    %29 = vector.load %arg1[%c0_29, %c5, %c0_30] : memref<1x22x64xbf16, #tpu.memory_space<vmem>>, vector<1x16x64xbf16>
    %30 = vector.shape_cast %29 : vector<1x16x64xbf16> to vector<16x64xbf16>
    %c5_31 = arith.constant 5 : index
    %c0_32 = arith.constant 0 : index
    %c0_33 = arith.constant 0 : index
    %31 = vector.load %arg2[%c5_31, %c0_32, %c0_33] : memref<7x64x64xbf16, #tpu.memory_space<vmem>>, vector<1x64x64xbf16>
    %32 = vector.shape_cast %31 : vector<1x64x64xbf16> to vector<64x64xbf16>
    %cst_34 = arith.constant dense<0.000000e+00> : vector<16x64xf32>
    %33 = tpu.matmul %30, %32, %cst_34 {dimension_numbers = #tpu.dot_dimension_numbers<[1], [0], [0], [1], [0, 0, 1, 1], [], []>} : vector<16x64xbf16>, vector<64x64xbf16>, vector<16x64xf32> -> vector<16x64xf32>
    %34 = arith.addf %28, %33 : vector<16x64xf32>
    %c0_35 = arith.constant 0 : index
    %c6 = arith.constant 6 : index
    %c0_36 = arith.constant 0 : index
    %35 = vector.load %arg1[%c0_35, %c6, %c0_36] : memref<1x22x64xbf16, #tpu.memory_space<vmem>>, vector<1x16x64xbf16>
    %36 = vector.shape_cast %35 : vector<1x16x64xbf16> to vector<16x64xbf16>
    %c6_37 = arith.constant 6 : index
    %c0_38 = arith.constant 0 : index
    %c0_39 = arith.constant 0 : index
    %37 = vector.load %arg2[%c6_37, %c0_38, %c0_39] : memref<7x64x64xbf16, #tpu.memory_space<vmem>>, vector<1x64x64xbf16>
    %38 = vector.shape_cast %37 : vector<1x64x64xbf16> to vector<64x64xbf16>
    %cst_40 = arith.constant dense<0.000000e+00> : vector<16x64xf32>
    %39 = tpu.matmul %36, %38, %cst_40 {dimension_numbers = #tpu.dot_dimension_numbers<[1], [0], [0], [1], [0, 0, 1, 1], [], []>} : vector<16x64xbf16>, vector<64x64xbf16>, vector<16x64xf32> -> vector<16x64xf32>
    %40 = arith.addf %34, %39 : vector<16x64xf32>
    %c0_41 = arith.constant 0 : index
    %c0_42 = arith.constant 0 : index
    %41 = vector.load %arg3[%c0_41, %c0_42] : memref<1x64xf32, #tpu.memory_space<vmem>>, vector<1x64xf32>
    %42 = vector.broadcast %41 : vector<1x64xf32> to vector<16x64xf32>
    %43 = arith.addf %40, %42 : vector<16x64xf32>
    %cst_43 = arith.constant 0.000000e+00 : f32
    %44 = vector.broadcast %cst_43 : f32 to vector<16x64xf32>
    %45 = arith.maximumf %43, %44 : vector<16x64xf32>
    %c0_44 = arith.constant 0 : index
    %c0_45 = arith.constant 0 : index
    %c0_46 = arith.constant 0 : index
    %46 = vector.load %arg4[%c0_44, %c0_45, %c0_46] : memref<1x16x64xf32, #tpu.memory_space<vmem>>, vector<1x16x64xf32>
    %47 = vector.shape_cast %46 : vector<1x16x64xf32> to vector<16x64xf32>
    %48 = arith.addf %45, %47 : vector<16x64xf32>
    %49 = vector.shape_cast %48 : vector<16x64xf32> to vector<1x16x64xf32>
    %c0_47 = arith.constant 0 : index
    %c0_48 = arith.constant 0 : index
    %c0_49 = arith.constant 0 : index
    %50 = vector.load %arg5[%c0_47, %c0_48, %c0_49] : memref<1x16x64xf32, #tpu.memory_space<vmem>>, vector<1x16x64xf32>
    tpu.vector_store %arg5[%c0_47, %c0_48, %c0_49], %49 {strides = array<i32>} : memref<1x16x64xf32, #tpu.memory_space<vmem>>, vector<1x16x64xf32>,
    %cst_50 = arith.constant dense<0xFF800000> : vector<64xf32>
    %51 = vector.multi_reduction <maximumf>, %48, %cst_50 [0] : vector<16x64xf32> to vector<64xf32>
    %52 = vector.shape_cast %51 : vector<64xf32> to vector<1x64xf32>
    %53 = vector.shape_cast %52 : vector<1x64xf32> to vector<1x1x64xf32>
    %c0_51 = arith.constant 0 : index
    %c0_52 = arith.constant 0 : index
    %c0_53 = arith.constant 0 : index
    %54 = vector.load %arg6[%c0_51, %c0_52, %c0_53] : memref<1x1x64xf32, #tpu.memory_space<vmem>>, vector<1x1x64xf32>
    tpu.vector_store %arg6[%c0_51, %c0_52, %c0_53], %53 {strides = array<i32>} : memref<1x1x64xf32, #tpu.memory_space<vmem>>, vector<1x1x64xf32>,
    %cst_54 = arith.constant dense<0.000000e+00> : vector<64xf32>
    %55 = vector.multi_reduction <add>, %48, %cst_54 [0] : vector<16x64xf32> to vector<64xf32>
    %56 = vector.shape_cast %55 : vector<64xf32> to vector<1x64xf32>
    %cst_55 = arith.constant 6.250000e-02 : f32
    %57 = vector.broadcast %cst_55 : f32 to vector<1x64xf32>
    %58 = arith.mulf %56, %57 : vector<1x64xf32>
    %59 = vector.shape_cast %58 : vector<1x64xf32> to vector<1x1x64xf32>
    %c0_56 = arith.constant 0 : index
    %c0_57 = arith.constant 0 : index
    %c0_58 = arith.constant 0 : index
    %60 = vector.load %arg7[%c0_56, %c0_57, %c0_58] : memref<1x1x64xf32, #tpu.memory_space<vmem>>, vector<1x1x64xf32>
    tpu.vector_store %arg7[%c0_56, %c0_57, %c0_58], %59 {strides = array<i32>} : memref<1x1x64xf32, #tpu.memory_space<vmem>>, vector<1x1x64xf32>,
    return
  }
  func.func @transform_0(%arg0: i32) -> (i32, i32, i32) {
    %c0_i32 = arith.constant 0 : i32
    %c0_i32_0 = arith.constant 0 : i32
    %c0_i32_1 = arith.constant 0 : i32
    return %arg0, %c0_i32, %c0_i32_0 : i32, i32, i32
  }
  func.func @transform_1(%arg0: i32) -> (i32, i32, i32) {
    %c0_i32 = arith.constant 0 : i32
    %c0_i32_0 = arith.constant 0 : i32
    %c0_i32_1 = arith.constant 0 : i32
    %c0_i32_2 = arith.constant 0 : i32
    return %c0_i32, %c0_i32_0, %c0_i32_1 : i32, i32, i32
  }
  func.func @transform_2(%arg0: i32) -> (i32, i32) {
    %c0_i32 = arith.constant 0 : i32
    %c0_i32_0 = arith.constant 0 : i32
    %c0_i32_1 = arith.constant 0 : i32
    return %c0_i32, %c0_i32_0 : i32, i32
  }
  func.func @transform_3(%arg0: i32) -> (i32, i32, i32) {
    %c0_i32 = arith.constant 0 : i32
    %c0_i32_0 = arith.constant 0 : i32
    %c0_i32_1 = arith.constant 0 : i32
    return %arg0, %c0_i32, %c0_i32_0 : i32, i32, i32
  }
  func.func @transform_4(%arg0: i32) -> (i32, i32, i32) {
    %c0_i32 = arith.constant 0 : i32
    %c0_i32_0 = arith.constant 0 : i32
    %c0_i32_1 = arith.constant 0 : i32
    return %arg0, %c0_i32, %c0_i32_0 : i32, i32, i32
  }
  func.func @transform_5(%arg0: i32) -> (i32, i32, i32) {
    %c0_i32 = arith.constant 0 : i32
    %c0_i32_0 = arith.constant 0 : i32
    %c0_i32_1 = arith.constant 0 : i32
    return %arg0, %c0_i32, %c0_i32_0 : i32, i32, i32
  }
  func.func @transform_6(%arg0: i32) -> (i32, i32, i32) {
    %c0_i32 = arith.constant 0 : i32
    %c0_i32_0 = arith.constant 0 : i32
    %c0_i32_1 = arith.constant 0 : i32
    return %arg0, %c0_i32, %c0_i32_0 : i32, i32, i32
  }
}

module attributes {stable_mosaic.version = 11 : i64} {
  func.func @_conv1d_res_kernel(%arg0: i32, %arg1: memref<1x22x64xbf16, #tpu.memory_space<vmem>>, %arg2: memref<7x64x64xbf16, #tpu.memory_space<vmem>>, %arg3: memref<1x64xf32, #tpu.memory_space<vmem>>, %arg4: memref<1x16x64xf32, #tpu.memory_space<vmem>>, %arg5: memref<1x16x64xf32, #tpu.memory_space<vmem>>, %arg6: memref<1x1x64xf32, #tpu.memory_space<vmem>>, %arg7: memref<1x1x64xf32, #tpu.memory_space<vmem>>) attributes {dimension_semantics = [#tpu.dimension_semantics<parallel>], iteration_bounds = array<i64: 2>, scalar_prefetch = 0 : i64, scratch_operands = 0 : i64, tpu.core_type = #tpu.core_type<tc>, window_params = [{transform_indices = @transform_0, window_bounds = array<i64: 1, 22, 64>}, {pipeline_mode = #tpu.pipeline_mode<synchronous>, transform_indices = @transform_1, window_bounds = array<i64: 7, 64, 64>}, {pipeline_mode = #tpu.pipeline_mode<synchronous>, transform_indices = @transform_2, window_bounds = array<i64: 1, 64>}, {transform_indices = @transform_3, window_bounds = array<i64: 1, 16, 64>}, {transform_indices = @transform_4, window_bounds = array<i64: 1, 16, 64>}, {transform_indices = @transform_5, window_bounds = array<i64: 1, 1, 64>}, {transform_indices = @transform_6, window_bounds = array<i64: 1, 1, 64>}]} {
    %c0 = arith.constant 0 : index
    %c0_0 = arith.constant 0 : index
    %c0_1 = arith.constant 0 : index
    %0 = vector.load %arg1[%c0, %c0_0, %c0_1] : memref<1x22x64xbf16, #tpu.memory_space<vmem>>, vector<1x16x64xbf16>
    %1 = vector.shape_cast %0 : vector<1x16x64xbf16> to vector<16x64xbf16>
    %c0_2 = arith.constant 0 : index
    %c0_3 = arith.constant 0 : index
    %c0_4 = arith.constant 0 : index
    %2 = vector.load %arg2[%c0_2, %c0_3, %c0_4] : memref<7x64x64xbf16, #tpu.memory_space<vmem>>, vector<1x64x64xbf16>
    %3 = vector.shape_cast %2 : vector<1x64x64xbf16> to vector<64x64xbf16>
    %cst = arith.constant dense<0.000000e+00> : vector<16x64xf32>
    %4 = tpu.matmul %1, %3, %cst {dimension_numbers = #tpu.dot_dimension_numbers<[1], [0], [0], [1], [0, 0, 1, 1], [], []>} : vector<16x64xbf16>, vector<64x64xbf16>, vector<16x64xf32> -> vector<16x64xf32>
    %c0_5 = arith.constant 0 : index
    %c1 = arith.constant 1 : index
    %c0_6 = arith.constant 0 : index
    %5 = vector.load %arg1[%c0_5, %c1, %c0_6] : memref<1x22x64xbf16, #tpu.memory_space<vmem>>, vector<1x16x64xbf16>
    %6 = vector.shape_cast %5 : vector<1x16x64xbf16> to vector<16x64xbf16>
    %c1_7 = arith.constant 1 : index
    %c0_8 = arith.constant 0 : index
    %c0_9 = arith.constant 0 : index
    %7 = vector.load %arg2[%c1_7, %c0_8, %c0_9] : memref<7x64x64xbf16, #tpu.memory_space<vmem>>, vector<1x64x64xbf16>
    %8 = vector.shape_cast %7 : vector<1x64x64xbf16> to vector<64x64xbf16>
    %cst_10 = arith.constant dense<0.000000e+00> : vector<16x64xf32>
    %9 = tpu.matmul %6, %8, %cst_10 {dimension_numbers = #tpu.dot_dimension_numbers<[1], [0], [0], [1], [0, 0, 1, 1], [], []>} : vector<16x64xbf16>, vector<64x64xbf16>, vector<16x64xf32> -> vector<16x64xf32>
    %10 = arith.addf %4, %9 : vector<16x64xf32>
    %c0_11 = arith.constant 0 : index
    %c2 = arith.constant 2 : index
    %c0_12 = arith.constant 0 : index
    %11 = vector.load %arg1[%c0_11, %c2, %c0_12] : memref<1x22x64xbf16, #tpu.memory_space<vmem>>, vector<1x16x64xbf16>
    %12 = vector.shape_cast %11 : vector<1x16x64xbf16> to vector<16x64xbf16>
    %c2_13 = arith.constant 2 : index
    %c0_14 = arith.constant 0 : index
    %c0_15 = arith.constant 0 : index
    %13 = vector.load %arg2[%c2_13, %c0_14, %c0_15] : memref<7x64x64xbf16, #tpu.memory_space<vmem>>, vector<1x64x64xbf16>
    %14 = vector.shape_cast %13 : vector<1x64x64xbf16> to vector<64x64xbf16>
    %cst_16 = arith.constant dense<0.000000e+00> : vector<16x64xf32>
    %15 = tpu.matmul %12, %14, %cst_16 {dimension_numbers = #tpu.dot_dimension_numbers<[1], [0], [0], [1], [0, 0, 1, 1], [], []>} : vector<16x64xbf16>, vector<64x64xbf16>, vector<16x64xf32> -> vector<16x64xf32>
    %16 = arith.addf %10, %15 : vector<16x64xf32>
    %c0_17 = arith.constant 0 : index
    %c3 = arith.constant 3 : index
    %c0_18 = arith.constant 0 : index
    %17 = vector.load %arg1[%c0_17, %c3, %c0_18] : memref<1x22x64xbf16, #tpu.memory_space<vmem>>, vector<1x16x64xbf16>
    %18 = vector.shape_cast %17 : vector<1x16x64xbf16> to vector<16x64xbf16>
    %c3_19 = arith.constant 3 : index
    %c0_20 = arith.constant 0 : index
    %c0_21 = arith.constant 0 : index
    %19 = vector.load %arg2[%c3_19, %c0_20, %c0_21] : memref<7x64x64xbf16, #tpu.memory_space<vmem>>, vector<1x64x64xbf16>
    %20 = vector.shape_cast %19 : vector<1x64x64xbf16> to vector<64x64xbf16>
    %cst_22 = arith.constant dense<0.000000e+00> : vector<16x64xf32>
    %21 = tpu.matmul %18, %20, %cst_22 {dimension_numbers = #tpu.dot_dimension_numbers<[1], [0], [0], [1], [0, 0, 1, 1], [], []>} : vector<16x64xbf16>, vector<64x64xbf16>, vector<16x64xf32> -> vector<16x64xf32>
    %22 = arith.addf %16, %21 : vector<16x64xf32>
    %c0_23 = arith.constant 0 : index
    %c4 = arith.constant 4 : index
    %c0_24 = arith.constant 0 : index
    %23 = vector.load %arg1[%c0_23, %c4, %c0_24] : memref<1x22x64xbf16, #tpu.memory_space<vmem>>, vector<1x16x64xbf16>
    %24 = vector.shape_cast %23 : vector<1x16x64xbf16> to vector<16x64xbf16>
    %c4_25 = arith.constant 4 : index
    %c0_26 = arith.constant 0 : index
    %c0_27 = arith.constant 0 : index
    %25 = vector.load %arg2[%c4_25, %c0_26, %c0_27] : memref<7x64x64xbf16, #tpu.memory_space<vmem>>, vector<1x64x64xbf16>
    %26 = vector.shape_cast %25 : vector<1x64x64xbf16> to vector<64x64xbf16>
    %cst_28 = arith.constant dense<0.000000e+00> : vector<16x64xf32>
    %27 = tpu.matmul %24, %26, %cst_28 {dimension_numbers = #tpu.dot_dimension_numbers<[1], [0], [0], [1], [0, 0, 1, 1], [], []>} : vector<16x64xbf16>, vector<64x64xbf16>, vector<16x64xf32> -> vector<16x64xf32>
    %28 = arith.addf %22, %27 : vector<16x64xf32>
    %c0_29 = arith.constant 0 : index
    %c5 = arith.constant 5 : index
    %c0_30 = arith.constant 0 : index
    %29 = vector.load %arg1[%c0_29, %c5, %c0_30] : memref<1x22x64xbf16, #tpu.memory_space<vmem>>, vector<1x16x64xbf16>
    %30 = vector.shape_cast %29 : vector<1x16x64xbf16> to vector<16x64xbf16>
    %c5_31 = arith.constant 5 : index
    %c0_32 = arith.constant 0 : index
    %c0_33 = arith.constant 0 : index
    %31 = vector.load %arg2[%c5_31, %c0_32, %c0_33] : memref<7x64x64xbf16, #tpu.memory_space<vmem>>, vector<1x64x64xbf16>
    %32 = vector.shape_cast %31 : vector<1x64x64xbf16> to vector<64x64xbf16>
    %cst_34 = arith.constant dense<0.000000e+00> : vector<16x64xf32>
    %33 = tpu.matmul %30, %32, %cst_34 {dimension_numbers = #tpu.dot_dimension_numbers<[1], [0], [0], [1], [0, 0, 1, 1], [], []>} : vector<16x64xbf16>, vector<64x64xbf16>, vector<16x64xf32> -> vector<16x64xf32>
    %34 = arith.addf %28, %33 : vector<16x64xf32>
    %c0_35 = arith.constant 0 : index
    %c6 = arith.constant 6 : index
    %c0_36 = arith.constant 0 : index
    %35 = vector.load %arg1[%c0_35, %c6, %c0_36] : memref<1x22x64xbf16, #tpu.memory_space<vmem>>, vector<1x16x64xbf16>
    %36 = vector.shape_cast %35 : vector<1x16x64xbf16> to vector<16x64xbf16>
    %c6_37 = arith.constant 6 : index
    %c0_38 = arith.constant 0 : index
    %c0_39 = arith.constant 0 : index
    %37 = vector.load %arg2[%c6_37, %c0_38, %c0_39] : memref<7x64x64xbf16, #tpu.memory_space<vmem>>, vector<1x64x64xbf16>
    %38 = vector.shape_cast %37 : vector<1x64x64xbf16> to vector<64x64xbf16>
    %cst_40 = arith.constant dense<0.000000e+00> : vector<16x64xf32>
    %39 = tpu.matmul %36, %38, %cst_40 {dimension_numbers = #tpu.dot_dimension_numbers<[1], [0], [0], [1], [0, 0, 1, 1], [], []>} : vector<16x64xbf16>, vector<64x64xbf16>, vector<16x64xf32> -> vector<16x64xf32>
    %40 = arith.addf %34, %39 : vector<16x64xf32>
    %c0_41 = arith.constant 0 : index
    %c0_42 = arith.constant 0 : index
    %41 = vector.load %arg3[%c0_41, %c0_42] : memref<1x64xf32, #tpu.memory_space<vmem>>, vector<1x64xf32>
    %42 = vector.broadcast %41 : vector<1x64xf32> to vector<16x64xf32>
    %43 = arith.addf %40, %42 : vector<16x64xf32>
    %cst_43 = arith.constant 0.000000e+00 : f32
    %44 = vector.broadcast %cst_43 : f32 to vector<16x64xf32>
    %45 = arith.maximumf %43, %44 : vector<16x64xf32>
    %c0_44 = arith.constant 0 : index
    %c0_45 = arith.constant 0 : index
    %c0_46 = arith.constant 0 : index
    %46 = vector.load %arg4[%c0_44, %c0_45, %c0_46] : memref<1x16x64xf32, #tpu.memory_space<vmem>>, vector<1x16x64xf32>
    %47 = vector.shape_cast %46 : vector<1x16x64xf32> to vector<16x64xf32>
    %48 = arith.addf %45, %47 : vector<16x64xf32>
    %49 = vector.shape_cast %48 : vector<16x64xf32> to vector<1x16x64xf32>
    %c0_47 = arith.constant 0 : index
    %c0_48 = arith.constant 0 : index
    %c0_49 = arith.constant 0 : index
    %50 = vector.load %arg5[%c0_47, %c0_48, %c0_49] : memref<1x16x64xf32, #tpu.memory_space<vmem>>, vector<1x16x64xf32>
    tpu.vector_store %arg5[%c0_47, %c0_48, %c0_49], %49 {strides = array<i32>} : memref<1x16x64xf32, #tpu.memory_space<vmem>>, vector<1x16x64xf32>,
    %cst_50 = arith.constant dense<0xFF800000> : vector<64xf32>
    %51 = vector.multi_reduction <maximumf>, %48, %cst_50 [0] : vector<16x64xf32> to vector<64xf32>
    %52 = vector.shape_cast %51 : vector<64xf32> to vector<1x64xf32>
    %53 = vector.shape_cast %52 : vector<1x64xf32> to vector<1x1x64xf32>
    %c0_51 = arith.constant 0 : index
    %c0_52 = arith.constant 0 : index
    %c0_53 = arith.constant 0 : index
    %54 = vector.load %arg6[%c0_51, %c0_52, %c0_53] : memref<1x1x64xf32, #tpu.memory_space<vmem>>, vector<1x1x64xf32>
    tpu.vector_store %arg6[%c0_51, %c0_52, %c0_53], %53 {strides = array<i32>} : memref<1x1x64xf32, #tpu.memory_space<vmem>>, vector<1x1x64xf32>,
    %cst_54 = arith.constant dense<0.000000e+00> : vector<64xf32>
    %55 = vector.multi_reduction <add>, %48, %cst_54 [0] : vector<16x64xf32> to vector<64xf32>
    %56 = vector.shape_cast %55 : vector<64xf32> to vector<1x64xf32>
    %cst_55 = arith.constant 6.250000e-02 : f32
    %57 = vector.broadcast %cst_55 : f32 to vector<1x64xf32>
    %58 = arith.mulf %56, %57 : vector<1x64xf32>
    %59 = vector.shape_cast %58 : vector<1x64xf32> to vector<1x1x64xf32>
    %c0_56 = arith.constant 0 : index
    %c0_57 = arith.constant 0 : index
    %c0_58 = arith.constant 0 : index
    %60 = vector.load %arg7[%c0_56, %c0_57, %c0_58] : memref<1x1x64xf32, #tpu.memory_space<vmem>>, vector<1x1x64xf32>
    tpu.vector_store %arg7[%c0_56, %c0_57, %c0_58], %59 {strides = array<i32>} : memref<1x1x64xf32, #tpu.memory_space<vmem>>, vector<1x1x64xf32>,
    return
  }
  func.func @transform_0(%arg0: i32) -> (i32, i32, i32) {
    %c0_i32 = arith.constant 0 : i32
    %c0_i32_0 = arith.constant 0 : i32
    %c0_i32_1 = arith.constant 0 : i32
    return %arg0, %c0_i32, %c0_i32_0 : i32, i32, i32
  }
  func.func @transform_1(%arg0: i32) -> (i32, i32, i32) {
    %c0_i32 = arith.constant 0 : i32
    %c0_i32_0 = arith.constant 0 : i32
    %c0_i32_1 = arith.constant 0 : i32
    %c0_i32_2 = arith.constant 0 : i32
    return %c0_i32, %c0_i32_0, %c0_i32_1 : i32, i32, i32
  }
  func.func @transform_2(%arg0: i32) -> (i32, i32) {
    %c0_i32 = arith.constant 0 : i32
    %c0_i32_0 = arith.constant 0 : i32
    %c0_i32_1 = arith.constant 0 : i32
    return %c0_i32, %c0_i32_0 : i32, i32
  }
  func.func @transform_3(%arg0: i32) -> (i32, i32, i32) {
    %c0_i32 = arith.constant 0 : i32
    %c0_i32_0 = arith.constant 0 : i32
    %c0_i32_1 = arith.constant 0 : i32
    return %arg0, %c0_i32, %c0_i32_0 : i32, i32, i32
  }
  func.func @transform_4(%arg0: i32) -> (i32, i32, i32) {
    %c0_i32 = arith.constant 0 : i32
    %c0_i32_0 = arith.constant 0 : i32
    %c0_i32_1 = arith.constant 0 : i32
    return %arg0, %c0_i32, %c0_i32_0 : i32, i32, i32
  }
  func.func @transform_5(%arg0: i32) -> (i32, i32, i32) {
    %c0_i32 = arith.constant 0 : i32
    %c0_i32_0 = arith.constant 0 : i32
    %c0_i32_1 = arith.constant 0 : i32
    return %arg0, %c0_i32, %c0_i32_0 : i32, i32, i32
  }
  func.func @transform_6(%arg0: i32) -> (i32, i32, i32) {
    %c0_i32 = arith.constant 0 : i32
    %c0_i32_0 = arith.constant 0 : i32
    %c0_i32_1 = arith.constant 0 : i32
    return %arg0, %c0_i32, %c0_i32_0 : i32, i32, i32
  }
}

module attributes {stable_mosaic.version = 11 : i64} {
  func.func @_pool_kernel(%arg0: i32, %arg1: memref<2x16x561xf32, #tpu.memory_space<vmem>>, %arg2: memref<2x561xf32, #tpu.memory_space<vmem>>, %arg3: memref<2x561xf32, #tpu.memory_space<vmem>>) attributes {dimension_semantics = [#tpu.dimension_semantics<arbitrary>], iteration_bounds = array<i64: 1>, scalar_prefetch = 0 : i64, scratch_operands = 0 : i64, tpu.core_type = #tpu.core_type<tc>, window_params = [{transform_indices = @transform_0, window_bounds = array<i64: 2, 16, 561>}, {pipeline_mode = #tpu.pipeline_mode<synchronous>, transform_indices = @transform_1, window_bounds = array<i64: 2, 561>}, {pipeline_mode = #tpu.pipeline_mode<synchronous>, transform_indices = @transform_2, window_bounds = array<i64: 2, 561>}]} {
    %c0_i32 = arith.constant 0 : i32
    %0 = arith.cmpi eq, %arg0, %c0_i32 : i32
    %1 = arith.extui %0 : i1 to i32
    %c0_i32_0 = arith.constant 0 : i32
    %2 = arith.cmpi ne, %1, %c0_i32_0 : i32
    scf.if %2 {
      %cst_17 = arith.constant 0xFF800000 : f32
      %24 = vector.broadcast %cst_17 : f32 to vector<2x561xf32>
      %c0_18 = arith.constant 0 : index
      %c0_19 = arith.constant 0 : index
      %25 = vector.load %arg2[%c0_18, %c0_19] : memref<2x561xf32, #tpu.memory_space<vmem>>, vector<2x561xf32>
      tpu.vector_store %arg2[%c0_18, %c0_19], %24 {strides = array<i32>} : memref<2x561xf32, #tpu.memory_space<vmem>>, vector<2x561xf32>,
      %cst_20 = arith.constant 0.000000e+00 : f32
      %26 = vector.broadcast %cst_20 : f32 to vector<2x561xf32>
      %c0_21 = arith.constant 0 : index
      %c0_22 = arith.constant 0 : index
      %27 = vector.load %arg3[%c0_21, %c0_22] : memref<2x561xf32, #tpu.memory_space<vmem>>, vector<2x561xf32>
      tpu.vector_store %arg3[%c0_21, %c0_22], %26 {strides = array<i32>} : memref<2x561xf32, #tpu.memory_space<vmem>>, vector<2x561xf32>,
    } else {
    }
    %c0 = arith.constant 0 : index
    %c0_1 = arith.constant 0 : index
    %c0_2 = arith.constant 0 : index
    %3 = vector.load %arg1[%c0, %c0_1, %c0_2] : memref<2x16x561xf32, #tpu.memory_space<vmem>>, vector<2x16x561xf32>
    %c16_i32 = arith.constant 16 : i32
    %4 = arith.muli %arg0, %c16_i32 : i32
    %c16_i32_3 = arith.constant 16 : i32
    %5 = arith.subi %c16_i32_3, %4 : i32
    %6 = tpu.iota {dimensions = array<i32: 1>} : vector<2x16x561xi32>
    %7 = vector.broadcast %5 : i32 to vector<2x16x561xi32>
    %8 = arith.cmpi slt, %6, %7 : vector<2x16x561xi32>
    %c0_4 = arith.constant 0 : index
    %c0_5 = arith.constant 0 : index
    %9 = vector.load %arg2[%c0_4, %c0_5] : memref<2x561xf32, #tpu.memory_space<vmem>>, vector<2x561xf32>
    %cst = arith.constant 0xFF800000 : f32
    %10 = vector.broadcast %cst : f32 to vector<2x16x561xf32>
    %11 = arith.select %8, %3, %10 : vector<2x16x561xi1>, vector<2x16x561xf32>
    %cst_6 = arith.constant dense<0xFF800000> : vector<2x561xf32>
    %12 = vector.multi_reduction <maximumf>, %11, %cst_6 [1] : vector<2x16x561xf32> to vector<2x561xf32>
    %13 = arith.maximumf %9, %12 : vector<2x561xf32>
    %c0_7 = arith.constant 0 : index
    %c0_8 = arith.constant 0 : index
    %14 = vector.load %arg2[%c0_7, %c0_8] : memref<2x561xf32, #tpu.memory_space<vmem>>, vector<2x561xf32>
    tpu.vector_store %arg2[%c0_7, %c0_8], %13 {strides = array<i32>} : memref<2x561xf32, #tpu.memory_space<vmem>>, vector<2x561xf32>,
    %c0_9 = arith.constant 0 : index
    %c0_10 = arith.constant 0 : index
    %15 = vector.load %arg3[%c0_9, %c0_10] : memref<2x561xf32, #tpu.memory_space<vmem>>, vector<2x561xf32>
    %cst_11 = arith.constant 0.000000e+00 : f32
    %16 = vector.broadcast %cst_11 : f32 to vector<2x16x561xf32>
    %17 = arith.select %8, %3, %16 : vector<2x16x561xi1>, vector<2x16x561xf32>
    %cst_12 = arith.constant dense<0.000000e+00> : vector<2x561xf32>
    %18 = vector.multi_reduction <add>, %17, %cst_12 [1] : vector<2x16x561xf32> to vector<2x561xf32>
    %19 = arith.addf %15, %18 : vector<2x561xf32>
    %c0_13 = arith.constant 0 : index
    %c0_14 = arith.constant 0 : index
    %20 = vector.load %arg3[%c0_13, %c0_14] : memref<2x561xf32, #tpu.memory_space<vmem>>, vector<2x561xf32>
    tpu.vector_store %arg3[%c0_13, %c0_14], %19 {strides = array<i32>} : memref<2x561xf32, #tpu.memory_space<vmem>>, vector<2x561xf32>,
    %c0_i32_15 = arith.constant 0 : i32
    %21 = arith.cmpi eq, %arg0, %c0_i32_15 : i32
    %22 = arith.extui %21 : i1 to i32
    %c0_i32_16 = arith.constant 0 : i32
    %23 = arith.cmpi ne, %22, %c0_i32_16 : i32
    scf.if %23 {
      %c0_17 = arith.constant 0 : index
      %c0_18 = arith.constant 0 : index
      %24 = vector.load %arg3[%c0_17, %c0_18] : memref<2x561xf32, #tpu.memory_space<vmem>>, vector<2x561xf32>
      %cst_19 = arith.constant 6.250000e-02 : f32
      %25 = vector.broadcast %cst_19 : f32 to vector<2x561xf32>
      %26 = arith.mulf %24, %25 : vector<2x561xf32>
      %c0_20 = arith.constant 0 : index
      %c0_21 = arith.constant 0 : index
      %27 = vector.load %arg3[%c0_20, %c0_21] : memref<2x561xf32, #tpu.memory_space<vmem>>, vector<2x561xf32>
      tpu.vector_store %arg3[%c0_20, %c0_21], %26 {strides = array<i32>} : memref<2x561xf32, #tpu.memory_space<vmem>>, vector<2x561xf32>,
    } else {
    }
    return
  }
  func.func @transform_0(%arg0: i32) -> (i32, i32, i32) {
    %c0_i32 = arith.constant 0 : i32
    %c0_i32_0 = arith.constant 0 : i32
    %c0_i32_1 = arith.constant 0 : i32
    return %c0_i32, %arg0, %c0_i32_0 : i32, i32, i32
  }
  func.func @transform_1(%arg0: i32) -> (i32, i32) {
    %c0_i32 = arith.constant 0 : i32
    %c0_i32_0 = arith.constant 0 : i32
    %c0_i32_1 = arith.constant 0 : i32
    return %c0_i32, %c0_i32_0 : i32, i32
  }
  func.func @transform_2(%arg0: i32) -> (i32, i32) {
    %c0_i32 = arith.constant 0 : i32
    %c0_i32_0 = arith.constant 0 : i32
    %c0_i32_1 = arith.constant 0 : i32
    return %c0_i32, %c0_i32_0 : i32, i32
  }
}

module attributes {stable_mosaic.version = 11 : i64} {
  func.func @_mm_kernel(%arg0: i32, %arg1: memref<2x1506xbf16, #tpu.memory_space<vmem>>, %arg2: memref<1506x200xbf16, #tpu.memory_space<vmem>>, %arg3: memref<1x200xf32, #tpu.memory_space<vmem>>, %arg4: memref<2x200xf32, #tpu.memory_space<vmem>>) attributes {dimension_semantics = [#tpu.dimension_semantics<parallel>], iteration_bounds = array<i64: 1>, scalar_prefetch = 0 : i64, scratch_operands = 0 : i64, tpu.core_type = #tpu.core_type<tc>, window_params = [{transform_indices = @transform_0, window_bounds = array<i64: 2, 1506>}, {pipeline_mode = #tpu.pipeline_mode<synchronous>, transform_indices = @transform_1, window_bounds = array<i64: 1506, 200>}, {pipeline_mode = #tpu.pipeline_mode<synchronous>, transform_indices = @transform_2, window_bounds = array<i64: 1, 200>}, {transform_indices = @transform_3, window_bounds = array<i64: 2, 200>}]} {
    %c0 = arith.constant 0 : index
    %c0_0 = arith.constant 0 : index
    %0 = vector.load %arg1[%c0, %c0_0] : memref<2x1506xbf16, #tpu.memory_space<vmem>>, vector<2x1506xbf16>
    %c0_1 = arith.constant 0 : index
    %c0_2 = arith.constant 0 : index
    %1 = vector.load %arg2[%c0_1, %c0_2] : memref<1506x200xbf16, #tpu.memory_space<vmem>>, vector<1506x200xbf16>
    %cst = arith.constant dense<0.000000e+00> : vector<2x200xf32>
    %2 = tpu.matmul %0, %1, %cst {dimension_numbers = #tpu.dot_dimension_numbers<[1], [0], [0], [1], [0, 0, 1, 1], [], []>} : vector<2x1506xbf16>, vector<1506x200xbf16>, vector<2x200xf32> -> vector<2x200xf32>
    %c0_3 = arith.constant 0 : index
    %c0_4 = arith.constant 0 : index
    %3 = vector.load %arg3[%c0_3, %c0_4] : memref<1x200xf32, #tpu.memory_space<vmem>>, vector<1x200xf32>
    %4 = vector.broadcast %3 : vector<1x200xf32> to vector<2x200xf32>
    %5 = arith.addf %2, %4 : vector<2x200xf32>
    %cst_5 = arith.constant 0.000000e+00 : f32
    %6 = vector.broadcast %cst_5 : f32 to vector<2x200xf32>
    %7 = arith.maximumf %5, %6 : vector<2x200xf32>
    %c0_6 = arith.constant 0 : index
    %c0_7 = arith.constant 0 : index
    %8 = vector.load %arg4[%c0_6, %c0_7] : memref<2x200xf32, #tpu.memory_space<vmem>>, vector<2x200xf32>
    tpu.vector_store %arg4[%c0_6, %c0_7], %7 {strides = array<i32>} : memref<2x200xf32, #tpu.memory_space<vmem>>, vector<2x200xf32>,
    return
  }
  func.func @transform_0(%arg0: i32) -> (i32, i32) {
    %c0_i32 = arith.constant 0 : i32
    %c0_i32_0 = arith.constant 0 : i32
    return %arg0, %c0_i32 : i32, i32
  }
  func.func @transform_1(%arg0: i32) -> (i32, i32) {
    %c0_i32 = arith.constant 0 : i32
    %c0_i32_0 = arith.constant 0 : i32
    %c0_i32_1 = arith.constant 0 : i32
    return %c0_i32, %c0_i32_0 : i32, i32
  }
  func.func @transform_2(%arg0: i32) -> (i32, i32) {
    %c0_i32 = arith.constant 0 : i32
    %c0_i32_0 = arith.constant 0 : i32
    %c0_i32_1 = arith.constant 0 : i32
    return %c0_i32, %c0_i32_0 : i32, i32
  }
  func.func @transform_3(%arg0: i32) -> (i32, i32) {
    %c0_i32 = arith.constant 0 : i32
    %c0_i32_0 = arith.constant 0 : i32
    return %arg0, %c0_i32 : i32, i32
  }
}

module attributes {stable_mosaic.version = 11 : i64} {
  func.func @_mm_kernel(%arg0: i32, %arg1: memref<2x200xbf16, #tpu.memory_space<vmem>>, %arg2: memref<200x10xbf16, #tpu.memory_space<vmem>>, %arg3: memref<1x10xf32, #tpu.memory_space<vmem>>, %arg4: memref<2x10xf32, #tpu.memory_space<vmem>>) attributes {dimension_semantics = [#tpu.dimension_semantics<parallel>], iteration_bounds = array<i64: 1>, scalar_prefetch = 0 : i64, scratch_operands = 0 : i64, tpu.core_type = #tpu.core_type<tc>, window_params = [{transform_indices = @transform_0, window_bounds = array<i64: 2, 200>}, {pipeline_mode = #tpu.pipeline_mode<synchronous>, transform_indices = @transform_1, window_bounds = array<i64: 200, 10>}, {pipeline_mode = #tpu.pipeline_mode<synchronous>, transform_indices = @transform_2, window_bounds = array<i64: 1, 10>}, {transform_indices = @transform_3, window_bounds = array<i64: 2, 10>}]} {
    %c0 = arith.constant 0 : index
    %c0_0 = arith.constant 0 : index
    %0 = vector.load %arg1[%c0, %c0_0] : memref<2x200xbf16, #tpu.memory_space<vmem>>, vector<2x200xbf16>
    %c0_1 = arith.constant 0 : index
    %c0_2 = arith.constant 0 : index
    %1 = vector.load %arg2[%c0_1, %c0_2] : memref<200x10xbf16, #tpu.memory_space<vmem>>, vector<200x10xbf16>
    %cst = arith.constant dense<0.000000e+00> : vector<2x10xf32>
    %2 = tpu.matmul %0, %1, %cst {dimension_numbers = #tpu.dot_dimension_numbers<[1], [0], [0], [1], [0, 0, 1, 1], [], []>} : vector<2x200xbf16>, vector<200x10xbf16>, vector<2x10xf32> -> vector<2x10xf32>
    %c0_3 = arith.constant 0 : index
    %c0_4 = arith.constant 0 : index
    %3 = vector.load %arg3[%c0_3, %c0_4] : memref<1x10xf32, #tpu.memory_space<vmem>>, vector<1x10xf32>
    %4 = vector.broadcast %3 : vector<1x10xf32> to vector<2x10xf32>
    %5 = arith.addf %2, %4 : vector<2x10xf32>
    %c0_5 = arith.constant 0 : index
    %c0_6 = arith.constant 0 : index
    %6 = vector.load %arg4[%c0_5, %c0_6] : memref<2x10xf32, #tpu.memory_space<vmem>>, vector<2x10xf32>
    tpu.vector_store %arg4[%c0_5, %c0_6], %5 {strides = array<i32>} : memref<2x10xf32, #tpu.memory_space<vmem>>, vector<2x10xf32>,
    return
  }
  func.func @transform_0(%arg0: i32) -> (i32, i32) {
    %c0_i32 = arith.constant 0 : i32
    %c0_i32_0 = arith.constant 0 : i32
    return %arg0, %c0_i32 : i32, i32
  }
  func.func @transform_1(%arg0: i32) -> (i32, i32) {
    %c0_i32 = arith.constant 0 : i32
    %c0_i32_0 = arith.constant 0 : i32
    %c0_i32_1 = arith.constant 0 : i32
    return %c0_i32, %c0_i32_0 : i32, i32
  }
  func.func @transform_2(%arg0: i32) -> (i32, i32) {
    %c0_i32 = arith.constant 0 : i32
    %c0_i32_0 = arith.constant 0 : i32
    %c0_i32_1 = arith.constant 0 : i32
    return %c0_i32, %c0_i32_0 : i32, i32
  }
  func.func @transform_3(%arg0: i32) -> (i32, i32) {
    %c0_i32 = arith.constant 0 : i32
    %c0_i32_0 = arith.constant 0 : i32
    return %arg0, %c0_i32 : i32, i32
  }
}

</mosaic_0001>

<bundles_post_ra>
// kernel: musicnn_forward.11
= control target key start
LH: loop header
LB: loop body
LE: loop exit
PB: predicated region body
PF: predicated region fallthrough
CT: control target
= control target key end

     0   :  { %vm374_vm0 = vcmask 1040384   ;;  %vm375_vm1 = vcmask 1041408   ;;  %v674_v33 = vmov 65535   ;;  %vm367_vm2 = vcmask 23552   ;;  %s899_s1 = inlined_call_operand.vmem [shape: bf16[387,153], index: 1, kind: input, shape index: {}]   ;;  %s900_s0 = inlined_call_operand.vmem [shape: bf16[32,387], index: 0, kind: input, shape index: {}]   ;;  %s901_s2 = inlined_call_operand.vmem [shape: f32[1,153], index: 2, kind: input, shape index: {}]   ;;  %s902_s3 = inlined_call_operand.vmem [shape: f32[32,153], index: 3, kind: output, shape index: {}]  }
   0x1   :  { %v588_v0 = vld [vmem:[%s899_s1 + $0x4] ss:$8 sps:$4 sm:$0xff]   ;;  %v590_v1 = vld [vmem:[%s899_s1] ss:$8 sps:$4 sm:$0xff]   ;;  %v591_v2 = vld [vmem:[%s899_s1 + $0x14] ss:$8 sps:$4 sm:$0xff]  }
   0x2   :  { %384 = vmatprep.subr.bf16.mxu1 %v588_v0  ;;  %v593_v3 = vld [vmem:[%s899_s1 + $0x10] ss:$8 sps:$4 sm:$0xff]   ;;  %v594_v4 = vld [vmem:[%s899_s1 + $0x24] ss:$8 sps:$4 sm:$0xff]   ;;  %v596_v5 = vld [vmem:[%s899_s1 + $0x20] ss:$8 sps:$4 sm:$0xff]  }
   0x3   :  { %385 = vmatpush1.bf16.msra.mxu1 %v590_v1  ;;  %v597_v6 = vld [vmem:[%s899_s1 + $0x34] ss:$8 sps:$4 sm:$0xff]   ;;  %v609_v7 = vld [vmem:[%s899_s1 + $0x104] ss:$8 sps:$4 sm:$0xff]   ;;  %v599_v8 = vld [vmem:[%s899_s1 + $0x30] ss:$8 sps:$4 sm:$0xff]  }
   0x4   :  { %386 = vmatprep.subr.bf16.mxu1 %v591_v2  ;;  %v600_v9 = vld [vmem:[%s899_s1 + $0x44] ss:$8 sps:$4 sm:$0xff]   ;;  %v613_v10 = vld [vmem:[%s899_s1 + $0x100] ss:$8 sps:$4 sm:$0xff]   ;;  %437 = vmatprep.subr.bf16.mxu0 %v609_v7  ;;  %v615_v11 = vld [vmem:[%s899_s1 + $0x114] ss:$8 sps:$4 sm:$0xff]  }
   0x5   :  { %438 = vmatpush1.bf16.msra.mxu0 %v613_v10  ;;  %v602_v12 = vld [vmem:[%s899_s1 + $0x40] ss:$8 sps:$4 sm:$0xff]   ;;  %v619_v13 = vld [vmem:[%s899_s1 + $0x110] ss:$8 sps:$4 sm:$0xff]   ;;  %v621_v14 = vld [vmem:[%s899_s1 + $0x124] ss:$8 sps:$4 sm:$0xff]  }
   0x6   :  { %439 = vmatprep.subr.bf16.mxu0 %v615_v11  ;;  %v603_v15 = vld [vmem:[%s899_s1 + $0x54] ss:$8 sps:$4 sm:$0xff]   ;;  %v625_v16 = vld [vmem:[%s899_s1 + $0x120] ss:$8 sps:$4 sm:$0xff]   ;;  %v605_v18 = vld [vmem:[%s899_s1 + $0x50] ss:$8 sps:$4 sm:$0xff]  }
   0x7   :  { %387 = vmatpush1.bf16.msra.mxu1 %v593_v3  ;;  %v627_v17 = vld [vmem:[%s899_s1 + $0x134] ss:$8 sps:$4 sm:$0xff]   ;;  %v606_v19 = vld [vmem:[%s899_s1 + $0x64] ss:$8 sps:$4 sm:$0xff]   ;;  %v631_v20 = vld [vmem:[%s899_s1 + $0x130] ss:$8 sps:$4 sm:$0xff]   ;;  %v74_v3 = vlaneseq }
   0x8   :  { %388 = vmatprep.subr.bf16.mxu1 %v594_v4  ;;  %v633_v21 = vld [vmem:[%s899_s1 + $0x144] ss:$8 sps:$4 sm:$0xff]   ;;  %v608_v22 = vld [vmem:[%s899_s1 + $0x60] ss:$8 sps:$4 sm:$0xff]   ;;  %v611_v23 = vld [vmem:[%s899_s1 + $0x74] ss:$8 sps:$4 sm:$0xff]  }
   0x9   :  { %440 = vmatpush1.bf16.msra.mxu0 %v619_v13  ;;  %v637_v24 = vld [vmem:[%s899_s1 + $0x140] ss:$8 sps:$4 sm:$0xff]   ;;  %v639_v25 = vld [vmem:[%s899_s1 + $0x154] ss:$8 sps:$4 sm:$0xff]   ;;  %v614_v26 = vld [vmem:[%s899_s1 + $0x70] ss:$8 sps:$4 sm:$0xff]  }
   0xa   :  { %441 = vmatprep.subr.bf16.mxu0 %v621_v14  ;;  %v617_v27 = vld [vmem:[%s899_s1 + $0x84] ss:$8 sps:$4 sm:$0xff]   ;;  %v643_v28 = vld [vmem:[%s899_s1 + $0x150] ss:$8 sps:$4 sm:$0xff]   ;;  %v620_v29 = vld [vmem:[%s899_s1 + $0x80] ss:$8 sps:$4 sm:$0xff]  }
   0xb   :  { %389 = vmatpush1.bf16.msra.mxu1 %v596_v5  ;;  %v645_v30 = vld [vmem:[%s899_s1 + $0x164] ss:$8 sps:$4 sm:$0xff]   ;;  %v623_v32 = vld [vmem:[%s899_s1 + $0x94] ss:$8 sps:$4 sm:$0xff]   ;;  %v376_v34 = vsel %vm374_vm0, 4294967295, %v674_v33  ;;  %v75_v5 = vshrl.u32 %v74_v3, 7 }
   0xc   :  { %390 = vmatprep.subr.bf16.mxu1 %v597_v6  ;;  %v71_v31 = vld [vmem:[%s899_s1 + $0x180] sm:$0x33]  ;;  %v664_v36 = vld [vmem:[%s900_s0 + $0xc] ss:$16 sps:$4 sm:$0xff]   ;;  %v626_v40 = vld [vmem:[%s899_s1 + $0x90] ss:$8 sps:$4 sm:$0xff]  }
   0xd   :  { %442 = vmatpush1.bf16.msra.mxu0 %v625_v16  ;;  %v649_v35 = vld [vmem:[%s899_s1 + $0x160] ss:$8 sps:$4 sm:$0xff]   ;;  %v651_v37 = vld [vmem:[%s899_s1 + $0x174] ss:$8 sps:$4 sm:$0xff]   ;;  %v568_v38 = vcombine.high %v71_v31, %v71_v31  ;;  %v377_v41 = vsel %vm375_vm1, %v376_v34, 0  ;;  %569 = vmatprep.mubr.msk.bf16.mxu0 %vm367_vm2, %v664_v36  ;;  %v567_v44 = vcombine.low %v71_v31, %v71_v31  ;;  %vm499_vm3 = vcmask 203776  }
   0xe   :  { %443 = vmatprep.subr.bf16.mxu0 %v627_v17  ;;  %v667_v39 = vld [vmem:[%s900_s0 + $0x4] ss:$16 sps:$4 sm:$0xff]   ;;  %v655_v43 = vld [vmem:[%s899_s1 + $0x170] ss:$8 sps:$4 sm:$0xff]   ;;  %v632_v46 = vld [vmem:[%s899_s1 + $0xa0] ss:$8 sps:$4 sm:$0xff]  }
   0xf   :  { %391 = vmatpush1.bf16.msra.mxu1 %v599_v8  ;;  %v629_v42 = vld [vmem:[%s899_s1 + $0xa4] ss:$8 sps:$4 sm:$0xff]   ;;  %416 = vmatprep.mubr.bf16.mxu1 %v667_v39  ;;  %v382_v45 = vand.u32 %v568_v38, %v377_v41  ;;  %v635_v47 = vld [vmem:[%s899_s1 + $0xb4] ss:$8 sps:$4 sm:$0xff]   ;;  %v379_v48 = vand.u32 %v567_v44, %v377_v41  ;;  %v638_v49 = vld [vmem:[%s899_s1 + $0xb0] ss:$8 sps:$4 sm:$0xff]  }
  0x10   :  { %392 = vmatprep.subr.bf16.mxu1 %v600_v9  ;;  %v641_v50 = vld [vmem:[%s899_s1 + $0xc4] ss:$8 sps:$4 sm:$0xff]   ;;  %v662_v51 = vld [vmem:[%s900_s0 + $0x8] ss:$16 sps:$4 sm:$0xff]   ;;  %v647_v54 = vld [vmem:[%s899_s1 + $0xd4] ss:$8 sps:$4 sm:$0xff]  }
  0x11   :  { %444 = vmatpush1.bf16.msra.mxu0 %v631_v20  ;;  %v668_v52 = vld [vmem:[%s900_s0 + $0x2c] ss:$16 sps:$4 sm:$0xff]   ;;  %v644_v53 = vld [vmem:[%s899_s1 + $0xc0] ss:$8 sps:$4 sm:$0xff]   ;;  %v650_v55 = vld [vmem:[%s899_s1 + $0xd0] ss:$8 sps:$4 sm:$0xff]  }
  0x12   :  { %445 = vmatprep.subr.bf16.mxu0 %v633_v21  ;;  %v653_v56 = vld [vmem:[%s899_s1 + $0xe4] ss:$8 sps:$4 sm:$0xff]   ;;  %v672_v57 = vld [vmem:[%s900_s0 + $0x28] ss:$16 sps:$4 sm:$0xff]   ;;  %v658_v59 = vld [vmem:[%s899_s1 + $0xf4] ss:$8 sps:$4 sm:$0xff]  }
  0x13   :  { %393 = vmatpush1.bf16.msra.mxu1 %v602_v12  ;;  %v656_v58 = vld [vmem:[%s899_s1 + $0xe0] ss:$8 sps:$4 sm:$0xff]   ;;  %v661_v60 = vld [vmem:[%s899_s1 + $0xf0] ss:$8 sps:$4 sm:$0xff]   ;;  %v670_v62 = vld [vmem:[%s900_s0 + $0x24] ss:$16 sps:$4 sm:$0xff]  }
  0x14   :  { %394 = vmatprep.subr.bf16.mxu1 %v603_v15  ;;  %v665_v61 = vld [vmem:[%s900_s0] ss:$16 sps:$4 sm:$0xff]   ;;  %v76_v9 = vsub.s32 0, %v75_v5  ;;  %v80_v12 = vsub.s32 1, %v75_v5 }
  0x15   :  { %446 = vmatpush1.bf16.msra.mxu0 %v637_v24  ;;  %v673_v63 = vld [vmem:[%s900_s0 + $0x20] ss:$16 sps:$4 sm:$0xff]  }
  0x16   :  { %447 = vmatprep.subr.bf16.mxu0 %v639_v25  ;;  %v72_v11 = vld [vmem:[%s901_s2] sm:$0x3] }
  0x17   :  { %395 = vmatpush1.bf16.msra.mxu1 %v605_v18  ;;  %v77_v13 = vrot.slane %v72_v11, %v76_v9  ;;  %v81_v14 = vrot.slane %v72_v11, %v80_v12 }
  0x18   :  { %396 = vmatprep.subr.bf16.mxu1 %v606_v19 }
  0x19   :  { %448 = vmatpush1.bf16.msra.mxu0 %v643_v28 }
  0x1a   :  { %449 = vmatprep.subr.bf16.mxu0 %v645_v30 }
  0x1b   :  { %397 = vmatpush1.bf16.msra.mxu1 %v608_v22 }
  0x1c   :  { %398 = vmatprep.subr.bf16.mxu1 %v611_v23 }
  0x1d   :  { %450 = vmatpush1.bf16.msra.mxu0 %v649_v35 }
  0x1e   :  { %451 = vmatprep.subr.bf16.mxu0 %v651_v37 }
  0x1f   :  { %399 = vmatpush1.bf16.msra.mxu1 %v614_v26 }
  0x20   :  { %400 = vmatprep.subr.bf16.mxu1 %v617_v27 }
  0x21   :  { %452 = vmatpush1.bf16.msra.mxu0 %v655_v43 }
  0x22   :  { %453 = vmatprep.subr.bf16.mxu0 %v382_v45 }
  0x23   :  { %401 = vmatpush1.bf16.msra.mxu1 %v620_v29 }
  0x24   :  { %402 = vmatprep.subr.bf16.mxu1 %v623_v32 }
  0x25   :  { %454 = vmatpush1.bf16.msra.mxu0 %v379_v48 }
  0x27   :  { %403 = vmatpush1.bf16.msra.mxu1 %v626_v40 }
  0x28   :  { %404 = vmatprep.subr.bf16.mxu1 %v629_v42  ;;  %470 = vmatmul.mubr.bf16.vlgmr.msra.gmra.mrb[0].mxu0 %v662_v51 }
  0x29   :  { %570 = vmatprep.mubr.msk.bf16.mxu0 %vm367_vm2, %v668_v52 }
  0x2b   :  { %405 = vmatpush1.bf16.msra.mxu1 %v632_v46 }
  0x2c   :  { %406 = vmatprep.subr.bf16.mxu1 %v635_v47 }
  0x2f   :  { %407 = vmatpush1.bf16.msra.mxu1 %v638_v49 }
  0x30   :  { %408 = vmatprep.subr.bf16.mxu1 %v641_v50  ;;  %480 = vmatmul.mubr.bf16.gmra.mrb[4].mxu0 %v672_v57 }
  0x33   :  { %409 = vmatpush1.bf16.msra.mxu1 %v644_v53 }
  0x34   :  { %410 = vmatprep.subr.bf16.mxu1 %v647_v54 }
  0x37   :  { %411 = vmatpush1.bf16.msra.mxu1 %v650_v55 }
  0x38   :  { %412 = vmatprep.subr.bf16.mxu1 %v653_v56 }
  0x3b   :  { %413 = vmatpush1.bf16.msra.mxu1 %v656_v58 }
  0x3c   :  { %414 = vmatprep.subr.bf16.mxu1 %v658_v59 }
  0x3f   :  { %415 = vmatpush1.bf16.msra.mxu1 %v661_v60 }
  0x42   :  { %417 = vmatmul.mubr.bf16.vlgmr.msra.gmra.mrb[0].mxu1 %v665_v61 }
  0x43   :  { %426 = vmatprep.mubr.bf16.mxu1 %v670_v62 }
  0x4a   :  { %427 = vmatmul.mubr.bf16.gmra.mrb[4].mxu1 %v673_v63 }
  0xfb   :  { %v471_v0 = vpop.f32.mrb[0].mxu0 }
  0xfc   :  { %v473_v1 = vpop.f32.mrb[1].mxu0 }
  0xfd   :  { %v475_v2 = vpop.f32.mrb[2].mxu0 }
  0xfe   :  { %v477_v4 = vpop.f32.mrb[3].mxu0 }
 0x103   :  { %v481_v6 = vpop.f32.mrb[4].mxu0 }
 0x104   :  { %v483_v7 = vpop.f32.mrb[5].mxu0 }
 0x105   :  { %v485_v8 = vpop.f32.mrb[6].mxu0 }
 0x106   :  { %v487_v10 = vpop.f32.mrb[7].mxu0 }
 0x115   :  { %v418_v15 = vpop.f32.mrb[0].mxu1 }
 0x116   :  { %v419_v16 = vadd.f32 %v418_v15, %v77_v13  ;;  %v420_v17 = vpop.f32.mrb[1].mxu1 }
 0x117   :  { %v421_v18 = vadd.f32 %v420_v17, %v81_v14  ;;  %v422_v19 = vpop.f32.mrb[2].mxu1 }
 0x118   :  { %v472_v20 = vadd.f32 %v471_v0, %v419_v16  ;;  %v423_v21 = vadd.f32 %v422_v19, %v77_v13  ;;  %v424_v22 = vpop.f32.mrb[3].mxu1 }
 0x119   :  { %v474_v23 = vadd.f32 %v473_v1, %v421_v18  ;;  %v425_v24 = vadd.f32 %v424_v22, %v81_v14 }
 0x11a   :  { %v490_v25 = vmax.f32 %v472_v20, 0.0  ;;  %v476_v26 = vadd.f32 %v475_v2, %v423_v21 }
 0x11b   :  { %v491_v27 = vmax.f32 %v474_v23, 0.0  ;;  %v478_v28 = vadd.f32 %v477_v4, %v425_v24 }
 0x11c   :  { %498 = vst [vmem:[%s902_s3] sm:$0xff] %v490_v25  ;;  %v492_v29 = vmax.f32 %v476_v26, 0.0 }
 0x11d   :  { %500 = vst.msk [vmem:[%s902_s3 + $0x8] sm:$0xff] %vm499_vm3, %v491_v27  ;;  %v493_v30 = vmax.f32 %v478_v28, 0.0  ;;  %v428_v31 = vpop.f32.mrb[4].mxu1 }
 0x11e   :  { %501 = vst [vmem:[%s902_s3 + $0x10] sm:$0xff] %v492_v29  ;;  %v429_v32 = vadd.f32 %v428_v31, %v77_v13  ;;  %v430_v33 = vpop.f32.mrb[5].mxu1 }
 0x11f   :  { %502 = vst.msk [vmem:[%s902_s3 + $0x18] sm:$0xff] %vm499_vm3, %v493_v30  ;;  %v431_v34 = vadd.f32 %v430_v33, %v81_v14  ;;  %v432_v35 = vpop.f32.mrb[6].mxu1 }
 0x120   :  { %v482_v36 = vadd.f32 %v481_v6, %v429_v32  ;;  %v433_v37 = vadd.f32 %v432_v35, %v77_v13  ;;  %v434_v38 = vpop.f32.mrb[7].mxu1 }
 0x121   :  { %v484_v39 = vadd.f32 %v483_v7, %v431_v34  ;;  %v435_v40 = vadd.f32 %v434_v38, %v81_v14 }
 0x122   :  { %v494_v41 = vmax.f32 %v482_v36, 0.0  ;;  %v486_v42 = vadd.f32 %v485_v8, %v433_v37 }
 0x123   :  { %v495_v43 = vmax.f32 %v484_v39, 0.0  ;;  %v488_v44 = vadd.f32 %v487_v10, %v435_v40 }
 0x124   :  { %503 = vst [vmem:[%s902_s3 + $0x20] sm:$0xff] %v494_v41  ;;  %v496_v45 = vmax.f32 %v486_v42, 0.0 }
 0x125   :  { %504 = vst.msk [vmem:[%s902_s3 + $0x28] sm:$0xff] %vm499_vm3, %v495_v43  ;;  %v497_v46 = vmax.f32 %v488_v44, 0.0 }
 0x126   :  { %505 = vst [vmem:[%s902_s3 + $0x30] sm:$0xff] %v496_v45 }
 0x127   :  { %506 = vst.msk [vmem:[%s902_s3 + $0x38] sm:$0xff] %vm499_vm3, %v497_v46 }

// kernel: musicnn_forward.10
= control target key start
LH: loop header
LB: loop body
LE: loop exit
PB: predicated region body
PF: predicated region fallthrough
CT: control target
= control target key end

     0   :  { %s1974_s12 = smov 0   ;;  %s1976_s13 = smov 0   ;;  %s2429_s0 = inlined_call_operand.vmem [shape: bf16[2,59,22,114], index: 0, kind: input, shape index: {}]   ;;  %s2430_s1 = inlined_call_operand.vmem [shape: bf16[7,114,204], index: 1, kind: input, shape index: {}]   ;;  %s2431_s2 = inlined_call_operand.vmem [shape: f32[1,204], index: 2, kind: input, shape index: {}]   ;;  %s2432_s3 = inlined_call_operand.vmem [shape: f32[2,16,204], index: 3, kind: output, shape index: {}]  }
   0x1   :  { %s1978_s14 = smov 0   ;;  %s1980_s15 = smov 0  }
   0x2   :  { %s1982_s16 = smov 0  }
   0x3 LB: > { %s22_s17 = sadd.s32 1, %s1942_s14  ;;  %s25_s18 = sadd.s32 1, %s1946_s15  ;;  %s1950_s16 = sphi %s1982_s16, %s13_s16   ;;  %s1946_s15 = sphi %s1980_s15, %s2436_s15   ;;  %s1942_s14 = sphi %s1978_s14, %s2435_s14   ;;  %s1938_s13 = sphi %s1976_s13, %s2434_s13   ;;  %s1934_s12 = sphi %s1974_s12, %s2433_s12  }
   0x4   : > { %p23_p0 = scmp.ge.s32.totalorder %s22_s17, 59  ;;  %p1444_p1 = scmp.ge.s32.totalorder %s1950_s16, 1 }
   0x5   : > { %p155_p2 = scmp.lt.s32.totalorder %s1950_s16, 119 }
   0x6   : > { %s2438_s17 = smov (%p23_p0, %s22_s17), 0  ;;  %s2440_s18 = smov (!%p23_p0, %s25_s18), %s1946_s15 }
   0x7   : > { %p156_p3 = pnand %p1444_p1, %p155_p2  ;;  %p27_p4 = scmp.ge.s32.totalorder %s2440_s18, 2 }
   0x8   : > { %v1744_v0 = vld [vmem:[%s2430_s1 + $0x7c] ss:$8 sps:$4 sm:$0xff] (!%p156_p3)   ;;  %v1746_v1 = vld [vmem:[%s2430_s1 + $0x16c] ss:$8 sps:$4 sm:$0xff] (!%p156_p3)   ;;  %v1952_v2 = vmov (!%p156_p3), 0   ;;  %p183_p5 = scmp.lt.s32.totalorder (!%p156_p3), %s1938_s13, 1 }
   0x9   : > { %s2442_s18 = smov (%p27_p4, %s2440_s18), 0  ;;  %159 = sbr.rel (%p156_p3) target bundleno = 372 (0x174), region = 32 }
   0xa   : > { %371 = vmatprep.mubr.bf16.mxu1 (!%p156_p3), %v1952_v2  ;;  %817 = vmatprep.mubr.bf16.mxu0 (!%p156_p3), %v1952_v2  ;;  %p185_p6 = scmp.lt.s32.totalorder (!%p156_p3), %s1934_s12, 58  ;;  %v1748_v3 = vld [vmem:[%s2430_s1 + $0x78] ss:$8 sps:$4 sm:$0xff] (!%p156_p3)   ;;  %v1749_v4 = vld [vmem:[%s2430_s1 + $0x168] ss:$8 sps:$4 sm:$0xff] (!%p156_p3)   ;;  %vm332_vm0 = vcmask (!%p156_p3), 1040384  }
   0xb   : > { %339 = vmatprep.subr.bf16.mxu1 (!%p156_p3), %v1744_v0  ;;  %785 = vmatprep.subr.bf16.mxu0 (!%p156_p3), %v1746_v1  ;;  %v1750_v5 = vld [vmem:[%s2430_s1 + $0x8c] ss:$8 sps:$4 sm:$0xff] (!%p156_p3)   ;;  %v1752_v6 = vld [vmem:[%s2430_s1 + $0x17c] ss:$8 sps:$4 sm:$0xff] (!%p156_p3)   ;;  %v1754_v7 = vld [vmem:[%s2430_s1 + $0x88] ss:$8 sps:$4 sm:$0xff] (!%p156_p3)  }
   0xc   : > { %340 = vmatpush1.bf16.msra.mxu1 (!%p156_p3), %v1748_v3  ;;  %786 = vmatpush1.bf16.msra.mxu0 (!%p156_p3), %v1749_v4  ;;  %v1755_v8 = vld [vmem:[%s2430_s1 + $0x178] ss:$8 sps:$4 sm:$0xff] (!%p156_p3)   ;;  %v1756_v9 = vld [vmem:[%s2430_s1 + $0x9c] ss:$8 sps:$4 sm:$0xff] (!%p156_p3)   ;;  %v1758_v10 = vld [vmem:[%s2430_s1 + $0x18c] ss:$8 sps:$4 sm:$0xff] (!%p156_p3)  }
   0xd   : > { %341 = vmatprep.subr.bf16.mxu1 (!%p156_p3), %v1750_v5  ;;  %787 = vmatprep.subr.bf16.mxu0 (!%p156_p3), %v1752_v6  ;;  %v1760_v11 = vld [vmem:[%s2430_s1 + $0x98] ss:$8 sps:$4 sm:$0xff] (!%p156_p3)   ;;  %v1761_v12 = vld [vmem:[%s2430_s1 + $0x188] ss:$8 sps:$4 sm:$0xff] (!%p156_p3)   ;;  %v1762_v13 = vld [vmem:[%s2430_s1 + $0xac] ss:$8 sps:$4 sm:$0xff] (!%p156_p3)  }
   0xe   : > { %v1764_v14 = vld [vmem:[%s2430_s1 + $0x19c] ss:$8 sps:$4 sm:$0xff] (!%p156_p3)   ;;  %v1766_v15 = vld [vmem:[%s2430_s1 + $0xa8] ss:$8 sps:$4 sm:$0xff] (!%p156_p3)   ;;  %v1767_v16 = vld [vmem:[%s2430_s1 + $0x198] ss:$8 sps:$4 sm:$0xff] (!%p156_p3)  }
   0xf   : > { %v1768_v17 = vld [vmem:[%s2430_s1 + $0xbc] ss:$8 sps:$4 sm:$0xff] (!%p156_p3)   ;;  %v1770_v18 = vld [vmem:[%s2430_s1 + $0x1ac] ss:$8 sps:$4 sm:$0xff] (!%p156_p3)   ;;  %v1772_v19 = vld [vmem:[%s2430_s1 + $0xb8] ss:$8 sps:$4 sm:$0xff] (!%p156_p3)  }
  0x10   : > { %s2444_s13 = smov (!%p183_p5, %s1938_s13), 1  ;;  %342 = vmatpush1.bf16.msra.mxu1 %v1754_v7  ;;  %788 = vmatpush1.bf16.msra.mxu0 %v1755_v8  ;;  %v1773_v20 = vld [vmem:[%s2430_s1 + $0x1a8] ss:$8 sps:$4 sm:$0xff]   ;;  %v1774_v21 = vld [vmem:[%s2430_s1 + $0xcc] ss:$8 sps:$4 sm:$0xff]   ;;  %vm528_vm2 = vcmask 1046528  }
  0x11   : > { %s186_s6 = scalar_select %p185_p6, %s1934_s12, 58  ;;  %343 = vmatprep.subr.bf16.mxu1 %v1756_v9  ;;  %789 = vmatprep.subr.bf16.mxu0 %v1758_v10  ;;  %v1776_v22 = vld [vmem:[%s2430_s1 + $0x1bc] ss:$8 sps:$4 sm:$0xff]   ;;  %v1778_v23 = vld [vmem:[%s2430_s1 + $0xc8] ss:$8 sps:$4 sm:$0xff]   ;;  %vm328_vm4 = vcmask 932864  }
  0x12   : > { %s1675_s9 = sshll.u32 %s2444_s13, 5  ;;  %s1701_s30 = smul.u32 177, %s2444_s13  ;;  %v1779_v24 = vld [vmem:[%s2430_s1 + $0x1b8] ss:$8 sps:$4 sm:$0xff]   ;;  %v1780_v25 = vld [vmem:[%s2430_s1 + $0xdc] ss:$8 sps:$4 sm:$0xff]  }
  0x13   : > { %s2043_s21 = scalar_lea.vmem %s2432_s3, %s1675_s9  ;;  %s1700_s7 = smul.u32 3, %s186_s6  ;;  %v1462_v26 = vld [vmem:[%s2430_s1 + $0xe8] sm:$0x11]  ;;  %v1549_v28 = vld [vmem:[%s2430_s1 + $0x1d8] sm:$0x11]  ;;  %vm852_vm5 = vcmask 1045504  }
  0x14   : > { %344 = vmatpush1.bf16.msra.mxu1 %v1760_v11  ;;  %790 = vmatpush1.bf16.msra.mxu0 %v1761_v12  ;;  %v1782_v27 = vld [vmem:[%s2430_s1 + $0x1cc] ss:$8 sps:$4 sm:$0xff]   ;;  %v1784_v29 = vld [vmem:[%s2430_s1 + $0xd8] ss:$8 sps:$4 sm:$0xff]   ;;  %v1479_v32 = vcombine.low %v1462_v26, %v1462_v26  ;;  %v1785_v35 = vld [vmem:[%s2430_s1 + $0x1c8] ss:$8 sps:$4 sm:$0xff]   ;;  %v1480_v36 = vcombine.high %v1462_v26, %v1462_v26  ;;  %v1566_v37 = vcombine.high %v1549_v28, %v1549_v28 }
  0x15   : > { %345 = vmatprep.subr.bf16.mxu1 %v1762_v13  ;;  %791 = vmatprep.subr.bf16.mxu0 %v1764_v14  ;;  %s189_s6 = sadd.s32 %s1701_s30, %s1700_s7  ;;  %v1565_v38 = vcombine.low %v1549_v28, %v1549_v28  ;;  %vm240_vm1 = vsmask.f32 7424  ;;  %v1792_v46 = vld [vmem:[%s2430_s1 + $0x4] ss:$8 sps:$4 sm:$0xff]   ;;  %vm683_vm3 = vsmask.f32 6400 }
  0x16   : > { %s1445_s29 = sshll.u32 %s189_s6, 2  ;;  %v334_v45 = vsel %vm332_vm0, %v1479_v32, 0  ;;  %v1795_v54 = vld [vmem:[%s2430_s1 + $0x1e4] ss:$8 sps:$4 sm:$0xff]   ;;  %v1790_v63 = vld [vmem:[%s2430_s1] ss:$8 sps:$4 sm:$0xff]  }
  0x17   : > { %s2094_s19 = scalar_lea.vmem %s2429_s0, %s1445_s29  ;;  %v780_v50 = vsel %vm332_vm0, %v1565_v38, 0  ;;  %v1793_v0 = vld [vmem:[%s2430_s1 + $0x1e0] ss:$8 sps:$4 sm:$0xff]   ;;  %v1802_v4 = vld [vmem:[%s2430_s1 + $0x14] ss:$8 sps:$4 sm:$0xff]   ;;  %vm1176_vm6 = vcmask 1044480  }
  0x18   : > { %346 = vmatpush1.bf16.msra.mxu1 %v1766_v15  ;;  %792 = vmatpush1.bf16.msra.mxu0 %v1767_v16  ;;  %v198_v30 = vld [vmem:[%s2094_s19] sm:$0xf]  ;;  %v2113_v31 = vld [vmem:[%s2094_s19 + $0x4] sm:$0xf]  ;;  %v1805_v5 = vld [vmem:[%s2430_s1 + $0x1f4] ss:$8 sps:$4 sm:$0xff]  }
  0x19   : > { %347 = vmatprep.subr.bf16.mxu1 %v1768_v17  ;;  %793 = vmatprep.subr.bf16.mxu0 %v1770_v18  ;;  %v2116_v33 = vcombine.low %v198_v30, %v2113_v31  ;;  %v1797_v34 = vld [vmem:[%s2094_s19 + $0x8] ss:$0 sps:$4 sm:$0x11]   ;;  %v508_v39 = vld [vmem:[%s2094_s19] sm:$0xe]  ;;  %p1671_p7 = scmp.ne.s32.totalorder %s1934_s12, 0 }
  0x1a   : > { %v249_v42 = vshll.u32 %v1797_v34, 16  ;;  %v1516_v43 = vcombine.low %v508_v39, %v2113_v31  ;;  %v2127_v44 = vld [vmem:[%s2094_s19 + $0x8] ss:$0 sps:$4 sm:$0x33]   ;;  %v530_v58 = vrot.slane %v1797_v34, 1  ;;  %vm1336_vm8 = vcmask (!%p1671_p7), 621568  }
  0x1b   : > { %v242_v40 = vshrl.u32 %v2116_v33, 16  ;;  %v244_v41 = vshll.u32 %v2116_v33, 16  ;;  %v693_v52 = vshrl.u32 %v2127_v44, 16  ;;  %v696_v53 = vshll.u32 %v2127_v44, 16  ;;  %v1800_v8 = vld [vmem:[%s2430_s1 + $0x10] ss:$8 sps:$4 sm:$0xff]  }
  0x1c   : > { %348 = vmatpush1.bf16.msra.mxu1 %v1772_v19  ;;  %794 = vmatpush1.bf16.msra.mxu0 %v1773_v20  ;;  %v685_v48 = vshrl.u32 %v1516_v43, 16  ;;  %v688_v49 = vshll.u32 %v1516_v43, 16  ;;  %v251_v51 = vrot.slane %v249_v42, 1  ;;  %v529_v62 = vrot.slane %v1516_v43, 1  ;;  %v1803_v9 = vld [vmem:[%s2430_s1 + $0x1f0] ss:$8 sps:$4 sm:$0xff]  }
  0x1d   : > { %349 = vmatprep.subr.bf16.mxu1 %v1774_v21  ;;  %795 = vmatprep.subr.bf16.mxu0 %v1776_v22  ;;  %v246_v47 = vrot.slane %v244_v41, 1  ;;  %v695_v59 = vrot.slane %v693_v52, 1  ;;  %v698_v60 = vrot.slane %v696_v53, 2  ;;  %v1808_v10 = vld [vmem:[%s2430_s1 + $0x24] ss:$8 sps:$4 sm:$0xff]   ;;  %v854_v42 = vrot.slane %v2127_v44, 2 }
  0x1e   : > { %v687_v56 = vrot.slane %v685_v48, 1  ;;  %v690_v57 = vrot.slane %v688_v49, 2  ;;  %v2154_v6 = vsel %vm528_vm2, %v529_v62, %v530_v58  ;;  %v1811_v11 = vld [vmem:[%s2430_s1 + $0x204] ss:$8 sps:$4 sm:$0xff]   ;;  %v1806_v12 = vld [vmem:[%s2430_s1 + $0x20] ss:$8 sps:$4 sm:$0xff]  }
  0x1f   : > { %v247_v55 = vor.u32 %v246_v47, %v242_v40  ;;  %v699_v3 = vor.u32 %v698_v60, %v695_v59  ;;  %v1809_v13 = vld [vmem:[%s2430_s1 + $0x200] ss:$8 sps:$4 sm:$0xff]   ;;  %v1814_v14 = vld [vmem:[%s2430_s1 + $0x34] ss:$8 sps:$4 sm:$0xff]   ;;  %v1812_v16 = vld [vmem:[%s2430_s1 + $0x30] ss:$8 sps:$4 sm:$0xff]  }
  0x20   : > { %350 = vmatpush1.bf16.msra.mxu1 %v1778_v23  ;;  %796 = vmatpush1.bf16.msra.mxu0 %v1779_v24  ;;  %v691_v61 = vor.u32 %v690_v57, %v687_v56  ;;  %v1817_v15 = vld [vmem:[%s2430_s1 + $0x214] ss:$8 sps:$4 sm:$0xff]   ;;  %v1815_v17 = vld [vmem:[%s2430_s1 + $0x210] ss:$8 sps:$4 sm:$0xff]   ;;  %v1820_v18 = vld [vmem:[%s2430_s1 + $0x44] ss:$8 sps:$4 sm:$0xff]  }
  0x21   : > { %351 = vmatprep.subr.bf16.mxu1 %v1780_v25  ;;  %797 = vmatprep.subr.bf16.mxu0 %v1782_v27  ;;  %v252_v1 = vsel %vm240_vm1, %v247_v55, %v251_v51  ;;  %v1823_v19 = vld [vmem:[%s2430_s1 + $0x224] ss:$8 sps:$4 sm:$0xff]   ;;  %v1818_v20 = vld [vmem:[%s2430_s1 + $0x40] ss:$8 sps:$4 sm:$0xff]   ;;  %v1826_v22 = vld [vmem:[%s2430_s1 + $0x54] ss:$8 sps:$4 sm:$0xff]  }
  0x22   : > { %v700_v7 = vsel %vm683_vm3, %v691_v61, %v699_v3  ;;  %v1821_v21 = vld [vmem:[%s2430_s1 + $0x220] ss:$8 sps:$4 sm:$0xff]   ;;  %v1829_v23 = vld [vmem:[%s2430_s1 + $0x234] ss:$8 sps:$4 sm:$0xff]   ;;  %v1824_v24 = vld [vmem:[%s2430_s1 + $0x50] ss:$8 sps:$4 sm:$0xff]  }
  0x23   : > { %v1827_v25 = vld [vmem:[%s2430_s1 + $0x230] ss:$8 sps:$4 sm:$0xff]   ;;  %v1832_v26 = vld [vmem:[%s2430_s1 + $0x64] ss:$8 sps:$4 sm:$0xff]   ;;  %v1830_v32 = vld [vmem:[%s2430_s1 + $0x60] ss:$8 sps:$4 sm:$0xff]  }
  0x24   : > { %352 = vmatpush1.bf16.msra.mxu1 %v1784_v29  ;;  %798 = vmatpush1.bf16.msra.mxu0 %v1785_v35  ;;  %v1835_v27 = vld [vmem:[%s2430_s1 + $0x244] ss:$8 sps:$4 sm:$0xff]   ;;  %v214_v28 = vld [vmem:[%s2430_s1 + $0x70] sm:$0x11]  ;;  %v832_v29 = vld [vmem:[%s2094_s19] sm:$0xc] }
  0x25   : > { %1481 = vmatprep.subr.msk.bf16.mxu1 %vm332_vm0, %v1480_v36  ;;  %1567 = vmatprep.subr.msk.bf16.mxu0 %vm332_vm0, %v1566_v37  ;;  %v1583_v30 = vld [vmem:[%s2430_s1 + $0x250] sm:$0x11]  ;;  %v1833_v34 = vld [vmem:[%s2430_s1 + $0x240] ss:$8 sps:$4 sm:$0xff]   ;;  %v1498_v35 = vcombine.high %v214_v28, %v214_v28  ;;  %v2234_v36 = vcombine.low %v832_v29, %v2113_v31  ;;  %v1497_v38 = vcombine.low %v214_v28, %v214_v28  ;;  %v1849_v49 = vld [vmem:[%s2430_s1 + $0x104] ss:$8 sps:$4 sm:$0xff]  }
  0x26   : > { %v1600_v37 = vcombine.high %v1583_v30, %v1583_v30  ;;  %v1599_v39 = vcombine.low %v1583_v30, %v1583_v30  ;;  %v1842_v40 = vld [vmem:[%s2430_s1 + $0xf4] ss:$8 sps:$4 sm:$0xff]   ;;  %v1840_v47 = vld [vmem:[%s2430_s1 + $0xf0] ss:$8 sps:$4 sm:$0xff]   ;;  %v1847_v51 = vld [vmem:[%s2430_s1 + $0x100] ss:$8 sps:$4 sm:$0xff]  }
  0x27   : > { %v853_v41 = vrot.slane %v2234_v36, 2  ;;  %v460_v43 = vsel %vm332_vm0, %v1497_v38, 0  ;;  %v1843_v44 = vld [vmem:[%s2430_s1 + $0x258] ss:$8 sps:$4 sm:$0xff]   ;;  %v1850_v52 = vld [vmem:[%s2430_s1 + $0x268] ss:$8 sps:$4 sm:$0xff]  }
  0x28   : > { %354 = vmatpush1.bf16.msra.mxu1 %v334_v45  ;;  %800 = vmatpush1.bf16.msra.mxu0 %v780_v50  ;;  %v935_v45 = vsel %vm332_vm0, %v1599_v39, 0  ;;  %v1852_v50 = vld [vmem:[%s2430_s1 + $0x26c] ss:$8 sps:$4 sm:$0xff]   ;;  %v1856_v55 = vld [vmem:[%s2430_s1 + $0x278] ss:$8 sps:$4 sm:$0xff]  }
  0x29   : > { %465 = vmatprep.subr.bf16.mxu1 %v1792_v46  ;;  %940 = vmatprep.subr.bf16.mxu0 %v1795_v54  ;;  %v1845_v46 = vld [vmem:[%s2430_s1 + $0x25c] ss:$8 sps:$4 sm:$0xff]   ;;  %v855_v48 = vsel %vm852_vm5, %v853_v41, %v854_v42  ;;  %v1853_v54 = vld [vmem:[%s2430_s1 + $0x110] ss:$8 sps:$4 sm:$0xff]   ;;  %v1864_v58 = vld [vmem:[%s2430_s1 + $0x28c] ss:$8 sps:$4 sm:$0xff]  }
  0x2a   : > { %v1855_v53 = vld [vmem:[%s2430_s1 + $0x114] ss:$8 sps:$4 sm:$0xff]   ;;  %v1890_v56 = vld [vmem:[%s2094_s19 + $0x8] ss:$0 sps:$4 sm:$0x77]  }
  0x2b   : > { %1482 = vmatmul.mubr.msk.bf16.vlgmr.msra.gmra.mrb[0].mxu1 %vm328_vm4, %v252_v1  ;;  %1568 = vmatmul.mubr.msk.bf16.vlgmr.msra.gmra.mrb[0].mxu0 %vm328_vm4, %v700_v7  ;;  %v1861_v57 = vld [vmem:[%s2430_s1 + $0x124] ss:$8 sps:$4 sm:$0xff]   ;;  %v1156_v59 = vld [vmem:[%s2094_s19] sm:$0x8]  ;;  %v1178_v61 = vrot.slane %v1890_v56, 3 }
  0x2c   : > { %466 = vmatpush1.bf16.msra.mxu1 %v1790_v63  ;;  %941 = vmatpush1.bf16.msra.mxu0 %v1793_v0  ;;  %v1652_v60 = vcombine.low %v1156_v59, %v2113_v31  ;;  %v1859_v62 = vld [vmem:[%s2430_s1 + $0x120] ss:$8 sps:$4 sm:$0xff]   ;;  %v1867_v1 = vld [vmem:[%s2430_s1 + $0x134] ss:$8 sps:$4 sm:$0xff]   ;;  %v1873_v7 = vld [vmem:[%s2430_s1 + $0x144] ss:$8 sps:$4 sm:$0xff]  }
  0x2d   : > { %467 = vmatprep.subr.bf16.mxu1 %v1802_v4  ;;  %942 = vmatprep.subr.bf16.mxu0 %v1805_v5  ;;  %v1862_v63 = vld [vmem:[%s2430_s1 + $0x288] ss:$8 sps:$4 sm:$0xff]   ;;  %v1870_v31 = vld [vmem:[%s2430_s1 + $0x29c] ss:$8 sps:$4 sm:$0xff]   ;;  %v1868_v5 = vld [vmem:[%s2430_s1 + $0x298] ss:$8 sps:$4 sm:$0xff]  }
  0x2e   : > { %497 = vmatprep.mubr.bf16.mxu1 %v1952_v2  ;;  %972 = vmatprep.mubr.bf16.mxu0 %v1952_v2  ;;  %v1177_v0 = vrot.slane %v1652_v60, 3  ;;  %v1865_v4 = vld [vmem:[%s2430_s1 + $0x130] ss:$8 sps:$4 sm:$0xff]   ;;  %vm1007_vm7 = vsmask.f32 5376 }
  0x2f   : > { %v1893_v38 = vld [vmem:[%s2430_s1 + $0x2e4] ss:$8 sps:$4 sm:$0xff]   ;;  %v1891_v39 = vld [vmem:[%s2430_s1 + $0x2e0] ss:$8 sps:$4 sm:$0xff]   ;;  %v1894_v41 = vld [vmem:[%s2430_s1 + $0x2f0] ss:$8 sps:$4 sm:$0xff]  }
  0x30   : > { %468 = vmatpush1.bf16.msra.mxu1 %v1800_v8  ;;  %943 = vmatpush1.bf16.msra.mxu0 %v1803_v9  ;;  %v2304_v3 = vsel %vm1176_vm6, %v1177_v0, %v1178_v61  ;;  %v1876_v8 = vld [vmem:[%s2430_s1 + $0x2ac] ss:$8 sps:$4 sm:$0xff]   ;;  %v1009_v9 = vshrl.u32 %v2234_v36, 16 }
  0x31   : > { %469 = vmatprep.subr.bf16.mxu1 %v1808_v10  ;;  %944 = vmatprep.subr.bf16.mxu0 %v1811_v11  ;;  %v1012_v10 = vshll.u32 %v2234_v36, 16  ;;  %v1871_v11 = vld [vmem:[%s2430_s1 + $0x140] ss:$8 sps:$4 sm:$0xff]   ;;  %v1887_v36 = vld [vmem:[%s2430_s1 + $0x2d0] ss:$8 sps:$4 sm:$0xff]  }
  0x32   : > { %v1902_v42 = vld [vmem:[%s2430_s1 + $0x314] ss:$8 sps:$4 sm:$0xff]  }
  0x34   : > { %470 = vmatpush1.bf16.msra.mxu1 %v1806_v12  ;;  %945 = vmatpush1.bf16.msra.mxu0 %v1809_v13  ;;  %v1874_v12 = vld [vmem:[%s2430_s1 + $0x2a8] ss:$8 sps:$4 sm:$0xff]   ;;  %v1017_v13 = vshrl.u32 %v1890_v56, 16 }
  0x35   : > { %471 = vmatprep.subr.bf16.mxu1 %v1814_v14  ;;  %946 = vmatprep.subr.bf16.mxu0 %v1817_v15  ;;  %v1020_v14 = vshll.u32 %v1890_v56, 16  ;;  %v1879_v15 = vld [vmem:[%s2430_s1 + $0x154] ss:$8 sps:$4 sm:$0xff]  }
  0x38   : > { %472 = vmatpush1.bf16.msra.mxu1 %v1812_v16  ;;  %947 = vmatpush1.bf16.msra.mxu0 %v1815_v17  ;;  %v1882_v16 = vld [vmem:[%s2430_s1 + $0x2bc] ss:$8 sps:$4 sm:$0xff]  }
  0x39   : > { %473 = vmatprep.subr.bf16.mxu1 %v1820_v18  ;;  %948 = vmatprep.subr.bf16.mxu0 %v1823_v19  ;;  %v1515_v17 = vld [vmem:[%s2430_s1 + $0x160] sm:$0x11]  ;;  %v1617_v18 = vld [vmem:[%s2430_s1 + $0x2c8] sm:$0x11]  ;;  %v1011_v19 = vrot.slane %v1009_v9, 2 }
  0x3a   : > { %v1633_v28 = vcombine.low %v1617_v18, %v1617_v18 }
  0x3c   : > { %474 = vmatpush1.bf16.msra.mxu1 %v1818_v20  ;;  %949 = vmatpush1.bf16.msra.mxu0 %v1821_v21  ;;  %v1014_v20 = vrot.slane %v1012_v10, 3  ;;  %v1877_v21 = vld [vmem:[%s2430_s1 + $0x150] ss:$8 sps:$4 sm:$0xff]  }
  0x3d   : > { %475 = vmatprep.subr.bf16.mxu1 %v1826_v22  ;;  %950 = vmatprep.subr.bf16.mxu0 %v1829_v23  ;;  %v1880_v22 = vld [vmem:[%s2430_s1 + $0x2b8] ss:$8 sps:$4 sm:$0xff]   ;;  %v1532_v23 = vcombine.high %v1515_v17, %v1515_v17 }
  0x3e   : > { %v1015_v29 = vor.u32 %v1014_v20, %v1011_v19 }
  0x40   : > { %476 = vmatpush1.bf16.msra.mxu1 %v1824_v24  ;;  %951 = vmatpush1.bf16.msra.mxu0 %v1827_v25  ;;  %v1019_v24 = vrot.slane %v1017_v13, 2  ;;  %v1022_v25 = vrot.slane %v1020_v14, 3 }
  0x41   : > { %477 = vmatprep.subr.bf16.mxu1 %v1832_v26  ;;  %952 = vmatprep.subr.bf16.mxu0 %v1835_v27  ;;  %v1634_v26 = vcombine.high %v1617_v18, %v1617_v18  ;;  %v1531_v27 = vcombine.low %v1515_v17, %v1515_v17 }
  0x42   : > { %v1023_v30 = vor.u32 %v1022_v25, %v1019_v24 }
  0x44   : > { %478 = vmatpush1.bf16.msra.mxu1 %v1830_v32  ;;  %953 = vmatpush1.bf16.msra.mxu0 %v1833_v34  ;;  %v611_v32 = vsel %vm332_vm0, %v1531_v27, 0  ;;  %v1104_v34 = vsel %vm332_vm0, %v1633_v28, 0 }
  0x45   : > { %1499 = vmatprep.subr.msk.bf16.mxu1 %vm332_vm0, %v1498_v35  ;;  %1601 = vmatprep.subr.msk.bf16.mxu0 %vm332_vm0, %v1600_v37  ;;  %v1889_v35 = vld [vmem:[%s2430_s1 + $0x2d4] ss:$8 sps:$4 sm:$0xff]   ;;  %v1024_v37 = vsel %vm1007_vm7, %v1015_v29, %v1023_v30 }
  0x48   : > { %480 = vmatpush1.bf16.msra.mxu1 %v460_v43  ;;  %955 = vmatpush1.bf16.msra.mxu0 %v935_v45  ;;  %v1900_v43 = vld [vmem:[%s2430_s1 + $0x310] ss:$8 sps:$4 sm:$0xff]   ;;  %v1905_v45 = vld [vmem:[%s2430_s1 + $0x324] ss:$8 sps:$4 sm:$0xff]  }
  0x49   : > { %616 = vmatprep.subr.bf16.mxu1 %v1842_v40  ;;  %1109 = vmatprep.subr.bf16.mxu0 %v1845_v46  ;;  %v1896_v40 = vld [vmem:[%s2430_s1 + $0x2f4] ss:$8 sps:$4 sm:$0xff]   ;;  %v1903_v46 = vld [vmem:[%s2430_s1 + $0x320] ss:$8 sps:$4 sm:$0xff]  }
  0x4b   : > { %1500 = vmatmul.mubr.msk.bf16.vlgmr.msra.gmra.mrb[0].mxu1 %vm328_vm4, %v2116_v33  ;;  %1602 = vmatmul.mubr.msk.bf16.vlgmr.msra.gmra.mrb[0].mxu0 %vm328_vm4, %v855_v48  ;;  %v1858_v33 = vld [vmem:[%s2430_s1 + $0x27c] ss:$8 sps:$4 sm:$0xff]   ;;  %v1906_v48 = vld [vmem:[%s2430_s1 + $0x330] ss:$8 sps:$4 sm:$0xff]  }
  0x4c   : > { %617 = vmatpush1.bf16.msra.mxu1 %v1840_v47  ;;  %1110 = vmatpush1.bf16.msra.mxu0 %v1843_v44  ;;  %v1908_v47 = vld [vmem:[%s2430_s1 + $0x334] ss:$8 sps:$4 sm:$0xff]   ;;  %v1651_v44 = vld [vmem:[%s2430_s1 + $0x340] sm:$0x11] }
  0x4d   : > { %618 = vmatprep.subr.bf16.mxu1 %v1849_v49  ;;  %1111 = vmatprep.subr.bf16.mxu0 %v1852_v50  ;;  %v1668_v49 = vcombine.high %v1651_v44, %v1651_v44  ;;  %v1667_v50 = vcombine.low %v1651_v44, %v1651_v44 }
  0x4e   : > { %648 = vmatprep.mubr.bf16.mxu1 %v1952_v2  ;;  %1141 = vmatprep.mubr.bf16.mxu0 %v1952_v2 }
  0x50   : > { %619 = vmatpush1.bf16.msra.mxu1 %v1847_v51  ;;  %1112 = vmatpush1.bf16.msra.mxu0 %v1850_v52  ;;  %v1259_v51 = vsel %vm332_vm0, %v1667_v50, 0 }
  0x51   : > { %620 = vmatprep.subr.bf16.mxu1 %v1855_v53  ;;  %1113 = vmatprep.subr.bf16.mxu0 %v1858_v33 }
  0x54   : > { %621 = vmatpush1.bf16.msra.mxu1 %v1853_v54  ;;  %1114 = vmatpush1.bf16.msra.mxu0 %v1856_v55  ;;  %v1313_v55 = vlaneseq }
  0x55   : > { %622 = vmatprep.subr.bf16.mxu1 %v1861_v57  ;;  %1115 = vmatprep.subr.bf16.mxu0 %v1864_v58  ;;  %v1311_v58 = vld [vmem:[%s2431_s2] sm:$0x3] }
  0x56   : > { %v1314_v56 = vshrl.u32 %v1313_v55, 7 }
  0x58   : > { %623 = vmatpush1.bf16.msra.mxu1 %v1859_v62  ;;  %1116 = vmatpush1.bf16.msra.mxu0 %v1862_v63  ;;  %v1315_v57 = vsub.s32 0, %v1314_v56  ;;  %v1319_v59 = vsub.s32 1, %v1314_v56 }
  0x59   : > { %624 = vmatprep.subr.bf16.mxu1 %v1867_v1  ;;  %1117 = vmatprep.subr.bf16.mxu0 %v1870_v31 }
  0x5a   : > { %v1316_v60 = vrot.slane %v1311_v58, %v1315_v57  ;;  %v1320_v62 = vrot.slane %v1311_v58, %v1319_v59 }
  0x5c   : > { %625 = vmatpush1.bf16.msra.mxu1 %v1865_v4  ;;  %1118 = vmatpush1.bf16.msra.mxu0 %v1868_v5 }
  0x5d   : > { %626 = vmatprep.subr.bf16.mxu1 %v1873_v7  ;;  %1119 = vmatprep.subr.bf16.mxu0 %v1876_v8 }
  0x60   : > { %627 = vmatpush1.bf16.msra.mxu1 %v1871_v11  ;;  %1120 = vmatpush1.bf16.msra.mxu0 %v1874_v12 }
  0x61   : > { %628 = vmatprep.subr.bf16.mxu1 %v1879_v15  ;;  %1121 = vmatprep.subr.bf16.mxu0 %v1882_v16  ;;  %v1953_v15 = vmov (!%p1671_p7), -inf  }
  0x62   : > { %1335 = vst [vmem:[#allocation2] sm:$0xff] (!%p1671_p7), %v1953_v15  ;;  %1338 = vst [vmem:[#allocation2 + $0x10] sm:$0xff] (!%p1671_p7), %v1953_v15 }
  0x63   : > { %1337 = vst.msk [vmem:[#allocation2 + $0x8] sm:$0xff] (!%p1671_p7), %vm1336_vm8, %v1953_v15  ;;  %1339 = vst.msk [vmem:[#allocation2 + $0x18] sm:$0xff] (!%p1671_p7), %vm1336_vm8, %v1953_v15 }
  0x64   : > { %629 = vmatpush1.bf16.msra.mxu1 %v1877_v21  ;;  %1122 = vmatpush1.bf16.msra.mxu0 %v1880_v22 }
  0x65   : > { %1533 = vmatprep.subr.msk.bf16.mxu1 %vm332_vm0, %v1532_v23  ;;  %1635 = vmatprep.subr.msk.bf16.mxu0 %vm332_vm0, %v1634_v26 }
  0x68   : > { %631 = vmatpush1.bf16.msra.mxu1 %v611_v32  ;;  %1124 = vmatpush1.bf16.msra.mxu0 %v1104_v34 }
  0x69   : > { %1264 = vmatprep.subr.bf16.mxu0 %v1889_v35 }
  0x6b   : > { %1534 = vmatmul.mubr.msk.bf16.vlgmr.msra.gmra.mrb[0].mxu1 %vm328_vm4, %v2154_v6  ;;  %1636 = vmatmul.mubr.msk.bf16.vlgmr.msra.gmra.mrb[0].mxu0 %vm328_vm4, %v1024_v37  ;;  %v1899_v6 = vld [vmem:[%s2430_s1 + $0x304] ss:$8 sps:$4 sm:$0xff]  }
  0x6c   : > { %1265 = vmatpush1.bf16.msra.mxu0 %v1887_v36  ;;  %1296 = vmatprep.mubr.bf16.mxu0 %v1952_v2  ;;  %v1897_v2 = vld [vmem:[%s2430_s1 + $0x300] ss:$8 sps:$4 sm:$0xff]  }
  0x6d   : > { %1266 = vmatprep.subr.bf16.mxu0 %v1893_v38 }
  0x70   : > { %1267 = vmatpush1.bf16.msra.mxu0 %v1891_v39 }
  0x71   : > { %1268 = vmatprep.subr.bf16.mxu0 %v1896_v40 }
  0x74   : > { %1269 = vmatpush1.bf16.msra.mxu0 %v1894_v41 }
  0x75   : > { %1270 = vmatprep.subr.bf16.mxu0 %v1899_v6 }
  0x78   : > { %1271 = vmatpush1.bf16.msra.mxu0 %v1897_v2 }
  0x79   : > { %1272 = vmatprep.subr.bf16.mxu0 %v1902_v42 }
  0x7c   : > { %1273 = vmatpush1.bf16.msra.mxu0 %v1900_v43 }
  0x7d   : > { %1274 = vmatprep.subr.bf16.mxu0 %v1905_v45 }
  0x80   : > { %1275 = vmatpush1.bf16.msra.mxu0 %v1903_v46 }
  0x81   : > { %1276 = vmatprep.subr.bf16.mxu0 %v1908_v47 }
  0x84   : > { %1277 = vmatpush1.bf16.msra.mxu0 %v1906_v48 }
  0x85   : > { %1669 = vmatprep.subr.msk.bf16.mxu0 %vm332_vm0, %v1668_v49 }
  0x88   : > { %1279 = vmatpush1.bf16.msra.mxu0 %v1259_v51 }
  0x8b   : > { %1670 = vmatmul.mubr.msk.bf16.vlgmr.msra.gmra.mrb[0].mxu0 %vm328_vm4, %v2304_v3 }
 0x13e   : > { %v650_v52 = vpop.f32.mrb[0].mxu1 }
 0x13f   : > { %v652_v53 = vpop.f32.mrb[1].mxu1 }
 0x140   : > { %v654_v33 = vpop.f32.mrb[2].mxu1 }
 0x141   : > { %v656_v54 = vpop.f32.mrb[3].mxu1 }
 0x15e   : > { %v1298_v61 = vpop.f32.mrb[0].mxu0 }
 0x15f   : > { %v1676_v63 = vadd.f32 %v1298_v61, %v650_v52  ;;  %v1300_v0 = vpop.f32.mrb[1].mxu0 }
 0x160   : > { %v1677_v1 = vadd.f32 %v1300_v0, %v652_v53  ;;  %v1302_v31 = vpop.f32.mrb[2].mxu0  ;;  %1334 = sbr.rel (%p1671_p7) target bundleno = 359 (0x167), region = 36 }
 0x161   : > { %v1323_v3 = vadd.f32 %v1676_v63, %v1316_v60  ;;  %v1678_v4 = vadd.f32 %v1302_v31, %v654_v33  ;;  %v1304_v5 = vpop.f32.mrb[3].mxu0 }
 0x162   : > { %v1324_v7 = vadd.f32 %v1677_v1, %v1320_v62  ;;  %v1679_v8 = vadd.f32 %v1304_v5, %v656_v54 }
 0x163   : > { %v1327_v9 = vmax.f32 %v1323_v3, 0.0  ;;  %v1325_v10 = vadd.f32 %v1678_v4, %v1316_v60 }
 0x164   : > { %v1328_v11 = vmax.f32 %v1324_v7, 0.0  ;;  %v1326_v12 = vadd.f32 %v1679_v8, %v1320_v62 }
 0x165   : > { %v1329_v13 = vmax.f32 %v1325_v10, 0.0 }
 0x166   : > { %v1330_v14 = vmax.f32 %v1326_v12, 0.0 }
 0x167 PF: > { %v1340_v16 = vld [vmem:[#allocation2] sm:$0xff]  ;;  %v1341_v17 = vld [vmem:[#allocation2 + $0x8] sm:$0xff]  ;;  %vm1349_vm9 = vcmask 621568   ;;  %v1342_v18 = vld [vmem:[#allocation2 + $0x10] sm:$0xff]  ;;  %p1672_p8 = scmp.ne.s32.totalorder %s1934_s12, 58 }
 0x168   : > { %v1344_v19 = vmax.f32 %v1340_v16, %v1327_v9  ;;  %v1345_v20 = vmax.f32 %v1341_v17, %v1328_v11  ;;  %v1346_v21 = vmax.f32 %v1342_v18, %v1329_v13  ;;  %v1343_v22 = vld [vmem:[#allocation2 + $0x18] sm:$0xff] }
 0x169   : > { %v1347_v23 = vmax.f32 %v1343_v22, %v1330_v14  ;;  %1356 = sbr.rel (%p1672_p8) target bundleno = 372 (0x174), region = 40 }
 0x16a   : > { %1348 = vst [vmem:[#allocation2] sm:$0xff] %v1344_v19  ;;  %1350 = vst.msk [vmem:[#allocation2 + $0x8] sm:$0xff] %vm1349_vm9, %v1345_v20 }
 0x16b   : > { %1351 = vst [vmem:[#allocation2 + $0x10] sm:$0xff] %v1346_v21  ;;  %1352 = vst.msk [vmem:[#allocation2 + $0x18] sm:$0xff] %vm1349_vm9, %v1347_v23 }
 0x171   : > { %v1357_v24 = vld [vmem:[#allocation2] sm:$0xff]  ;;  %v1358_v25 = vld [vmem:[#allocation2 + $0x8] sm:$0xff] }
 0x172   : > { %v1359_v26 = vld [vmem:[#allocation2 + $0x10] sm:$0xff]  ;;  %1361 = vst [vmem:[%s2043_s21] sm:$0xff] %v1357_v24  ;;  %1362 = vst.msk [vmem:[%s2043_s21 + $0x8] sm:$0xff] %vm1349_vm9, %v1358_v25  ;;  %v1360_v27 = vld [vmem:[#allocation2 + $0x18] sm:$0xff] }
 0x173   : > { %1363 = vst [vmem:[%s2043_s21 + $0x10] sm:$0xff] %v1359_v26  ;;  %1364 = vst.msk [vmem:[%s2043_s21 + $0x18] sm:$0xff] %vm1349_vm9, %v1360_v27 }
 0x174 PF: > { %s13_s16 = sadd.s32 1, %s1950_s16   ;;  %s2433_s12 = smov %s1942_s14 }
 0x175   : > { %p10_p9 = scmp.ge.s32.totalorder %s13_s16, 120   ;;  %s2434_s13 = smov %s1946_s15 }
 0x176   : > { %s2435_s14 = smov %s2438_s17  ;;  %s2436_s15 = smov %s2442_s18 }
 0x177   :  { %12 = sbr.rel (!%p10_p9) target bundleno = 3 (0x3), region = 76 }

// kernel: musicnn_forward.9
= control target key start
LH: loop header
LB: loop body
LE: loop exit
PB: predicated region body
PF: predicated region fallthrough
CT: control target
= control target key end

     0   :  { %s2758_s12 = smov 0   ;;  %s2760_s13 = smov 0   ;;  %s3506_s0 = inlined_call_operand.vmem [shape: bf16[2,30,22,201], index: 0, kind: input, shape index: {}]   ;;  %s3507_s1 = inlined_call_operand.vmem [shape: bf16[7,201,204], index: 1, kind: input, shape index: {}]   ;;  %s3508_s2 = inlined_call_operand.vmem [shape: f32[1,204], index: 2, kind: input, shape index: {}]   ;;  %s3509_s3 = inlined_call_operand.vmem [shape: f32[2,16,204], index: 3, kind: output, shape index: {}]  }
   0x1   :  { %s2762_s14 = smov 0   ;;  %s2764_s15 = smov 0  }
   0x2   :  { %s2766_s16 = smov 0  }
   0x3 LB: > { %s22_s17 = sadd.s32 1, %s2726_s14  ;;  %s25_s18 = sadd.s32 1, %s2730_s15  ;;  %s2734_s16 = sphi %s2766_s16, %s13_s16   ;;  %s2730_s15 = sphi %s2764_s15, %s3513_s15   ;;  %s2726_s14 = sphi %s2762_s14, %s3512_s14   ;;  %s2722_s13 = sphi %s2760_s13, %s3511_s13   ;;  %s2718_s12 = sphi %s2758_s12, %s3510_s12  }
   0x4   : > { %p23_p0 = scmp.ge.s32.totalorder %s22_s17, 30  ;;  %p1972_p1 = scmp.ge.s32.totalorder %s2734_s16, 1 }
   0x5   : > { %p155_p2 = scmp.lt.s32.totalorder %s2734_s16, 61 }
   0x6   : > { %s3515_s17 = smov (%p23_p0, %s22_s17), 0  ;;  %s3517_s18 = smov (!%p23_p0, %s25_s18), %s2730_s15 }
   0x7   : > { %p156_p3 = pnand %p1972_p1, %p155_p2  ;;  %p27_p4 = scmp.ge.s32.totalorder %s3517_s18, 2 }
   0x8   : > { %v2408_v0 = vld [vmem:[%s3507_s1 + $0xd4] ss:$8 sps:$4 sm:$0xff] (!%p156_p3)   ;;  %p183_p5 = scmp.lt.s32.totalorder (!%p156_p3), %s2722_s13, 1  ;;  %v2412_v2 = vld [vmem:[%s3507_s1 + $0xd0] ss:$8 sps:$4 sm:$0xff] (!%p156_p3)   ;;  %p185_p6 = scmp.lt.s32.totalorder (!%p156_p3), %s2718_s12, 29 }
   0x9   : > { %s3519_s18 = smov (%p27_p4, %s3517_s18), 0  ;;  %159 = sbr.rel (%p156_p3) target bundleno = 452 (0x1c4), region = 32 }
   0xa   : > { %v2410_v1 = vld [vmem:[%s3507_s1 + $0x274] ss:$8 sps:$4 sm:$0xff] (!%p156_p3)   ;;  %435 = vmatprep.subr.bf16.mxu1 (!%p156_p3), %v2408_v0  ;;  %v2413_v3 = vld [vmem:[%s3507_s1 + $0x270] ss:$8 sps:$4 sm:$0xff] (!%p156_p3)   ;;  %v2414_v4 = vld [vmem:[%s3507_s1 + $0xe4] ss:$8 sps:$4 sm:$0xff] (!%p156_p3)  }
   0xb   : > { %1089 = vmatprep.subr.bf16.mxu0 (!%p156_p3), %v2410_v1  ;;  %436 = vmatpush1.bf16.msra.mxu1 (!%p156_p3), %v2412_v2  ;;  %v2416_v5 = vld [vmem:[%s3507_s1 + $0x284] ss:$8 sps:$4 sm:$0xff] (!%p156_p3)   ;;  %v2418_v6 = vld [vmem:[%s3507_s1 + $0xe0] ss:$8 sps:$4 sm:$0xff] (!%p156_p3)   ;;  %v2420_v8 = vld [vmem:[%s3507_s1 + $0xf4] ss:$8 sps:$4 sm:$0xff] (!%p156_p3)  }
   0xc   : > { %1090 = vmatpush1.bf16.msra.mxu0 (!%p156_p3), %v2413_v3  ;;  %437 = vmatprep.subr.bf16.mxu1 (!%p156_p3), %v2414_v4  ;;  %v2419_v7 = vld [vmem:[%s3507_s1 + $0x280] ss:$8 sps:$4 sm:$0xff] (!%p156_p3)   ;;  %v2422_v9 = vld [vmem:[%s3507_s1 + $0x294] ss:$8 sps:$4 sm:$0xff] (!%p156_p3)   ;;  %v2424_v10 = vld [vmem:[%s3507_s1 + $0xf0] ss:$8 sps:$4 sm:$0xff] (!%p156_p3)  }
   0xd   : > { %1091 = vmatprep.subr.bf16.mxu0 (!%p156_p3), %v2416_v5  ;;  %v2425_v11 = vld [vmem:[%s3507_s1 + $0x290] ss:$8 sps:$4 sm:$0xff] (!%p156_p3)   ;;  %v2426_v12 = vld [vmem:[%s3507_s1 + $0x104] ss:$8 sps:$4 sm:$0xff] (!%p156_p3)   ;;  %v2430_v14 = vld [vmem:[%s3507_s1 + $0x100] ss:$8 sps:$4 sm:$0xff] (!%p156_p3)  }
   0xe   : > { %v2428_v13 = vld [vmem:[%s3507_s1 + $0x2a4] ss:$8 sps:$4 sm:$0xff] (!%p156_p3)   ;;  %v2431_v15 = vld [vmem:[%s3507_s1 + $0x2a0] ss:$8 sps:$4 sm:$0xff] (!%p156_p3)   ;;  %v2432_v16 = vld [vmem:[%s3507_s1 + $0x114] ss:$8 sps:$4 sm:$0xff] (!%p156_p3)  }
   0xf   : > { %438 = vmatpush1.bf16.msra.mxu1 (!%p156_p3), %v2418_v6  ;;  %v2434_v17 = vld [vmem:[%s3507_s1 + $0x2b4] ss:$8 sps:$4 sm:$0xff] (!%p156_p3)   ;;  %v2436_v18 = vld [vmem:[%s3507_s1 + $0x110] ss:$8 sps:$4 sm:$0xff] (!%p156_p3)   ;;  %v2438_v20 = vld [vmem:[%s3507_s1 + $0x124] ss:$8 sps:$4 sm:$0xff] (!%p156_p3)  }
  0x10   : > { %s3521_s13 = smov (!%p183_p5, %s2722_s13), 1  ;;  %1092 = vmatpush1.bf16.msra.mxu0 %v2419_v7  ;;  %439 = vmatprep.subr.bf16.mxu1 %v2420_v8  ;;  %v2437_v19 = vld [vmem:[%s3507_s1 + $0x2b0] ss:$8 sps:$4 sm:$0xff]   ;;  %v2440_v21 = vld [vmem:[%s3507_s1 + $0x2c4] ss:$8 sps:$4 sm:$0xff]   ;;  %vm425_vm0 = vcmask 1043456  }
  0x11   : > { %s2339_s8 = sshll.u32 %s3521_s13, 5  ;;  %1093 = vmatprep.subr.bf16.mxu0 %v2422_v9  ;;  %v2442_v22 = vld [vmem:[%s3507_s1 + $0x120] ss:$8 sps:$4 sm:$0xff]   ;;  %v2444_v24 = vld [vmem:[%s3507_s1 + $0x134] ss:$8 sps:$4 sm:$0xff]   ;;  %s2365_s10 = smul.u32 180, %s3521_s13 }
  0x12   : > { %s2832_s26 = scalar_lea.vmem %s3509_s3, %s2339_s8  ;;  %v2443_v23 = vld [vmem:[%s3507_s1 + $0x2c0] ss:$8 sps:$4 sm:$0xff]   ;;  %v2446_v25 = vld [vmem:[%s3507_s1 + $0x2d4] ss:$8 sps:$4 sm:$0xff]   ;;  %v2448_v26 = vld [vmem:[%s3507_s1 + $0x130] ss:$8 sps:$4 sm:$0xff]  }
  0x13   : > { %440 = vmatpush1.bf16.msra.mxu1 %v2424_v10  ;;  %s186_s28 = scalar_select %p185_p6, %s2718_s12, 29  ;;  %v2449_v27 = vld [vmem:[%s3507_s1 + $0x2d0] ss:$8 sps:$4 sm:$0xff]   ;;  %v2450_v28 = vld [vmem:[%s3507_s1 + $0x144] ss:$8 sps:$4 sm:$0xff]   ;;  %vm426_vm1 = vcmask 1044480  }
  0x14   : > { %1094 = vmatpush1.bf16.msra.mxu0 %v2425_v11  ;;  %441 = vmatprep.subr.bf16.mxu1 %v2426_v12  ;;  %v2452_v29 = vld [vmem:[%s3507_s1 + $0x2e4] ss:$8 sps:$4 sm:$0xff]   ;;  %v2454_v30 = vld [vmem:[%s3507_s1 + $0x140] ss:$8 sps:$4 sm:$0xff]   ;;  %v2456_v32 = vld [vmem:[%s3507_s1 + $0x154] ss:$8 sps:$4 sm:$0xff]  }
  0x15   : > { %1095 = vmatprep.subr.bf16.mxu0 %v2428_v13  ;;  %s2364_s11 = smul.u32 6, %s186_s28  ;;  %v2455_v31 = vld [vmem:[%s3507_s1 + $0x2e0] ss:$8 sps:$4 sm:$0xff]   ;;  %v2458_v33 = vld [vmem:[%s3507_s1 + $0x2f4] ss:$8 sps:$4 sm:$0xff]   ;;  %v2736_v38 = vmov 65535  }
  0x16   : > { %v2460_v34 = vld [vmem:[%s3507_s1 + $0x150] ss:$8 sps:$4 sm:$0xff]   ;;  %v2462_v36 = vld [vmem:[%s3507_s1 + $0x164] ss:$8 sps:$4 sm:$0xff]   ;;  %v427_v39 = vsel %vm425_vm0, 4294967295, %v2736_v38  ;;  %vm421_vm4 = vcmask 596992  }
  0x17   : > { %442 = vmatpush1.bf16.msra.mxu1 %v2430_v14  ;;  %s189_s13 = sadd.s32 %s2365_s10, %s2364_s11  ;;  %v2461_v35 = vld [vmem:[%s3507_s1 + $0x2f0] ss:$8 sps:$4 sm:$0xff]   ;;  %v2464_v37 = vld [vmem:[%s3507_s1 + $0x304] ss:$8 sps:$4 sm:$0xff]   ;;  %v2466_v40 = vld [vmem:[%s3507_s1 + $0x160] ss:$8 sps:$4 sm:$0xff]  }
  0x18   : > { %1096 = vmatpush1.bf16.msra.mxu0 %v2431_v15  ;;  %443 = vmatprep.subr.bf16.mxu1 %v2432_v16  ;;  %s1973_s9 = sshll.u32 %s189_s13, 2  ;;  %v2467_v41 = vld [vmem:[%s3507_s1 + $0x300] ss:$8 sps:$4 sm:$0xff]   ;;  %v2468_v42 = vld [vmem:[%s3507_s1 + $0x174] ss:$8 sps:$4 sm:$0xff]   ;;  %v2940_v47 = vsel %vm426_vm1, %v427_v39, 0 }
  0x19   : > { %1097 = vmatprep.subr.bf16.mxu0 %v2434_v17  ;;  %s2915_s25 = scalar_lea.vmem %s3506_s0, %s1973_s9  ;;  %vm267_vm2 = vsmask.f32 7424  ;;  %v2937_v46 = vld [vmem:[%s3507_s1 + $0x194] ss:$8 sps:$4 sm:$0x1f]   ;;  %vm691_vm5 = vcmask 1046528  }
  0x1a   : > { %v198_v43 = vld [vmem:[%s2915_s25] sm:$0xff]  ;;  %v2931_v44 = vld [vmem:[%s2915_s25 + $0x8] sm:$0xff]  ;;  %v226_v45 = vld [vmem:[%s2915_s25 + $0x10] sm:$0x11]  ;;  %vm916_vm3 = vsmask.f32 6400  ;;  %v433_v7 = vand.u32 %v2937_v46, %v2940_v47 }
  0x1b   : > { %444 = vmatpush1.bf16.msra.mxu1 %v2436_v18  ;;  %v2943_v48 = vcombine.high %v198_v43, %v2931_v44  ;;  %v2470_v49 = vld [vmem:[%s3507_s1 + $0x314] ss:$8 sps:$4 sm:$0xff]   ;;  %v2948_v50 = vcombine.high %v226_v45, %v226_v45  ;;  %v658_v51 = vld [vmem:[%s2915_s25] sm:$0xee]  ;;  %v2953_v53 = vcombine.low %v198_v43, %v2931_v44  ;;  %v2472_v54 = vld [vmem:[%s3507_s1 + $0x170] ss:$8 sps:$4 sm:$0xff]   ;;  %v2978_v0 = vcombine.low %v226_v45, %v226_v45 }
  0x1c   : > { %1098 = vmatpush1.bf16.msra.mxu0 %v2437_v19  ;;  %445 = vmatprep.subr.bf16.mxu1 %v2438_v20  ;;  %v883_v52 = vld [vmem:[%s2915_s25 + $0x10] sm:$0x33]  ;;  %v2964_v58 = vcombine.high %v658_v51, %v2931_v44  ;;  %v2474_v60 = vld [vmem:[%s3507_s1 + $0x184] ss:$8 sps:$4 sm:$0xff]   ;;  %v2478_v15 = vld [vmem:[%s3507_s1 + $0x180] ss:$8 sps:$4 sm:$0xff]   ;;  %v2086_v18 = vcombine.low %v658_v51, %v2931_v44 }
  0x1d   : > { %1099 = vmatprep.subr.bf16.mxu0 %v2440_v21  ;;  %v2473_v55 = vld [vmem:[%s3507_s1 + $0x310] ss:$8 sps:$4 sm:$0xff]   ;;  %v281_v56 = vshrl.u32 %v2943_v48, 16  ;;  %v283_v57 = vshll.u32 %v2943_v48, 16  ;;  %v2966_v59 = vcombine.high %v883_v52, %v883_v52  ;;  %v2476_v61 = vld [vmem:[%s3507_s1 + $0x324] ss:$8 sps:$4 sm:$0xff]   ;;  %v2998_v19 = vcombine.low %v883_v52, %v883_v52 }
  0x1e   : > { %v2482_v62 = vld [vmem:[%s3507_s1 + $0x334] ss:$8 sps:$4 sm:$0x1f]   ;;  %v288_v63 = vshll.u32 %v2948_v50, 16  ;;  %v271_v1 = vshll.u32 %v2953_v53, 16  ;;  %v935_v4 = vshrl.u32 %v2964_v58, 16 }
  0x1f   : > { %446 = vmatpush1.bf16.msra.mxu1 %v2442_v22  ;;  %v2484_v2 = vld [vmem:[%s3507_s1 + $0x190] ss:$8 sps:$4 sm:$0x1f]   ;;  %v285_v3 = vrot.slane %v283_v57, 1  ;;  %v938_v5 = vshll.u32 %v2964_v58, 16  ;;  %v943_v6 = vshrl.u32 %v2966_v59, 16 }
  0x20   : > { %1100 = vmatpush1.bf16.msra.mxu0 %v2443_v23  ;;  %447 = vmatprep.subr.bf16.mxu1 %v2444_v24  ;;  %v2485_v8 = vld [vmem:[%s3507_s1 + $0x330] ss:$8 sps:$4 sm:$0x1f]   ;;  %v290_v9 = vrot.slane %v288_v63, 1  ;;  %v946_v10 = vshll.u32 %v2966_v59, 16  ;;  %v937_v12 = vrot.slane %v935_v4, 1 }
  0x21   : > { %1101 = vmatprep.subr.bf16.mxu0 %v2446_v25  ;;  %v286_v11 = vor.u32 %v285_v3, %v281_v56  ;;  %v940_v13 = vrot.slane %v938_v5, 2  ;;  %v945_v14 = vrot.slane %v943_v6, 1  ;;  %v276_v17 = vshll.u32 %v2978_v0, 16  ;;  %v2479_v20 = vld [vmem:[%s3507_s1 + $0x320] ss:$8 sps:$4 sm:$0xff]   ;;  %p2335_p7 = scmp.ne.s32.totalorder %s2718_s12, 0 }
  0x22   : > { %v948_v16 = vrot.slane %v946_v10, 2  ;;  %v269_v23 = vshrl.u32 %v2953_v53, 16  ;;  %v273_v24 = vrot.slane %v271_v1, 1  ;;  %v1087_v25 = vand.u32 %v2482_v62, %v2940_v47  ;;  %v2503_v62 = vld [vmem:[%s3507_s1 + $0x350] ss:$8 sps:$4 sm:$0xff]  }
  0x23   : > { %448 = vmatpush1.bf16.msra.mxu1 %v2448_v26  ;;  %v291_v21 = vsel %vm267_vm2, %v286_v11, %v290_v9  ;;  %v941_v22 = vor.u32 %v940_v13, %v937_v12  ;;  %v696_v46 = vrot.slane %v2948_v50, 1  ;;  %v692_v51 = vrot.slane %v2086_v18, 1  ;;  %v2502_v50 = vld [vmem:[%s3507_s1 + $0x14] ss:$8 sps:$4 sm:$0xff]   ;;  %v2508_v63 = vld [vmem:[%s3507_s1 + $0x24] ss:$8 sps:$4 sm:$0xff]  }
  0x24   : > { %1102 = vmatpush1.bf16.msra.mxu0 %v2449_v27  ;;  %449 = vmatprep.subr.bf16.mxu1 %v2450_v28  ;;  %v949_v26 = vor.u32 %v948_v16, %v945_v14  ;;  %v918_v27 = vshrl.u32 %v2086_v18, 16  ;;  %v921_v28 = vshll.u32 %v2086_v18, 16  ;;  %v693_v52 = vrot.slane %v2978_v0, 1  ;;  %v2511_v0 = vld [vmem:[%s3507_s1 + $0x364] ss:$8 sps:$4 sm:$0xff]  }
  0x25   : > { %1103 = vmatprep.subr.bf16.mxu0 %v2452_v29  ;;  %v430_v29 = vand.u32 %v2484_v2, %v2940_v47  ;;  %2032 = vmatprep.mubr.msk.bf16.mxu1 %vm421_vm4, %v291_v21  ;;  %v2506_v1 = vld [vmem:[%s3507_s1 + $0x20] ss:$8 sps:$4 sm:$0xff]   ;;  %v2514_v3 = vld [vmem:[%s3507_s1 + $0x34] ss:$8 sps:$4 sm:$0xff]   ;;  %v2512_v4 = vld [vmem:[%s3507_s1 + $0x30] ss:$8 sps:$4 sm:$0xff]  }
  0x26   : > { %v2509_v2 = vld [vmem:[%s3507_s1 + $0x360] ss:$8 sps:$4 sm:$0xff]   ;;  %v2515_v5 = vld [vmem:[%s3507_s1 + $0x370] ss:$8 sps:$4 sm:$0xff]   ;;  %v2520_v6 = vld [vmem:[%s3507_s1 + $0x44] ss:$8 sps:$4 sm:$0xff]  }
  0x27   : > { %450 = vmatpush1.bf16.msra.mxu1 %v2454_v30  ;;  %v1084_v30 = vand.u32 %v2485_v8, %v2940_v47  ;;  %v2518_v8 = vld [vmem:[%s3507_s1 + $0x40] ss:$8 sps:$4 sm:$0xff]   ;;  %v2526_v10 = vld [vmem:[%s3507_s1 + $0x54] ss:$8 sps:$4 sm:$0xff]   ;;  %v2524_v12 = vld [vmem:[%s3507_s1 + $0x50] ss:$8 sps:$4 sm:$0xff]  }
  0x28   : > { %1104 = vmatpush1.bf16.msra.mxu0 %v2455_v31  ;;  %451 = vmatprep.subr.bf16.mxu1 %v2456_v32  ;;  %v926_v31 = vshrl.u32 %v2998_v19, 16  ;;  %v929_v32 = vshll.u32 %v2998_v19, 16  ;;  %v2521_v9 = vld [vmem:[%s3507_s1 + $0x380] ss:$8 sps:$4 sm:$0xff]   ;;  %v2529_v11 = vld [vmem:[%s3507_s1 + $0x394] ss:$8 sps:$4 sm:$0xff]  }
  0x29   : > { %1105 = vmatprep.subr.bf16.mxu0 %v2458_v33  ;;  %v950_v33 = vsel %vm916_vm3, %v941_v22, %v949_v26  ;;  %v2527_v13 = vld [vmem:[%s3507_s1 + $0x390] ss:$8 sps:$4 sm:$0xff]   ;;  %v2532_v14 = vld [vmem:[%s3507_s1 + $0x64] ss:$8 sps:$4 sm:$0xff]   ;;  %v2530_v16 = vld [vmem:[%s3507_s1 + $0x60] ss:$8 sps:$4 sm:$0xff]  }
  0x2a   : > { %v928_v38 = vrot.slane %v926_v31, 1  ;;  %v931_v39 = vrot.slane %v929_v32, 2  ;;  %2169 = vmatprep.mubr.msk.bf16.mxu0 %vm421_vm4, %v950_v33  ;;  %v2533_v18 = vld [vmem:[%s3507_s1 + $0x3a0] ss:$8 sps:$4 sm:$0xff]   ;;  %v1174_v22 = vrot.slane %v2966_v59, 2  ;;  %vm1169_vm6 = vcmask 1045504  }
  0x2b   : > { %452 = vmatpush1.bf16.msra.mxu1 %v2460_v34  ;;  %v278_v34 = vrot.slane %v276_v17, 1  ;;  %v1136_v17 = vld [vmem:[%s2915_s25] sm:$0xcc]  ;;  %v2539_v26 = vld [vmem:[%s3507_s1 + $0x3b0] ss:$8 sps:$4 sm:$0xff]   ;;  %vm1864_vm8 = vcmask (!%p2335_p7), 621568  }
  0x2c   : > { %1106 = vmatpush1.bf16.msra.mxu0 %v2461_v35  ;;  %453 = vmatprep.subr.bf16.mxu1 %v2462_v36  ;;  %v920_v35 = vrot.slane %v918_v27, 1  ;;  %v923_v36 = vrot.slane %v921_v28, 2  ;;  %v932_v45 = vor.u32 %v931_v39, %v928_v38  ;;  %v3115_v21 = vcombine.high %v1136_v17, %v2931_v44  ;;  %v2544_v59 = vld [vmem:[%s3507_s1 + $0x84] ss:$8 sps:$4 sm:$0xff]   ;;  %v2550_v31 = vld [vmem:[%s3507_s1 + $0x94] ss:$8 sps:$4 sm:$0xff]  }
  0x2d   : > { %1107 = vmatprep.subr.bf16.mxu0 %v2464_v37  ;;  %v274_v37 = vor.u32 %v273_v24, %v269_v23  ;;  %v2541_v23 = vld [vmem:[%s3507_s1 + $0x3b4] ss:$8 sps:$4 sm:$0xff]   ;;  %v2547_v28 = vld [vmem:[%s3507_s1 + $0x3c4] ss:$8 sps:$4 sm:$0xff]   ;;  %v2548_v33 = vld [vmem:[%s3507_s1 + $0x90] ss:$8 sps:$4 sm:$0xff]  }
  0x2e   : > { %v924_v43 = vor.u32 %v923_v36, %v920_v35  ;;  %v1173_v24 = vrot.slane %v3115_v21, 2  ;;  %v2553_v32 = vld [vmem:[%s3507_s1 + $0x3d4] ss:$8 sps:$4 sm:$0xff]   ;;  %v2556_v35 = vld [vmem:[%s3507_s1 + $0xa4] ss:$8 sps:$4 sm:$0xff]  }
  0x2f   : > { %454 = vmatpush1.bf16.msra.mxu1 %v2466_v40  ;;  %v695_v40 = vrot.slane %v2964_v58, 1  ;;  %v2505_v58 = vld [vmem:[%s3507_s1 + $0x354] ss:$8 sps:$4 sm:$0xff]   ;;  %v2559_v36 = vld [vmem:[%s3507_s1 + $0x3e4] ss:$8 sps:$4 sm:$0xff]  }
  0x30   : > { %1108 = vmatpush1.bf16.msra.mxu0 %v2467_v41  ;;  %455 = vmatprep.subr.bf16.mxu1 %v2468_v42  ;;  %v2490_v41 = vld [vmem:[%s3507_s1 + $0x4] ss:$8 sps:$4 sm:$0xff]   ;;  %v933_v56 = vsel %vm916_vm3, %v924_v43, %v932_v45  ;;  %v1175_v27 = vsel %vm1169_vm6, %v1173_v24, %v1174_v22  ;;  %v2557_v38 = vld [vmem:[%s3507_s1 + $0x3e0] ss:$8 sps:$4 sm:$0xff]   ;;  %v2562_v39 = vld [vmem:[%s3507_s1 + $0xb4] ss:$8 sps:$4 sm:$0xff]  }
  0x31   : > { %1109 = vmatprep.subr.bf16.mxu0 %v2470_v49  ;;  %v2495_v42 = vld [vmem:[%s3507_s1 + $0x344] ss:$8 sps:$4 sm:$0xff]   ;;  %v2488_v49 = vld [vmem:[%s3507_s1] ss:$8 sps:$4 sm:$0xff]   ;;  %v3031_v57 = vsel %vm691_vm5, %v695_v40, %v696_v46  ;;  %v2565_v40 = vld [vmem:[%s3507_s1 + $0x3f4] ss:$8 sps:$4 sm:$0xff]  }
  0x32   : > { %v2560_v43 = vld [vmem:[%s3507_s1 + $0xb0] ss:$8 sps:$4 sm:$0xff]   ;;  %v2566_v45 = vld [vmem:[%s3507_s1 + $0xc0] ss:$8 sps:$4 sm:$0x1f]  }
  0x33   : > { %456 = vmatpush1.bf16.msra.mxu1 %v2472_v54  ;;  %v2493_v54 = vld [vmem:[%s3507_s1 + $0x340] ss:$8 sps:$4 sm:$0xff]   ;;  %v2563_v46 = vld [vmem:[%s3507_s1 + $0x3f0] ss:$8 sps:$4 sm:$0xff]   ;;  %vm1394_vm7 = vsmask.f32 5376 }
  0x34   : > { %1110 = vmatpush1.bf16.msra.mxu0 %v2473_v55  ;;  %457 = vmatprep.subr.bf16.mxu1 %v2474_v60  ;;  %v279_v55 = vsel %vm267_vm2, %v274_v37, %v278_v34  ;;  %v3040_v60 = vsel %vm691_vm5, %v692_v51, %v693_v52  ;;  %v2551_v34 = vld [vmem:[%s3507_s1 + $0x3d0] ss:$8 sps:$4 sm:$0xff]   ;;  %v2554_v37 = vld [vmem:[%s3507_s1 + $0xa0] ss:$8 sps:$4 sm:$0xff]   ;;  %v3191_v51 = vcombine.low %v1136_v17, %v2931_v44  ;;  %v2603_v24 = vld [vmem:[%s3507_s1 + $0x454] ss:$8 sps:$4 sm:$0xff]  }
  0x35   : > { %1111 = vmatprep.subr.bf16.mxu0 %v2476_v61  ;;  %v2500_v61 = vld [vmem:[%s3507_s1 + $0x10] ss:$8 sps:$4 sm:$0xff]  }
  0x37   : > { %458 = vmatpush1.bf16.msra.mxu1 %v2478_v15  ;;  %v2535_v15 = vld [vmem:[%s3507_s1 + $0x3a4] ss:$8 sps:$4 sm:$0xff]  }
  0x38   : > { %1112 = vmatpush1.bf16.msra.mxu0 %v2479_v20  ;;  %459 = vmatprep.subr.bf16.mxu1 %v433_v7  ;;  %v2523_v7 = vld [vmem:[%s3507_s1 + $0x384] ss:$8 sps:$4 sm:$0xff]   ;;  %v2538_v20 = vld [vmem:[%s3507_s1 + $0x74] ss:$8 sps:$4 sm:$0xff]  }
  0x39   : > { %1113 = vmatprep.subr.bf16.mxu0 %v1087_v25  ;;  %v2536_v25 = vld [vmem:[%s3507_s1 + $0x70] ss:$8 sps:$4 sm:$0xff]  }
  0x3b   : > { %460 = vmatpush1.bf16.msra.mxu1 %v430_v29  ;;  %v2542_v29 = vld [vmem:[%s3507_s1 + $0x80] ss:$8 sps:$4 sm:$0xff]  }
  0x3c   : > { %1114 = vmatpush1.bf16.msra.mxu0 %v1084_v30  ;;  %615 = vmatprep.subr.bf16.mxu1 %v2490_v41  ;;  %v2545_v30 = vld [vmem:[%s3507_s1 + $0x3c0] ss:$8 sps:$4 sm:$0xff]   ;;  %v2568_v41 = vld [vmem:[%s3507_s1 + $0xc4] ss:$8 sps:$4 sm:$0x1f]  }
  0x3d   : > { %1314 = vmatprep.subr.bf16.mxu0 %v2495_v42  ;;  %v2571_v42 = vld [vmem:[%s3507_s1 + $0x404] ss:$8 sps:$4 sm:$0x1f]   ;;  %v613_v52 = vand.u32 %v2568_v41, %v2940_v47  ;;  %v2622_v41 = vld [vmem:[%s3507_s1 + $0x220] ss:$8 sps:$4 sm:$0xff]  }
  0x3e   : > { %468 = vmatmul.mubr.bf16.vlgmr.msra.gmra.mrb[0].mxu1 %v279_v55  ;;  %v610_v55 = vand.u32 %v2566_v45, %v2940_v47  ;;  %v2633_v45 = vld [vmem:[%s3507_s1 + $0x4a4] ss:$8 sps:$4 sm:$0xff]  }
  0x3f   : > { %1122 = vmatmul.mubr.bf16.vlgmr.msra.gmra.mrb[0].mxu0 %v933_v56  ;;  %616 = vmatpush1.bf16.msra.mxu1 %v2488_v49  ;;  %v2569_v49 = vld [vmem:[%s3507_s1 + $0x400] ss:$8 sps:$4 sm:$0x1f]  }
  0x40   : > { %1315 = vmatpush1.bf16.msra.mxu0 %v2493_v54  ;;  %617 = vmatprep.subr.bf16.mxu1 %v2502_v50  ;;  %v1312_v54 = vand.u32 %v2571_v42, %v2940_v47  ;;  %v1309_v56 = vand.u32 %v2569_v49, %v2940_v47  ;;  %v2574_v50 = vld [vmem:[%s3507_s1 + $0x1a4] ss:$8 sps:$4 sm:$0xff]   ;;  %v2625_v42 = vld [vmem:[%s3507_s1 + $0x490] ss:$8 sps:$4 sm:$0xff]   ;;  %v2631_v49 = vld [vmem:[%s3507_s1 + $0x4a0] ss:$8 sps:$4 sm:$0xff]  }
  0x41   : > { %1316 = vmatprep.subr.bf16.mxu0 %v2505_v58  ;;  %2059 = vmatprep.mubr.msk.bf16.mxu1 %vm421_vm4, %v2943_v48  ;;  %v2517_v48 = vld [vmem:[%s3507_s1 + $0x374] ss:$8 sps:$4 sm:$0xff]   ;;  %v1170_v58 = vrot.slane %v3191_v51, 2 }
  0x42   : > { %2224 = vmatprep.mubr.msk.bf16.mxu0 %vm421_vm4, %v1175_v27  ;;  %v2606_v27 = vld [vmem:[%s3507_s1 + $0x1f4] ss:$8 sps:$4 sm:$0xff]  }
  0x43   : > { %618 = vmatpush1.bf16.msra.mxu1 %v2500_v61  ;;  %v1171_v61 = vrot.slane %v2998_v19, 2  ;;  %v2582_v19 = vld [vmem:[%s3507_s1 + $0x1b4] ss:$8 sps:$4 sm:$0xff]  }
  0x44   : > { %1317 = vmatpush1.bf16.msra.mxu0 %v2503_v62  ;;  %619 = vmatprep.subr.bf16.mxu1 %v2508_v63  ;;  %v2578_v62 = vld [vmem:[%s3507_s1 + $0x414] ss:$8 sps:$4 sm:$0xff]   ;;  %v2572_v63 = vld [vmem:[%s3507_s1 + $0x1a0] ss:$8 sps:$4 sm:$0xff]  }
  0x45   : > { %1318 = vmatprep.subr.bf16.mxu0 %v2511_v0  ;;  %v2576_v0 = vld [vmem:[%s3507_s1 + $0x410] ss:$8 sps:$4 sm:$0xff]  }
  0x47   : > { %620 = vmatpush1.bf16.msra.mxu1 %v2506_v1  ;;  %v1172_v1 = vsel %vm1169_vm6, %v1170_v58, %v1171_v61  ;;  %v2637_v58 = vld [vmem:[%s3507_s1 + $0x4b0] ss:$8 sps:$4 sm:$0xff]   ;;  %v1399_v61 = vshll.u32 %v3191_v51, 16 }
  0x48   : > { %1319 = vmatpush1.bf16.msra.mxu0 %v2509_v2  ;;  %621 = vmatprep.subr.bf16.mxu1 %v2514_v3  ;;  %v2585_v2 = vld [vmem:[%s3507_s1 + $0x424] ss:$8 sps:$4 sm:$0xff]   ;;  %v1413_v3 = vshrl.u32 %v3115_v21, 16 }
  0x49   : > { %1320 = vmatprep.subr.bf16.mxu0 %v2517_v48  ;;  %v1416_v48 = vshll.u32 %v3115_v21, 16  ;;  %v2595_v21 = vld [vmem:[%s3507_s1 + $0x440] ss:$8 sps:$4 sm:$0xff]  }
  0x4b   : > { %622 = vmatpush1.bf16.msra.mxu1 %v2512_v4  ;;  %v2580_v4 = vld [vmem:[%s3507_s1 + $0x1b0] ss:$8 sps:$4 sm:$0xff]  }
  0x4c   : > { %1321 = vmatpush1.bf16.msra.mxu0 %v2515_v5  ;;  %623 = vmatprep.subr.bf16.mxu1 %v2520_v6  ;;  %v2583_v5 = vld [vmem:[%s3507_s1 + $0x420] ss:$8 sps:$4 sm:$0xff]   ;;  %v2588_v6 = vld [vmem:[%s3507_s1 + $0x1c4] ss:$8 sps:$4 sm:$0xff]  }
  0x4d   : > { %1322 = vmatprep.subr.bf16.mxu0 %v2523_v7  ;;  %v3234_v7 = vld [vmem:[%s2915_s25 + $0x10] sm:$0x77] }
  0x4f   : > { %624 = vmatpush1.bf16.msra.mxu1 %v2518_v8  ;;  %v3240_v8 = vcombine.high %v3234_v7, %v3234_v7 }
  0x50   : > { %1323 = vmatpush1.bf16.msra.mxu0 %v2521_v9  ;;  %625 = vmatprep.subr.bf16.mxu1 %v2526_v10  ;;  %v1415_v9 = vrot.slane %v1413_v3, 2  ;;  %v1418_v10 = vrot.slane %v1416_v48, 3  ;;  %v3372_v48 = vld [vmem:[%s2915_s25] sm:$0x88] }
  0x51   : > { %1324 = vmatprep.subr.bf16.mxu0 %v2529_v11  ;;  %v2586_v11 = vld [vmem:[%s3507_s1 + $0x1c0] ss:$8 sps:$4 sm:$0xff]  }
  0x53   : > { %626 = vmatpush1.bf16.msra.mxu1 %v2524_v12  ;;  %v2589_v12 = vld [vmem:[%s3507_s1 + $0x430] ss:$8 sps:$4 sm:$0xff]  }
  0x54   : > { %1325 = vmatpush1.bf16.msra.mxu0 %v2527_v13  ;;  %627 = vmatprep.subr.bf16.mxu1 %v2532_v14  ;;  %v1421_v13 = vshrl.u32 %v3240_v8, 16  ;;  %v1424_v14 = vshll.u32 %v3240_v8, 16 }
  0x55   : > { %1326 = vmatprep.subr.bf16.mxu0 %v2535_v15  ;;  %v2597_v15 = vld [vmem:[%s3507_s1 + $0x444] ss:$8 sps:$4 sm:$0xff]  }
  0x56   : > { %v1423_v17 = vrot.slane %v1421_v13, 2 }
  0x57   : > { %628 = vmatpush1.bf16.msra.mxu1 %v2530_v16  ;;  %v1419_v16 = vor.u32 %v1418_v10, %v1415_v9 }
  0x58   : > { %1327 = vmatpush1.bf16.msra.mxu0 %v2533_v18  ;;  %629 = vmatprep.subr.bf16.mxu1 %v2538_v20  ;;  %v1426_v18 = vrot.slane %v1424_v14, 3  ;;  %v2592_v20 = vld [vmem:[%s3507_s1 + $0x1d0] ss:$8 sps:$4 sm:$0xff]  }
  0x59   : > { %1328 = vmatprep.subr.bf16.mxu0 %v2541_v23  ;;  %v2600_v23 = vld [vmem:[%s3507_s1 + $0x1e4] ss:$8 sps:$4 sm:$0xff]  }
  0x5a   : > { %v1427_v22 = vor.u32 %v1426_v18, %v1423_v17  ;;  %v1652_v18 = vrot.slane %v3240_v8, 3  ;;  %v2657_v8 = vld [vmem:[%s3507_s1 + $0x4f0] ss:$8 sps:$4 sm:$0xff]  }
  0x5b   : > { %630 = vmatpush1.bf16.msra.mxu1 %v2536_v25 }
  0x5c   : > { %1329 = vmatpush1.bf16.msra.mxu0 %v2539_v26  ;;  %631 = vmatprep.subr.bf16.mxu1 %v2544_v59  ;;  %v1428_v25 = vsel %vm1394_vm7, %v1419_v16, %v1427_v22  ;;  %v2598_v26 = vld [vmem:[%s3507_s1 + $0x1e0] ss:$8 sps:$4 sm:$0xff]   ;;  %v2601_v59 = vld [vmem:[%s3507_s1 + $0x450] ss:$8 sps:$4 sm:$0xff]   ;;  %v2655_v16 = vld [vmem:[%s3507_s1 + $0x4e4] ss:$8 sps:$4 sm:$0xff]  }
  0x5d   : > { %1330 = vmatprep.subr.bf16.mxu0 %v2547_v28  ;;  %v2609_v28 = vld [vmem:[%s3507_s1 + $0x464] ss:$8 sps:$4 sm:$0xff]  }
  0x5f   : > { %632 = vmatpush1.bf16.msra.mxu1 %v2542_v29  ;;  %v2604_v29 = vld [vmem:[%s3507_s1 + $0x1f0] ss:$8 sps:$4 sm:$0xff]  }
  0x60   : > { %1331 = vmatpush1.bf16.msra.mxu0 %v2545_v30  ;;  %633 = vmatprep.subr.bf16.mxu1 %v2550_v31  ;;  %v2607_v30 = vld [vmem:[%s3507_s1 + $0x460] ss:$8 sps:$4 sm:$0xff]   ;;  %v2612_v31 = vld [vmem:[%s3507_s1 + $0x204] ss:$8 sps:$4 sm:$0xff]  }
  0x61   : > { %1332 = vmatprep.subr.bf16.mxu0 %v2553_v32  ;;  %v2615_v32 = vld [vmem:[%s3507_s1 + $0x474] ss:$8 sps:$4 sm:$0xff]  }
  0x63   : > { %634 = vmatpush1.bf16.msra.mxu1 %v2548_v33  ;;  %v2610_v33 = vld [vmem:[%s3507_s1 + $0x200] ss:$8 sps:$4 sm:$0xff]  }
  0x64   : > { %1333 = vmatpush1.bf16.msra.mxu0 %v2551_v34  ;;  %635 = vmatprep.subr.bf16.mxu1 %v2556_v35  ;;  %v2613_v34 = vld [vmem:[%s3507_s1 + $0x470] ss:$8 sps:$4 sm:$0xff]   ;;  %v2618_v35 = vld [vmem:[%s3507_s1 + $0x214] ss:$8 sps:$4 sm:$0xff]  }
  0x65   : > { %1334 = vmatprep.subr.bf16.mxu0 %v2559_v36  ;;  %v2621_v36 = vld [vmem:[%s3507_s1 + $0x484] ss:$8 sps:$4 sm:$0xff]  }
  0x67   : > { %636 = vmatpush1.bf16.msra.mxu1 %v2554_v37  ;;  %v2616_v37 = vld [vmem:[%s3507_s1 + $0x210] ss:$8 sps:$4 sm:$0xff]  }
  0x68   : > { %1335 = vmatpush1.bf16.msra.mxu0 %v2557_v38  ;;  %637 = vmatprep.subr.bf16.mxu1 %v2562_v39  ;;  %v2619_v38 = vld [vmem:[%s3507_s1 + $0x480] ss:$8 sps:$4 sm:$0xff]   ;;  %v2624_v39 = vld [vmem:[%s3507_s1 + $0x224] ss:$8 sps:$4 sm:$0xff]  }
  0x69   : > { %1336 = vmatprep.subr.bf16.mxu0 %v2565_v40  ;;  %v2627_v40 = vld [vmem:[%s3507_s1 + $0x494] ss:$8 sps:$4 sm:$0xff]  }
  0x6b   : > { %638 = vmatpush1.bf16.msra.mxu1 %v2560_v43  ;;  %v2630_v43 = vld [vmem:[%s3507_s1 + $0x234] ss:$8 sps:$4 sm:$0xff]  }
  0x6c   : > { %1337 = vmatpush1.bf16.msra.mxu0 %v2563_v46  ;;  %639 = vmatprep.subr.bf16.mxu1 %v613_v52  ;;  %v2628_v46 = vld [vmem:[%s3507_s1 + $0x230] ss:$8 sps:$4 sm:$0xff]   ;;  %v3338_v52 = vcombine.low %v3234_v7, %v3234_v7 }
  0x6d   : > { %1338 = vmatprep.subr.bf16.mxu0 %v1312_v54  ;;  %v2636_v54 = vld [vmem:[%s3507_s1 + $0x244] ss:$8 sps:$4 sm:$0xff]  }
  0x6f   : > { %640 = vmatpush1.bf16.msra.mxu1 %v610_v55  ;;  %v2639_v55 = vld [vmem:[%s3507_s1 + $0x4b4] ss:$8 sps:$4 sm:$0xff]  }
  0x70   : > { %1339 = vmatpush1.bf16.msra.mxu0 %v1309_v56  ;;  %836 = vmatprep.subr.bf16.mxu1 %v2574_v50  ;;  %v1396_v56 = vshrl.u32 %v3191_v51, 16  ;;  %v2634_v50 = vld [vmem:[%s3507_s1 + $0x240] ss:$8 sps:$4 sm:$0xff]   ;;  %v2648_v51 = vld [vmem:[%s3507_s1 + $0x264] ss:$8 sps:$4 sm:$0x1f]  }
  0x71   : > { %1567 = vmatprep.subr.bf16.mxu0 %v2578_v62  ;;  %v2642_v62 = vld [vmem:[%s3507_s1 + $0x254] ss:$8 sps:$4 sm:$0xff]   ;;  %v834_v10 = vand.u32 %v2648_v51, %v2940_v47  ;;  %v1839_v51 = vld [vmem:[%s3508_s2] sm:$0x3] }
  0x72   : > { %648 = vmatmul.mubr.bf16.vlgmr.msra.gmra.mrb[0].mxu1 %v2953_v53  ;;  %v2591_v53 = vld [vmem:[%s3507_s1 + $0x434] ss:$8 sps:$4 sm:$0xff]   ;;  %v1398_v3 = vrot.slane %v1396_v56, 2 }
  0x73   : > { %1347 = vmatmul.mubr.bf16.vlgmr.msra.gmra.mrb[0].mxu0 %v1172_v1  ;;  %837 = vmatpush1.bf16.msra.mxu1 %v2572_v63  ;;  %v2645_v63 = vld [vmem:[%s3507_s1 + $0x4c4] ss:$8 sps:$4 sm:$0xff]   ;;  %v1407_v1 = vshll.u32 %v3338_v52, 16 }
  0x74   : > { %1568 = vmatpush1.bf16.msra.mxu0 %v2576_v0  ;;  %838 = vmatprep.subr.bf16.mxu1 %v2582_v19  ;;  %v1404_v0 = vshrl.u32 %v3338_v52, 16  ;;  %v2651_v19 = vld [vmem:[%s3507_s1 + $0x4d4] ss:$8 sps:$4 sm:$0x1f]  }
  0x75   : > { %1569 = vmatprep.subr.bf16.mxu0 %v2585_v2  ;;  %2114 = vmatprep.mubr.msk.bf16.mxu1 %vm421_vm4, %v3031_v57  ;;  %v2594_v57 = vld [vmem:[%s3507_s1 + $0x1d4] ss:$8 sps:$4 sm:$0xff]   ;;  %v2640_v2 = vld [vmem:[%s3507_s1 + $0x250] ss:$8 sps:$4 sm:$0xff]   ;;  %v1409_v9 = vrot.slane %v1407_v1, 3 }
  0x76   : > { %2279 = vmatprep.mubr.msk.bf16.mxu0 %vm421_vm4, %v1428_v25  ;;  %v1406_v7 = vrot.slane %v1404_v0, 2  ;;  %v2663_v25 = vld [vmem:[%s3507_s1 + $0x510] ss:$8 sps:$4 sm:$0xff]  }
  0x77   : > { %839 = vmatpush1.bf16.msra.mxu1 %v2580_v4  ;;  %v2643_v4 = vld [vmem:[%s3507_s1 + $0x4c0] ss:$8 sps:$4 sm:$0xff]  }
  0x78   : > { %1570 = vmatpush1.bf16.msra.mxu0 %v2583_v5  ;;  %840 = vmatprep.subr.bf16.mxu1 %v2588_v6  ;;  %v2646_v5 = vld [vmem:[%s3507_s1 + $0x260] ss:$8 sps:$4 sm:$0x1f]   ;;  %v1401_v6 = vrot.slane %v1399_v61, 3 }
  0x79   : > { %1571 = vmatprep.subr.bf16.mxu0 %v2591_v53  ;;  %v2649_v53 = vld [vmem:[%s3507_s1 + $0x4d0] ss:$8 sps:$4 sm:$0x1f]   ;;  %v831_v13 = vand.u32 %v2646_v5, %v2940_v47 }
  0x7a   : > { %v1562_v14 = vand.u32 %v2649_v53, %v2940_v47 }
  0x7b   : > { %841 = vmatpush1.bf16.msra.mxu1 %v2586_v11  ;;  %v1565_v11 = vand.u32 %v2651_v19, %v2940_v47 }
  0x7c   : > { %1572 = vmatpush1.bf16.msra.mxu0 %v2589_v12  ;;  %842 = vmatprep.subr.bf16.mxu1 %v2594_v57  ;;  %v2307_v12 = vcombine.high %v3372_v48, %v2931_v44  ;;  %v1402_v57 = vor.u32 %v1401_v6, %v1398_v3  ;;  %v2653_v44 = vld [vmem:[%s3507_s1 + $0x4e0] ss:$8 sps:$4 sm:$0xff]  }
  0x7d   : > { %1573 = vmatprep.subr.bf16.mxu0 %v2597_v15  ;;  %v1410_v15 = vor.u32 %v1409_v9, %v1406_v7 }
  0x7e   : > { %v1651_v17 = vrot.slane %v2307_v12, 3 }
  0x7f   : > { %843 = vmatpush1.bf16.msra.mxu1 %v2592_v20  ;;  %v1411_v20 = vsel %vm1394_vm7, %v1402_v57, %v1410_v15 }
  0x80   : > { %1574 = vmatpush1.bf16.msra.mxu0 %v2595_v21  ;;  %844 = vmatprep.subr.bf16.mxu1 %v2600_v23  ;;  %v2659_v21 = vld [vmem:[%s3507_s1 + $0x4f4] ss:$8 sps:$4 sm:$0xff]   ;;  %v1653_v22 = vsel %vm426_vm1, %v1651_v17, %v1652_v18  ;;  %v2662_v23 = vld [vmem:[%s3507_s1 + $0x504] ss:$8 sps:$4 sm:$0xff]  }
  0x81   : > { %1575 = vmatprep.subr.bf16.mxu0 %v2603_v24  ;;  %v2660_v24 = vld [vmem:[%s3507_s1 + $0x500] ss:$8 sps:$4 sm:$0xff]  }
  0x83   : > { %845 = vmatpush1.bf16.msra.mxu1 %v2598_v26  ;;  %v2668_v26 = vld [vmem:[%s3507_s1 + $0x524] ss:$8 sps:$4 sm:$0xff]  }
  0x84   : > { %1576 = vmatpush1.bf16.msra.mxu0 %v2601_v59  ;;  %846 = vmatprep.subr.bf16.mxu1 %v2606_v27  ;;  %v2666_v59 = vld [vmem:[%s3507_s1 + $0x520] ss:$8 sps:$4 sm:$0xff]   ;;  %v2671_v27 = vld [vmem:[%s3507_s1 + $0x534] ss:$8 sps:$4 sm:$0xff]  }
  0x85   : > { %1577 = vmatprep.subr.bf16.mxu0 %v2609_v28  ;;  %v2669_v28 = vld [vmem:[%s3507_s1 + $0x530] ss:$8 sps:$4 sm:$0xff]  }
  0x87   : > { %847 = vmatpush1.bf16.msra.mxu1 %v2604_v29  ;;  %v2674_v29 = vld [vmem:[%s3507_s1 + $0x544] ss:$8 sps:$4 sm:$0xff]  }
  0x88   : > { %1578 = vmatpush1.bf16.msra.mxu0 %v2607_v30  ;;  %848 = vmatprep.subr.bf16.mxu1 %v2612_v31  ;;  %v2672_v30 = vld [vmem:[%s3507_s1 + $0x540] ss:$8 sps:$4 sm:$0xff]   ;;  %v2677_v31 = vld [vmem:[%s3507_s1 + $0x554] ss:$8 sps:$4 sm:$0xff]  }
  0x89   : > { %1579 = vmatprep.subr.bf16.mxu0 %v2615_v32  ;;  %v2675_v32 = vld [vmem:[%s3507_s1 + $0x550] ss:$8 sps:$4 sm:$0xff]  }
  0x8b   : > { %849 = vmatpush1.bf16.msra.mxu1 %v2610_v33  ;;  %v2680_v33 = vld [vmem:[%s3507_s1 + $0x564] ss:$8 sps:$4 sm:$0xff]  }
  0x8c   : > { %1580 = vmatpush1.bf16.msra.mxu0 %v2613_v34  ;;  %850 = vmatprep.subr.bf16.mxu1 %v2618_v35  ;;  %v2678_v34 = vld [vmem:[%s3507_s1 + $0x560] ss:$8 sps:$4 sm:$0xff]   ;;  %v2683_v35 = vld [vmem:[%s3507_s1 + $0x574] ss:$8 sps:$4 sm:$0xff]  }
  0x8d   : > { %1581 = vmatprep.subr.bf16.mxu0 %v2621_v36  ;;  %v2681_v36 = vld [vmem:[%s3507_s1 + $0x570] ss:$8 sps:$4 sm:$0xff]  }
  0x8f   : > { %851 = vmatpush1.bf16.msra.mxu1 %v2616_v37  ;;  %v2686_v37 = vld [vmem:[%s3507_s1 + $0x584] ss:$8 sps:$4 sm:$0xff]  }
  0x90   : > { %1582 = vmatpush1.bf16.msra.mxu0 %v2619_v38  ;;  %852 = vmatprep.subr.bf16.mxu1 %v2624_v39  ;;  %v2684_v38 = vld [vmem:[%s3507_s1 + $0x580] ss:$8 sps:$4 sm:$0xff]   ;;  %v2689_v39 = vld [vmem:[%s3507_s1 + $0x594] ss:$8 sps:$4 sm:$0xff]  }
  0x91   : > { %1583 = vmatprep.subr.bf16.mxu0 %v2627_v40  ;;  %v2692_v40 = vld [vmem:[%s3507_s1 + $0x5a4] ss:$8 sps:$4 sm:$0x1f]  }
  0x93   : > { %853 = vmatpush1.bf16.msra.mxu1 %v2622_v41  ;;  %v2687_v41 = vld [vmem:[%s3507_s1 + $0x590] ss:$8 sps:$4 sm:$0xff]  }
  0x94   : > { %1584 = vmatpush1.bf16.msra.mxu0 %v2625_v42  ;;  %854 = vmatprep.subr.bf16.mxu1 %v2630_v43  ;;  %v2690_v42 = vld [vmem:[%s3507_s1 + $0x5a0] ss:$8 sps:$4 sm:$0x1f]  }
  0x95   : > { %1585 = vmatprep.subr.bf16.mxu0 %v2633_v45  ;;  %v2695_v43 = vld [vmem:[%s2915_s25 + $0x8] sm:$0xff] }
  0x96   : > { %v2306_v45 = vcombine.low %v3372_v48, %v2695_v43 }
  0x97   : > { %855 = vmatpush1.bf16.msra.mxu1 %v2628_v46  ;;  %v1790_v46 = vand.u32 %v2692_v40, %v2940_v47 }
  0x98   : > { %1586 = vmatpush1.bf16.msra.mxu0 %v2631_v49  ;;  %856 = vmatprep.subr.bf16.mxu1 %v2636_v54  ;;  %v1787_v49 = vand.u32 %v2690_v42, %v2940_v47  ;;  %v1648_v54 = vrot.slane %v2306_v45, 3 }
  0x99   : > { %1587 = vmatprep.subr.bf16.mxu0 %v2639_v55  ;;  %v1649_v55 = vrot.slane %v3338_v52, 3 }
  0x9b   : > { %857 = vmatpush1.bf16.msra.mxu1 %v2634_v50  ;;  %v1650_v56 = vsel %vm426_vm1, %v1648_v54, %v1649_v55 }
  0x9c   : > { %1588 = vmatpush1.bf16.msra.mxu0 %v2637_v58  ;;  %858 = vmatprep.subr.bf16.mxu1 %v2642_v62 }
  0x9d   : > { %1589 = vmatprep.subr.bf16.mxu0 %v2645_v63  ;;  %v1841_v63 = vlaneseq }
  0x9f   : > { %859 = vmatpush1.bf16.msra.mxu1 %v2640_v2  ;;  %v1842_v0 = vshrl.u32 %v1841_v63, 7 }
  0xa0   : > { %1590 = vmatpush1.bf16.msra.mxu0 %v2643_v4  ;;  %860 = vmatprep.subr.bf16.mxu1 %v834_v10 }
  0xa1   : > { %1591 = vmatprep.subr.bf16.mxu0 %v1565_v11  ;;  %v1843_v1 = vsub.s32 0, %v1842_v0  ;;  %v1847_v47 = vsub.s32 1, %v1842_v0 }
  0xa3   : > { %861 = vmatpush1.bf16.msra.mxu1 %v831_v13  ;;  %v1844_v19 = vrot.slane %v1839_v51, %v1843_v1  ;;  %v1848_v52 = vrot.slane %v1839_v51, %v1847_v47 }
  0xa4   : > { %1592 = vmatpush1.bf16.msra.mxu0 %v1562_v14 }
  0xa5   : > { %1792 = vmatprep.subr.bf16.mxu0 %v2655_v16  ;;  %v2737_v16 = vmov (!%p2335_p7), -inf  }
  0xa6   : > { %869 = vmatmul.mubr.bf16.vlgmr.msra.gmra.mrb[0].mxu1 %v3040_v60  ;;  %v2665_v60 = vld [vmem:[%s3507_s1 + $0x514] ss:$8 sps:$4 sm:$0xff]   ;;  %1863 = vst [vmem:[#allocation2] sm:$0xff] (!%p2335_p7), %v2737_v16  ;;  %1866 = vst [vmem:[#allocation2 + $0x10] sm:$0xff] (!%p2335_p7), %v2737_v16 }
  0xa7   : > { %1600 = vmatmul.mubr.bf16.vlgmr.msra.gmra.mrb[0].mxu0 %v1411_v20  ;;  %1865 = vst.msk [vmem:[#allocation2 + $0x8] sm:$0xff] (!%p2335_p7), %vm1864_vm8, %v2737_v16  ;;  %1867 = vst.msk [vmem:[#allocation2 + $0x18] sm:$0xff] (!%p2335_p7), %vm1864_vm8, %v2737_v16 }
  0xa8   : > { %1793 = vmatpush1.bf16.msra.mxu0 %v2653_v44  ;;  %2334 = vmatprep.mubr.msk.bf16.mxu0 %vm421_vm4, %v1653_v22 }
  0xa9   : > { %1794 = vmatprep.subr.bf16.mxu0 %v2659_v21 }
  0xac   : > { %1795 = vmatpush1.bf16.msra.mxu0 %v2657_v8 }
  0xad   : > { %1796 = vmatprep.subr.bf16.mxu0 %v2662_v23 }
  0xb0   : > { %1797 = vmatpush1.bf16.msra.mxu0 %v2660_v24 }
  0xb1   : > { %1798 = vmatprep.subr.bf16.mxu0 %v2665_v60 }
  0xb4   : > { %1799 = vmatpush1.bf16.msra.mxu0 %v2663_v25 }
  0xb5   : > { %1800 = vmatprep.subr.bf16.mxu0 %v2668_v26 }
  0xb8   : > { %1801 = vmatpush1.bf16.msra.mxu0 %v2666_v59 }
  0xb9   : > { %1802 = vmatprep.subr.bf16.mxu0 %v2671_v27 }
  0xbc   : > { %1803 = vmatpush1.bf16.msra.mxu0 %v2669_v28 }
  0xbd   : > { %1804 = vmatprep.subr.bf16.mxu0 %v2674_v29 }
  0xc0   : > { %1805 = vmatpush1.bf16.msra.mxu0 %v2672_v30 }
  0xc1   : > { %1806 = vmatprep.subr.bf16.mxu0 %v2677_v31 }
  0xc4   : > { %1807 = vmatpush1.bf16.msra.mxu0 %v2675_v32 }
  0xc5   : > { %1808 = vmatprep.subr.bf16.mxu0 %v2680_v33 }
  0xc8   : > { %1809 = vmatpush1.bf16.msra.mxu0 %v2678_v34 }
  0xc9   : > { %1810 = vmatprep.subr.bf16.mxu0 %v2683_v35 }
  0xcc   : > { %1811 = vmatpush1.bf16.msra.mxu0 %v2681_v36 }
  0xcd   : > { %1812 = vmatprep.subr.bf16.mxu0 %v2686_v37 }
  0xd0   : > { %1813 = vmatpush1.bf16.msra.mxu0 %v2684_v38 }
  0xd1   : > { %1814 = vmatprep.subr.bf16.mxu0 %v2689_v39 }
  0xd4   : > { %1815 = vmatpush1.bf16.msra.mxu0 %v2687_v41 }
  0xd5   : > { %1816 = vmatprep.subr.bf16.mxu0 %v1790_v46 }
  0xd8   : > { %1817 = vmatpush1.bf16.msra.mxu0 %v1787_v49 }
  0xdb   : > { %1825 = vmatmul.mubr.bf16.vlgmr.msra.gmra.mrb[0].mxu0 %v1650_v56 }
 0x179   : > { %v870_v50 = vpop.f32.mrb[0].mxu1 }
 0x17a   : > { %v872_v58 = vpop.f32.mrb[1].mxu1 }
 0x17b   : > { %v874_v61 = vpop.f32.mrb[2].mxu1 }
 0x17c   : > { %v876_v62 = vpop.f32.mrb[3].mxu1 }
 0x1ae   : > { %v1826_v2 = vpop.f32.mrb[0].mxu0 }
 0x1af   : > { %v2340_v3 = vadd.f32 %v1826_v2, %v870_v50  ;;  %v1828_v48 = vpop.f32.mrb[1].mxu0 }
 0x1b0   : > { %v2341_v4 = vadd.f32 %v1828_v48, %v872_v58  ;;  %v1830_v5 = vpop.f32.mrb[2].mxu0  ;;  %1862 = sbr.rel (%p2335_p7) target bundleno = 439 (0x1b7), region = 36 }
 0x1b1   : > { %v1851_v6 = vadd.f32 %v2340_v3, %v1844_v19  ;;  %v2342_v53 = vadd.f32 %v1830_v5, %v874_v61  ;;  %v1832_v7 = vpop.f32.mrb[3].mxu0 }
 0x1b2   : > { %v1852_v9 = vadd.f32 %v2341_v4, %v1848_v52  ;;  %v2343_v10 = vadd.f32 %v1832_v7, %v876_v62 }
 0x1b3   : > { %v1855_v11 = vmax.f32 %v1851_v6, 0.0  ;;  %v1853_v12 = vadd.f32 %v2342_v53, %v1844_v19 }
 0x1b4   : > { %v1856_v57 = vmax.f32 %v1852_v9, 0.0  ;;  %v1854_v13 = vadd.f32 %v2343_v10, %v1848_v52 }
 0x1b5   : > { %v1857_v14 = vmax.f32 %v1853_v12, 0.0 }
 0x1b6   : > { %v1858_v15 = vmax.f32 %v1854_v13, 0.0 }
 0x1b7 PF: > { %v1868_v17 = vld [vmem:[#allocation2] sm:$0xff]  ;;  %v1869_v18 = vld [vmem:[#allocation2 + $0x8] sm:$0xff]  ;;  %vm1877_vm9 = vcmask 621568   ;;  %v1870_v44 = vld [vmem:[#allocation2 + $0x10] sm:$0xff]  ;;  %p2336_p8 = scmp.ne.s32.totalorder %s2718_s12, 29 }
 0x1b8   : > { %v1872_v20 = vmax.f32 %v1868_v17, %v1855_v11  ;;  %v1873_v21 = vmax.f32 %v1869_v18, %v1856_v57  ;;  %v1874_v22 = vmax.f32 %v1870_v44, %v1857_v14  ;;  %v1871_v8 = vld [vmem:[#allocation2 + $0x18] sm:$0xff] }
 0x1b9   : > { %v1875_v23 = vmax.f32 %v1871_v8, %v1858_v15  ;;  %1884 = sbr.rel (%p2336_p8) target bundleno = 452 (0x1c4), region = 40 }
 0x1ba   : > { %1876 = vst [vmem:[#allocation2] sm:$0xff] %v1872_v20  ;;  %1878 = vst.msk [vmem:[#allocation2 + $0x8] sm:$0xff] %vm1877_vm9, %v1873_v21 }
 0x1bb   : > { %1879 = vst [vmem:[#allocation2 + $0x10] sm:$0xff] %v1874_v22  ;;  %1880 = vst.msk [vmem:[#allocation2 + $0x18] sm:$0xff] %vm1877_vm9, %v1875_v23 }
 0x1c1   : > { %v1885_v24 = vld [vmem:[#allocation2] sm:$0xff]  ;;  %v1886_v60 = vld [vmem:[#allocation2 + $0x8] sm:$0xff] }
 0x1c2   : > { %v1887_v25 = vld [vmem:[#allocation2 + $0x10] sm:$0xff]  ;;  %1889 = vst [vmem:[%s2832_s26] sm:$0xff] %v1885_v24  ;;  %1890 = vst.msk [vmem:[%s2832_s26 + $0x8] sm:$0xff] %vm1877_vm9, %v1886_v60  ;;  %v1888_v26 = vld [vmem:[#allocation2 + $0x18] sm:$0xff] }
 0x1c3   : > { %1891 = vst [vmem:[%s2832_s26 + $0x10] sm:$0xff] %v1887_v25  ;;  %1892 = vst.msk [vmem:[%s2832_s26 + $0x18] sm:$0xff] %vm1877_vm9, %v1888_v26 }
 0x1c4 PF: > { %s13_s16 = sadd.s32 1, %s2734_s16   ;;  %s3510_s12 = smov %s2726_s14 }
 0x1c5   : > { %p10_p9 = scmp.ge.s32.totalorder %s13_s16, 62   ;;  %s3511_s13 = smov %s2730_s15 }
 0x1c6   : > { %s3512_s14 = smov %s3515_s17  ;;  %s3513_s15 = smov %s3519_s18 }
 0x1c7   :  { %12 = sbr.rel (!%p10_p9) target bundleno = 3 (0x3), region = 76 }

// kernel: musicnn_forward.13
= control target key start
LH: loop header
LB: loop body
LE: loop exit
PB: predicated region body
PF: predicated region fallthrough
CT: control target
= control target key end

     0   :  { %s1401_s21 = smov 0   ;;  %s1605_s0 = inlined_call_operand.vmem [shape: bf16[2,22,64], index: 0, kind: input, shape index: {}]   ;;  %s1606_s1 = inlined_call_operand.vmem [shape: bf16[7,64,64], index: 1, kind: input, shape index: {}]   ;;  %s1607_s2 = inlined_call_operand.vmem [shape: f32[1,64], index: 2, kind: input, shape index: {}]   ;;  %s1608_s3 = inlined_call_operand.vmem [shape: f32[2,16,64], index: 3, kind: input, shape index: {}]   ;;  %s1609_s4 = inlined_call_operand.vmem [shape: f32[2,16,64], index: 4, kind: output, shape index: {0}]   ;;  %s1610_s5 = inlined_call_operand.vmem [shape: f32[2,1,64], index: 5, kind: output, shape index: {1}]   ;;  %s1611_s6 = inlined_call_operand.vmem [shape: f32[2,1,64], index: 6, kind: output, shape index: {2}]  }
   0x1 LB: > { %s1086_s22 = sadd.s32 4294967295, %s1362_s21   ;;  %p1090_p0 = scmp.ge.s32.totalorder %s1362_s21, 1  ;;  %s1362_s21 = sphi %s1401_s21, %s17_s21  }
   0x2   : > { %p227_p1 = scmp.lt.s32.totalorder %s1362_s21, 3 }
   0x4   : > { %p228_p2 = pnand %p1090_p0, %p227_p1 }
   0x5   : > { %v1321_v0 = vld [vmem:[%s1606_s1 + $0x20] sm:$0xff] (!%p228_p2)   ;;  %v1364_v1 = vmov (!%p228_p2), 0.0   ;;  %v1323_v3 = vld [vmem:[%s1606_s1 + $0x28] sm:$0xff] (!%p228_p2)   ;;  %vm1365_vm0 = vmmov (!%p228_p2), 0   ;;  %p268_p3 = scmp.lt.s32.totalorder (!%p228_p2), %s1086_s22, 1  ;;  %v1325_v5 = vld [vmem:[%s1606_s1 + $0x30] sm:$0xff] (!%p228_p2)  }
   0x6   : > { %231 = sbr.rel (%p228_p2) target bundleno = 315 (0x13b), region = 36  ;;  %1226 = vmatprep.subr.bf16.mxu0 (!%p228_p2), %v1364_v1  ;;  %1238 = vmatprep.subr.bf16.mxu1 (!%p228_p2), %v1364_v1  ;;  %v1322_v2 = vld [vmem:[%s1606_s1] sm:$0xff] (!%p228_p2)   ;;  %v1324_v4 = vld [vmem:[%s1606_s1 + $0x8] sm:$0xff] (!%p228_p2)   ;;  %v1326_v6 = vld [vmem:[%s1606_s1 + $0x10] sm:$0xff] (!%p228_p2)   ;;  %vm318_vm1 = vsmask.f32 (!%p228_p2), 7424 }
   0x7   : > { %1227 = vmatpush3.bf16.msra.mxu0 (!%p228_p2), %v1321_v0  ;;  %1234 = vmatprep.mubr.msk.bf16.mxu0 (!%p228_p2), %vm1365_vm0, %v1364_v1  ;;  %v1327_v9 = vld [vmem:[%s1606_s1 + $0x38] sm:$0xff] (!%p228_p2)   ;;  %vm355_vm2 = vcmask (!%p228_p2), 523264   ;;  %v1332_v18 = vld [vmem:[%s1606_s1 + $0x60] sm:$0xff] (!%p228_p2)   ;;  %v1334_v23 = vld [vmem:[%s1606_s1 + $0x68] sm:$0xff] (!%p228_p2)   ;;  %vm567_vm3 = vsmask.f32 (!%p228_p2), 6400 }
   0x8   : > { %1239 = vmatpush3.bf16.msra.mxu1 (!%p228_p2), %v1322_v2  ;;  %1228 = vmatprep.subr.bf16.mxu0 (!%p228_p2), %v1364_v1  ;;  %v1328_v12 = vld [vmem:[%s1606_s1 + $0x18] sm:$0xff] (!%p228_p2)   ;;  %v1331_v20 = vld [vmem:[%s1606_s1 + $0x40] sm:$0xff] (!%p228_p2)   ;;  %v1333_v25 = vld [vmem:[%s1606_s1 + $0x48] sm:$0xff] (!%p228_p2)   ;;  %vm480_vm4 = vcmask (!%p228_p2), 1046528   ;;  %vm755_vm5 = vsmask.f32 (!%p228_p2), 5376 }
   0x9   : > { %1240 = vmatprep.subr.bf16.mxu1 (!%p228_p2), %v1364_v1  ;;  %1246 = vmatprep.mubr.msk.bf16.mxu1 (!%p228_p2), %vm1365_vm0, %v1364_v1  ;;  %v1336_v27 = vld [vmem:[%s1606_s1 + $0x70] sm:$0xff] (!%p228_p2)   ;;  %v1338_v37 = vld [vmem:[%s1606_s1 + $0x78] sm:$0xff] (!%p228_p2)   ;;  %v1342_v45 = vld [vmem:[%s1606_s1 + $0xa0] sm:$0xff] (!%p228_p2)   ;;  %vm668_vm6 = vcmask (!%p228_p2), 1045504   ;;  %vm856_vm7 = vcmask (!%p228_p2), 1044480   ;;  %vm956_vm8 = vcmask (!%p228_p2), 516096  }
   0xa   : > { %v1335_v34 = vld [vmem:[%s1606_s1 + $0x50] sm:$0xff] (!%p228_p2)   ;;  %v1337_v41 = vld [vmem:[%s1606_s1 + $0x58] sm:$0xff] (!%p228_p2)   ;;  %v1340_v49 = vld [vmem:[%s1606_s1 + $0x80] sm:$0xff] (!%p228_p2)  }
   0xb   : > { %1229 = vmatpush3.bf16.msra.mxu0 (!%p228_p2), %v1323_v3  ;;  %v1344_v50 = vld [vmem:[%s1606_s1 + $0xa8] sm:$0xff] (!%p228_p2)   ;;  %v1346_v56 = vld [vmem:[%s1606_s1 + $0xb0] sm:$0xff] (!%p228_p2)   ;;  %v1348_v62 = vld [vmem:[%s1606_s1 + $0xb8] sm:$0xff] (!%p228_p2)  }
   0xc   : > { %1241 = vmatpush3.bf16.msra.mxu1 (!%p228_p2), %v1324_v4  ;;  %1230 = vmatprep.subr.bf16.mxu0 (!%p228_p2), %v1364_v1  ;;  %v1343_v55 = vld [vmem:[%s1606_s1 + $0x88] sm:$0xff] (!%p228_p2)   ;;  %v1345_v61 = vld [vmem:[%s1606_s1 + $0x90] sm:$0xff] (!%p228_p2)   ;;  %v1347_v2 = vld [vmem:[%s1606_s1 + $0x98] sm:$0xff] (!%p228_p2)  }
   0xd   : > { %s1613_s22 = smov (!%p268_p3, %s1086_s22), 1  ;;  %1242 = vmatprep.subr.bf16.mxu1 %v1364_v1 }
   0xe   : > { %s1310_s9 = smul.u32 12, %s1613_s22  ;;  %s285_s29 = scalar_lea.vmem %s1610_s5, %s1613_s22 }
   0xf   : > { %1231 = vmatpush3.bf16.msra.mxu0 %v1325_v5  ;;  %s288_s8 = scalar_lea.vmem %s1611_s6, %s1613_s22 }
  0x10   : > { %s1443_s14 = scalar_lea.vmem %s1605_s0, %s1310_s9  ;;  %1243 = vmatpush3.bf16.msra.mxu1 %v1326_v6  ;;  %1232 = vmatprep.subr.bf16.mxu0 %v1364_v1 }
  0x11   : > { %v290_v7 = vld [vmem:[%s1443_s14] sm:$0xf]  ;;  %v1447_v8 = vld [vmem:[%s1443_s14 + $0x4] sm:$0xf]  ;;  %1244 = vmatprep.subr.bf16.mxu1 %v1364_v1 }
  0x12   : > { %v1104_v10 = vcombine.low %v290_v7, %v1447_v8  ;;  %v1454_v11 = vld [vmem:[%s1443_s14 + $0x8] ss:$0 sps:$4 sm:$0x11]   ;;  %v467_v22 = vld [vmem:[%s1443_s14] sm:$0xe] }
  0x13   : > { %v327_v15 = vshll.u32 %v1454_v11, 16  ;;  %1233 = vmatpush3.bf16.msra.mxu0 %v1327_v9  ;;  %v1124_v24 = vcombine.low %v467_v22, %v1447_v8  ;;  %v1482_v26 = vld [vmem:[%s1443_s14 + $0x8] ss:$0 sps:$4 sm:$0x33]   ;;  %v482_v38 = vrot.slane %v1454_v11, 1  ;;  %v1350_v7 = vld [vmem:[%s1606_s1 + $0xc0] sm:$0xff]  }
  0x14   : > { %v320_v13 = vshrl.u32 %v1104_v10, 16  ;;  %v322_v14 = vshll.u32 %v1104_v10, 16  ;;  %1245 = vmatpush3.bf16.msra.mxu1 %v1328_v12  ;;  %1250 = vmatprep.subr.bf16.mxu0 %v1364_v1  ;;  %v577_v30 = vshrl.u32 %v1482_v26, 16  ;;  %v580_v31 = vshll.u32 %v1482_v26, 16  ;;  %v655_v43 = vld [vmem:[%s1443_s14] sm:$0xc] }
  0x15   : > { %v329_v17 = vrot.slane %v327_v15, 1  ;;  %1262 = vmatprep.subr.bf16.mxu1 %v1364_v1  ;;  %v569_v28 = vshrl.u32 %v1124_v24, 16  ;;  %v572_v29 = vshll.u32 %v1124_v24, 16  ;;  %v481_v42 = vrot.slane %v1124_v24, 1  ;;  %v1352_v9 = vld [vmem:[%s1606_s1 + $0xc8] sm:$0xff]   ;;  %v1353_v11 = vld [vmem:[%s1606_s1 + $0xd0] sm:$0xff]  }
  0x16   : > { %v324_v16 = vrot.slane %v322_v14, 1  ;;  %v579_v35 = vrot.slane %v577_v30, 1  ;;  %v582_v36 = vrot.slane %v580_v31, 2  ;;  %v1152_v46 = vcombine.low %v655_v43, %v1447_v8  ;;  %v1514_v47 = vld [vmem:[%s1443_s14 + $0x8] ss:$0 sps:$4 sm:$0x77]  }
  0x17   : > { %1247 = vmatmul.mubr.msk.bf16.vlgmr.msra.gmra.mrb[0].mxu1 %vm355_vm2, %v1104_v10  ;;  %v571_v32 = vrot.slane %v569_v28, 1  ;;  %v574_v33 = vrot.slane %v572_v29, 2  ;;  %v483_v48 = vsel %vm480_vm4, %v481_v42, %v482_v38  ;;  %v765_v53 = vshrl.u32 %v1514_v47, 16  ;;  %v843_v10 = vld [vmem:[%s1443_s14] sm:$0x8]  ;;  %s1189_s14 = sshll.u32 %s1613_s22, 4 }
  0x18   : > { %v325_v19 = vor.u32 %v324_v16, %v320_v13  ;;  %1263 = vmatpush3.bf16.msra.mxu1 %v1332_v18  ;;  %1270 = vmatprep.mubr.msk.bf16.mxu1 %vm1365_vm0, %v1364_v1  ;;  %v583_v40 = vor.u32 %v582_v36, %v579_v35  ;;  %v757_v51 = vshrl.u32 %v1152_v46, 16  ;;  %v760_v52 = vshll.u32 %v1152_v46, 16  ;;  %v1354_v13 = vld [vmem:[%s1606_s1 + $0xd8] sm:$0xff]   ;;  %s277_s23 = scalar_lea.vmem %s1608_s3, %s1189_s14  ;;  %s282_s26 = scalar_lea.vmem %s1609_s4, %s1189_s14 }
  0x19   : > { %1264 = vmatprep.subr.bf16.mxu1 %v1364_v1  ;;  %v575_v39 = vor.u32 %v574_v33, %v571_v32  ;;  %v768_v54 = vshll.u32 %v1514_v47, 16  ;;  %v767_v59 = vrot.slane %v765_v53, 2  ;;  %v669_v3 = vrot.slane %v1152_v46, 2 }
  0x1a   : > { %v330_v21 = vsel %vm318_vm1, %v325_v19, %v329_v17  ;;  %v759_v57 = vrot.slane %v757_v51, 2  ;;  %v762_v58 = vrot.slane %v760_v52, 3  ;;  %v670_v4 = vrot.slane %v1482_v26, 2 }
  0x1b   : > { %1235 = vmatmul.mubr.msk.bf16.vlgmr.msra.gmra.mrb[0].mxu0 %vm355_vm2, %v330_v21  ;;  %v584_v44 = vsel %vm567_vm3, %v575_v39, %v583_v40  ;;  %v770_v60 = vrot.slane %v768_v54, 3  ;;  %v1180_v12 = vcombine.low %v843_v10, %v1447_v8  ;;  %v858_v15 = vrot.slane %v1514_v47, 3 }
  0x1c   : > { %1251 = vmatpush3.bf16.msra.mxu0 %v1331_v20  ;;  %1258 = vmatprep.mubr.msk.bf16.mxu0 %vm1365_vm0, %v1364_v1  ;;  %v763_v63 = vor.u32 %v762_v58, %v759_v57  ;;  %v671_v6 = vsel %vm668_vm6, %v669_v3, %v670_v4  ;;  %v941_v57 = vld [vmem:[%s277_s23] sm:$0xff] }
  0x1d   : > { %1252 = vmatprep.subr.bf16.mxu0 %v1364_v1  ;;  %1265 = vmatpush3.bf16.msra.mxu1 %v1334_v23  ;;  %v771_v0 = vor.u32 %v770_v60, %v767_v59  ;;  %v857_v14 = vrot.slane %v1180_v12, 3  ;;  %v942_v60 = vld [vmem:[%s277_s23 + $0x8] sm:$0xff] }
  0x1e   : > { %1266 = vmatprep.subr.bf16.mxu1 %v1364_v1 }
  0x1f   : > { %v772_v5 = vsel %vm755_vm5, %v763_v63, %v771_v0  ;;  %v859_v16 = vsel %vm856_vm7, %v857_v14, %v858_v15 }
  0x20   : > { %1253 = vmatpush3.bf16.msra.mxu0 %v1333_v25 }
  0x21   : > { %1254 = vmatprep.subr.bf16.mxu0 %v1364_v1  ;;  %1267 = vmatpush3.bf16.msra.mxu1 %v1336_v27 }
  0x22   : > { %1268 = vmatprep.subr.bf16.mxu1 %v1364_v1 }
  0x24   : > { %1255 = vmatpush3.bf16.msra.mxu0 %v1335_v34 }
  0x25   : > { %1256 = vmatprep.subr.bf16.mxu0 %v1364_v1  ;;  %1269 = vmatpush3.bf16.msra.mxu1 %v1338_v37 }
  0x26   : > { %1286 = vmatprep.subr.bf16.mxu1 %v1364_v1 }
  0x28   : > { %1257 = vmatpush3.bf16.msra.mxu0 %v1337_v41  ;;  %1271 = vmatmul.mubr.msk.bf16.vlgmr.msra.gmra.mrb[4].mxu1 %vm355_vm2, %v584_v44 }
  0x29   : > { %1274 = vmatprep.subr.bf16.mxu0 %v1364_v1  ;;  %1287 = vmatpush3.bf16.msra.mxu1 %v1342_v45 }
  0x2a   : > { %1288 = vmatprep.subr.bf16.mxu1 %v1364_v1  ;;  %1294 = vmatprep.mubr.msk.bf16.mxu1 %vm1365_vm0, %v1364_v1 }
  0x2b   : > { %1259 = vmatmul.mubr.msk.bf16.vlgmr.msra.gmra.mrb[4].mxu0 %vm355_vm2, %v483_v48 }
  0x2c   : > { %1275 = vmatpush3.bf16.msra.mxu0 %v1340_v49  ;;  %1282 = vmatprep.mubr.msk.bf16.mxu0 %vm1365_vm0, %v1364_v1 }
  0x2d   : > { %1276 = vmatprep.subr.bf16.mxu0 %v1364_v1  ;;  %1289 = vmatpush3.bf16.msra.mxu1 %v1344_v50  ;;  %v1186_v50 = vld [vmem:[%s1607_s2] ss:$0 sm:$0xff] }
  0x2e   : > { %1290 = vmatprep.subr.bf16.mxu1 %v1364_v1 }
  0x30   : > { %1277 = vmatpush3.bf16.msra.mxu0 %v1343_v55 }
  0x31   : > { %1278 = vmatprep.subr.bf16.mxu0 %v1364_v1  ;;  %1291 = vmatpush3.bf16.msra.mxu1 %v1346_v56 }
  0x32   : > { %1292 = vmatprep.subr.bf16.mxu1 %v1364_v1 }
  0x34   : > { %1279 = vmatpush3.bf16.msra.mxu0 %v1345_v61 }
  0x35   : > { %1280 = vmatprep.subr.bf16.mxu0 %v1364_v1  ;;  %1293 = vmatpush3.bf16.msra.mxu1 %v1348_v62 }
  0x38   : > { %1281 = vmatpush3.bf16.msra.mxu0 %v1347_v2  ;;  %1295 = vmatmul.mubr.msk.bf16.vlgmr.msra.gmra.mrb[8].mxu1 %vm355_vm2, %v772_v5 }
  0x39   : > { %1298 = vmatprep.subr.bf16.mxu0 %v1364_v1 }
  0x3b   : > { %1283 = vmatmul.mubr.msk.bf16.vlgmr.msra.gmra.mrb[8].mxu0 %vm355_vm2, %v671_v6 }
  0x3c   : > { %1299 = vmatpush3.bf16.msra.mxu0 %v1350_v7  ;;  %1306 = vmatprep.mubr.msk.bf16.mxu0 %vm1365_vm0, %v1364_v1 }
  0x3d   : > { %1300 = vmatprep.subr.bf16.mxu0 %v1364_v1 }
  0x40   : > { %1301 = vmatpush3.bf16.msra.mxu0 %v1352_v9 }
  0x41   : > { %1302 = vmatprep.subr.bf16.mxu0 %v1364_v1 }
  0x44   : > { %1303 = vmatpush3.bf16.msra.mxu0 %v1353_v11 }
  0x45   : > { %1304 = vmatprep.subr.bf16.mxu0 %v1364_v1 }
  0x48   : > { %1305 = vmatpush3.bf16.msra.mxu0 %v1354_v13 }
  0x4b   : > { %1307 = vmatmul.mubr.msk.bf16.vlgmr.msra.gmra.mrb[12].mxu0 %vm355_vm2, %v859_v16 }
  0xea   : > { %v460_v17 = vpop.f32.mrb[0].mxu1 }
  0xeb   : > { %v1248_v8 = vpop.f32.mrb[1].mxu1 }
  0xec   : > { %v463_v21 = vpop.f32.mrb[2].mxu1 }
  0xed   : > { %v1249_v23 = vpop.f32.mrb[3].mxu1 }
  0xee   : > { %v393_v18 = vpop.f32.mrb[0].mxu0 }
  0xef   : > { %v461_v19 = vadd.f32 %v460_v17, %v393_v18  ;;  %v1236_v20 = vpop.f32.mrb[1].mxu0 }
  0xf0   : > { %v396_v22 = vpop.f32.mrb[2].mxu0 }
  0xf1   : > { %v464_v24 = vadd.f32 %v463_v21, %v396_v22  ;;  %v1237_v25 = vpop.f32.mrb[3].mxu0 }
  0xfb   : > { %v646_v26 = vpop.f32.mrb[4].mxu1 }
  0xfc   : > { %v1272_v28 = vpop.f32.mrb[5].mxu1 }
  0xfd   : > { %v649_v30 = vpop.f32.mrb[6].mxu1 }
  0xfe   : > { %v545_v27 = vpop.f32.mrb[4].mxu0  ;;  %v1273_v32 = vpop.f32.mrb[7].mxu1 }
  0xff   : > { %v552_v29 = vadd.f32 %v545_v27, %v461_v19  ;;  %v1260_v1 = vpop.f32.mrb[5].mxu0 }
 0x100   : > { %v548_v31 = vpop.f32.mrb[6].mxu0 }
 0x101   : > { %v553_v33 = vadd.f32 %v548_v31, %v464_v24  ;;  %v653_v34 = vadd.f32 %v646_v26, %v552_v29  ;;  %v1261_v35 = vpop.f32.mrb[7].mxu0 }
 0x103   : > { %v654_v36 = vadd.f32 %v649_v30, %v553_v33 }
 0x10b   : > { %v834_v37 = vpop.f32.mrb[8].mxu1 }
 0x10c   : > { %v1296_v39 = vpop.f32.mrb[9].mxu1 }
 0x10d   : > { %v837_v42 = vpop.f32.mrb[10].mxu1 }
 0x10e   : > { %v733_v38 = vpop.f32.mrb[8].mxu0  ;;  %v1297_v44 = vpop.f32.mrb[11].mxu1 }
 0x10f   : > { %v740_v40 = vadd.f32 %v733_v38, %v653_v34  ;;  %v1284_v41 = vpop.f32.mrb[9].mxu0 }
 0x110   : > { %v736_v43 = vpop.f32.mrb[10].mxu0 }
 0x111   : > { %v741_v45 = vadd.f32 %v736_v43, %v654_v36  ;;  %v841_v46 = vadd.f32 %v834_v37, %v740_v40  ;;  %v1285_v47 = vpop.f32.mrb[11].mxu0 }
 0x113   : > { %v842_v48 = vadd.f32 %v837_v42, %v741_v45 }
 0x11e   : > { %v921_v49 = vpop.f32.mrb[12].mxu0 }
 0x11f   : > { %v928_v51 = vadd.f32 %v921_v49, %v841_v46  ;;  %v1308_v52 = vpop.f32.mrb[13].mxu0 }
 0x120   : > { %v924_v53 = vpop.f32.mrb[14].mxu0 }
 0x121   : > { %v937_v54 = vadd.f32 %v1186_v50, %v928_v51  ;;  %v929_v55 = vadd.f32 %v924_v53, %v842_v48  ;;  %v1309_v56 = vpop.f32.mrb[15].mxu0 }
 0x123   : > { %v939_v58 = vmax.f32 %v937_v54, 0.0  ;;  %v938_v59 = vadd.f32 %v1186_v50, %v929_v55 }
 0x125   : > { %v943_v61 = vadd.f32 %v941_v57, %v939_v58  ;;  %v940_v62 = vmax.f32 %v938_v59, 0.0 }
 0x127   : > { %945 = vst.msk [vmem:[%s282_s26] sm:$0xff] %vm355_vm2, %v943_v61  ;;  %v944_v63 = vadd.f32 %v942_v60, %v940_v62  ;;  %v947_v0 = vsel %vm355_vm2, %v943_v61, -inf  ;;  %v958_v2 = vsel %vm355_vm2, %v943_v61, 0.0 }
 0x129   : > { %946 = vst.msk [vmem:[%s282_s26 + $0x8] sm:$0xff] %vm355_vm2, %v944_v63  ;;  %v948_v3 = vsel %vm355_vm2, %v944_v63, -inf  ;;  %v959_v4 = vsel %vm355_vm2, %v944_v63, 0.0 }
 0x12a   : > { %v949_v5 = vmax.f32 %v947_v0, %v948_v3  ;;  %v960_v6 = vadd.f32 %v959_v4, %v958_v2 }
 0x12c   : > { %v950_v7 = vrot.slane %v949_v5, 4  ;;  %v961_v9 = vrot.slane %v960_v6, 4 }
 0x12e   : > { %v951_v10 = vmax.f32 %v949_v5, %v950_v7  ;;  %v962_v11 = vadd.f32 %v961_v9, %v960_v6 }
 0x130   : > { %v952_v12 = vrot.slane %v951_v10, 2  ;;  %v963_v13 = vrot.slane %v962_v11, 2 }
 0x132   : > { %v953_v14 = vmax.f32 %v951_v10, %v952_v12  ;;  %v964_v15 = vadd.f32 %v963_v13, %v962_v11 }
 0x134   : > { %v954_v16 = vrot.slane %v953_v14, 1  ;;  %v965_v17 = vrot.slane %v964_v15, 1 }
 0x136   : > { %v955_v18 = vmax.f32 %v953_v14, %v954_v16  ;;  %v966_v8 = vadd.f32 %v965_v17, %v964_v15 }
 0x138   : > { %957 = vst.msk [vmem:[%s285_s29] sm:$0x1] %vm956_vm8, %v955_v18  ;;  %v967_v19 = vmul.f32 0.0625, %v966_v8 }
 0x13a   : > { %968 = vst.msk [vmem:[%s288_s8] sm:$0x1] %vm956_vm8, %v967_v19 }
 0x13b PF: > { %s17_s21 = sadd.s32 1, %s1362_s21  }
 0x13c   : > { %p14_p4 = scmp.ge.s32.totalorder %s17_s21, 4  }
 0x13e   :  { %16 = sbr.rel (!%p14_p4) target bundleno = 1 (0x1), region = 99 }

// kernel: musicnn_forward.14
= control target key start
LH: loop header
LB: loop body
LE: loop exit
PB: predicated region body
PF: predicated region fallthrough
CT: control target
= control target key end

     0   :  { %12 = vsyncpa [#allocation3], 0  ;;  %s1807_s0 = inlined_call_operand.vmem [shape: bf16[2,22,64], index: 0, kind: input, shape index: {}]   ;;  %s1808_s1 = inlined_call_operand.vmem [shape: bf16[7,64,64], index: 1, kind: input, shape index: {}]   ;;  %s1809_s2 = inlined_call_operand.vmem [shape: f32[1,64], index: 2, kind: input, shape index: {}]   ;;  %s1810_s3 = inlined_call_operand.vmem [shape: f32[2,16,64], index: 3, kind: input, shape index: {}]   ;;  %s1811_s4 = inlined_call_operand.hbm [shape: f32[2,16,64], index: 4, kind: output, shape index: {0}]   ;;  %s1812_s5 = inlined_call_operand.vmem [shape: f32[2,1,64], index: 5, kind: output, shape index: {1}]   ;;  %s1813_s6 = inlined_call_operand.vmem [shape: f32[2,1,64], index: 6, kind: output, shape index: {2}]  }
   0x1   :  { %14 = vsyncpa [#allocation3 + $0x1], 0  ;;  %s1513_s21 = smov 0   ;;  %s1515_s22 = smov 0  }
   0x2   :  { %s1517_s23 = smov 0   ;;  %s1519_s24 = smov 0  }
   0x3 LB: > { %s1534_s25 = sadd.s32 4294967295, %s1471_s24   ;;  %s1105_s26 = sadd.s32 4294967294, %s1471_s24   ;;  %s1471_s24 = sphi %s1519_s24, %s1819_s24   ;;  %s1467_s23 = sphi %s1517_s23, %s1818_s23   ;;  %s1463_s22 = sphi %s1515_s22, %s1817_s22   ;;  %s1459_s21 = sphi %s1513_s21, %s1816_s21  }
   0x4   : > { %s1538_s27 = sadd.s32 1, %s1471_s24   ;;  %s121_s28 = sadd.s32 1, %s1467_s23 }
   0x5   : > { %s118_s29 = ssub.s32 %s1471_s24, %s1538_s27  ;;  %p131_p0 = scmp.ne.s32.totalorder %s1467_s23, %s1463_s22 }
   0x6   : > { %p119_p1 = scmp.eq.s32.totalorder %s118_s29, 0  ;;  %p132_p2 = scmp.eq.s32.totalorder %s1534_s25, 1 }
   0x7   : > { %p137_p3 = scmp.ne.s32.totalorder %s1463_s22, %s1459_s21  ;;  %p138_p4 = scmp.eq.s32.totalorder %s1105_s26, 1 }
   0x8   : > { %s1549_s30 = scalar_select %p119_p1, %s1467_s23, %s121_s28  }
   0x9   : > { %p1551_p5 = por %p132_p2, %p131_p0  ;;  %p1555_p6 = por %p138_p4, %p137_p3 }
   0xa   : > { %p1108_p7 = scmp.ge.s32.totalorder %s1471_s24, 1  ;;  %p230_p8 = scmp.lt.s32.totalorder %s1471_s24, 3 }
   0xc   : > { %p231_p9 = pnand %p1108_p7, %p230_p8 }
   0xd   : > { %v1374_v0 = vld [vmem:[%s1808_s1 + $0x20] sm:$0xff] (!%p231_p9)   ;;  %v1473_v1 = vmov (!%p231_p9), 0.0   ;;  %v1376_v3 = vld [vmem:[%s1808_s1 + $0x28] sm:$0xff] (!%p231_p9)   ;;  %vm1474_vm0 = vmmov (!%p231_p9), 0   ;;  %p271_p10 = scmp.lt.s32.totalorder (!%p231_p9), %s1534_s25, 1  ;;  %v1378_v5 = vld [vmem:[%s1808_s1 + $0x30] sm:$0xff] (!%p231_p9)  }
   0xe   : > { %234 = sbr.rel (%p231_p9) target bundleno = 335 (0x14f), region = 36  ;;  %1246 = vmatprep.subr.bf16.mxu0 (!%p231_p9), %v1473_v1  ;;  %1258 = vmatprep.subr.bf16.mxu1 (!%p231_p9), %v1473_v1  ;;  %v1375_v2 = vld [vmem:[%s1808_s1] sm:$0xff] (!%p231_p9)   ;;  %v1377_v4 = vld [vmem:[%s1808_s1 + $0x8] sm:$0xff] (!%p231_p9)   ;;  %v1379_v6 = vld [vmem:[%s1808_s1 + $0x10] sm:$0xff] (!%p231_p9)   ;;  %vm316_vm1 = vsmask.f32 (!%p231_p9), 7424 }
   0xf   : > { %1247 = vmatpush3.bf16.msra.mxu0 (!%p231_p9), %v1374_v0  ;;  %1254 = vmatprep.mubr.msk.bf16.mxu0 (!%p231_p9), %vm1474_vm0, %v1473_v1  ;;  %v1380_v9 = vld [vmem:[%s1808_s1 + $0x38] sm:$0xff] (!%p231_p9)   ;;  %vm353_vm2 = vcmask (!%p231_p9), 523264   ;;  %v1385_v18 = vld [vmem:[%s1808_s1 + $0x60] sm:$0xff] (!%p231_p9)   ;;  %v1387_v23 = vld [vmem:[%s1808_s1 + $0x68] sm:$0xff] (!%p231_p9)   ;;  %vm565_vm3 = vsmask.f32 (!%p231_p9), 6400 }
  0x10   : > { %1259 = vmatpush3.bf16.msra.mxu1 (!%p231_p9), %v1375_v2  ;;  %1248 = vmatprep.subr.bf16.mxu0 (!%p231_p9), %v1473_v1  ;;  %v1381_v12 = vld [vmem:[%s1808_s1 + $0x18] sm:$0xff] (!%p231_p9)   ;;  %v1384_v20 = vld [vmem:[%s1808_s1 + $0x40] sm:$0xff] (!%p231_p9)   ;;  %v1386_v25 = vld [vmem:[%s1808_s1 + $0x48] sm:$0xff] (!%p231_p9)   ;;  %vm478_vm4 = vcmask (!%p231_p9), 1046528   ;;  %vm753_vm5 = vsmask.f32 (!%p231_p9), 5376 }
  0x11   : > { %1260 = vmatprep.subr.bf16.mxu1 (!%p231_p9), %v1473_v1  ;;  %1266 = vmatprep.mubr.msk.bf16.mxu1 (!%p231_p9), %vm1474_vm0, %v1473_v1  ;;  %v1389_v27 = vld [vmem:[%s1808_s1 + $0x70] sm:$0xff] (!%p231_p9)   ;;  %v1391_v37 = vld [vmem:[%s1808_s1 + $0x78] sm:$0xff] (!%p231_p9)   ;;  %v1395_v45 = vld [vmem:[%s1808_s1 + $0xa0] sm:$0xff] (!%p231_p9)   ;;  %vm666_vm6 = vcmask (!%p231_p9), 1045504   ;;  %vm854_vm7 = vcmask (!%p231_p9), 1044480   ;;  %s1210_s9 = sshll.u32 (!%p231_p9), %s1534_s25, 8 }
  0x12   : > { %v1388_v34 = vld [vmem:[%s1808_s1 + $0x50] sm:$0xff] (!%p231_p9)   ;;  %v1390_v41 = vld [vmem:[%s1808_s1 + $0x58] sm:$0xff] (!%p231_p9)   ;;  %v1393_v49 = vld [vmem:[%s1808_s1 + $0x80] sm:$0xff] (!%p231_p9)   ;;  %s1746_s15 = scalar_lea.hbm (!%p231_p9), %s1811_s4, %s1210_s9  ;;  %s1475_s18 = smov (!%p231_p9), [#allocation2]  }
  0x13   : > { %1249 = vmatpush3.bf16.msra.mxu0 (!%p231_p9), %v1376_v3  ;;  %v1397_v50 = vld [vmem:[%s1808_s1 + $0xa8] sm:$0xff] (!%p231_p9)   ;;  %v1399_v56 = vld [vmem:[%s1808_s1 + $0xb0] sm:$0xff] (!%p231_p9)   ;;  %v1401_v62 = vld [vmem:[%s1808_s1 + $0xb8] sm:$0xff] (!%p231_p9)   ;;  %s1413_s19 = sshll.u32 (!%p231_p9), %s1475_s18, 4  ;;  %s1414_s19 = int_to_ptr.vmem [resolvable:$false] %s1413_s19 }
  0x14   : > { %1261 = vmatpush3.bf16.msra.mxu1 (!%p231_p9), %v1377_v4  ;;  %1250 = vmatprep.subr.bf16.mxu0 (!%p231_p9), %v1473_v1  ;;  %v1396_v55 = vld [vmem:[%s1808_s1 + $0x88] sm:$0xff] (!%p231_p9)   ;;  %v1398_v61 = vld [vmem:[%s1808_s1 + $0x90] sm:$0xff] (!%p231_p9)   ;;  %v1400_v2 = vld [vmem:[%s1808_s1 + $0x98] sm:$0xff] (!%p231_p9)  }
  0x15   : > { %s1583_s17 = scalar_select %p271_p10, %s1534_s25, 1  ;;  %1262 = vmatprep.subr.bf16.mxu1 %v1473_v1 }
  0x17   : > { %s1330_s20 = smul.u32 12, %s1583_s17  ;;  %1251 = vmatpush3.bf16.msra.mxu0 %v1378_v5  ;;  %s1209_s16 = sshll.u32 %s1583_s17, 4 }
  0x18   : > { %1263 = vmatpush3.bf16.msra.mxu1 %v1379_v6  ;;  %1252 = vmatprep.subr.bf16.mxu0 %v1473_v1  ;;  %s280_s29 = scalar_lea.vmem %s1810_s3, %s1209_s16 }
  0x19   : > { %s1597_s10 = scalar_lea.vmem %s1807_s0, %s1330_s20  ;;  %1264 = vmatprep.subr.bf16.mxu1 %v1473_v1 }
  0x1a   : > { %v288_v7 = vld [vmem:[%s1597_s10] sm:$0xf]  ;;  %v1601_v8 = vld [vmem:[%s1597_s10 + $0x4] sm:$0xf] }
  0x1b   : > { %v1121_v10 = vcombine.low %v288_v7, %v1601_v8  ;;  %v1608_v11 = vld [vmem:[%s1597_s10 + $0x8] ss:$0 sps:$4 sm:$0x11]   ;;  %1253 = vmatpush3.bf16.msra.mxu0 %v1380_v9  ;;  %v465_v22 = vld [vmem:[%s1597_s10] sm:$0xe] }
  0x1c   : > { %v325_v15 = vshll.u32 %v1608_v11, 16  ;;  %1265 = vmatpush3.bf16.msra.mxu1 %v1381_v12  ;;  %1270 = vmatprep.subr.bf16.mxu0 %v1473_v1  ;;  %v1141_v24 = vcombine.low %v465_v22, %v1601_v8  ;;  %v1636_v26 = vld [vmem:[%s1597_s10 + $0x8] ss:$0 sps:$4 sm:$0x33]   ;;  %v480_v38 = vrot.slane %v1608_v11, 1  ;;  %v1403_v7 = vld [vmem:[%s1808_s1 + $0xc0] sm:$0xff]  }
  0x1d   : > { %v318_v13 = vshrl.u32 %v1121_v10, 16  ;;  %v320_v14 = vshll.u32 %v1121_v10, 16  ;;  %1282 = vmatprep.subr.bf16.mxu1 %v1473_v1  ;;  %v575_v30 = vshrl.u32 %v1636_v26, 16  ;;  %v578_v31 = vshll.u32 %v1636_v26, 16  ;;  %v653_v43 = vld [vmem:[%s1597_s10] sm:$0xc] }
  0x1e   : > { %v327_v17 = vrot.slane %v325_v15, 1  ;;  %v567_v28 = vshrl.u32 %v1141_v24, 16  ;;  %v570_v29 = vshll.u32 %v1141_v24, 16  ;;  %v479_v42 = vrot.slane %v1141_v24, 1  ;;  %v1405_v9 = vld [vmem:[%s1808_s1 + $0xc8] sm:$0xff]   ;;  %v1406_v11 = vld [vmem:[%s1808_s1 + $0xd0] sm:$0xff]  }
  0x1f   : > { %v322_v16 = vrot.slane %v320_v14, 1  ;;  %1267 = vmatmul.mubr.msk.bf16.vlgmr.msra.gmra.mrb[0].mxu1 %vm353_vm2, %v1121_v10  ;;  %v577_v35 = vrot.slane %v575_v30, 1  ;;  %v580_v36 = vrot.slane %v578_v31, 2  ;;  %v1169_v46 = vcombine.low %v653_v43, %v1601_v8  ;;  %v1668_v47 = vld [vmem:[%s1597_s10 + $0x8] ss:$0 sps:$4 sm:$0x77]  }
  0x20   : > { %1283 = vmatpush3.bf16.msra.mxu1 %v1385_v18  ;;  %1290 = vmatprep.mubr.msk.bf16.mxu1 %vm1474_vm0, %v1473_v1  ;;  %v569_v32 = vrot.slane %v567_v28, 1  ;;  %v572_v33 = vrot.slane %v570_v29, 2  ;;  %v481_v48 = vsel %vm478_vm4, %v479_v42, %v480_v38  ;;  %v763_v53 = vshrl.u32 %v1668_v47, 16  ;;  %v841_v10 = vld [vmem:[%s1597_s10] sm:$0x8]  ;;  %s258_s10 = sand.u32 1, %s1463_s22  }
  0x21   : > { %v323_v19 = vor.u32 %v322_v16, %v318_v13  ;;  %1284 = vmatprep.subr.bf16.mxu1 %v1473_v1  ;;  %v581_v40 = vor.u32 %v580_v36, %v577_v35  ;;  %v755_v51 = vshrl.u32 %v1169_v46, 16  ;;  %v758_v52 = vshll.u32 %v1169_v46, 16  ;;  %v1407_v13 = vld [vmem:[%s1808_s1 + $0xd8] sm:$0xff]   ;;  %s1109_s20 = sshll.u32 %s258_s10, 4  ;;  %s1758_s25 = scalar_lea.sflag [#allocation3], %s258_s10 }
  0x22   : > { %v573_v39 = vor.u32 %v572_v33, %v569_v32  ;;  %v766_v54 = vshll.u32 %v1668_v47, 16  ;;  %v765_v59 = vrot.slane %v763_v53, 2  ;;  %v667_v3 = vrot.slane %v1169_v46, 2  ;;  %s260_s11 = scalar_lea.vmem [#allocation2], %s1109_s20  ;;  %s1415_s20 = scalar_lea.vmem %s1414_s19, 512 }
  0x23   : > { %v328_v21 = vsel %vm316_vm1, %v323_v19, %v327_v17  ;;  %v757_v57 = vrot.slane %v755_v51, 2  ;;  %v760_v58 = vrot.slane %v758_v52, 3  ;;  %v668_v4 = vrot.slane %v1636_v26, 2  ;;  %s987_s12 = sshll.u32 %s260_s11, 4  ;;  %s1748_s12 = int_to_ptr.vmem [resolvable:$true] %s987_s12 }
  0x24   : > { %1255 = vmatmul.mubr.msk.bf16.vlgmr.msra.gmra.mrb[0].mxu0 %vm353_vm2, %v328_v21  ;;  %1285 = vmatpush3.bf16.msra.mxu1 %v1387_v23  ;;  %v582_v44 = vsel %vm565_vm3, %v573_v39, %v581_v40  ;;  %v768_v60 = vrot.slane %v766_v54, 3  ;;  %v1197_v12 = vcombine.low %v841_v10, %v1601_v8  ;;  %v856_v15 = vrot.slane %v1668_v47, 3  ;;  %s1409_s16 = scalar_lea.vmem %s1748_s12, 256  ;;  %p1416_p0 = scmp.lt.s32.totalorder %s1748_s12, %s1414_s19 }
  0x25   : > { %1271 = vmatpush3.bf16.msra.mxu0 %v1384_v20  ;;  %1278 = vmatprep.mubr.msk.bf16.mxu0 %vm1474_vm0, %v1473_v1  ;;  %v761_v63 = vor.u32 %v760_v58, %v757_v57  ;;  %v669_v6 = vsel %vm666_vm6, %v667_v3, %v668_v4  ;;  %v939_v57 = vld [vmem:[%s280_s29] sm:$0xff]  ;;  %p1410_p11 = scmp.ne.s32.totalorder %s1748_s12, %s1409_s16  ;;  %p1417_p1 = scmp.lt.s32.totalorder %s1415_s20, %s1409_s16 }
  0x26   : > { %1272 = vmatprep.subr.bf16.mxu0 %v1473_v1  ;;  %1286 = vmatprep.subr.bf16.mxu1 %v1473_v1  ;;  %v769_v0 = vor.u32 %v768_v60, %v765_v59  ;;  %v855_v14 = vrot.slane %v1197_v12, 3  ;;  %v940_v60 = vld [vmem:[%s280_s29 + $0x8] sm:$0xff] }
  0x27   : > { %p1411_p12 = pnand %p1410_p11, %p1551_p5  ;;  %p1418_p2 = por %p1417_p1, %p1416_p0 }
  0x28   : > { %1287 = vmatpush3.bf16.msra.mxu1 %v1389_v27  ;;  %v770_v5 = vsel %vm753_vm5, %v761_v63, %v769_v0  ;;  %v857_v16 = vsel %vm854_vm7, %v855_v14, %v856_v15 }
  0x29   : > { %1273 = vmatpush3.bf16.msra.mxu0 %v1386_v25  ;;  %1288 = vmatprep.subr.bf16.mxu1 %v1473_v1  ;;  %p1412_p13 = pneg %p1411_p12 }
  0x2a   : > { %1274 = vmatprep.subr.bf16.mxu0 %v1473_v1 }
  0x2b   : > { %p1419_p3 = pnand %p1418_p2, %p1412_p13 }
  0x2c   : > { %1289 = vmatpush3.bf16.msra.mxu1 %v1391_v37 }
  0x2d   : > { %1275 = vmatpush3.bf16.msra.mxu0 %v1388_v34  ;;  %1306 = vmatprep.subr.bf16.mxu1 %v1473_v1 }
  0x2e   : > { %1276 = vmatprep.subr.bf16.mxu0 %v1473_v1 }
  0x2f   : > { %1291 = vmatmul.mubr.msk.bf16.vlgmr.msra.gmra.mrb[4].mxu1 %vm353_vm2, %v582_v44 }
  0x30   : > { %1307 = vmatpush3.bf16.msra.mxu1 %v1395_v45  ;;  %1314 = vmatprep.mubr.msk.bf16.mxu1 %vm1474_vm0, %v1473_v1 }
  0x31   : > { %1277 = vmatpush3.bf16.msra.mxu0 %v1390_v41  ;;  %1308 = vmatprep.subr.bf16.mxu1 %v1473_v1 }
  0x32   : > { %1294 = vmatprep.subr.bf16.mxu0 %v1473_v1 }
  0x34   : > { %1279 = vmatmul.mubr.msk.bf16.vlgmr.msra.gmra.mrb[4].mxu0 %vm353_vm2, %v481_v48  ;;  %1309 = vmatpush3.bf16.msra.mxu1 %v1397_v50  ;;  %v1203_v50 = vld [vmem:[%s1809_s2] ss:$0 sm:$0xff] }
  0x35   : > { %1295 = vmatpush3.bf16.msra.mxu0 %v1393_v49  ;;  %1302 = vmatprep.mubr.msk.bf16.mxu0 %vm1474_vm0, %v1473_v1 }
  0x36   : > { %1296 = vmatprep.subr.bf16.mxu0 %v1473_v1  ;;  %1310 = vmatprep.subr.bf16.mxu1 %v1473_v1 }
  0x38   : > { %1311 = vmatpush3.bf16.msra.mxu1 %v1399_v56 }
  0x39   : > { %1297 = vmatpush3.bf16.msra.mxu0 %v1396_v55  ;;  %1312 = vmatprep.subr.bf16.mxu1 %v1473_v1 }
  0x3a   : > { %1298 = vmatprep.subr.bf16.mxu0 %v1473_v1 }
  0x3c   : > { %1313 = vmatpush3.bf16.msra.mxu1 %v1401_v62 }
  0x3d   : > { %1299 = vmatpush3.bf16.msra.mxu0 %v1398_v61 }
  0x3e   : > { %1300 = vmatprep.subr.bf16.mxu0 %v1473_v1 }
  0x3f   : > { %1315 = vmatmul.mubr.msk.bf16.vlgmr.msra.gmra.mrb[8].mxu1 %vm353_vm2, %v770_v5 }
  0x41   : > { %1301 = vmatpush3.bf16.msra.mxu0 %v1400_v2 }
  0x42   : > { %1318 = vmatprep.subr.bf16.mxu0 %v1473_v1 }
  0x44   : > { %1303 = vmatmul.mubr.msk.bf16.vlgmr.msra.gmra.mrb[8].mxu0 %vm353_vm2, %v669_v6 }
  0x45   : > { %1319 = vmatpush3.bf16.msra.mxu0 %v1403_v7  ;;  %1326 = vmatprep.mubr.msk.bf16.mxu0 %vm1474_vm0, %v1473_v1 }
  0x46   : > { %1320 = vmatprep.subr.bf16.mxu0 %v1473_v1 }
  0x49   : > { %1321 = vmatpush3.bf16.msra.mxu0 %v1405_v9 }
  0x4a   : > { %1322 = vmatprep.subr.bf16.mxu0 %v1473_v1 }
  0x4d   : > { %1323 = vmatpush3.bf16.msra.mxu0 %v1406_v11 }
  0x4e   : > { %1324 = vmatprep.subr.bf16.mxu0 %v1473_v1 }
  0x51   : > { %1325 = vmatpush3.bf16.msra.mxu0 %v1407_v13 }
  0x54   : > { %1327 = vmatmul.mubr.msk.bf16.vlgmr.msra.gmra.mrb[12].mxu0 %vm353_vm2, %v857_v16 }
  0xf2   : > { %v458_v17 = vpop.f32.mrb[0].mxu1 }
  0xf3   : > { %v1268_v8 = vpop.f32.mrb[1].mxu1 }
  0xf4   : > { %v461_v21 = vpop.f32.mrb[2].mxu1 }
  0xf5   : > { %v1269_v23 = vpop.f32.mrb[3].mxu1 }
  0xf7   : > { %v391_v18 = vpop.f32.mrb[0].mxu0 }
  0xf8   : > { %v459_v19 = vadd.f32 %v458_v17, %v391_v18  ;;  %v1256_v20 = vpop.f32.mrb[1].mxu0 }
  0xf9   : > { %v394_v22 = vpop.f32.mrb[2].mxu0 }
  0xfa   : > { %v462_v24 = vadd.f32 %v461_v21, %v394_v22  ;;  %v1257_v25 = vpop.f32.mrb[3].mxu0 }
 0x102   : > { %v644_v26 = vpop.f32.mrb[4].mxu1 }
 0x103   : > { %v1292_v28 = vpop.f32.mrb[5].mxu1 }
 0x104   : > { %v647_v30 = vpop.f32.mrb[6].mxu1 }
 0x105   : > { %v1293_v32 = vpop.f32.mrb[7].mxu1 }
 0x107   : > { %v543_v27 = vpop.f32.mrb[4].mxu0 }
 0x108   : > { %v550_v29 = vadd.f32 %v543_v27, %v459_v19  ;;  %v1280_v1 = vpop.f32.mrb[5].mxu0 }
 0x109   : > { %v546_v31 = vpop.f32.mrb[6].mxu0 }
 0x10a   : > { %v551_v33 = vadd.f32 %v546_v31, %v462_v24  ;;  %v651_v34 = vadd.f32 %v644_v26, %v550_v29  ;;  %v1281_v35 = vpop.f32.mrb[7].mxu0 }
 0x10c   : > { %v652_v36 = vadd.f32 %v647_v30, %v551_v33 }
 0x112   : > { %v832_v37 = vpop.f32.mrb[8].mxu1 }
 0x113   : > { %v1316_v39 = vpop.f32.mrb[9].mxu1 }
 0x114   : > { %v835_v42 = vpop.f32.mrb[10].mxu1 }
 0x115   : > { %v1317_v44 = vpop.f32.mrb[11].mxu1 }
 0x117   : > { %v731_v38 = vpop.f32.mrb[8].mxu0 }
 0x118   : > { %v738_v40 = vadd.f32 %v731_v38, %v651_v34  ;;  %v1304_v41 = vpop.f32.mrb[9].mxu0 }
 0x119   : > { %v734_v43 = vpop.f32.mrb[10].mxu0 }
 0x11a   : > { %v739_v45 = vadd.f32 %v734_v43, %v652_v36  ;;  %v839_v46 = vadd.f32 %v832_v37, %v738_v40  ;;  %v1305_v47 = vpop.f32.mrb[11].mxu0 }
 0x11c   : > { %v840_v48 = vadd.f32 %v835_v42, %v739_v45 }
 0x127   : > { %v919_v49 = vpop.f32.mrb[12].mxu0 }
 0x128   : > { %v926_v51 = vadd.f32 %v919_v49, %v839_v46  ;;  %v1328_v52 = vpop.f32.mrb[13].mxu0 }
 0x129   : > { %v922_v53 = vpop.f32.mrb[14].mxu0 }
 0x12a   : > { %v935_v54 = vadd.f32 %v1203_v50, %v926_v51  ;;  %v927_v55 = vadd.f32 %v922_v53, %v840_v48  ;;  %v1329_v56 = vpop.f32.mrb[15].mxu0 }
 0x12c   : > { %v937_v58 = vmax.f32 %v935_v54, 0.0  ;;  %v936_v59 = vadd.f32 %v1203_v50, %v927_v55 }
 0x12e   : > { %v941_v61 = vadd.f32 %v939_v57, %v937_v58  ;;  %v938_v62 = vmax.f32 %v936_v59, 0.0 }
 0x130   : > { %943 = vst.msk [vmem:[%s260_s11] sm:$0xff] %vm353_vm2, %v941_v61  ;;  %v942_v63 = vadd.f32 %v940_v60, %v938_v62  ;;  %v945_v0 = vsel %vm353_vm2, %v941_v61, -inf  ;;  %v956_v2 = vsel %vm353_vm2, %v941_v61, 0.0 }
 0x132   : > { %944 = vst.msk [vmem:[%s260_s11 + $0x8] sm:$0xff] %vm353_vm2, %v942_v63  ;;  %v946_v3 = vsel %vm353_vm2, %v942_v63, -inf  ;;  %v957_v4 = vsel %vm353_vm2, %v942_v63, 0.0 }
 0x133   : > { %v947_v5 = vmax.f32 %v945_v0, %v946_v3  ;;  %v958_v6 = vadd.f32 %v957_v4, %v956_v2 }
 0x134   : > { %1422 = shalt.err (!%p1419_p3)
}
 0x135   : > { %s1423_s10 = scalar_lea.hbm %s1746_s15, 256  ;;  %s1427_s29 = scalar_lea.hbm %s1811_s4, 512 }
 0x136   : > { %p1424_p4 = scmp.ne.s32.totalorder %s1746_s15, %s1423_s10  ;;  %p1428_p9 = scmp.lt.u32.totalorder %s1746_s15, %s1811_s4 }
 0x137   : > { %p1429_p10 = scmp.lt.u32.totalorder %s1427_s29, %s1423_s10  ;;  %p1431_p12 = scmp.lt.u32.totalorder %s1423_s10, %s1746_s15 }
 0x138   : > { %p1425_p7 = pnand %p1424_p4, %p1551_p5 }
 0x139   : > { %p1430_p11 = por %p1429_p10, %p1428_p9 }
 0x13a   : > { %p1426_p8 = pneg %p1425_p7 }
 0x13b   : > { %p1432_p13 = por %p1431_p12, %p1430_p11 }
 0x13d   : > { %p1433_p0 = pnand %p1432_p13, %p1426_p8 }
 0x13f   : > { %1436 = shalt.err (!%p1433_p0)
}
 0x140   : > { %s1476_s13 = smov 128   ;;  %s1477_s14 = smov 8   ;;  %v948_v7 = vrot.slane %v947_v5, 4  ;;  %v959_v9 = vrot.slane %v958_v6, 4  ;;  %vm954_vm8 = vcmask 516096  }
 0x141   : > { %1331 = dma.vmem_to_hbm [thread:$0]  (%p1551_p5), %s1748_s12, 256, %s1746_s15, %s1758_s25, %s1476_s13, %s1476_s13, %s1477_s14  }
 0x142   : > { %v949_v10 = vmax.f32 %v947_v5, %v948_v7  ;;  %v960_v11 = vadd.f32 %v959_v9, %v958_v6  ;;  %s283_s19 = scalar_lea.vmem %s1812_s5, %s1583_s17  ;;  %s286_s12 = scalar_lea.vmem %s1813_s6, %s1583_s17 }
 0x144   : > { %v950_v12 = vrot.slane %v949_v10, 2  ;;  %v961_v13 = vrot.slane %v960_v11, 2 }
 0x146   : > { %v951_v14 = vmax.f32 %v949_v10, %v950_v12  ;;  %v962_v15 = vadd.f32 %v961_v13, %v960_v11 }
 0x148   : > { %v952_v16 = vrot.slane %v951_v14, 1  ;;  %v963_v17 = vrot.slane %v962_v15, 1 }
 0x14a   : > { %v953_v18 = vmax.f32 %v951_v14, %v952_v16  ;;  %v964_v8 = vadd.f32 %v963_v17, %v962_v15 }
 0x14c   : > { %955 = vst.msk [vmem:[%s283_s19] sm:$0x1] %vm954_vm8, %v953_v18  ;;  %v965_v19 = vmul.f32 0.0625, %v964_v8 }
 0x14e   : > { %966 = vst.msk [vmem:[%s286_s12] sm:$0x1] %vm954_vm8, %v965_v19 }
 0x14f PF: > { %p1337_p5 = scmp.ge.s32.totalorder %s1471_s24, 2  ;;  %s1008_s15 = sand.u32 1, %s1459_s21  }
 0x150   : > { %s1009_s25 = scalar_lea.sflag [#allocation3], %s1008_s15 }
 0x151   : > { %p1334_p1 = pnand %p1337_p5, %p1555_p6 }
 0x153   : > { %1454 = dma.done.wait (!%p1334_p1), %s1009_s25, 256  }
 0x154   : > { %1456 = vsyncadd (!%p1334_p1), %s1009_s25, 4294967040  ;;  %p17_p2 = scmp.ge.s32.totalorder %s1538_s27, 4   ;;  %s1816_s21 = smov %s1463_s22 }
 0x155   : > { %s1817_s22 = smov %s1467_s23  ;;  %s1818_s23 = smov %s1549_s30 }
 0x156   : > { %s1819_s24 = smov %s1538_s27  ;;  %19 = sbr.rel (!%p17_p2) target bundleno = 3 (0x3), region = 104 }
 0x15d   :  { %1026 = vsyncpa [#allocation3], 1 }
 0x15e   :  { %1028 = vsyncpa [#allocation3 + $0x1], 1 }

// kernel: musicnn_forward.15
= control target key start
LH: loop header
LB: loop body
LE: loop exit
PB: predicated region body
PF: predicated region fallthrough
CT: control target
= control target key end

     0   :  { %vm15_vm0 = vcmask 394240   ;;  %v423_v0 = vmov 0.0   ;;  %v424_v1 = vmov -inf   ;;  %v425_v5 = vmov 1983009808   ;;  %s642_s2 = inlined_call_operand.vmem [shape: f32[2,561], index: 2, kind: output, shape index: {1}]   ;;  %s643_s1 = inlined_call_operand.vmem [shape: f32[2,561], index: 1, kind: output, shape index: {0}]   ;;  %s644_s0 = inlined_call_operand.vmem [shape: f32[2,16,561], index: 0, kind: input, shape index: {}]  }
   0x1   :  { %18 = vst.msk [vmem:[%s642_s2 + $0x8] sm:$0x3] %vm15_vm0, %v423_v0  ;;  %16 = vst.msk [vmem:[%s643_s1 + $0x8] sm:$0x3] %vm15_vm0, %v424_v1  ;;  %v19_v2 = vld [vmem:[%s644_s0] sm:$0xff]  ;;  %v20_v3 = vld [vmem:[%s644_s0 + $0x8] sm:$0xff]  ;;  %v157_v6 = vunpack.c.l.s4 %v425_v5  ;;  %v159_v7 = vlaneseq }
   0x2   :  { %v21_v4 = vld [vmem:[%s644_s0 + $0x10] sm:$0xff]  ;;  %v461_v8 = vld [vmem:[%s644_s0 + $0x18] sm:$0xff]  ;;  %v24_v9 = vld [vmem:[%s644_s0 + $0x28] sm:$0xff]  ;;  %vm97_vm1 = vcmask 400384   ;;  %vm207_vm2 = vcmask 1041409   ;;  %vm209_vm3 = vcmask 1043459  }
   0x3   :  { %v25_v10 = vld [vmem:[%s644_s0 + $0x30] sm:$0xff]  ;;  %v26_v11 = vld [vmem:[%s644_s0 + $0x38] sm:$0xff]  ;;  %v475_v12 = vld [vmem:[%s644_s0 + $0x40] sm:$0xff]  ;;  %v158_v14 = vunpack.c.0.s8 %v157_v6  ;;  %v160_v15 = vshrl.u32 %v159_v7, 7  ;;  %v251_v16 = vadd.f32 %v24_v9, %v19_v2  ;;  %v499_v23 = vmax.f32 %v19_v2, %v24_v9 }
   0x4   :  { %v480_v13 = vld [vmem:[%s644_s0 + $0x50] sm:$0xff]  ;;  %v258_v17 = vadd.f32 %v25_v10, %v20_v3  ;;  %v485_v18 = vld [vmem:[%s644_s0 + $0x58] sm:$0xff]  ;;  %v490_v19 = vld [vmem:[%s644_s0 + $0x60] sm:$0xff]  ;;  %v265_v21 = vadd.f32 %v26_v11, %v21_v4  ;;  %v272_v22 = vadd.f32 %v475_v12, %v461_v8  ;;  %v501_v24 = vmax.f32 %v20_v3, %v25_v10 }
   0x5   :  { %v495_v20 = vld [vmem:[%s644_s0 + $0x68] sm:$0xff]  ;;  %v506_v25 = vld [vmem:[%s644_s0 + $0x78] sm:$0xff]  ;;  %v511_v26 = vld [vmem:[%s644_s0 + $0x80] sm:$0xff]  ;;  %v518_v28 = vsub.s32 %v158_v14, %v160_v15  ;;  %v252_v29 = vrot.slane %v251_v16, 4  ;;  %v520_v31 = vmax.f32 %v21_v4, %v26_v11  ;;  %vm211_vm4 = vcmask 1045509  }
   0x6   :  { %v516_v27 = vld [vmem:[%s644_s0 + $0x88] sm:$0xff]  ;;  %v259_v30 = vrot.slane %v258_v17, 4  ;;  %v525_v32 = vld [vmem:[%s644_s0 + $0x90] sm:$0xff]  ;;  %v266_v33 = vrot.slane %v265_v21, 4  ;;  %v273_v34 = vrot.slane %v272_v22, 4  ;;  %v288_v35 = vadd.f32 %v506_v25, %v480_v13  ;;  %v538_v5 = vld [vmem:[%s644_s0 + $0x20] sm:$0xff] }
   0x7   :  { %v295_v36 = vadd.f32 %v511_v26, %v485_v18  ;;  %v253_v37 = vadd.f32 %v252_v29, %v251_v16  ;;  %v302_v39 = vadd.f32 %v516_v27, %v490_v19  ;;  %v309_v40 = vadd.f32 %v525_v32, %v495_v20  ;;  %v543_v11 = vld [vmem:[%s644_s0 + $0x48] sm:$0xff] }
   0x8   :  { %v260_v38 = vadd.f32 %v259_v30, %v258_v17  ;;  %v267_v41 = vadd.f32 %v266_v33, %v265_v21  ;;  %v274_v42 = vadd.f32 %v273_v34, %v272_v22  ;;  %v289_v43 = vrot.slane %v288_v35, 4  ;;  %v548_v30 = vld [vmem:[%s644_s0 + $0x70] sm:$0xff]  ;;  %v553_v33 = vld [vmem:[%s644_s0 + $0x98] sm:$0xff] }
   0x9   :  { %v296_v44 = vrot.slane %v295_v36, 4  ;;  %v254_v45 = vrot.slane %v253_v37, 2  ;;  %v303_v47 = vrot.slane %v302_v39, 4  ;;  %v310_v48 = vrot.slane %v309_v40, 4 }
   0xa   :  { %v261_v46 = vrot.slane %v260_v38, 2  ;;  %v268_v49 = vrot.slane %v267_v41, 2  ;;  %v275_v50 = vrot.slane %v274_v42, 2  ;;  %v290_v51 = vadd.f32 %v289_v43, %v288_v35 }
   0xb   :  { %v297_v52 = vadd.f32 %v296_v44, %v295_v36  ;;  %v255_v53 = vadd.f32 %v254_v45, %v253_v37  ;;  %v304_v55 = vadd.f32 %v303_v47, %v302_v39  ;;  %v311_v56 = vadd.f32 %v310_v48, %v309_v40 }
   0xc   :  { %v262_v54 = vadd.f32 %v261_v46, %v260_v38  ;;  %v269_v57 = vadd.f32 %v268_v49, %v267_v41  ;;  %v276_v58 = vadd.f32 %v275_v50, %v274_v42  ;;  %v291_v59 = vrot.slane %v290_v51, 2 }
   0xd   :  { %v298_v60 = vrot.slane %v297_v52, 2  ;;  %v256_v61 = vrot.slane %v255_v53, 1  ;;  %v305_v63 = vrot.slane %v304_v55, 2  ;;  %v312_v0 = vrot.slane %v311_v56, 2 }
   0xe   :  { %v263_v62 = vrot.slane %v262_v54, 1  ;;  %v270_v1 = vrot.slane %v269_v57, 1  ;;  %v277_v2 = vrot.slane %v276_v58, 1  ;;  %v292_v3 = vadd.f32 %v291_v59, %v290_v51 }
   0xf   :  { %v299_v4 = vadd.f32 %v298_v60, %v297_v52  ;;  %v257_v6 = vadd.f32 %v256_v61, %v255_v53  ;;  %v306_v9 = vadd.f32 %v305_v63, %v304_v55  ;;  %v313_v10 = vadd.f32 %v312_v0, %v311_v56 }
  0x10   :  { %v264_v7 = vadd.f32 %v263_v62, %v262_v54  ;;  %v271_v14 = vadd.f32 %v270_v1, %v269_v57  ;;  %v278_v15 = vadd.f32 %v277_v2, %v276_v58  ;;  %v293_v16 = vrot.slane %v292_v3, 1 }
  0x11   :  { %v300_v17 = vrot.slane %v299_v4, 1  ;;  %v307_v21 = vrot.slane %v306_v9, 1  ;;  %v314_v22 = vrot.slane %v313_v10, 1  ;;  %v279_v34 = vsel %vm97_vm1, %v538_v5, 0.0 }
  0x12   :  { %v335_v29 = vcombine.low %v257_v6, %v264_v7  ;;  %v294_v35 = vadd.f32 %v293_v16, %v292_v3  ;;  %v336_v37 = vcombine.low %v271_v14, %v278_v15  ;;  %v280_v38 = vsel %vm97_vm1, %v543_v11, 0.0 }
  0x13   :  { %v301_v36 = vadd.f32 %v300_v17, %v299_v4  ;;  %v308_v39 = vadd.f32 %v307_v21, %v306_v9  ;;  %v315_v40 = vadd.f32 %v314_v22, %v313_v10  ;;  %v281_v42 = vadd.f32 %v280_v38, %v279_v34 }
  0x14   :  { %v343_v41 = vrot.slane %v335_v29, %v518_v28  ;;  %v350_v43 = vrot.slane %v336_v37, %v518_v28  ;;  %v316_v45 = vsel %vm97_vm1, %v548_v30, 0.0  ;;  %v317_v46 = vsel %vm97_vm1, %v553_v33, 0.0 }
  0x15   :  { %v359_v44 = vcombine.low %v294_v35, %v301_v36  ;;  %v360_v47 = vcombine.low %v308_v39, %v315_v40  ;;  %v282_v48 = vrot.slane %v281_v42, 4  ;;  %v318_v49 = vadd.f32 %v317_v46, %v316_v45 }
  0x16   :  { %v70_v50 = vrot.slane %v499_v23, 4  ;;  %v351_v51 = vcombine.low %v343_v41, %v350_v43  ;;  %v77_v53 = vrot.slane %v501_v24, 4  ;;  %v84_v54 = vrot.slane %v520_v31, 4 }
  0x17   :  { %v367_v52 = vrot.slane %v359_v44, %v518_v28  ;;  %v374_v55 = vrot.slane %v360_v47, %v518_v28  ;;  %v283_v56 = vadd.f32 %v282_v48, %v281_v42  ;;  %v319_v57 = vrot.slane %v318_v49, 4 }
  0x18   :  { %v71_v58 = vmax.f32 %v499_v23, %v70_v50  ;;  %v78_v59 = vmax.f32 %v501_v24, %v77_v53  ;;  %v85_v60 = vmax.f32 %v520_v31, %v84_v54  ;;  %v90_v61 = vmax.f32 %v461_v8, %v475_v12 }
  0x19   :  { %v107_v62 = vmax.f32 %v480_v13, %v506_v25  ;;  %v375_v63 = vcombine.low %v367_v52, %v374_v55  ;;  %v284_v0 = vrot.slane %v283_v56, 2  ;;  %v320_v1 = vadd.f32 %v319_v57, %v318_v49 }
  0x1a   :  { %v72_v2 = vrot.slane %v71_v58, 2  ;;  %v79_v3 = vrot.slane %v78_v59, 2  ;;  %v86_v4 = vrot.slane %v85_v60, 2  ;;  %v91_v6 = vrot.slane %v90_v61, 4 }
  0x1b   :  { %v108_v7 = vrot.slane %v107_v62, 4  ;;  %v385_v9 = vrot.slane %v375_v63, 7  ;;  %v285_v23 = vadd.f32 %v284_v0, %v283_v56  ;;  %v321_v10 = vrot.slane %v320_v1, 2 }
  0x1c   :  { %v73_v24 = vmax.f32 %v71_v58, %v72_v2  ;;  %v80_v14 = vmax.f32 %v78_v59, %v79_v3  ;;  %v87_v31 = vmax.f32 %v85_v60, %v86_v4  ;;  %v92_v15 = vmax.f32 %v90_v61, %v91_v6 }
  0x1d   :  { %v109_v16 = vmax.f32 %v107_v62, %v108_v7  ;;  %v386_v8 = vsel %vm207_vm2, %v385_v9, %v351_v51  ;;  %v286_v12 = vrot.slane %v285_v23, 1  ;;  %v322_v13 = vadd.f32 %v321_v10, %v320_v1 }
  0x1e   :  { %v74_v25 = vrot.slane %v73_v24, 1  ;;  %v387_v17 = vsel %vm209_vm3, %v385_v9, %v386_v8  ;;  %v81_v21 = vrot.slane %v80_v14, 1  ;;  %v93_v22 = vrot.slane %v92_v15, 2 }
  0x1f   :  { %v388_v29 = vsel %vm211_vm4, %v385_v9, %v387_v17  ;;  %v287_v34 = vadd.f32 %v286_v12, %v285_v23  ;;  %v323_v35 = vrot.slane %v322_v13, 1  ;;  %v88_v36 = vrot.slane %v87_v31, 1 }
  0x20   :  { %vm213_vm5 = vcmask 1047559   ;;  %v75_v37 = vmax.f32 %v73_v24, %v74_v25  ;;  %v94_v38 = vmax.f32 %v92_v15, %v93_v22  ;;  %v82_v41 = vmax.f32 %v80_v14, %v81_v21 }
  0x21   :  { %v389_v39 = vsel %vm213_vm5, %v385_v9, %v388_v29  ;;  %v324_v40 = vadd.f32 %v323_v35, %v322_v13  ;;  %v110_v42 = vrot.slane %v109_v16, 2  ;;  %v114_v44 = vmax.f32 %v485_v18, %v511_v26 }
  0x22   :  { %v95_v43 = vrot.slane %v94_v38, 1  ;;  %v121_v45 = vmax.f32 %v490_v19, %v516_v27  ;;  %v128_v46 = vmax.f32 %v495_v20, %v525_v32  ;;  %v358_v47 = vrot.slane %v287_v34, %v518_v28 }
  0x23   :  { %v382_v48 = vrot.slane %v324_v40, %v518_v28  ;;  %v89_v49 = vmax.f32 %v87_v31, %v88_v36  ;;  %v111_v50 = vmax.f32 %v109_v16, %v110_v42  ;;  %v115_v51 = vrot.slane %v114_v44, 4 }
  0x24   :  { %v122_v52 = vrot.slane %v121_v45, 4  ;;  %v129_v53 = vrot.slane %v128_v46, 4  ;;  %v98_v54 = vsel %vm97_vm1, %v538_v5, -inf  ;;  %v96_v18 = vmax.f32 %v94_v38, %v95_v43  ;;  %v230_v5 = vld [vmem:[%s642_s2 + $0x8] sm:$0x3] }
  0x25   :  { %v392_v55 = vrot.slane %v382_v48, 7  ;;  %v99_v19 = vsel %vm97_vm1, %v543_v11, -inf  ;;  %v116_v26 = vmax.f32 %v114_v44, %v115_v51  ;;  %v154_v32 = vcombine.low %v75_v37, %v82_v41 }
  0x26   :  { %v123_v27 = vmax.f32 %v121_v45, %v122_v52  ;;  %v130_v20 = vmax.f32 %v128_v46, %v129_v53  ;;  %v112_v57 = vrot.slane %v111_v50, 1  ;;  %v100_v58 = vmax.f32 %v98_v54, %v99_v19 }
  0x27   :  { %v393_v56 = vsel %vm207_vm2, %v392_v55, %v358_v47  ;;  %v135_v59 = vsel %vm97_vm1, %v548_v30, -inf  ;;  %v117_v61 = vrot.slane %v116_v26, 2  ;;  %v155_v0 = vcombine.low %v89_v49, %v96_v18  ;;  %v48_v18 = vld [vmem:[%s643_s1 + $0x8] sm:$0x3] }
  0x28   :  { %v394_v60 = vsel %vm209_vm3, %v392_v55, %v393_v56  ;;  %v124_v62 = vrot.slane %v123_v27, 2  ;;  %v131_v11 = vrot.slane %v130_v20, 2  ;;  %v101_v1 = vrot.slane %v100_v58, 4 }
  0x29   :  { %v395_v63 = vsel %vm211_vm4, %v392_v55, %v394_v60  ;;  %v136_v2 = vsel %vm97_vm1, %v553_v33, -inf  ;;  %v118_v4 = vmax.f32 %v116_v26, %v117_v61  ;;  %v113_v9 = vmax.f32 %v111_v50, %v112_v57 }
  0x2a   :  { %v396_v3 = vsel %vm213_vm5, %v392_v55, %v395_v63  ;;  %v125_v30 = vmax.f32 %v123_v27, %v124_v62  ;;  %v132_v6 = vmax.f32 %v130_v20, %v131_v11  ;;  %v102_v23 = vmax.f32 %v100_v58, %v101_v1 }
  0x2b   :  { %v400_v7 = vadd.f32 %v396_v3, %v230_v5  ;;  %v137_v10 = vmax.f32 %v135_v59, %v136_v2  ;;  %v119_v24 = vrot.slane %v118_v4, 1  ;;  %v408_v15 = vmul.f32 0.0625, %v389_v39 }
  0x2c   :  { %v126_v14 = vrot.slane %v125_v30, 1  ;;  %v133_v31 = vrot.slane %v132_v6, 1  ;;  %v103_v16 = vrot.slane %v102_v23, 2  ;;  %v162_v21 = vrot.slane %v154_v32, %v518_v28 }
  0x2d   :  { %402 = vst.msk [vmem:[%s642_s2 + $0x8] sm:$0x3] %vm15_vm0, %v400_v7  ;;  %v138_v33 = vrot.slane %v137_v10, 4  ;;  %v120_v8 = vmax.f32 %v118_v4, %v119_v24  ;;  %410 = vst [vmem:[%s642_s2] sm:$0xff] %v408_v15  ;;  %v169_v22 = vrot.slane %v155_v0, %v518_v28 }
  0x2e   :  { %v127_v12 = vmax.f32 %v125_v30, %v126_v14  ;;  %v134_v13 = vmax.f32 %v132_v6, %v133_v31  ;;  %v104_v25 = vmax.f32 %v102_v23, %v103_v16 }
  0x2f   :  { %v139_v17 = vmax.f32 %v137_v10, %v138_v33  ;;  %v178_v29 = vcombine.low %v113_v9, %v120_v8  ;;  %v170_v40 = vcombine.low %v162_v21, %v169_v22 }
  0x30   :  { %v179_v34 = vcombine.low %v127_v12, %v134_v13  ;;  %v105_v35 = vrot.slane %v104_v25, 1 }
  0x31   :  { %v140_v36 = vrot.slane %v139_v17, 2  ;;  %v186_v37 = vrot.slane %v178_v29, %v518_v28 }
  0x32   :  { %v193_v38 = vrot.slane %v179_v34, %v518_v28  ;;  %v106_v43 = vmax.f32 %v104_v25, %v105_v35 }
  0x33   :  { %v141_v39 = vmax.f32 %v139_v17, %v140_v36 }
  0x34   :  { %v194_v41 = vcombine.low %v186_v37, %v193_v38  ;;  %v407_v42 = vld [vmem:[%s642_s2 + $0x8] sm:$0x3]  ;;  %v177_v50 = vrot.slane %v106_v43, %v518_v28 }
  0x35   :  { %v142_v44 = vrot.slane %v141_v39, 1  ;;  %v409_v45 = vmul.f32 0.0625, %v407_v42 }
  0x36   :  { %v206_v46 = vrot.slane %v194_v41, 7 }
  0x37   :  { %v143_v47 = vmax.f32 %v141_v39, %v142_v44  ;;  %411 = vst.msk [vmem:[%s642_s2 + $0x8] sm:$0x3] %vm15_vm0, %v409_v45 }
  0x38   :  { %v208_v48 = vsel %vm207_vm2, %v206_v46, %v170_v40 }
  0x39   :  { %v210_v49 = vsel %vm209_vm3, %v206_v46, %v208_v48  ;;  %v201_v51 = vrot.slane %v143_v47, %v518_v28 }
  0x3a   :  { %v212_v52 = vsel %vm211_vm4, %v206_v46, %v210_v49 }
  0x3b   :  { %v214_v53 = vsel %vm213_vm5, %v206_v46, %v212_v52  ;;  %v217_v54 = vrot.slane %v201_v51, 7 }
  0x3c   :  { %226 = vst [vmem:[%s643_s1] sm:$0xff] %v214_v53 }
  0x3d   :  { %v218_v55 = vsel %vm207_vm2, %v217_v54, %v177_v50 }
  0x3e   :  { %v219_v19 = vsel %vm209_vm3, %v217_v54, %v218_v55 }
  0x3f   :  { %v220_v26 = vsel %vm211_vm4, %v217_v54, %v219_v19 }
  0x40   :  { %v221_v28 = vsel %vm213_vm5, %v217_v54, %v220_v26 }
  0x41   :  { %v225_v27 = vmax.f32 %v48_v18, %v221_v28 }
  0x43   :  { %228 = vst.msk [vmem:[%s643_s1 + $0x8] sm:$0x3] %vm15_vm0, %v225_v27 }

// kernel: musicnn_forward.12
= control target key start
LH: loop header
LB: loop body
LE: loop exit
PB: predicated region body
PF: predicated region fallthrough
CT: control target
= control target key end

     0   :  { %s5228_s18 = smov 0   ;;  %s6312_s0 = inlined_call_operand.vmem [shape: bf16[2,22,561], index: 0, kind: input, shape index: {}]   ;;  %s6313_s1 = inlined_call_operand.vmem [shape: bf16[7,561,64], index: 1, kind: input, shape index: {}]   ;;  %s6314_s2 = inlined_call_operand.vmem [shape: f32[1,64], index: 2, kind: input, shape index: {}]   ;;  %s6315_s3 = inlined_call_operand.vmem [shape: f32[2,16,64], index: 3, kind: output, shape index: {0}]   ;;  %s6316_s4 = inlined_call_operand.vmem [shape: f32[2,1,64], index: 4, kind: output, shape index: {1}]   ;;  %s6317_s5 = inlined_call_operand.vmem [shape: f32[2,1,64], index: 5, kind: output, shape index: {2}]  }
   0x1 LB: > { %s3726_s19 = sadd.s32 4294967295, %s5193_s18   ;;  %p3730_p0 = scmp.ge.s32.totalorder %s5193_s18, 1  ;;  %s5193_s18 = sphi %s5228_s18, %s16_s18  }
   0x2   : > { %p192_p1 = scmp.lt.s32.totalorder %s5193_s18, 3 }
   0x4   : > { %p193_p2 = pnand %p3730_p0, %p192_p1 }
   0x5   : > { %v4897_v0 = vld [vmem:[%s6313_s1 + $0x15c] sm:$0xff] (!%p193_p2)   ;;  %v4901_v4 = vld [vmem:[%s6313_s1 + $0x164] sm:$0xff] (!%p193_p2)   ;;  %v4905_v8 = vld [vmem:[%s6313_s1 + $0x16c] sm:$0xff] (!%p193_p2)   ;;  %p226_p3 = scmp.lt.s32.totalorder (!%p193_p2), %s3726_s19, 1  ;;  %vm429_vm0 = vsmask.f32 (!%p193_p2), 7424 }
   0x6   : > { %196 = sbr.rel (%p193_p2) target bundleno = 535 (0x217), region = 32  ;;  %v4898_v1 = vld [vmem:[%s6313_s1 + $0x1dc] sm:$0xff] (!%p193_p2)   ;;  %4458 = vmatprep.subr.bf16.mxu0 (!%p193_p2), %v4897_v0  ;;  %v4902_v5 = vld [vmem:[%s6313_s1 + $0x1e4] sm:$0xff] (!%p193_p2)   ;;  %v4906_v9 = vld [vmem:[%s6313_s1 + $0x1ec] sm:$0xff] (!%p193_p2)   ;;  %v5195_v46 = vmov (!%p193_p2), 0.0   ;;  %vm711_vm1 = vcmask (!%p193_p2), 1040384  }
   0x7   : > { %v4899_v2 = vld [vmem:[%s6313_s1 + $0x11c] sm:$0xff] (!%p193_p2)   ;;  %4480 = vmatprep.subr.bf16.mxu1 (!%p193_p2), %v4898_v1  ;;  %v4903_v6 = vld [vmem:[%s6313_s1 + $0x124] sm:$0xff] (!%p193_p2)   ;;  %v4907_v10 = vld [vmem:[%s6313_s1 + $0x12c] sm:$0xff] (!%p193_p2)   ;;  %vm5196_vm2 = vmmov (!%p193_p2), 0   ;;  %vm707_vm3 = vcmask (!%p193_p2), 400384   ;;  %vm1273_vm4 = vcmask (!%p193_p2), 1046528  }
   0x8   : > { %v4900_v3 = vld [vmem:[%s6313_s1 + $0x19c] sm:$0xff] (!%p193_p2)   ;;  %4459 = vmatpush3.bf16.msra.mxu0 (!%p193_p2), %v4899_v2  ;;  %v4904_v7 = vld [vmem:[%s6313_s1 + $0x1a4] sm:$0xff] (!%p193_p2)   ;;  %v4908_v11 = vld [vmem:[%s6313_s1 + $0x1ac] sm:$0xff] (!%p193_p2)   ;;  %vm1725_vm5 = vsmask.f32 (!%p193_p2), 6400  ;;  %vm2247_vm6 = vcmask (!%p193_p2), 1045504  }
   0x9   : > { %4481 = vmatpush3.bf16.msra.mxu1 (!%p193_p2), %v4900_v3  ;;  %4460 = vmatprep.subr.bf16.mxu0 (!%p193_p2), %v4901_v4  ;;  %v4909_v12 = vld [vmem:[%s6313_s1 + $0x174] sm:$0xff] (!%p193_p2)   ;;  %v4913_v16 = vld [vmem:[%s6313_s1 + $0x17c] sm:$0xff] (!%p193_p2)   ;;  %v4917_v20 = vld [vmem:[%s6313_s1 + $0x184] sm:$0xff] (!%p193_p2)   ;;  %vm2699_vm7 = vsmask.f32 (!%p193_p2), 5376  ;;  %vm3221_vm8 = vcmask (!%p193_p2), 1044480  }
   0xa   : > { %4482 = vmatprep.subr.bf16.mxu1 (!%p193_p2), %v4902_v5  ;;  %v4910_v13 = vld [vmem:[%s6313_s1 + $0x1f4] sm:$0xff] (!%p193_p2)   ;;  %v4914_v17 = vld [vmem:[%s6313_s1 + $0x1fc] sm:$0xff] (!%p193_p2)   ;;  %v4918_v21 = vld [vmem:[%s6313_s1 + $0x204] sm:$0xff] (!%p193_p2)   ;;  %vm3596_vm9 = vcmask (!%p193_p2), 523264   ;;  %vm3608_vm10 = vcmask (!%p193_p2), 516096  }
   0xb   : > { %v4911_v14 = vld [vmem:[%s6313_s1 + $0x134] sm:$0xff] (!%p193_p2)   ;;  %v4915_v18 = vld [vmem:[%s6313_s1 + $0x13c] sm:$0xff] (!%p193_p2)   ;;  %v4919_v22 = vld [vmem:[%s6313_s1 + $0x144] sm:$0xff] (!%p193_p2)  }
   0xc   : > { %4461 = vmatpush3.bf16.msra.mxu0 (!%p193_p2), %v4903_v6  ;;  %v4912_v15 = vld [vmem:[%s6313_s1 + $0x1b4] sm:$0xff] (!%p193_p2)   ;;  %v4916_v19 = vld [vmem:[%s6313_s1 + $0x1bc] sm:$0xff] (!%p193_p2)   ;;  %v4920_v23 = vld [vmem:[%s6313_s1 + $0x1c4] sm:$0xff] (!%p193_p2)  }
   0xd   : > { %4483 = vmatpush3.bf16.msra.mxu1 %v4904_v7  ;;  %4462 = vmatprep.subr.bf16.mxu0 %v4905_v8  ;;  %s6319_s19 = smov (!%p226_p3, %s3726_s19), 1  ;;  %v4921_v24 = vld [vmem:[%s6313_s1 + $0x18c] sm:$0xff]   ;;  %v4925_v28 = vld [vmem:[%s6313_s1 + $0x194] sm:$0xff]   ;;  %v4937_v47 = vld [vmem:[%s6313_s1 + $0x40] sm:$0xff]  }
   0xe   : > { %4484 = vmatprep.subr.bf16.mxu1 %v4906_v9  ;;  %v4922_v25 = vld [vmem:[%s6313_s1 + $0x20c] sm:$0xff]   ;;  %s4885_s26 = smul.u32 60, %s6319_s19  ;;  %v4926_v29 = vld [vmem:[%s6313_s1 + $0x214] sm:$0xff]   ;;  %v4938_v6 = vld [vmem:[%s6313_s1 + $0x21c] sm:$0xff]   ;;  %s4457_s20 = sshll.u32 %s6319_s19, 4 }
   0xf   : > { %v4923_v26 = vld [vmem:[%s6313_s1 + $0x14c] sm:$0xff]   ;;  %v4927_v30 = vld [vmem:[%s6313_s1 + $0x154] sm:$0xff]   ;;  %s235_s23 = scalar_lea.vmem %s6315_s3, %s4457_s20  ;;  %s241_s29 = scalar_lea.vmem %s6317_s5, %s6319_s19 }
  0x10   : > { %4463 = vmatpush3.bf16.msra.mxu0 %v4907_v10  ;;  %v4924_v27 = vld [vmem:[%s6313_s1 + $0x1cc] sm:$0xff]   ;;  %s5336_s12 = scalar_lea.vmem %s6312_s0, %s4885_s26  ;;  %v4928_v31 = vld [vmem:[%s6313_s1 + $0x1d4] sm:$0xff]   ;;  %s238_s26 = scalar_lea.vmem %s6316_s4, %s6319_s19 }
  0x11   : > { %4485 = vmatpush3.bf16.msra.mxu1 %v4908_v11  ;;  %4464 = vmatprep.subr.bf16.mxu0 %v4909_v12  ;;  %v243_v32 = vld [vmem:[%s5336_s12] sm:$0xff]  ;;  %v5346_v33 = vld [vmem:[%s5336_s12 + $0x14] sm:$0xff]  ;;  %v320_v34 = vld [vmem:[%s5336_s12 + $0x28] sm:$0x11] }
  0x12   : > { %4486 = vmatprep.subr.bf16.mxu1 %v4910_v13  ;;  %v3806_v35 = vcombine.high %v243_v32, %v5346_v33  ;;  %v5350_v36 = vcombine.high %v320_v34, %v320_v34  ;;  %v244_v37 = vld [vmem:[%s5336_s12 + $0x8] sm:$0xff]  ;;  %v5354_v38 = vld [vmem:[%s5336_s12 + $0x1c] sm:$0xff]  ;;  %v321_v39 = vld [vmem:[%s5336_s12 + $0x30] sm:$0x11]  ;;  %v5358_v40 = vcombine.low %v243_v32, %v5346_v33  ;;  %v5360_v41 = vcombine.low %v320_v34, %v320_v34 }
  0x13   : > { %v5363_v42 = vcombine.high %v244_v37, %v5354_v38  ;;  %v5365_v43 = vcombine.high %v321_v39, %v321_v39  ;;  %v5368_v44 = vcombine.low %v244_v37, %v5354_v38  ;;  %v5370_v45 = vcombine.low %v321_v39, %v321_v39  ;;  %v4939_v12 = vld [vmem:[%s6313_s1] sm:$0xff]   ;;  %v4940_v13 = vld [vmem:[%s6313_s1 + $0x48] sm:$0xff]   ;;  %v4948_v37 = vld [vmem:[%s6313_s1 + $0x18] sm:$0xff]  }
  0x14   : > { %4465 = vmatpush3.bf16.msra.mxu0 %v4911_v14  ;;  %v443_v48 = vshrl.u32 %v3806_v35, 16  ;;  %v445_v49 = vshll.u32 %v3806_v35, 16  ;;  %v450_v50 = vshll.u32 %v5350_v36, 16  ;;  %v431_v51 = vshrl.u32 %v5358_v40, 16  ;;  %v4952_v32 = vld [vmem:[%s6313_s1 + $0xc0] sm:$0xff]  }
  0x15   : > { %4487 = vmatpush3.bf16.msra.mxu1 %v4912_v15  ;;  %4466 = vmatprep.subr.bf16.mxu0 %v4913_v16  ;;  %v467_v52 = vshrl.u32 %v5363_v42, 16  ;;  %v469_v53 = vshll.u32 %v5363_v42, 16  ;;  %v474_v54 = vshll.u32 %v5365_v43, 16  ;;  %v433_v55 = vshll.u32 %v5358_v40, 16  ;;  %v4941_v15 = vld [vmem:[%s6313_s1 + $0x224] sm:$0xff]  }
  0x16   : > { %4488 = vmatprep.subr.bf16.mxu1 %v4914_v17  ;;  %v447_v56 = vrot.slane %v445_v49, 1  ;;  %v452_v57 = vrot.slane %v450_v50, 1  ;;  %v438_v58 = vshll.u32 %v5360_v41, 16  ;;  %v455_v59 = vshrl.u32 %v5368_v44, 16  ;;  %v4942_v16 = vld [vmem:[%s6313_s1 + $0x8] sm:$0xff]   ;;  %v4943_v17 = vld [vmem:[%s6313_s1 + $0x50] sm:$0xff]  }
  0x17   : > { %v471_v60 = vrot.slane %v469_v53, 1  ;;  %v476_v61 = vrot.slane %v474_v54, 1  ;;  %v435_v62 = vrot.slane %v433_v55, 1  ;;  %v457_v63 = vshll.u32 %v5368_v44, 16  ;;  %v4956_v50 = vld [vmem:[%s6313_s1 + $0xc8] sm:$0xff]   ;;  %v4960_v54 = vld [vmem:[%s6313_s1 + $0xd0] sm:$0xff]  }
  0x18   : > { %4467 = vmatpush3.bf16.msra.mxu0 %v4915_v18  ;;  %v448_v0 = vor.u32 %v447_v56, %v443_v48  ;;  %v440_v1 = vrot.slane %v438_v58, 1  ;;  %v462_v2 = vshll.u32 %v5370_v45, 16  ;;  %v5197_v18 = vmov 0   ;;  %v4954_v48 = vld [vmem:[%s6313_s1 + $0x80] sm:$0xff]   ;;  %v4958_v53 = vld [vmem:[%s6313_s1 + $0x88] sm:$0xff]   ;;  %v4959_v56 = vld [vmem:[%s6313_s1 + $0x70] sm:$0xff]  }
  0x19   : > { %4489 = vmatpush3.bf16.msra.mxu1 %v4916_v19  ;;  %4468 = vmatprep.subr.bf16.mxu0 %v4917_v20  ;;  %v472_v3 = vor.u32 %v471_v60, %v467_v52  ;;  %v436_v4 = vor.u32 %v435_v62, %v431_v51  ;;  %v459_v5 = vrot.slane %v457_v63, 1  ;;  %v5411_v19 = vsel %vm711_vm1, 65535, %v5197_v18  ;;  %v4944_v20 = vld [vmem:[%s6313_s1 + $0x22c] sm:$0xff]   ;;  %v4953_v51 = vld [vmem:[%s6313_s1 + $0x20] sm:$0xff]   ;;  %v4966_v60 = vld [vmem:[%s6313_s1 + $0x98] sm:$0xff]  }
  0x1a   : > { %4490 = vmatprep.subr.bf16.mxu1 %v4918_v21  ;;  %v453_v7 = vsel %vm429_vm0, %v448_v0, %v452_v57  ;;  %v464_v8 = vrot.slane %v462_v2, 1  ;;  %v4947_v21 = vld [vmem:[%s6313_s1 + $0x234] ss:$0 sps:$4 sm:$0x11]   ;;  %v4955_v52 = vld [vmem:[%s6313_s1 + $0x68] sm:$0xff]   ;;  %v4964_v57 = vld [vmem:[%s6313_s1 + $0xd8] sm:$0xff]  }
  0x1b   : > { %749 = vmatprep.mubr.bf16.mxu0 %v453_v7  ;;  %v477_v9 = vsel %vm429_vm0, %v472_v3, %v476_v61  ;;  %v441_v10 = vsel %vm429_vm0, %v436_v4, %v440_v1  ;;  %v460_v11 = vor.u32 %v459_v5, %v455_v59  ;;  %v4957_v55 = vld [vmem:[%s6313_s1 + $0x28] sm:$0xff]   ;;  %v4961_v58 = vld [vmem:[%s6313_s1 + $0x30] sm:$0xff]   ;;  %v4963_v59 = vld [vmem:[%s6313_s1 + $0x78] sm:$0xff]  }
  0x1c   : > { %4469 = vmatpush3.bf16.msra.mxu0 %v4919_v22  ;;  %790 = vmatprep.mubr.bf16.mxu1 %v477_v9  ;;  %v245_v22 = vld [vmem:[%s5336_s12 + $0x10] sm:$0xf]  ;;  %v4967_v61 = vld [vmem:[%s6313_s1 + $0xe0] sm:$0xff]   ;;  %v4965_v62 = vld [vmem:[%s6313_s1 + $0x38] sm:$0xff]  }
  0x1d   : > { %4491 = vmatpush3.bf16.msra.mxu1 %v4920_v23  ;;  %4470 = vmatprep.subr.bf16.mxu0 %v4921_v24  ;;  %v465_v14 = vsel %vm429_vm0, %v460_v11, %v464_v8  ;;  %v5421_v23 = vld [vmem:[%s5336_s12 + $0x24] sm:$0xf]  ;;  %v4945_v24 = vld [vmem:[%s6313_s1 + $0x10] sm:$0xff]   ;;  %v4970_v0 = vld [vmem:[%s6313_s1 + $0xe8] sm:$0xff]  }
  0x1e   : > { %4492 = vmatprep.subr.bf16.mxu1 %v4922_v25  ;;  %v5428_v25 = vcombine.low %v245_v22, %v5421_v23  ;;  %v4968_v63 = vld [vmem:[%s6313_s1 + $0xa0] sm:$0xff]   ;;  %v4971_v2 = vld [vmem:[%s6313_s1 + $0xa8] sm:$0xff]   ;;  %v4973_v3 = vld [vmem:[%s6313_s1 + $0xf0] sm:$0xff]  }
  0x1f   : > { %v4969_v1 = vld [vmem:[%s6313_s1 + $0x100] sm:$0xff]   ;;  %v4972_v4 = vld [vmem:[%s6313_s1 + $0x108] sm:$0xff]   ;;  %v4978_v5 = vld [vmem:[%s6313_s1 + $0x118] ss:$0 sps:$4 sm:$0x11]  }
  0x20   : > { %4471 = vmatpush3.bf16.msra.mxu0 %v4923_v26  ;;  %v5431_v26 = vld [vmem:[%s5336_s12 + $0x38] ss:$0 sps:$4 sm:$0x11]   ;;  %v4975_v7 = vld [vmem:[%s6313_s1 + $0x110] sm:$0xff]   ;;  %v4987_v18 = vld [vmem:[%s6313_s1 + $0x288] sm:$0xff]  }
  0x21   : > { %4493 = vmatpush3.bf16.msra.mxu1 %v4924_v27  ;;  %4472 = vmatprep.subr.bf16.mxu0 %v4925_v28  ;;  %v4946_v27 = vld [vmem:[%s6313_s1 + $0x58] sm:$0xff]   ;;  %v479_v28 = vshrl.u32 %v5428_v25, 16  ;;  %v4991_v22 = vld [vmem:[%s6313_s1 + $0x290] sm:$0xff]  }
  0x22   : > { %4494 = vmatprep.subr.bf16.mxu1 %v4926_v29  ;;  %v481_v29 = vshll.u32 %v5428_v25, 16  ;;  %v4977_v8 = vld [vmem:[%s6313_s1 + $0xb8] sm:$0xff]  }
  0x23   : > { %v4979_v9 = vld [vmem:[%s6313_s1 + $0x278] sm:$0xff]  }
  0x24   : > { %4473 = vmatpush3.bf16.msra.mxu0 %v4927_v30  ;;  %v486_v30 = vshll.u32 %v5431_v26, 16  ;;  %v483_v34 = vrot.slane %v481_v29, 1  ;;  %v4980_v11 = vld [vmem:[%s6313_s1 + $0x2f8] sm:$0xff]  }
  0x25   : > { %4495 = vmatpush3.bf16.msra.mxu1 %v4928_v31  ;;  %4801 = vmatprep.subr.bf16.mxu0 %v5195_v46  ;;  %v715_v31 = vand.u32 %v4947_v21, %v5411_v19  ;;  %v4990_v21 = vld [vmem:[%s6313_s1 + $0x2c8] sm:$0xff]   ;;  %v4996_v29 = vld [vmem:[%s6313_s1 + $0x318] sm:$0xff]  }
  0x26   : > { %4507 = vmatprep.subr.bf16.mxu1 %v4937_v47  ;;  %v484_v39 = vor.u32 %v483_v34, %v479_v28  ;;  %v4951_v47 = vld [vmem:[%s6313_s1 + $0x60] sm:$0xff]   ;;  %v4995_v28 = vld [vmem:[%s6313_s1 + $0x298] sm:$0xff]  }
  0x27   : > { %750 = vmatmul.mubr.bf16.vlgmr.msra.gmra.mrb[0].mxu0 %v441_v10  ;;  %v1060_v10 = vand.u32 %v4978_v5, %v5411_v19  ;;  %v5000_v34 = vld [vmem:[%s6313_s1 + $0x320] sm:$0xff]   ;;  %v1187_v5 = vld [vmem:[%s5336_s12 + $0x10] sm:$0xe] }
  0x28   : > { %4802 = vmatpush3.bf16.msra.mxu0 %v4938_v6  ;;  %4809 = vmatprep.mubr.msk.bf16.mxu0 %vm5196_vm2, %v5195_v46  ;;  %v4976_v6 = vld [vmem:[%s6313_s1 + $0xf8] sm:$0xff]  }
  0x29   : > { %791 = vmatmul.mubr.bf16.vlgmr.msra.gmra.mrb[0].mxu1 %v465_v14  ;;  %4803 = vmatprep.subr.bf16.mxu0 %v5195_v46  ;;  %v4983_v14 = vld [vmem:[%s6313_s1 + $0x280] sm:$0xff]  }
  0x2a   : > { %4508 = vmatpush3.bf16.msra.mxu1 %v4939_v12  ;;  %1094 = vmatprep.mubr.bf16.mxu1 %v3806_v35  ;;  %v488_v35 = vrot.slane %v486_v30, 1  ;;  %v4981_v12 = vld [vmem:[%s6313_s1 + $0x238] sm:$0xff]  }
  0x2b   : > { %4509 = vmatprep.subr.bf16.mxu1 %v4940_v13  ;;  %v4982_v13 = vld [vmem:[%s6313_s1 + $0x2b8] sm:$0xff]  }
  0x2c   : > { %4804 = vmatpush3.bf16.msra.mxu0 %v4941_v15  ;;  %v489_v49 = vsel %vm429_vm0, %v484_v39, %v488_v35  ;;  %v4984_v15 = vld [vmem:[%s6313_s1 + $0x300] sm:$0xff]   ;;  %v4997_v30 = vld [vmem:[%s6313_s1 + $0x258] sm:$0xff]   ;;  %v5003_v39 = vld [vmem:[%s6313_s1 + $0x2a8] sm:$0xff]  }
  0x2d   : > { %4805 = vmatprep.subr.bf16.mxu0 %v5195_v46  ;;  %v5001_v35 = vld [vmem:[%s6313_s1 + $0x260] sm:$0xff]  }
  0x2e   : > { %4510 = vmatpush3.bf16.msra.mxu1 %v4942_v16  ;;  %v4985_v16 = vld [vmem:[%s6313_s1 + $0x240] sm:$0xff]  }
  0x2f   : > { %4511 = vmatprep.subr.bf16.mxu1 %v4943_v17  ;;  %v4986_v17 = vld [vmem:[%s6313_s1 + $0x2c0] sm:$0xff]  }
  0x30   : > { %4806 = vmatpush3.bf16.msra.mxu0 %v4944_v20  ;;  %v4989_v20 = vld [vmem:[%s6313_s1 + $0x248] sm:$0xff]  }
  0x31   : > { %4807 = vmatprep.subr.bf16.mxu0 %v5195_v46 }
  0x32   : > { %4512 = vmatpush3.bf16.msra.mxu1 %v4945_v24  ;;  %v4992_v24 = vld [vmem:[%s6313_s1 + $0x310] sm:$0xff]  }
  0x33   : > { %4513 = vmatprep.subr.bf16.mxu1 %v4946_v27  ;;  %v4994_v27 = vld [vmem:[%s6313_s1 + $0x2d0] sm:$0xff]  }
  0x34   : > { %4808 = vmatpush3.bf16.msra.mxu0 %v715_v31  ;;  %v4998_v31 = vld [vmem:[%s6313_s1 + $0x2d8] sm:$0xff]  }
  0x35   : > { %4529 = vmatprep.subr.bf16.mxu0 %v4952_v32  ;;  %v4999_v32 = vld [vmem:[%s6313_s1 + $0x2a0] sm:$0xff]  }
  0x36   : > { %4514 = vmatpush3.bf16.msra.mxu1 %v4948_v37  ;;  %v5002_v37 = vld [vmem:[%s6313_s1 + $0x2e0] sm:$0xff]  }
  0x37   : > { %4810 = vmatmul.mubr.msk.bf16.vlgmr.msra.gmra.mrb[4].mxu0 %vm707_vm3, %v489_v49  ;;  %4515 = vmatprep.subr.bf16.mxu1 %v4951_v47  ;;  %v1278_v47 = vrot.slane %v5350_v36, 1  ;;  %v1186_v49 = vld [vmem:[%s5336_s12 + $0x8] sm:$0xee] }
  0x38   : > { %4530 = vmatpush3.bf16.msra.mxu0 %v4954_v48  ;;  %1135 = vmatprep.mubr.bf16.mxu0 %v5363_v42  ;;  %v4962_v42 = vld [vmem:[%s6313_s1 + $0x90] sm:$0xff]   ;;  %v1185_v48 = vld [vmem:[%s5336_s12] sm:$0xee]  ;;  %v5005_v36 = vld [vmem:[%s6313_s1 + $0x268] sm:$0xff]  }
  0x39   : > { %4531 = vmatprep.subr.bf16.mxu0 %v4956_v50  ;;  %v5004_v50 = vld [vmem:[%s6313_s1 + $0x328] sm:$0xff]  }
  0x3a   : > { %4516 = vmatpush3.bf16.msra.mxu1 %v4953_v51  ;;  %v5624_v51 = vcombine.high %v1185_v48, %v5346_v33 }
  0x3b   : > { %4517 = vmatprep.subr.bf16.mxu1 %v4955_v52  ;;  %v5627_v52 = vcombine.high %v1186_v49, %v5354_v38 }
  0x3c   : > { %4532 = vmatpush3.bf16.msra.mxu0 %v4958_v53  ;;  %v1284_v53 = vrot.slane %v5365_v43, 1  ;;  %v5006_v43 = vld [vmem:[%s6313_s1 + $0x2e8] sm:$0xff]  }
  0x3d   : > { %4533 = vmatprep.subr.bf16.mxu0 %v4960_v54  ;;  %v5634_v54 = vcombine.low %v1185_v48, %v5346_v33  ;;  %v5008_v33 = vld [vmem:[%s6313_s1 + $0x330] sm:$0xff]   ;;  %v1778_v48 = vshrl.u32 %v5627_v52, 16 }
  0x3e   : > { %4518 = vmatpush3.bf16.msra.mxu1 %v4957_v55  ;;  %v5007_v55 = vld [vmem:[%s6313_s1 + $0x2b0] sm:$0xff]  }
  0x3f   : > { %4519 = vmatprep.subr.bf16.mxu1 %v4959_v56  ;;  %v1277_v56 = vrot.slane %v5624_v51, 1 }
  0x40   : > { %4534 = vmatpush3.bf16.msra.mxu0 %v4962_v42  ;;  %v1283_v42 = vrot.slane %v5627_v52, 1 }
  0x41   : > { %4535 = vmatprep.subr.bf16.mxu0 %v4964_v57  ;;  %v5645_v57 = vcombine.low %v1186_v49, %v5354_v38  ;;  %v1274_v38 = vrot.slane %v5634_v54, 1 }
  0x42   : > { %4520 = vmatpush3.bf16.msra.mxu1 %v4961_v58  ;;  %v1279_v58 = vsel %vm1273_vm4, %v1277_v56, %v1278_v47  ;;  %v5037_v47 = vld [vmem:[%s6313_s1 + $0x424] sm:$0xff]  }
  0x43   : > { %4521 = vmatprep.subr.bf16.mxu1 %v4963_v59  ;;  %v1285_v59 = vsel %vm1273_vm4, %v1283_v42, %v1284_v53  ;;  %v5039_v56 = vld [vmem:[%s6313_s1 + $0x3e4] sm:$0xff]   ;;  %v5041_v42 = vld [vmem:[%s6313_s1 + $0x42c] sm:$0xff]  }
  0x44   : > { %4536 = vmatpush3.bf16.msra.mxu0 %v4966_v60  ;;  %v1275_v60 = vrot.slane %v5360_v41, 1  ;;  %v5015_v41 = vld [vmem:[%s6313_s1 + $0x394] sm:$0xff]  }
  0x45   : > { %4537 = vmatprep.subr.bf16.mxu0 %v4967_v61  ;;  %v5009_v61 = vld [vmem:[%s6313_s1 + $0x270] sm:$0xff]  }
  0x46   : > { %4522 = vmatpush3.bf16.msra.mxu1 %v4965_v62  ;;  %v1281_v62 = vrot.slane %v5370_v45, 1  ;;  %v5016_v45 = vld [vmem:[%s6313_s1 + $0x338] sm:$0xff]  }
  0x47   : > { %4813 = vmatprep.subr.bf16.mxu1 %v5195_v46 }
  0x48   : > { %4538 = vmatpush3.bf16.msra.mxu0 %v4968_v63  ;;  %v5010_v63 = vld [vmem:[%s6313_s1 + $0x2f0] sm:$0xff]  }
  0x49   : > { %1095 = vmatmul.mubr.bf16.vlgmr.msra.gmra.mrb[4].mxu1 %v5358_v40  ;;  %4539 = vmatprep.subr.bf16.mxu0 %v4970_v0  ;;  %v4974_v40 = vld [vmem:[%s6313_s1 + $0xb0] sm:$0xff]   ;;  %v1280_v0 = vrot.slane %v5645_v57, 1 }
  0x4a   : > { %4814 = vmatpush3.bf16.msra.mxu1 %v4969_v1  ;;  %4821 = vmatprep.mubr.msk.bf16.mxu1 %vm5196_vm2, %v5195_v46  ;;  %v1276_v1 = vsel %vm1273_vm4, %v1274_v38, %v1275_v60  ;;  %v1761_v38 = vshrl.u32 %v5645_v57, 16 }
  0x4b   : > { %4815 = vmatprep.subr.bf16.mxu1 %v5195_v46 }
  0x4c   : > { %4540 = vmatpush3.bf16.msra.mxu0 %v4971_v2  ;;  %v1282_v2 = vsel %vm1273_vm4, %v1280_v0, %v1281_v62  ;;  %v5043_v62 = vld [vmem:[%s6313_s1 + $0x3ec] sm:$0xff]   ;;  %v1764_v0 = vshll.u32 %v5645_v57, 16  ;;  %v5785_v57 = vrot.slane %v1761_v38, 1  ;;  %v5067_v38 = vld [vmem:[%s6313_s1 + $0x478] sm:$0xff]  }
  0x4d   : > { %4541 = vmatprep.subr.bf16.mxu0 %v4973_v3  ;;  %v5017_v3 = vld [vmem:[%s6313_s1 + $0x354] sm:$0xff]  }
  0x4e   : > { %4816 = vmatpush3.bf16.msra.mxu1 %v4972_v4  ;;  %v5018_v4 = vld [vmem:[%s6313_s1 + $0x39c] sm:$0xff]  }
  0x4f   : > { %4817 = vmatprep.subr.bf16.mxu1 %v5195_v46 }
  0x50   : > { %4542 = vmatpush3.bf16.msra.mxu0 %v4974_v40  ;;  %v5019_v40 = vld [vmem:[%s6313_s1 + $0x340] sm:$0xff]  }
  0x51   : > { %4543 = vmatprep.subr.bf16.mxu0 %v4976_v6  ;;  %v5020_v6 = vld [vmem:[%s6313_s1 + $0x35c] sm:$0xff]  }
  0x52   : > { %4818 = vmatpush3.bf16.msra.mxu1 %v4975_v7  ;;  %v5025_v7 = vld [vmem:[%s6313_s1 + $0x350] ss:$0 sps:$4 sm:$0x11]  }
  0x53   : > { %4819 = vmatprep.subr.bf16.mxu1 %v5195_v46 }
  0x54   : > { %4544 = vmatpush3.bf16.msra.mxu0 %v4977_v8  ;;  %v5021_v8 = vld [vmem:[%s6313_s1 + $0x3a4] sm:$0xff]  }
  0x55   : > { %4556 = vmatprep.subr.bf16.mxu0 %v4979_v9  ;;  %v5022_v9 = vld [vmem:[%s6313_s1 + $0x348] sm:$0xff]  }
  0x56   : > { %4820 = vmatpush3.bf16.msra.mxu1 %v1060_v10  ;;  %v5697_v10 = vcombine.low %v1187_v5, %v5421_v23  ;;  %v5047_v5 = vld [vmem:[%s6313_s1 + $0x3f4] sm:$0xff]  }
  0x57   : > { %1136 = vmatmul.mubr.bf16.vlgmr.msra.gmra.mrb[8].mxu0 %v5368_v44  ;;  %4578 = vmatprep.subr.bf16.mxu1 %v4980_v11  ;;  %v4988_v44 = vld [vmem:[%s6313_s1 + $0x308] sm:$0xff]  }
  0x58   : > { %4557 = vmatpush3.bf16.msra.mxu0 %v4981_v12  ;;  %1544 = vmatprep.mubr.bf16.mxu0 %v1279_v58  ;;  %v5023_v11 = vld [vmem:[%s6313_s1 + $0x364] sm:$0xff]   ;;  %v5024_v12 = vld [vmem:[%s6313_s1 + $0x3ac] sm:$0xff]   ;;  %v1286_v23 = vrot.slane %v5697_v10, 1 }
  0x59   : > { %4822 = vmatmul.mubr.msk.bf16.vlgmr.msra.gmra.mrb[8].mxu1 %vm707_vm3, %v5428_v25  ;;  %4558 = vmatprep.subr.bf16.mxu0 %v4983_v14  ;;  %v4993_v25 = vld [vmem:[%s6313_s1 + $0x250] sm:$0xff]   ;;  %v1510_v14 = vand.u32 %v5025_v7, %v5411_v19 }
  0x5a   : > { %4579 = vmatpush3.bf16.msra.mxu1 %v4982_v13  ;;  %1585 = vmatprep.mubr.bf16.mxu1 %v1285_v59  ;;  %v1287_v13 = vrot.slane %v5431_v26, 1  ;;  %v5026_v26 = vld [vmem:[%s6313_s1 + $0x36c] sm:$0xff]  }
  0x5b   : > { %4580 = vmatprep.subr.bf16.mxu1 %v4984_v15  ;;  %v1744_v15 = vshrl.u32 %v5624_v51, 16  ;;  %v1638_v7 = vld [vmem:[%s5336_s12 + $0x30] sm:$0x33] }
  0x5c   : > { %4559 = vmatpush3.bf16.msra.mxu0 %v4985_v16  ;;  %v5029_v16 = vld [vmem:[%s6313_s1 + $0x414] sm:$0xff]  }
  0x5d   : > { %4560 = vmatprep.subr.bf16.mxu0 %v4987_v18  ;;  %v1727_v18 = vshrl.u32 %v5634_v54, 16 }
  0x5e   : > { %4581 = vmatpush3.bf16.msra.mxu1 %v4986_v17  ;;  %v1747_v17 = vshll.u32 %v5624_v51, 16 }
  0x5f   : > { %4582 = vmatprep.subr.bf16.mxu1 %v4988_v44  ;;  %v5028_v44 = vld [vmem:[%s6313_s1 + $0x3b4] sm:$0xff]  }
  0x60   : > { %4561 = vmatpush3.bf16.msra.mxu0 %v4989_v20  ;;  %v1730_v20 = vshll.u32 %v5634_v54, 16  ;;  %v1781_v54 = vshll.u32 %v5627_v52, 16 }
  0x61   : > { %4562 = vmatprep.subr.bf16.mxu0 %v4991_v22  ;;  %v5031_v22 = vld [vmem:[%s6313_s1 + $0x3d4] sm:$0xff]  }
  0x62   : > { %4583 = vmatpush3.bf16.msra.mxu1 %v4990_v21  ;;  %v1288_v21 = vsel %vm1273_vm4, %v1286_v23, %v1287_v13 }
  0x63   : > { %4584 = vmatprep.subr.bf16.mxu1 %v4992_v24  ;;  %v5033_v24 = vld [vmem:[%s6313_s1 + $0x41c] sm:$0xff]  }
  0x64   : > { %4563 = vmatpush3.bf16.msra.mxu0 %v4993_v25  ;;  %v1746_v25 = vrot.slane %v1744_v15, 1  ;;  %v5050_v15 = vld [vmem:[%s6313_s1 + $0x3fc] sm:$0xff]  }
  0x65   : > { %4564 = vmatprep.subr.bf16.mxu0 %v4995_v28  ;;  %v1749_v28 = vrot.slane %v1747_v17, 2 }
  0x66   : > { %4585 = vmatpush3.bf16.msra.mxu1 %v4994_v27  ;;  %v5030_v27 = vld [vmem:[%s6313_s1 + $0x374] sm:$0xff]  }
  0x67   : > { %4586 = vmatprep.subr.bf16.mxu1 %v4996_v29  ;;  %v5032_v29 = vld [vmem:[%s6313_s1 + $0x3bc] sm:$0xff]  }
  0x68   : > { %4565 = vmatpush3.bf16.msra.mxu0 %v4997_v30  ;;  %v5035_v30 = vld [vmem:[%s6313_s1 + $0x3dc] sm:$0xff]  }
  0x69   : > { %4566 = vmatprep.subr.bf16.mxu0 %v4999_v32  ;;  %v1729_v32 = vrot.slane %v1727_v18, 1  ;;  %v5812_v18 = vld [vmem:[%s5336_s12 + $0x38] ss:$0 sps:$4 sm:$0x33]  }
  0x6a   : > { %4587 = vmatpush3.bf16.msra.mxu1 %v4998_v31  ;;  %v1637_v31 = vld [vmem:[%s5336_s12 + $0x28] sm:$0x33] }
  0x6b   : > { %4588 = vmatprep.subr.bf16.mxu1 %v5000_v34  ;;  %v1732_v34 = vrot.slane %v1730_v20, 2 }
  0x6c   : > { %4567 = vmatpush3.bf16.msra.mxu0 %v5001_v35  ;;  %v5034_v35 = vld [vmem:[%s6313_s1 + $0x37c] sm:$0xff]  }
  0x6d   : > { %4568 = vmatprep.subr.bf16.mxu0 %v5003_v39  ;;  %v5746_v39 = vcombine.low %v1637_v31, %v1637_v31 }
  0x6e   : > { %4589 = vmatpush3.bf16.msra.mxu1 %v5002_v37  ;;  %v5744_v37 = vcombine.high %v1637_v31, %v1637_v31  ;;  %v5054_v31 = vld [vmem:[%s6313_s1 + $0x464] sm:$0xff]  }
  0x6f   : > { %4590 = vmatprep.subr.bf16.mxu1 %v5004_v50  ;;  %v1735_v51 = vshrl.u32 %v5746_v39, 16  ;;  %v1738_v53 = vshll.u32 %v5746_v39, 16 }
  0x70   : > { %4569 = vmatpush3.bf16.msra.mxu0 %v5005_v36  ;;  %v1752_v49 = vshrl.u32 %v5744_v37, 16  ;;  %v1755_v50 = vshll.u32 %v5744_v37, 16  ;;  %v5036_v36 = vld [vmem:[%s6313_s1 + $0x3c4] sm:$0xff]  }
  0x71   : > { %4570 = vmatprep.subr.bf16.mxu0 %v5007_v55  ;;  %v5038_v55 = vld [vmem:[%s6313_s1 + $0x384] sm:$0xff]   ;;  %v1737_v59 = vrot.slane %v1735_v51, 1  ;;  %v1740_v60 = vrot.slane %v1738_v53, 2  ;;  %v5056_v51 = vld [vmem:[%s6313_s1 + $0x40c] sm:$0xff]  }
  0x72   : > { %4591 = vmatpush3.bf16.msra.mxu1 %v5006_v43  ;;  %v1750_v43 = vor.u32 %v1749_v28, %v1746_v25  ;;  %v1757_v58 = vrot.slane %v1755_v50, 2  ;;  %v5051_v25 = vld [vmem:[%s6313_s1 + $0x45c] sm:$0xff]   ;;  %v1803_v28 = vshrl.u32 %v5812_v18, 16 }
  0x73   : > { %4592 = vmatprep.subr.bf16.mxu1 %v5008_v33  ;;  %v1754_v33 = vrot.slane %v1752_v49, 1 }
  0x74   : > { %4571 = vmatpush3.bf16.msra.mxu0 %v5009_v61  ;;  %v5040_v61 = vld [vmem:[%s6313_s1 + $0x3cc] sm:$0xff]   ;;  %v1805_v49 = vrot.slane %v1803_v28, 1 }
  0x75   : > { %4825 = vmatprep.subr.bf16.mxu0 %v5195_v46  ;;  %v1758_v52 = vor.u32 %v1757_v58, %v1754_v33  ;;  %v5063_v33 = vld [vmem:[%s6313_s1 + $0x470] sm:$0xff]   ;;  %v5089_v28 = vld [vmem:[%s6313_s1 + $0x4e8] sm:$0xff]  }
  0x76   : > { %4593 = vmatpush3.bf16.msra.mxu1 %v5010_v63 }
  0x77   : > { %1545 = vmatmul.mubr.bf16.vlgmr.msra.gmra.mrb[12].mxu0 %v1276_v1  ;;  %4605 = vmatprep.subr.bf16.mxu1 %v5015_v41  ;;  %v1759_v63 = vsel %vm1725_vm5, %v1750_v43, %v1758_v52  ;;  %v5045_v41 = vld [vmem:[%s6313_s1 + $0x434] sm:$0xff]   ;;  %v1780_v1 = vrot.slane %v1778_v48, 1 }
  0x78   : > { %4826 = vmatpush3.bf16.msra.mxu0 %v5016_v45  ;;  %4833 = vmatprep.mubr.msk.bf16.mxu0 %vm5196_vm2, %v5195_v46  ;;  %v5042_v45 = vld [vmem:[%s6313_s1 + $0x38c] sm:$0xff]  }
  0x79   : > { %1586 = vmatmul.mubr.bf16.vlgmr.msra.gmra.mrb[12].mxu1 %v1282_v2  ;;  %4827 = vmatprep.subr.bf16.mxu0 %v5195_v46  ;;  %v1733_v2 = vor.u32 %v1732_v34, %v1729_v32  ;;  %v5055_v32 = vld [vmem:[%s6313_s1 + $0x44c] sm:$0xff]  }
  0x7a   : > { %4606 = vmatpush3.bf16.msra.mxu1 %v5017_v3  ;;  %2066 = vmatprep.mubr.bf16.mxu1 %v1759_v63  ;;  %v1741_v3 = vor.u32 %v1740_v60, %v1737_v59  ;;  %v5057_v34 = vld [vmem:[%s6313_s1 + $0x46c] ss:$0 sps:$4 sm:$0x11]   ;;  %v5064_v52 = vld [vmem:[%s6313_s1 + $0x4f0] sm:$0xff]   ;;  %v5065_v59 = vld [vmem:[%s6313_s1 + $0x4b8] sm:$0xff]  }
  0x7b   : > { %4607 = vmatprep.subr.bf16.mxu1 %v5018_v4  ;;  %v1795_v4 = vshrl.u32 %v5697_v10, 16  ;;  %v5069_v63 = vld [vmem:[%s6313_s1 + $0x4c0] sm:$0xff]  }
  0x7c   : > { %4828 = vmatpush3.bf16.msra.mxu0 %v5019_v40  ;;  %v1783_v40 = vrot.slane %v1781_v54, 2  ;;  %v1742_v13 = vsel %vm1725_vm5, %v1733_v2, %v1741_v3  ;;  %v5060_v54 = vld [vmem:[%s6313_s1 + $0x4b0] sm:$0xff]   ;;  %v5074_v2 = vld [vmem:[%s6313_s1 + $0x548] sm:$0xff]  }
  0x7d   : > { %4829 = vmatprep.subr.bf16.mxu0 %v5195_v46  ;;  %v1797_v23 = vrot.slane %v1795_v4, 1  ;;  %v5075_v3 = vld [vmem:[%s6313_s1 + $0x488] sm:$0xff]  }
  0x7e   : > { %4608 = vmatpush3.bf16.msra.mxu1 %v5020_v6  ;;  %v5049_v6 = vld [vmem:[%s6313_s1 + $0x43c] sm:$0xff]   ;;  %v1784_v20 = vor.u32 %v1783_v40, %v1780_v1  ;;  %v5076_v4 = vld [vmem:[%s6313_s1 + $0x508] sm:$0xff]   ;;  %v5077_v40 = vld [vmem:[%s6313_s1 + $0x4d0] sm:$0xff]  }
  0x7f   : > { %4609 = vmatprep.subr.bf16.mxu1 %v5021_v8  ;;  %v1766_v8 = vrot.slane %v1764_v0, 2  ;;  %v5070_v0 = vld [vmem:[%s6313_s1 + $0x540] sm:$0xff]  }
  0x80   : > { %4830 = vmatpush3.bf16.msra.mxu0 %v5022_v9  ;;  %v1798_v9 = vshll.u32 %v5697_v10, 16  ;;  %v5072_v1 = vld [vmem:[%s6313_s1 + $0x500] sm:$0xff]  }
  0x81   : > { %4831 = vmatprep.subr.bf16.mxu0 %v5195_v46  ;;  %v1767_v53 = vor.u32 %v1766_v8, %v5785_v57  ;;  %v5078_v57 = vld [vmem:[%s6313_s1 + $0x550] sm:$0xff]   ;;  %v5082_v8 = vld [vmem:[%s6313_s1 + $0x558] sm:$0xff]  }
  0x82   : > { %4610 = vmatpush3.bf16.msra.mxu1 %v5023_v11  ;;  %v5795_v11 = vcombine.high %v1638_v7, %v1638_v7 }
  0x83   : > { %4611 = vmatprep.subr.bf16.mxu1 %v5024_v12  ;;  %v5797_v12 = vcombine.low %v1638_v7, %v1638_v7  ;;  %v5081_v7 = vld [vmem:[%s6313_s1 + $0x4d8] sm:$0xff]  }
  0x84   : > { %4832 = vmatpush3.bf16.msra.mxu0 %v1510_v14  ;;  %v5048_v14 = vld [vmem:[%s6313_s1 + $0x454] sm:$0xff]   ;;  %v1786_v10 = vshrl.u32 %v5795_v11, 16 }
  0x85   : > { %4627 = vmatprep.subr.bf16.mxu0 %v5029_v16  ;;  %v1789_v16 = vshll.u32 %v5795_v11, 16  ;;  %v1769_v17 = vshrl.u32 %v5797_v12, 16 }
  0x86   : > { %4612 = vmatpush3.bf16.msra.mxu1 %v5026_v26  ;;  %v1772_v26 = vshll.u32 %v5797_v12, 16 }
  0x87   : > { %4834 = vmatmul.mubr.msk.bf16.vlgmr.msra.gmra.mrb[16].mxu0 %vm707_vm3, %v1288_v21  ;;  %4613 = vmatprep.subr.bf16.mxu1 %v5028_v44  ;;  %v5052_v44 = vld [vmem:[%s6313_s1 + $0x444] sm:$0xff]   ;;  %v1788_v21 = vrot.slane %v1786_v10, 1  ;;  %v5083_v10 = vld [vmem:[%s6313_s1 + $0x498] sm:$0xff]  }
  0x88   : > { %4628 = vmatpush3.bf16.msra.mxu0 %v5031_v22  ;;  %v1791_v22 = vrot.slane %v1789_v16, 2  ;;  %v5927_v16 = vld [vmem:[%s5336_s12 + $0x1c] sm:$0xff] }
  0x89   : > { %4629 = vmatprep.subr.bf16.mxu0 %v5033_v24  ;;  %v1800_v24 = vrot.slane %v1798_v9, 2  ;;  %v2159_v9 = vld [vmem:[%s5336_s12] sm:$0xcc] }
  0x8a   : > { %4614 = vmatpush3.bf16.msra.mxu1 %v5030_v27  ;;  %v5053_v27 = vld [vmem:[%s6313_s1 + $0x404] sm:$0xff]  }
  0x8b   : > { %4615 = vmatprep.subr.bf16.mxu1 %v5032_v29  ;;  %v1806_v29 = vshll.u32 %v5812_v18, 16 }
  0x8c   : > { %4630 = vmatpush3.bf16.msra.mxu0 %v5035_v30  ;;  %v1792_v30 = vor.u32 %v1791_v22, %v1788_v21  ;;  %v5086_v22 = vld [vmem:[%s6313_s1 + $0x560] sm:$0xff]  }
  0x8d   : > { %4631 = vmatprep.subr.bf16.mxu0 %v5037_v47  ;;  %v1774_v47 = vrot.slane %v1772_v26, 2  ;;  %v1808_v50 = vrot.slane %v1806_v29, 2  ;;  %v2258_v26 = vrot.slane %v5795_v11, 2  ;;  %v5088_v29 = vld [vmem:[%s6313_s1 + $0x520] sm:$0xff]  }
  0x8e   : > { %4616 = vmatpush3.bf16.msra.mxu1 %v5034_v35  ;;  %v1771_v35 = vrot.slane %v1769_v17, 1  ;;  %v1793_v48 = vsel %vm1725_vm5, %v1784_v20, %v1792_v30  ;;  %v5084_v20 = vld [vmem:[%s6313_s1 + $0x518] sm:$0xff]  }
  0x8f   : > { %4617 = vmatprep.subr.bf16.mxu1 %v5036_v36  ;;  %2107 = vmatprep.mubr.bf16.mxu0 %v1793_v48  ;;  %v1809_v43 = vor.u32 %v1808_v50, %v1805_v49  ;;  %v2255_v49 = vrot.slane %v5797_v12, 2  ;;  %v5099_v12 = vld [vmem:[%s6313_s1 + $0x58c] sm:$0xff]  }
  0x90   : > { %4632 = vmatpush3.bf16.msra.mxu0 %v5039_v56  ;;  %v1775_v36 = vor.u32 %v1774_v47, %v1771_v35  ;;  %v5061_v56 = vld [vmem:[%s6313_s1 + $0x530] sm:$0xff]   ;;  %v5092_v47 = vld [vmem:[%s6313_s1 + $0x528] sm:$0xff]  }
  0x91   : > { %4633 = vmatprep.subr.bf16.mxu0 %v5041_v42  ;;  %v1801_v42 = vor.u32 %v1800_v24, %v1797_v23  ;;  %v5087_v24 = vld [vmem:[%s6313_s1 + $0x4a0] sm:$0xff]  }
  0x92   : > { %4618 = vmatpush3.bf16.msra.mxu1 %v5038_v55  ;;  %v2032_v55 = vand.u32 %v5057_v34, %v5411_v19  ;;  %v1776_v58 = vsel %vm1725_vm5, %v1767_v53, %v1775_v36  ;;  %v5091_v34 = vld [vmem:[%s6313_s1 + $0x4a8] sm:$0xff]   ;;  %v5100_v36 = vld [vmem:[%s6313_s1 + $0x5d4] sm:$0xff]  }
  0x93   : > { %4619 = vmatprep.subr.bf16.mxu1 %v5040_v61  ;;  %v1810_v60 = vsel %vm1725_vm5, %v1801_v42, %v1809_v43  ;;  %v5066_v61 = vld [vmem:[%s6313_s1 + $0x538] sm:$0xff]   ;;  %v5107_v42 = vld [vmem:[%s6313_s1 + $0x588] ss:$0 sps:$4 sm:$0x11]  }
  0x94   : > { %4634 = vmatpush3.bf16.msra.mxu0 %v5043_v62  ;;  %v5068_v62 = vld [vmem:[%s6313_s1 + $0x4f8] sm:$0xff]  }
  0x95   : > { %4635 = vmatprep.subr.bf16.mxu0 %v5045_v41  ;;  %v5071_v41 = vld [vmem:[%s6313_s1 + $0x480] sm:$0xff]  }
  0x96   : > { %4620 = vmatpush3.bf16.msra.mxu1 %v5042_v45  ;;  %v5073_v45 = vld [vmem:[%s6313_s1 + $0x4c8] sm:$0xff]   ;;  %v5103_v43 = vld [vmem:[%s6313_s1 + $0x5dc] sm:$0xff]  }
  0x97   : > { %4837 = vmatprep.subr.bf16.mxu1 %v5195_v46 }
  0x98   : > { %4636 = vmatpush3.bf16.msra.mxu0 %v5047_v5  ;;  %v5079_v5 = vld [vmem:[%s6313_s1 + $0x490] sm:$0xff]  }
  0x99   : > { %2067 = vmatmul.mubr.bf16.vlgmr.msra.gmra.mrb[16].mxu1 %v1742_v13  ;;  %4637 = vmatprep.subr.bf16.mxu0 %v5049_v6  ;;  %v5080_v6 = vld [vmem:[%s6313_s1 + $0x510] sm:$0xff]   ;;  %v2252_v13 = vrot.slane %v5744_v37, 2  ;;  %v5085_v37 = vld [vmem:[%s6313_s1 + $0x4e0] sm:$0xff]  }
  0x9a   : > { %4838 = vmatpush3.bf16.msra.mxu1 %v5048_v14  ;;  %4845 = vmatprep.mubr.msk.bf16.mxu1 %vm5196_vm2, %v5195_v46  ;;  %v5917_v14 = vld [vmem:[%s5336_s12 + $0x14] sm:$0xff] }
  0x9b   : > { %4839 = vmatprep.subr.bf16.mxu1 %v5195_v46  ;;  %v5920_v23 = vcombine.high %v2159_v9, %v5917_v14 }
  0x9c   : > { %4638 = vmatpush3.bf16.msra.mxu0 %v5050_v15  ;;  %v2160_v15 = vld [vmem:[%s5336_s12 + $0x8] sm:$0xcc] }
  0x9d   : > { %4639 = vmatprep.subr.bf16.mxu0 %v5052_v44  ;;  %v5930_v17 = vcombine.high %v2160_v15, %v5927_v16  ;;  %v2251_v44 = vrot.slane %v5920_v23, 2  ;;  %v5959_v30 = vcombine.low %v2160_v15, %v5927_v16 }
  0x9e   : > { %4840 = vmatpush3.bf16.msra.mxu1 %v5051_v25 }
  0x9f   : > { %4841 = vmatprep.subr.bf16.mxu1 %v5195_v46  ;;  %v2257_v21 = vrot.slane %v5930_v17, 2  ;;  %v2253_v11 = vsel %vm2247_vm6, %v2251_v44, %v2252_v13  ;;  %v2254_v48 = vrot.slane %v5959_v30, 2  ;;  %v5119_v44 = vld [vmem:[%s6313_s1 + $0x65c] sm:$0xff]  }
  0xa0   : > { %4640 = vmatpush3.bf16.msra.mxu0 %v5053_v27  ;;  %v5950_v27 = vcombine.low %v2159_v9, %v5917_v14  ;;  %v5114_v9 = vld [vmem:[%s6313_s1 + $0x5f4] sm:$0xff]  }
  0xa1   : > { %4641 = vmatprep.subr.bf16.mxu0 %v5055_v32  ;;  %v2259_v25 = vsel %vm2247_vm6, %v2257_v21, %v2258_v26  ;;  %v2249_v32 = vrot.slane %v5746_v39, 2  ;;  %v5097_v39 = vld [vmem:[%s6313_s1 + $0x5cc] sm:$0xff]   ;;  %v2256_v53 = vsel %vm2247_vm6, %v2254_v48, %v2255_v49  ;;  %v5116_v26 = vld [vmem:[%s6313_s1 + $0x5b4] sm:$0xff]  }
  0xa2   : > { %4842 = vmatpush3.bf16.msra.mxu1 %v5054_v31  ;;  %v5090_v31 = vld [vmem:[%s6313_s1 + $0x568] sm:$0xff]   ;;  %v2248_v35 = vrot.slane %v5950_v27, 2 }
  0xa3   : > { %4843 = vmatprep.subr.bf16.mxu1 %v5195_v46 }
  0xa4   : > { %4642 = vmatpush3.bf16.msra.mxu0 %v5056_v51  ;;  %v2250_v50 = vsel %vm2247_vm6, %v2248_v35, %v2249_v32  ;;  %v5098_v51 = vld [vmem:[%s6313_s1 + $0x570] sm:$0xff]   ;;  %v5123_v35 = vld [vmem:[%s6313_s1 + $0x664] sm:$0xff]  }
  0xa5   : > { %4654 = vmatprep.subr.bf16.mxu0 %v5060_v54  ;;  %v5101_v54 = vld [vmem:[%s6313_s1 + $0x578] sm:$0xff]  }
  0xa6   : > { %4844 = vmatpush3.bf16.msra.mxu1 %v2032_v55  ;;  %v2161_v55 = vld [vmem:[%s5336_s12 + $0x10] sm:$0xc] }
  0xa7   : > { %2108 = vmatmul.mubr.bf16.vlgmr.msra.gmra.mrb[20].mxu0 %v1776_v58  ;;  %4676 = vmatprep.subr.bf16.mxu1 %v5061_v56  ;;  %v5102_v56 = vld [vmem:[%s6313_s1 + $0x594] sm:$0xff]   ;;  %v6009_v58 = vld [vmem:[%s5336_s12 + $0x24] sm:$0xf] }
  0xa8   : > { %4655 = vmatpush3.bf16.msra.mxu0 %v5063_v33  ;;  %2518 = vmatprep.mubr.bf16.mxu0 %v2253_v11  ;;  %v5104_v33 = vld [vmem:[%s6313_s1 + $0x580] sm:$0xff]  }
  0xa9   : > { %4846 = vmatmul.mubr.msk.bf16.vlgmr.msra.gmra.mrb[20].mxu1 %vm707_vm3, %v1810_v60  ;;  %4656 = vmatprep.subr.bf16.mxu0 %v5065_v59  ;;  %v5105_v59 = vld [vmem:[%s6313_s1 + $0x59c] sm:$0xff]   ;;  %v2261_v60 = vrot.slane %v5812_v18, 2  ;;  %v5111_v18 = vld [vmem:[%s6313_s1 + $0x64c] sm:$0xff]  }
  0xaa   : > { %4677 = vmatpush3.bf16.msra.mxu1 %v5064_v52  ;;  %2559 = vmatprep.mubr.bf16.mxu1 %v2259_v25  ;;  %v6012_v52 = vcombine.low %v2161_v55, %v6009_v58 }
  0xab   : > { %4678 = vmatprep.subr.bf16.mxu1 %v5066_v61  ;;  %v5106_v61 = vld [vmem:[%s6313_s1 + $0x5e4] sm:$0xff]  }
  0xac   : > { %4657 = vmatpush3.bf16.msra.mxu0 %v5067_v38  ;;  %v2718_v38 = vshrl.u32 %v5920_v23, 16 }
  0xad   : > { %4658 = vmatprep.subr.bf16.mxu0 %v5069_v63  ;;  %v2260_v63 = vrot.slane %v6012_v52, 2 }
  0xae   : > { %4679 = vmatpush3.bf16.msra.mxu1 %v5068_v62  ;;  %v2484_v62 = vand.u32 %v5107_v42, %v5411_v19 }
  0xaf   : > { %4680 = vmatprep.subr.bf16.mxu1 %v5070_v0  ;;  %v2721_v0 = vshll.u32 %v5920_v23, 16 }
  0xb0   : > { %4659 = vmatpush3.bf16.msra.mxu0 %v5071_v41  ;;  %v5108_v41 = vld [vmem:[%s6313_s1 + $0x5a4] sm:$0xff]  }
  0xb1   : > { %4660 = vmatprep.subr.bf16.mxu0 %v5073_v45  ;;  %v5110_v45 = vld [vmem:[%s6313_s1 + $0x5ec] sm:$0xff]  }
  0xb2   : > { %4681 = vmatpush3.bf16.msra.mxu1 %v5072_v1  ;;  %v2701_v1 = vshrl.u32 %v5950_v27, 16 }
  0xb3   : > { %4682 = vmatprep.subr.bf16.mxu1 %v5074_v2  ;;  %v2611_v2 = vld [vmem:[%s5336_s12 + $0x28] sm:$0x77] }
  0xb4   : > { %4661 = vmatpush3.bf16.msra.mxu0 %v5075_v3  ;;  %v2720_v3 = vrot.slane %v2718_v38, 2  ;;  %v6056_v15 = vcombine.low %v2611_v2, %v2611_v2 }
  0xb5   : > { %4662 = vmatprep.subr.bf16.mxu0 %v5077_v40  ;;  %v5113_v40 = vld [vmem:[%s6313_s1 + $0x60c] sm:$0xff]  }
  0xb6   : > { %4683 = vmatpush3.bf16.msra.mxu1 %v5076_v4  ;;  %v2262_v4 = vsel %vm2247_vm6, %v2260_v63, %v2261_v60  ;;  %v2712_v25 = vshll.u32 %v6056_v15, 16 }
  0xb7   : > { %4684 = vmatprep.subr.bf16.mxu1 %v5078_v57  ;;  %v6042_v57 = vcombine.high %v2611_v2, %v2611_v2  ;;  %v5132_v2 = vld [vmem:[%s6313_s1 + $0x634] sm:$0xff]  }
  0xb8   : > { %4663 = vmatpush3.bf16.msra.mxu0 %v5079_v5  ;;  %v2723_v5 = vrot.slane %v2721_v0, 3  ;;  %v2714_v49 = vrot.slane %v2712_v25, 3  ;;  %v6113_v0 = vld [vmem:[%s5336_s12 + $0x38] ss:$0 sps:$4 sm:$0x77]   ;;  %v5138_v25 = vld [vmem:[%s6313_s1 + $0x644] sm:$0xff]  }
  0xb9   : > { %4664 = vmatprep.subr.bf16.mxu0 %v5081_v7  ;;  %v2704_v7 = vshll.u32 %v5950_v27, 16  ;;  %v2726_v13 = vshrl.u32 %v6042_v57, 16  ;;  %v2729_v23 = vshll.u32 %v6042_v57, 16  ;;  %v5118_v27 = vld [vmem:[%s6313_s1 + $0x5fc] sm:$0xff]  }
  0xba   : > { %4685 = vmatpush3.bf16.msra.mxu1 %v5080_v6  ;;  %v5115_v6 = vld [vmem:[%s6313_s1 + $0x654] sm:$0xff]  }
  0xbb   : > { %4686 = vmatprep.subr.bf16.mxu1 %v5082_v8  ;;  %v5112_v8 = vld [vmem:[%s6313_s1 + $0x5ac] sm:$0xff]   ;;  %v2728_v21 = vrot.slane %v2726_v13, 2  ;;  %v2777_v13 = vshrl.u32 %v6113_v0, 16 }
  0xbc   : > { %4665 = vmatpush3.bf16.msra.mxu0 %v5083_v10  ;;  %v2703_v10 = vrot.slane %v2701_v1, 2 }
  0xbd   : > { %4666 = vmatprep.subr.bf16.mxu0 %v5085_v37  ;;  %v5117_v37 = vld [vmem:[%s6313_s1 + $0x614] sm:$0xff]  }
  0xbe   : > { %4687 = vmatpush3.bf16.msra.mxu1 %v5084_v20  ;;  %v2724_v20 = vor.u32 %v2723_v5, %v2720_v3 }
  0xbf   : > { %4688 = vmatprep.subr.bf16.mxu1 %v5086_v22  ;;  %v2731_v22 = vrot.slane %v2729_v23, 3  ;;  %v2780_v23 = vshll.u32 %v6113_v0, 16 }
  0xc0   : > { %4667 = vmatpush3.bf16.msra.mxu0 %v5087_v24  ;;  %v2709_v24 = vshrl.u32 %v6056_v15, 16 }
  0xc1   : > { %4668 = vmatprep.subr.bf16.mxu0 %v5089_v28  ;;  %v2732_v11 = vor.u32 %v2731_v22, %v2728_v21  ;;  %v2752_v28 = vshrl.u32 %v5930_v17, 16  ;;  %v5137_v21 = vld [vmem:[%s6313_s1 + $0x684] sm:$0xff]  }
  0xc2   : > { %4689 = vmatpush3.bf16.msra.mxu1 %v5088_v29  ;;  %v5120_v29 = vld [vmem:[%s6313_s1 + $0x5bc] sm:$0xff]   ;;  %v2711_v48 = vrot.slane %v2709_v24, 2  ;;  %v2782_v24 = vrot.slane %v2780_v23, 3  ;;  %v3134_v23 = vld [vmem:[%s5336_s12 + $0x8] sm:$0x88] }
  0xc3   : > { %4690 = vmatprep.subr.bf16.mxu1 %v5090_v31  ;;  %v5121_v31 = vld [vmem:[%s6313_s1 + $0x61c] sm:$0xff]   ;;  %v2733_v32 = vsel %vm2699_vm7, %v2724_v20, %v2732_v11  ;;  %v2779_v11 = vrot.slane %v2777_v13, 2 }
  0xc4   : > { %4669 = vmatpush3.bf16.msra.mxu0 %v5091_v34  ;;  %v2755_v34 = vshll.u32 %v5930_v17, 16  ;;  %v5125_v17 = vld [vmem:[%s6313_s1 + $0x624] sm:$0xff]  }
  0xc5   : > { %4849 = vmatprep.subr.bf16.mxu0 %v5195_v46  ;;  %v3133_v13 = vld [vmem:[%s5336_s12] sm:$0x88] }
  0xc6   : > { %4691 = vmatpush3.bf16.msra.mxu1 %v5092_v47  ;;  %v2706_v47 = vrot.slane %v2704_v7, 3  ;;  %v5134_v7 = vld [vmem:[%s6313_s1 + $0x67c] sm:$0xff]  }
  0xc7   : > { %2519 = vmatmul.mubr.bf16.vlgmr.msra.gmra.mrb[24].mxu0 %v2250_v50  ;;  %4703 = vmatprep.subr.bf16.mxu1 %v5097_v39  ;;  %v5122_v39 = vld [vmem:[%s6313_s1 + $0x604] sm:$0xff]   ;;  %v2754_v50 = vrot.slane %v2752_v28, 2 }
  0xc8   : > { %4850 = vmatpush3.bf16.msra.mxu0 %v5098_v51  ;;  %4857 = vmatprep.mubr.msk.bf16.mxu0 %vm5196_vm2, %v5195_v46  ;;  %v5127_v51 = vld [vmem:[%s6313_s1 + $0x66c] sm:$0xff]   ;;  %v2707_v55 = vor.u32 %v2706_v47, %v2703_v10  ;;  %v5135_v10 = vld [vmem:[%s6313_s1 + $0x63c] sm:$0xff]  }
  0xc9   : > { %2560 = vmatmul.mubr.bf16.vlgmr.msra.gmra.mrb[24].mxu1 %v2256_v53  ;;  %4851 = vmatprep.subr.bf16.mxu0 %v5195_v46  ;;  %v2757_v53 = vrot.slane %v2755_v34, 3  ;;  %v5145_v47 = vld [vmem:[%s6313_s1 + $0x6a8] sm:$0xff]  }
  0xca   : > { %4704 = vmatpush3.bf16.msra.mxu1 %v5099_v12  ;;  %3040 = vmatprep.mubr.bf16.mxu1 %v2733_v32  ;;  %v2735_v12 = vshrl.u32 %v5959_v30, 16  ;;  %v5143_v32 = vld [vmem:[%s6313_s1 + $0x768] sm:$0xff]  }
  0xcb   : > { %4705 = vmatprep.subr.bf16.mxu1 %v5100_v36  ;;  %v2612_v36 = vld [vmem:[%s5336_s12 + $0x30] sm:$0x77]  ;;  %v2758_v63 = vor.u32 %v2757_v53, %v2754_v50 }
  0xcc   : > { %4852 = vmatpush3.bf16.msra.mxu0 %v5101_v54  ;;  %v5124_v54 = vld [vmem:[%s6313_s1 + $0x5c4] sm:$0xff]   ;;  %v6099_v42 = vcombine.high %v2612_v36, %v2612_v36  ;;  %v2737_v38 = vrot.slane %v2735_v12, 2  ;;  %v5150_v53 = vld [vmem:[%s6313_s1 + $0x730] sm:$0xff]   ;;  %v5151_v12 = vld [vmem:[%s6313_s1 + $0x6f8] sm:$0xff]  }
  0xcd   : > { %4853 = vmatprep.subr.bf16.mxu0 %v5195_v46 }
  0xce   : > { %4706 = vmatpush3.bf16.msra.mxu1 %v5102_v56  ;;  %v2715_v56 = vor.u32 %v2714_v49, %v2711_v48  ;;  %v2763_v60 = vshll.u32 %v6099_v42, 16  ;;  %v5146_v49 = vld [vmem:[%s6313_s1 + $0x728] sm:$0xff]  }
  0xcf   : > { %4707 = vmatprep.subr.bf16.mxu1 %v5103_v43  ;;  %v2738_v43 = vshll.u32 %v5959_v30, 16 }
  0xd0   : > { %4854 = vmatpush3.bf16.msra.mxu0 %v5104_v33  ;;  %v5129_v33 = vld [vmem:[%s6313_s1 + $0x62c] sm:$0xff]   ;;  %v2716_v30 = vsel %vm2699_vm7, %v2707_v55, %v2715_v56  ;;  %v2765_v1 = vrot.slane %v2763_v60, 3  ;;  %v5153_v56 = vld [vmem:[%s6313_s1 + $0x6b8] sm:$0xff]  }
  0xd1   : > { %4855 = vmatprep.subr.bf16.mxu0 %v5195_v46  ;;  %v2740_v3 = vrot.slane %v2738_v43, 3  ;;  %v5154_v60 = vld [vmem:[%s6313_s1 + $0x738] sm:$0xff]  }
  0xd2   : > { %4708 = vmatpush3.bf16.msra.mxu1 %v5105_v59  ;;  %v2760_v59 = vshrl.u32 %v6099_v42, 16 }
  0xd3   : > { %4709 = vmatprep.subr.bf16.mxu1 %v5106_v61  ;;  %v6107_v61 = vcombine.low %v2612_v36, %v2612_v36 }
  0xd4   : > { %4856 = vmatpush3.bf16.msra.mxu0 %v2484_v62  ;;  %v5131_v62 = vld [vmem:[%s6313_s1 + $0x674] sm:$0xff]  }
  0xd5   : > { %4725 = vmatprep.subr.bf16.mxu0 %v5111_v18  ;;  %v5130_v18 = vld [vmem:[%s6313_s1 + $0x68c] sm:$0xff]   ;;  %v2743_v5 = vshrl.u32 %v6107_v61, 16 }
  0xd6   : > { %4710 = vmatpush3.bf16.msra.mxu1 %v5108_v41  ;;  %v2762_v41 = vrot.slane %v2760_v59, 2 }
  0xd7   : > { %4858 = vmatmul.mubr.msk.bf16.vlgmr.msra.gmra.mrb[28].mxu0 %vm707_vm3, %v2262_v4  ;;  %4711 = vmatprep.subr.bf16.mxu1 %v5110_v45  ;;  %v2769_v45 = vshrl.u32 %v6012_v52, 16  ;;  %v5133_v4 = vld [vmem:[%s6313_s1 + $0x694] sm:$0xff]  }
  0xd8   : > { %4726 = vmatpush3.bf16.msra.mxu0 %v5113_v40  ;;  %v2766_v40 = vor.u32 %v2765_v1, %v2762_v41  ;;  %v5156_v1 = vld [vmem:[%s6313_s1 + $0x780] sm:$0xff]  }
  0xd9   : > { %4727 = vmatprep.subr.bf16.mxu0 %v5115_v6  ;;  %v2746_v6 = vshll.u32 %v6107_v61, 16 }
  0xda   : > { %4712 = vmatpush3.bf16.msra.mxu1 %v5112_v8  ;;  %v2772_v8 = vshll.u32 %v6012_v52, 16  ;;  %v5136_v52 = vld [vmem:[%s6313_s1 + $0x69c] sm:$0xff]  }
  0xdb   : > { %4713 = vmatprep.subr.bf16.mxu1 %v5114_v9  ;;  %v2767_v9 = vsel %vm2699_vm7, %v2758_v63, %v2766_v40  ;;  %v2748_v20 = vrot.slane %v2746_v6, 3  ;;  %v5160_v6 = vld [vmem:[%s6313_s1 + $0x788] sm:$0xff]  }
  0xdc   : > { %4728 = vmatpush3.bf16.msra.mxu0 %v5117_v37  ;;  %3081 = vmatprep.mubr.bf16.mxu0 %v2767_v9  ;;  %v5139_v37 = vld [vmem:[%s6313_s1 + $0x6a4] ss:$0 sps:$4 sm:$0x11]   ;;  %v2774_v22 = vrot.slane %v2772_v8, 3  ;;  %v5161_v8 = vld [vmem:[%s6313_s1 + $0x6c8] sm:$0xff]   ;;  %v3226_v9 = vrot.slane %v6042_v57, 3 }
  0xdd   : > { %4729 = vmatprep.subr.bf16.mxu0 %v5119_v44  ;;  %v2745_v44 = vrot.slane %v2743_v5, 2  ;;  %v5159_v5 = vld [vmem:[%s6313_s1 + $0x708] sm:$0xff]   ;;  %v5164_v57 = vld [vmem:[%s6313_s1 + $0x790] sm:$0xff]  }
  0xde   : > { %4714 = vmatpush3.bf16.msra.mxu1 %v5116_v26  ;;  %v2771_v26 = vrot.slane %v2769_v45, 2 }
  0xdf   : > { %4715 = vmatprep.subr.bf16.mxu1 %v5118_v27  ;;  %v2741_v27 = vor.u32 %v2740_v3, %v2737_v38  ;;  %v2749_v28 = vor.u32 %v2748_v20, %v2745_v44  ;;  %v5155_v38 = vld [vmem:[%s6313_s1 + $0x700] sm:$0xff]   ;;  %v5162_v44 = vld [vmem:[%s6313_s1 + $0x748] sm:$0xff]  }
  0xe0   : > { %4730 = vmatpush3.bf16.msra.mxu0 %v5121_v31  ;;  %v3006_v31 = vand.u32 %v5139_v37, %v5411_v19  ;;  %v2775_v34 = vor.u32 %v2774_v22, %v2771_v26  ;;  %v4413_v26 = vcombine.high %v3133_v13, %v5917_v14  ;;  %v3232_v37 = vrot.slane %v6099_v42, 3  ;;  %v5165_v22 = vld [vmem:[%s6313_s1 + $0x6d0] sm:$0xff]   ;;  %v5167_v42 = vld [vmem:[%s6313_s1 + $0x718] sm:$0xff]  }
  0xe1   : > { %4731 = vmatprep.subr.bf16.mxu0 %v5123_v35  ;;  %v2783_v35 = vor.u32 %v2782_v24, %v2779_v11  ;;  %v2750_v48 = vsel %vm2699_vm7, %v2741_v27, %v2749_v28  ;;  %v5166_v27 = vld [vmem:[%s6313_s1 + $0x750] sm:$0xff]  }
  0xe2   : > { %4716 = vmatpush3.bf16.msra.mxu1 %v5120_v29  ;;  %v5142_v29 = vld [vmem:[%s6313_s1 + $0x6e8] sm:$0xff]   ;;  %v3225_v20 = vrot.slane %v4413_v26, 3 }
  0xe3   : > { %4717 = vmatprep.subr.bf16.mxu1 %v5122_v39  ;;  %v5147_v39 = vld [vmem:[%s6313_s1 + $0x6f0] sm:$0xff]   ;;  %v2784_v50 = vsel %vm2699_vm7, %v2775_v34, %v2783_v35  ;;  %v5169_v34 = vld [vmem:[%s6313_s1 + $0x6d8] sm:$0xff]   ;;  %v4412_v35 = vcombine.low %v3133_v13, %v5917_v14  ;;  %v5173_v14 = vld [vmem:[%s6313_s1 + $0x6e0] sm:$0xff]  }
  0xe4   : > { %4732 = vmatpush3.bf16.msra.mxu0 %v5125_v17  ;;  %v5148_v17 = vld [vmem:[%s6313_s1 + $0x770] sm:$0xff]   ;;  %v3227_v11 = vsel %vm3221_vm8, %v3225_v20, %v3226_v9 }
  0xe5   : > { %4733 = vmatprep.subr.bf16.mxu0 %v5127_v51  ;;  %v5149_v51 = vld [vmem:[%s6313_s1 + $0x6b0] sm:$0xff]  }
  0xe6   : > { %4718 = vmatpush3.bf16.msra.mxu1 %v5124_v54  ;;  %v5152_v54 = vld [vmem:[%s6313_s1 + $0x778] sm:$0xff]  }
  0xe7   : > { %4861 = vmatprep.subr.bf16.mxu1 %v5195_v46 }
  0xe8   : > { %4734 = vmatpush3.bf16.msra.mxu0 %v5129_v33 }
  0xe9   : > { %3041 = vmatmul.mubr.bf16.vlgmr.msra.gmra.mrb[28].mxu1 %v2716_v30  ;;  %4735 = vmatprep.subr.bf16.mxu0 %v5131_v62 }
  0xea   : > { %4862 = vmatpush3.bf16.msra.mxu1 %v5130_v18  ;;  %4869 = vmatprep.mubr.msk.bf16.mxu1 %vm5196_vm2, %v5195_v46 }
  0xeb   : > { %4863 = vmatprep.subr.bf16.mxu1 %v5195_v46 }
  0xec   : > { %4736 = vmatpush3.bf16.msra.mxu0 %v5132_v2  ;;  %v5157_v2 = vld [vmem:[%s6313_s1 + $0x6c0] sm:$0xff]  }
  0xed   : > { %4737 = vmatprep.subr.bf16.mxu0 %v5134_v7 }
  0xee   : > { %4864 = vmatpush3.bf16.msra.mxu1 %v5133_v4  ;;  %v5158_v4 = vld [vmem:[%s6313_s1 + $0x740] sm:$0xff]  }
  0xef   : > { %4865 = vmatprep.subr.bf16.mxu1 %v5195_v46 }
  0xf0   : > { %4738 = vmatpush3.bf16.msra.mxu0 %v5135_v10  ;;  %v5163_v10 = vld [vmem:[%s6313_s1 + $0x710] sm:$0xff]  }
  0xf1   : > { %4739 = vmatprep.subr.bf16.mxu0 %v5137_v21 }
  0xf2   : > { %4866 = vmatpush3.bf16.msra.mxu1 %v5136_v52  ;;  %v4415_v52 = vcombine.high %v3134_v23, %v5927_v16 }
  0xf3   : > { %4867 = vmatprep.subr.bf16.mxu1 %v5195_v46 }
  0xf4   : > { %4740 = vmatpush3.bf16.msra.mxu0 %v5138_v25  ;;  %v3231_v21 = vrot.slane %v4415_v52, 3 }
  0xf5   : > { %4752 = vmatprep.subr.bf16.mxu0 %v5142_v29 }
  0xf6   : > { %4868 = vmatpush3.bf16.msra.mxu1 %v3006_v31  ;;  %v3233_v24 = vsel %vm3221_vm8, %v3231_v21, %v3232_v37  ;;  %v5168_v31 = vld [vmem:[%s6313_s1 + $0x798] sm:$0xff]  }
  0xf7   : > { %3082 = vmatmul.mubr.bf16.vlgmr.msra.gmra.mrb[32].mxu0 %v2750_v48  ;;  %4774 = vmatprep.subr.bf16.mxu1 %v5143_v32 }
  0xf8   : > { %4753 = vmatpush3.bf16.msra.mxu0 %v5145_v47  ;;  %3492 = vmatprep.mubr.bf16.mxu0 %v3227_v11 }
  0xf9   : > { %4870 = vmatmul.mubr.msk.bf16.vlgmr.msra.gmra.mrb[32].mxu1 %vm707_vm3, %v2784_v50  ;;  %4754 = vmatprep.subr.bf16.mxu0 %v5147_v39  ;;  %v5170_v39 = vld [vmem:[%s6313_s1 + $0x758] sm:$0xff]   ;;  %v4414_v50 = vcombine.low %v3134_v23, %v5927_v16 }
  0xfa   : > { %4775 = vmatpush3.bf16.msra.mxu1 %v5146_v49  ;;  %v4474_v36 = vpop.f32.mrb[0].mxu0  ;;  %3533 = vmatprep.mubr.bf16.mxu1 %v3233_v24  ;;  %v5171_v49 = vld [vmem:[%s6313_s1 + $0x720] sm:$0xff]  }
  0xfb   : > { %v4475_v55 = vpop.f32.mrb[1].mxu0  ;;  %4776 = vmatprep.subr.bf16.mxu1 %v5148_v17  ;;  %v5172_v17 = vld [vmem:[%s6313_s1 + $0x7a0] sm:$0xff]   ;;  %v3228_v16 = vrot.slane %v4414_v50, 3 }
  0xfc   : > { %v4496_v43 = vpop.f32.mrb[0].mxu1  ;;  %v4476_v33 = vadd.f32 %v4475_v55, %v4474_v36  ;;  %v4477_v59 = vpop.f32.mrb[2].mxu0  ;;  %4755 = vmatpush3.bf16.msra.mxu0 %v5149_v51  ;;  %v3222_v51 = vrot.slane %v4412_v35, 3  ;;  %v3229_v36 = vrot.slane %v6107_v61, 3  ;;  %v5179_v55 = vld [vmem:[%s6313_s1 + $0x7a8] sm:$0xff]  }
  0xfd   : > { %v4497_v62 = vpop.f32.mrb[1].mxu1  ;;  %v4478_v63 = vpop.f32.mrb[3].mxu0  ;;  %4756 = vmatprep.subr.bf16.mxu0 %v5151_v12  ;;  %v5174_v12 = vld [vmem:[%s6313_s1 + $0x760] sm:$0xff]   ;;  %v3135_v61 = vld [vmem:[%s5336_s12 + $0x10] sm:$0x8] }
  0xfe   : > { %v4498_v30 = vadd.f32 %v4497_v62, %v4496_v43  ;;  %v4499_v18 = vpop.f32.mrb[2].mxu1  ;;  %4777 = vmatpush3.bf16.msra.mxu1 %v5150_v53  ;;  %v4479_v41 = vadd.f32 %v4478_v63, %v4477_v59  ;;  %v3223_v53 = vrot.slane %v6056_v15, 3  ;;  %v3230_v15 = vsel %vm3221_vm8, %v3228_v16, %v3229_v36  ;;  %v5182_v59 = vld [vmem:[%s6313_s1 + $0x7c0] ss:$0 sps:$4 sm:$0x11]  }
  0xff   : > { %v4500_v45 = vpop.f32.mrb[3].mxu1  ;;  %4778 = vmatprep.subr.bf16.mxu1 %v5152_v54 }
 0x100   : > { %v4501_v3 = vadd.f32 %v4500_v45, %v4499_v18  ;;  %4757 = vmatpush3.bf16.msra.mxu0 %v5153_v56  ;;  %v793_v40 = vadd.f32 %v4498_v30, %v4476_v33  ;;  %v3224_v54 = vsel %vm3221_vm8, %v3222_v51, %v3223_v53  ;;  %v5180_v56 = vld [vmem:[%s6313_s1 + $0x7b0] sm:$0xff]   ;;  %v5181_v33 = vld [vmem:[%s6313_s1 + $0x7b8] sm:$0xff]   ;;  %v3235_v18 = vrot.slane %v6113_v0, 3 }
 0x101   : > { %4758 = vmatprep.subr.bf16.mxu0 %v5155_v38  ;;  %v3458_v45 = vand.u32 %v5182_v59, %v5411_v19 }
 0x102   : > { %4779 = vmatpush3.bf16.msra.mxu1 %v5154_v60  ;;  %v796_v7 = vadd.f32 %v4501_v3, %v4479_v41  ;;  %v4416_v60 = vcombine.low %v3135_v61, %v6009_v58 }
 0x103   : > { %4780 = vmatprep.subr.bf16.mxu1 %v5156_v1 }
 0x104   : > { %4759 = vmatpush3.bf16.msra.mxu0 %v5157_v2  ;;  %v3234_v2 = vrot.slane %v4416_v60, 3 }
 0x105   : > { %4760 = vmatprep.subr.bf16.mxu0 %v5159_v5 }
 0x106   : > { %4781 = vmatpush3.bf16.msra.mxu1 %v5158_v4  ;;  %v3236_v58 = vsel %vm3221_vm8, %v3234_v2, %v3235_v18 }
 0x107   : > { %4782 = vmatprep.subr.bf16.mxu1 %v5160_v6 }
 0x108   : > { %4761 = vmatpush3.bf16.msra.mxu0 %v5161_v8 }
 0x109   : > { %4762 = vmatprep.subr.bf16.mxu0 %v5163_v10 }
 0x10a   : > { %4783 = vmatpush3.bf16.msra.mxu1 %v5162_v44  ;;  %v833_v25 = vpop.f32.mrb[4].mxu0 }
 0x10b   : > { %v834_v28 = vadd.f32 %v833_v25, %v793_v40  ;;  %v4811_v29 = vpop.f32.mrb[5].mxu0  ;;  %4784 = vmatprep.subr.bf16.mxu1 %v5164_v57 }
 0x10c   : > { %v836_v32 = vpop.f32.mrb[6].mxu0  ;;  %4763 = vmatpush3.bf16.msra.mxu0 %v5165_v22 }
 0x10d   : > { %v837_v47 = vadd.f32 %v836_v32, %v796_v7  ;;  %v4812_v48 = vpop.f32.mrb[7].mxu0  ;;  %4764 = vmatprep.subr.bf16.mxu0 %v5167_v42 }
 0x10e   : > { %4785 = vmatpush3.bf16.msra.mxu1 %v5166_v27 }
 0x10f   : > { %4786 = vmatprep.subr.bf16.mxu1 %v5168_v31 }
 0x110   : > { %4765 = vmatpush3.bf16.msra.mxu0 %v5169_v34 }
 0x111   : > { %4766 = vmatprep.subr.bf16.mxu0 %v5171_v49 }
 0x112   : > { %4787 = vmatpush3.bf16.msra.mxu1 %v5170_v39 }
 0x113   : > { %4788 = vmatprep.subr.bf16.mxu1 %v5172_v17 }
 0x114   : > { %4767 = vmatpush3.bf16.msra.mxu0 %v5173_v14 }
 0x115   : > { %4873 = vmatprep.subr.bf16.mxu0 %v5195_v46 }
 0x116   : > { %4789 = vmatpush3.bf16.msra.mxu1 %v5174_v12 }
 0x117   : > { %3493 = vmatmul.mubr.bf16.vlgmr.msra.gmra.mrb[36].mxu0 %v3224_v54 }
 0x118   : > { %4874 = vmatpush3.bf16.msra.mxu0 %v5179_v55  ;;  %4881 = vmatprep.mubr.msk.bf16.mxu0 %vm5196_vm2, %v5195_v46 }
 0x119   : > { %3534 = vmatmul.mubr.bf16.vlgmr.msra.gmra.mrb[36].mxu1 %v3230_v15  ;;  %4875 = vmatprep.subr.bf16.mxu0 %v5195_v46 }
 0x11c   : > { %v4523_v43 = vpop.f32.mrb[4].mxu1  ;;  %4876 = vmatpush3.bf16.msra.mxu0 %v5180_v56 }
 0x11d   : > { %v4524_v38 = vpop.f32.mrb[5].mxu1  ;;  %4877 = vmatprep.subr.bf16.mxu0 %v5195_v46 }
 0x11e   : > { %v4525_v62 = vadd.f32 %v4524_v38, %v4523_v43  ;;  %v4526_v63 = vpop.f32.mrb[6].mxu1 }
 0x11f   : > { %v4527_v30 = vpop.f32.mrb[7].mxu1 }
 0x120   : > { %v1097_v41 = vadd.f32 %v4525_v62, %v834_v28  ;;  %v4528_v1 = vadd.f32 %v4527_v30, %v4526_v63  ;;  %4878 = vmatpush3.bf16.msra.mxu0 %v5181_v33 }
 0x121   : > { %4879 = vmatprep.subr.bf16.mxu0 %v5195_v46 }
 0x122   : > { %v1100_v3 = vadd.f32 %v4528_v1, %v837_v47 }
 0x124   : > { %4880 = vmatpush3.bf16.msra.mxu0 %v3458_v45 }
 0x127   : > { %4882 = vmatmul.mubr.msk.bf16.vlgmr.msra.gmra.mrb[40].mxu0 %vm707_vm3, %v3236_v58 }
 0x12a   : > { %v4545_v4 = vpop.f32.mrb[8].mxu0 }
 0x12b   : > { %v4546_v40 = vpop.f32.mrb[9].mxu0 }
 0x12c   : > { %v4547_v5 = vadd.f32 %v4546_v40, %v4545_v4  ;;  %v4548_v6 = vpop.f32.mrb[10].mxu0  ;;  %v1178_v7 = vpop.f32.mrb[8].mxu1 }
 0x12d   : > { %v4549_v0 = vpop.f32.mrb[11].mxu0  ;;  %v4823_v8 = vpop.f32.mrb[9].mxu1 }
 0x12e   : > { %v4550_v9 = vadd.f32 %v4549_v0, %v4548_v6  ;;  %v1138_v13 = vadd.f32 %v4547_v5, %v1097_v41  ;;  %v1181_v23 = vpop.f32.mrb[10].mxu1 }
 0x12f   : > { %v4824_v19 = vpop.f32.mrb[11].mxu1 }
 0x130   : > { %v1179_v10 = vadd.f32 %v1178_v7, %v1138_v13  ;;  %v1141_v26 = vadd.f32 %v4550_v9, %v1100_v3 }
 0x132   : > { %v1182_v46 = vadd.f32 %v1181_v23, %v1141_v26 }
 0x14a   : > { %v4572_v52 = vpop.f32.mrb[12].mxu0 }
 0x14b   : > { %v4573_v37 = vpop.f32.mrb[13].mxu0 }
 0x14c   : > { %v4594_v44 = vpop.f32.mrb[12].mxu1  ;;  %v4574_v57 = vadd.f32 %v4573_v37, %v4572_v52  ;;  %v4575_v20 = vpop.f32.mrb[14].mxu0 }
 0x14d   : > { %v4595_v21 = vpop.f32.mrb[13].mxu1  ;;  %v4576_v22 = vpop.f32.mrb[15].mxu0 }
 0x14e   : > { %v4596_v42 = vadd.f32 %v4595_v21, %v4594_v44  ;;  %v4597_v11 = vpop.f32.mrb[14].mxu1  ;;  %v4577_v24 = vadd.f32 %v4576_v22, %v4575_v20 }
 0x14f   : > { %v4598_v25 = vpop.f32.mrb[15].mxu1 }
 0x150   : > { %v4599_v27 = vadd.f32 %v4598_v25, %v4597_v11  ;;  %v1588_v28 = vadd.f32 %v4596_v42, %v4574_v57 }
 0x152   : > { %v1591_v29 = vadd.f32 %v4599_v27, %v4577_v24 }
 0x15a   : > { %v1628_v31 = vpop.f32.mrb[16].mxu0 }
 0x15b   : > { %v1629_v32 = vadd.f32 %v1628_v31, %v1588_v28  ;;  %v4835_v34 = vpop.f32.mrb[17].mxu0 }
 0x15c   : > { %v1631_v35 = vpop.f32.mrb[18].mxu0 }
 0x15d   : > { %v1635_v47 = vadd.f32 %v1629_v32, %v1179_v10  ;;  %v1632_v48 = vadd.f32 %v1631_v35, %v1591_v29  ;;  %v4836_v49 = vpop.f32.mrb[19].mxu0 }
 0x15f   : > { %v1636_v39 = vadd.f32 %v1632_v48, %v1182_v46 }
 0x16c   : > { %v4621_v50 = vpop.f32.mrb[16].mxu1 }
 0x16d   : > { %v4622_v17 = vpop.f32.mrb[17].mxu1 }
 0x16e   : > { %v4623_v14 = vadd.f32 %v4622_v17, %v4621_v50  ;;  %v4624_v51 = vpop.f32.mrb[18].mxu1 }
 0x16f   : > { %v4625_v53 = vpop.f32.mrb[19].mxu1 }
 0x170   : > { %v4626_v12 = vadd.f32 %v4625_v53, %v4624_v51 }
 0x17a   : > { %v4643_v16 = vpop.f32.mrb[20].mxu0 }
 0x17b   : > { %v4644_v36 = vpop.f32.mrb[21].mxu0 }
 0x17c   : > { %v4645_v54 = vadd.f32 %v4644_v36, %v4643_v16  ;;  %v4646_v55 = vpop.f32.mrb[22].mxu0  ;;  %v2150_v15 = vpop.f32.mrb[20].mxu1 }
 0x17d   : > { %v4647_v56 = vpop.f32.mrb[23].mxu0  ;;  %v4847_v61 = vpop.f32.mrb[21].mxu1 }
 0x17e   : > { %v4648_v43 = vadd.f32 %v4647_v56, %v4646_v55  ;;  %v2110_v33 = vadd.f32 %v4645_v54, %v4623_v14  ;;  %v2153_v59 = vpop.f32.mrb[22].mxu1 }
 0x17f   : > { %v4848_v60 = vpop.f32.mrb[23].mxu1 }
 0x180   : > { %v2151_v38 = vadd.f32 %v2150_v15, %v2110_v33  ;;  %v2113_v62 = vadd.f32 %v4648_v43, %v4626_v12 }
 0x182   : > { %v2157_v63 = vadd.f32 %v2151_v38, %v1635_v47  ;;  %v2154_v30 = vadd.f32 %v2153_v59, %v2113_v62 }
 0x184   : > { %v2158_v18 = vadd.f32 %v2154_v30, %v1636_v39 }
 0x19a   : > { %v4670_v41 = vpop.f32.mrb[24].mxu0 }
 0x19b   : > { %v4671_v1 = vpop.f32.mrb[25].mxu0 }
 0x19c   : > { %v4692_v45 = vpop.f32.mrb[24].mxu1  ;;  %v4672_v2 = vadd.f32 %v4671_v1, %v4670_v41  ;;  %v4673_v3 = vpop.f32.mrb[26].mxu0 }
 0x19d   : > { %v4693_v58 = vpop.f32.mrb[25].mxu1  ;;  %v4674_v4 = vpop.f32.mrb[27].mxu0 }
 0x19e   : > { %v4694_v40 = vadd.f32 %v4693_v58, %v4692_v45  ;;  %v4695_v5 = vpop.f32.mrb[26].mxu1  ;;  %v4675_v6 = vadd.f32 %v4674_v4, %v4673_v3 }
 0x19f   : > { %v4696_v7 = vpop.f32.mrb[27].mxu1 }
 0x1a0   : > { %v4697_v0 = vadd.f32 %v4696_v7, %v4695_v5  ;;  %v2562_v8 = vadd.f32 %v4694_v40, %v4672_v2 }
 0x1a2   : > { %v2565_v9 = vadd.f32 %v4697_v0, %v4675_v6 }
 0x1aa   : > { %v2602_v13 = vpop.f32.mrb[28].mxu0 }
 0x1ab   : > { %v2603_v23 = vadd.f32 %v2602_v13, %v2562_v8  ;;  %v4859_v19 = vpop.f32.mrb[29].mxu0 }
 0x1ac   : > { %v2605_v10 = vpop.f32.mrb[30].mxu0 }
 0x1ad   : > { %v2609_v26 = vadd.f32 %v2603_v23, %v2157_v63  ;;  %v2606_v46 = vadd.f32 %v2605_v10, %v2565_v9  ;;  %v4860_v52 = vpop.f32.mrb[31].mxu0  ;;  %v4454_v63 = vld [vmem:[%s6314_s2] ss:$0 sm:$0xff] }
 0x1af   : > { %v2610_v37 = vadd.f32 %v2606_v46, %v2158_v18 }
 0x1bc   : > { %v4719_v44 = vpop.f32.mrb[28].mxu1 }
 0x1bd   : > { %v4720_v57 = vpop.f32.mrb[29].mxu1 }
 0x1be   : > { %v4721_v20 = vadd.f32 %v4720_v57, %v4719_v44  ;;  %v4722_v21 = vpop.f32.mrb[30].mxu1 }
 0x1bf   : > { %v4723_v22 = vpop.f32.mrb[31].mxu1 }
 0x1c0   : > { %v4724_v42 = vadd.f32 %v4723_v22, %v4722_v21 }
 0x1ca   : > { %v4741_v11 = vpop.f32.mrb[32].mxu0 }
 0x1cb   : > { %v4742_v24 = vpop.f32.mrb[33].mxu0 }
 0x1cc   : > { %v4743_v25 = vadd.f32 %v4742_v24, %v4741_v11  ;;  %v4744_v27 = vpop.f32.mrb[34].mxu0  ;;  %v3124_v28 = vpop.f32.mrb[32].mxu1 }
 0x1cd   : > { %v4745_v29 = vpop.f32.mrb[35].mxu0  ;;  %v4871_v31 = vpop.f32.mrb[33].mxu1 }
 0x1ce   : > { %v4746_v32 = vadd.f32 %v4745_v29, %v4744_v27  ;;  %v3084_v34 = vadd.f32 %v4743_v25, %v4721_v20  ;;  %v3127_v35 = vpop.f32.mrb[34].mxu1 }
 0x1cf   : > { %v4872_v47 = vpop.f32.mrb[35].mxu1 }
 0x1d0   : > { %v3125_v48 = vadd.f32 %v3124_v28, %v3084_v34  ;;  %v3087_v49 = vadd.f32 %v4746_v32, %v4724_v42 }
 0x1d2   : > { %v3131_v39 = vadd.f32 %v3125_v48, %v2609_v26  ;;  %v3128_v50 = vadd.f32 %v3127_v35, %v3087_v49 }
 0x1d4   : > { %v3132_v17 = vadd.f32 %v3128_v50, %v2610_v37 }
 0x1ea   : > { %v4768_v14 = vpop.f32.mrb[36].mxu0 }
 0x1eb   : > { %v4769_v51 = vpop.f32.mrb[37].mxu0 }
 0x1ec   : > { %v4790_v53 = vpop.f32.mrb[36].mxu1  ;;  %v4770_v12 = vadd.f32 %v4769_v51, %v4768_v14  ;;  %v4771_v16 = vpop.f32.mrb[38].mxu0 }
 0x1ed   : > { %v4791_v36 = vpop.f32.mrb[37].mxu1  ;;  %v4772_v54 = vpop.f32.mrb[39].mxu0 }
 0x1ee   : > { %v4792_v55 = vadd.f32 %v4791_v36, %v4790_v53  ;;  %v4793_v15 = vpop.f32.mrb[38].mxu1  ;;  %v4773_v56 = vadd.f32 %v4772_v54, %v4771_v16 }
 0x1ef   : > { %v4794_v61 = vpop.f32.mrb[39].mxu1 }
 0x1f0   : > { %v4795_v43 = vadd.f32 %v4794_v61, %v4793_v15  ;;  %v3536_v33 = vadd.f32 %v4792_v55, %v4770_v12 }
 0x1f2   : > { %v3539_v59 = vadd.f32 %v4795_v43, %v4773_v56 }
 0x1fa   : > { %v3576_v60 = vpop.f32.mrb[40].mxu0 }
 0x1fb   : > { %v3577_v38 = vadd.f32 %v3576_v60, %v3536_v33  ;;  %v4883_v62 = vpop.f32.mrb[41].mxu0 }
 0x1fc   : > { %v3579_v30 = vpop.f32.mrb[42].mxu0 }
 0x1fd   : > { %v3583_v18 = vadd.f32 %v3577_v38, %v3131_v39  ;;  %v3580_v41 = vadd.f32 %v3579_v30, %v3539_v59  ;;  %v4884_v1 = vpop.f32.mrb[43].mxu0 }
 0x1ff   : > { %v3592_v45 = vadd.f32 %v4454_v63, %v3583_v18  ;;  %v3584_v2 = vadd.f32 %v3580_v41, %v3132_v17 }
 0x201   : > { %v3594_v3 = vmax.f32 %v3592_v45, 0.0  ;;  %v3593_v58 = vadd.f32 %v4454_v63, %v3584_v2 }
 0x203   : > { %3597 = vst.msk [vmem:[%s235_s23] sm:$0xff] %vm3596_vm9, %v3594_v3  ;;  %v3595_v4 = vmax.f32 %v3593_v58, 0.0  ;;  %v3599_v40 = vsel %vm3596_vm9, %v3594_v3, -inf  ;;  %v3610_v5 = vsel %vm3596_vm9, %v3594_v3, 0.0 }
 0x205   : > { %3598 = vst.msk [vmem:[%s235_s23 + $0x8] sm:$0xff] %vm3596_vm9, %v3595_v4  ;;  %v3600_v6 = vsel %vm3596_vm9, %v3595_v4, -inf  ;;  %v3611_v7 = vsel %vm3596_vm9, %v3595_v4, 0.0 }
 0x206   : > { %v3601_v0 = vmax.f32 %v3599_v40, %v3600_v6  ;;  %v3612_v8 = vadd.f32 %v3611_v7, %v3610_v5 }
 0x208   : > { %v3602_v9 = vrot.slane %v3601_v0, 4  ;;  %v3613_v13 = vrot.slane %v3612_v8, 4 }
 0x20a   : > { %v3603_v23 = vmax.f32 %v3601_v0, %v3602_v9  ;;  %v3614_v19 = vadd.f32 %v3613_v13, %v3612_v8 }
 0x20c   : > { %v3604_v10 = vrot.slane %v3603_v23, 2  ;;  %v3615_v26 = vrot.slane %v3614_v19, 2 }
 0x20e   : > { %v3605_v46 = vmax.f32 %v3603_v23, %v3604_v10  ;;  %v3616_v52 = vadd.f32 %v3615_v26, %v3614_v19 }
 0x210   : > { %v3606_v37 = vrot.slane %v3605_v46, 1  ;;  %v3617_v44 = vrot.slane %v3616_v52, 1 }
 0x212   : > { %v3607_v57 = vmax.f32 %v3605_v46, %v3606_v37  ;;  %v3618_v20 = vadd.f32 %v3617_v44, %v3616_v52 }
 0x214   : > { %3609 = vst.msk [vmem:[%s238_s26] sm:$0x1] %vm3608_vm10, %v3607_v57  ;;  %v3619_v21 = vmul.f32 0.0625, %v3618_v20 }
 0x216   : > { %3620 = vst.msk [vmem:[%s241_s29] sm:$0x1] %vm3608_vm10, %v3619_v21 }
 0x217 PF: > { %s16_s18 = sadd.s32 1, %s5193_s18  }
 0x218   : > { %p13_p4 = scmp.ge.s32.totalorder %s16_s18, 4  }
 0x21a   :  { %15 = sbr.rel (!%p13_p4) target bundleno = 1 (0x1), region = 92 }

// kernel: musicnn_forward.17
= control target key start
LH: loop header
LB: loop body
LE: loop exit
PB: predicated region body
PF: predicated region fallthrough
CT: control target
= control target key end

     0   :  { %v268_v1 = vmov 0   ;;  %v61_v4 = vlaneseq  ;;  %v269_v7 = vmov 1966171168   ;;  %s348_s0 = inlined_call_operand.vmem [shape: bf16[2,200], index: 0, kind: input, shape index: {}]   ;;  %s349_s1 = inlined_call_operand.vmem [shape: bf16[200,10], index: 1, kind: input, shape index: {}]   ;;  %s350_s2 = inlined_call_operand.vmem [shape: f32[1,10], index: 2, kind: input, shape index: {}]   ;;  %s351_s3 = inlined_call_operand.hbm [shape: f32[2,10], index: 3, kind: output, shape index: {}]  }
   0x1   :  { %v231_v0 = vld [vmem:[%s349_s1] sm:$0xff]   ;;  %156 = vmatprep.subr.bf16.mxu0 %v268_v1  ;;  %v232_v2 = vld [vmem:[%s349_s1 + $0x8] sm:$0xff]   ;;  %v233_v3 = vld [vmem:[%s349_s1 + $0x10] sm:$0xff]   ;;  %v59_v8 = vunpack.c.l.s4 %v269_v7 }
   0x2   :  { %157 = vmatpush1.bf16.msra.mxu0 %v231_v0  ;;  %v234_v5 = vld [vmem:[%s349_s1 + $0x18] sm:$0xff]   ;;  %v213_v6 = vld.sshfl [vmem:[%s348_s0] sm:$0x11 pattern:$0x75316420]  ;;  %v62_v9 = vshrl.u32 %v61_v4, 7 }
   0x3   :  { %158 = vmatprep.subr.bf16.mxu0 %v268_v1  ;;  %v235_v10 = vld [vmem:[%s349_s1 + $0x20] sm:$0xff]  }
   0x6   :  { %159 = vmatpush1.bf16.msra.mxu0 %v232_v2 }
   0x7   :  { %160 = vmatprep.subr.bf16.mxu0 %v268_v1 }
   0xa   :  { %161 = vmatpush1.bf16.msra.mxu0 %v233_v3 }
   0xb   :  { %162 = vmatprep.subr.bf16.mxu0 %v268_v1 }
   0xe   :  { %163 = vmatpush1.bf16.msra.mxu0 %v234_v5 }
   0xf   :  { %8 = vsyncpa [#allocation3], 0  ;;  %164 = vmatprep.subr.bf16.mxu0 %v268_v1  ;;  %v57_v11 = vcombine.high %v213_v6, %v213_v6  ;;  %v60_v12 = vunpack.c.0.s8 %v59_v8  ;;  %v236_v14 = vld [vmem:[%s349_s1 + $0x28] sm:$0xff]   ;;  %vm148_vm0 = vcmask 588800   ;;  %v237_v16 = vld [vmem:[%s349_s1 + $0x30] sm:$0xff]   ;;  %vm152_vm1 = vcmask 1043456  }
  0x10   :  { %v238_v17 = vld [vmem:[%s349_s1 + $0x38] sm:$0xff]   ;;  %v239_v18 = vld [vmem:[%s349_s1 + $0x40] sm:$0xff]   ;;  %v240_v19 = vld [vmem:[%s349_s1 + $0x48] sm:$0xff]   ;;  %s270_s14 = smov [#allocation2]   ;;  %vm196_vm2 = vcmask 74752  }
  0x11   :  { %v63_v13 = vsub.s32 %v60_v12, %v62_v9  ;;  %v241_v20 = vld [vmem:[%s349_s1 + $0x50] sm:$0xff]   ;;  %v242_v21 = vld [vmem:[%s349_s1 + $0x58] sm:$0xff]   ;;  %v243_v22 = vld [vmem:[%s349_s1 + $0x60] ss:$0 sps:$4 sm:$0xff]   ;;  %s204_s15 = sshll.u32 %s270_s14, 4  ;;  %s205_s15 = int_to_ptr.vmem [resolvable:$true] %s204_s15 }
  0x12   :  { %165 = vmatpush1.bf16.msra.mxu0 %v235_v10  ;;  %v154_v23 = vsel %vm152_vm1, %v243_v22, 0  ;;  %v212_v25 = vld [vmem:[%s350_s2] ss:$0 sm:$0xff]  ;;  %s244_s1 = scalar_lea.vmem %s205_s15, 32  ;;  %p249_p1 = scmp.lt.s32.totalorder %s205_s15, %s205_s15 }
  0x13   :  { %166 = vmatprep.subr.bf16.mxu0 %v268_v1  ;;  %v71_v15 = vrot.slane %v57_v11, %v63_v13  ;;  %v64_v24 = vrot.slane %v213_v6, %v63_v13  ;;  %p245_p0 = scmp.ne.s32.totalorder %s205_s15, %s244_s1  ;;  %p250_p2 = scmp.lt.s32.totalorder %s244_s1, %s244_s1 }
  0x15   :  { %227 = vmatprep.mubr.msk.bf16.mxu0 %vm148_vm0, %v71_v15  ;;  %p251_p3 = por %p250_p2, %p249_p1 }
  0x16   :  { %167 = vmatpush1.bf16.msra.mxu0 %v236_v14 }
  0x17   :  { %168 = vmatprep.subr.bf16.mxu0 %v268_v1  ;;  %p252_p4 = pnand %p251_p3, %p245_p0 }
  0x1a   :  { %169 = vmatpush1.bf16.msra.mxu0 %v237_v16 }
  0x1b   :  { %170 = vmatprep.subr.bf16.mxu0 %v268_v1 }
  0x1e   :  { %171 = vmatpush1.bf16.msra.mxu0 %v238_v17 }
  0x1f   :  { %172 = vmatprep.subr.bf16.mxu0 %v268_v1 }
  0x22   :  { %173 = vmatpush1.bf16.msra.mxu0 %v239_v18 }
  0x23   :  { %174 = vmatprep.subr.bf16.mxu0 %v268_v1 }
  0x26   :  { %175 = vmatpush1.bf16.msra.mxu0 %v240_v19 }
  0x27   :  { %176 = vmatprep.subr.bf16.mxu0 %v268_v1 }
  0x2a   :  { %177 = vmatpush1.bf16.msra.mxu0 %v241_v20 }
  0x2b   :  { %178 = vmatprep.subr.bf16.mxu0 %v268_v1 }
  0x2e   :  { %179 = vmatpush1.bf16.msra.mxu0 %v242_v21 }
  0x2f   :  { %180 = vmatprep.subr.bf16.mxu0 %v268_v1 }
  0x32   :  { %181 = vmatpush1.bf16.msra.mxu0 %v154_v23 }
  0x35   :  { %189 = vmatmul.mubr.bf16.vlgmr.msra.gmra.mrb[0].mxu0 %v64_v24 }
 0x108   :  { %v190_v26 = vpop.f32.mrb[0].mxu0 }
 0x109   :  { %v191_v27 = vadd.f32 %v212_v25, %v190_v26  ;;  %v192_v28 = vpop.f32.mrb[1].mxu0 }
 0x10a   :  { %v193_v29 = vpop.f32.mrb[2].mxu0 }
 0x10b   :  { %v194_v30 = vpop.f32.mrb[3].mxu0  ;;  %197 = vst.msk [vmem:[#allocation2] sm:$0x3] %vm196_vm2, %v191_v27 }
 0x10c   :  { %255 = shalt.err (!%p252_p4)
}
 0x10d   :  { %s256_s2 = scalar_lea.hbm %s351_s3, 32 }
 0x10e   :  { %p257_p5 = scmp.ne.s32.totalorder %s351_s3, %s256_s2  ;;  %p260_p6 = scmp.lt.u32.totalorder %s256_s2, %s351_s3 }
 0x110   :  { %p262_p7 = pnand %p260_p6, %p257_p5 }
 0x112   :  { %265 = shalt.err (!%p262_p7)
}
 0x113   :  { %207 = dma.vmem_to_hbm [thread:$0]  %s205_s15, 32, %s351_s3, [#allocation3]  }
 0x114   :  { %266 = dma.done.wait [#allocation3], 32  }
 0x115   :  { %267 = vsyncadd [#allocation3], 4294967264 }
 0x116   :  { %211 = vsyncpa [#allocation3], 1 }

// kernel: musicnn_forward.16
= control target key start
LH: loop header
LB: loop body
LE: loop exit
PB: predicated region body
PF: predicated region fallthrough
CT: control target
= control target key end

     0   :  { %v208_v38 = vlaneseq  ;;  %v2027_v39 = vmov 1966171168   ;;  %vm1249_vm0 = vcmask 801792   ;;  %vm1253_vm1 = vcmask 1040384   ;;  %s2674_s1 = inlined_call_operand.vmem [shape: bf16[1506,200], index: 1, kind: input, shape index: {}]   ;;  %s2675_s0 = inlined_call_operand.vmem [shape: bf16[2,1506], index: 0, kind: input, shape index: {}]   ;;  %s2676_s2 = inlined_call_operand.vmem [shape: f32[1,200], index: 2, kind: input, shape index: {}]   ;;  %s2677_s3 = inlined_call_operand.vmem [shape: f32[2,200], index: 3, kind: output, shape index: {}]  }
   0x1   :  { %v1742_v0 = vld [vmem:[%s2674_s1 + $0x4] ss:$8 sps:$4 sm:$0xff]   ;;  %v1746_v2 = vld [vmem:[%s2674_s1] ss:$8 sps:$4 sm:$0xff]   ;;  %v1748_v4 = vld [vmem:[%s2674_s1 + $0x14] ss:$8 sps:$4 sm:$0xff]   ;;  %v222_v40 = vunpack.c.l.s4 %v2027_v39 }
   0x2   :  { %v1744_v1 = vld [vmem:[%s2674_s1 + $0x304] ss:$8 sps:$4 sm:$0xff]   ;;  %1260 = vmatprep.subr.bf16.mxu1 %v1742_v0  ;;  %v1747_v3 = vld [vmem:[%s2674_s1 + $0x300] ss:$8 sps:$4 sm:$0xff]   ;;  %v1750_v5 = vld [vmem:[%s2674_s1 + $0x314] ss:$8 sps:$4 sm:$0xff]  }
   0x3   :  { %1383 = vmatprep.subr.bf16.mxu0 %v1744_v1  ;;  %1261 = vmatpush1.bf16.msra.mxu1 %v1746_v2  ;;  %v1752_v6 = vld [vmem:[%s2674_s1 + $0x10] ss:$8 sps:$4 sm:$0xff]   ;;  %v1754_v8 = vld [vmem:[%s2674_s1 + $0x24] ss:$8 sps:$4 sm:$0xff]   ;;  %v1758_v10 = vld [vmem:[%s2674_s1 + $0x20] ss:$8 sps:$4 sm:$0xff]   ;;  %v223_v46 = vunpack.c.0.s8 %v222_v40 }
   0x4   :  { %1384 = vmatpush1.bf16.msra.mxu0 %v1747_v3  ;;  %1262 = vmatprep.subr.bf16.mxu1 %v1748_v4  ;;  %v1753_v7 = vld [vmem:[%s2674_s1 + $0x310] ss:$8 sps:$4 sm:$0xff]   ;;  %v1756_v9 = vld [vmem:[%s2674_s1 + $0x324] ss:$8 sps:$4 sm:$0xff]   ;;  %v1759_v11 = vld [vmem:[%s2674_s1 + $0x320] ss:$8 sps:$4 sm:$0xff]  }
   0x5   :  { %1385 = vmatprep.subr.bf16.mxu0 %v1750_v5  ;;  %v1760_v12 = vld [vmem:[%s2674_s1 + $0x34] ss:$8 sps:$4 sm:$0xff]   ;;  %v1764_v14 = vld [vmem:[%s2674_s1 + $0x30] ss:$8 sps:$4 sm:$0xff]   ;;  %v1766_v16 = vld [vmem:[%s2674_s1 + $0x44] ss:$8 sps:$4 sm:$0xff]  }
   0x6   :  { %v1762_v13 = vld [vmem:[%s2674_s1 + $0x334] ss:$8 sps:$4 sm:$0xff]   ;;  %v1765_v15 = vld [vmem:[%s2674_s1 + $0x330] ss:$8 sps:$4 sm:$0xff]   ;;  %v1768_v17 = vld [vmem:[%s2674_s1 + $0x344] ss:$8 sps:$4 sm:$0xff]  }
   0x7   :  { %1263 = vmatpush1.bf16.msra.mxu1 %v1752_v6  ;;  %v1770_v18 = vld [vmem:[%s2674_s1 + $0x40] ss:$8 sps:$4 sm:$0xff]   ;;  %v1772_v20 = vld [vmem:[%s2674_s1 + $0x54] ss:$8 sps:$4 sm:$0xff]   ;;  %v1776_v22 = vld [vmem:[%s2674_s1 + $0x50] ss:$8 sps:$4 sm:$0xff]  }
   0x8   :  { %1386 = vmatpush1.bf16.msra.mxu0 %v1753_v7  ;;  %1264 = vmatprep.subr.bf16.mxu1 %v1754_v8  ;;  %v1771_v19 = vld [vmem:[%s2674_s1 + $0x340] ss:$8 sps:$4 sm:$0xff]   ;;  %v1774_v21 = vld [vmem:[%s2674_s1 + $0x354] ss:$8 sps:$4 sm:$0xff]   ;;  %v1777_v23 = vld [vmem:[%s2674_s1 + $0x350] ss:$8 sps:$4 sm:$0xff]  }
   0x9   :  { %1387 = vmatprep.subr.bf16.mxu0 %v1756_v9  ;;  %v1778_v24 = vld [vmem:[%s2674_s1 + $0x64] ss:$8 sps:$4 sm:$0xff]   ;;  %v1782_v26 = vld [vmem:[%s2674_s1 + $0x60] ss:$8 sps:$4 sm:$0xff]   ;;  %v1784_v28 = vld [vmem:[%s2674_s1 + $0x74] ss:$8 sps:$4 sm:$0xff]  }
   0xa   :  { %v1780_v25 = vld [vmem:[%s2674_s1 + $0x364] ss:$8 sps:$4 sm:$0xff]   ;;  %v1783_v27 = vld [vmem:[%s2674_s1 + $0x360] ss:$8 sps:$4 sm:$0xff]   ;;  %v1786_v29 = vld [vmem:[%s2674_s1 + $0x374] ss:$8 sps:$4 sm:$0xff]  }
   0xb   :  { %1265 = vmatpush1.bf16.msra.mxu1 %v1758_v10  ;;  %v1788_v30 = vld [vmem:[%s2674_s1 + $0x70] ss:$8 sps:$4 sm:$0xff]   ;;  %v1790_v32 = vld [vmem:[%s2674_s1 + $0x84] ss:$8 sps:$4 sm:$0xff]   ;;  %v1794_v34 = vld [vmem:[%s2674_s1 + $0x80] ss:$8 sps:$4 sm:$0xff]  }
   0xc   :  { %1388 = vmatpush1.bf16.msra.mxu0 %v1759_v11  ;;  %1266 = vmatprep.subr.bf16.mxu1 %v1760_v12  ;;  %v1789_v31 = vld [vmem:[%s2674_s1 + $0x370] ss:$8 sps:$4 sm:$0xff]   ;;  %v1792_v33 = vld [vmem:[%s2674_s1 + $0x384] ss:$8 sps:$4 sm:$0xff]   ;;  %v1795_v35 = vld [vmem:[%s2674_s1 + $0x380] ss:$8 sps:$4 sm:$0xff]  }
   0xd   :  { %1389 = vmatprep.subr.bf16.mxu0 %v1762_v13  ;;  %v1796_v36 = vld [vmem:[%s2674_s1 + $0x94] ss:$8 sps:$4 sm:$0xff]   ;;  %v1800_v41 = vld [vmem:[%s2674_s1 + $0x90] ss:$8 sps:$4 sm:$0xff]   ;;  %v1802_v43 = vld [vmem:[%s2674_s1 + $0xa4] ss:$8 sps:$4 sm:$0xff]  }
   0xe   :  { %v1798_v37 = vld [vmem:[%s2674_s1 + $0x394] ss:$8 sps:$4 sm:$0xff]   ;;  %v1801_v42 = vld [vmem:[%s2674_s1 + $0x390] ss:$8 sps:$4 sm:$0xff]   ;;  %v1804_v44 = vld [vmem:[%s2674_s1 + $0x3a4] ss:$8 sps:$4 sm:$0xff]  }
   0xf   :  { %1267 = vmatpush1.bf16.msra.mxu1 %v1764_v14  ;;  %v2175_v45 = vshrl.u32 %v208_v38, 7  ;;  %v1806_v47 = vld [vmem:[%s2674_s1 + $0xa0] ss:$8 sps:$4 sm:$0xff]   ;;  %v1808_v49 = vld [vmem:[%s2674_s1 + $0xb4] ss:$8 sps:$4 sm:$0xff]   ;;  %vm1519_vm2 = vcmask 1041408  }
  0x10   :  { %1390 = vmatpush1.bf16.msra.mxu0 %v1765_v15  ;;  %1268 = vmatprep.subr.bf16.mxu1 %v1766_v16  ;;  %v1807_v48 = vld [vmem:[%s2674_s1 + $0x3a0] ss:$8 sps:$4 sm:$0xff]   ;;  %v1810_v50 = vld [vmem:[%s2674_s1 + $0x3b4] ss:$8 sps:$4 sm:$0xff]   ;;  %v1812_v53 = vld [vmem:[%s2674_s1 + $0xb0] ss:$8 sps:$4 sm:$0xff]  }
  0x11   :  { %1391 = vmatprep.subr.bf16.mxu0 %v1768_v17  ;;  %v2190_v51 = vsub.s32 %v223_v46, %v2175_v45  ;;  %v15_v52 = vld [vmem:[%s2675_s0] sm:$0xff]  ;;  %v1813_v56 = vld [vmem:[%s2674_s1 + $0x3b0] ss:$8 sps:$4 sm:$0xff]   ;;  %v1820_v1 = vld [vmem:[%s2674_s1 + $0xd4] ss:$8 sps:$4 sm:$0xff]   ;;  %vm1520_vm3 = vcmask 584706  }
  0x12   :  { %v220_v54 = vcombine.high %v15_v52, %v15_v52  ;;  %v1814_v57 = vld [vmem:[%s2674_s1 + $0xc4] ss:$8 sps:$4 sm:$0xff]   ;;  %v1818_v61 = vld [vmem:[%s2674_s1 + $0xc0] ss:$8 sps:$4 sm:$0xff]   ;;  %v1822_v2 = vld [vmem:[%s2674_s1 + $0x3d4] ss:$8 sps:$4 sm:$0xff]  }
  0x13   :  { %1269 = vmatpush1.bf16.msra.mxu1 %v1770_v18  ;;  %v227_v55 = vrot.slane %v15_v52, %v2190_v51  ;;  %v1816_v58 = vld [vmem:[%s2674_s1 + $0x3c4] ss:$8 sps:$4 sm:$0xff]   ;;  %v1819_v0 = vld [vmem:[%s2674_s1 + $0x3c0] ss:$8 sps:$4 sm:$0xff]   ;;  %v1824_v4 = vld [vmem:[%s2674_s1 + $0xd0] ss:$8 sps:$4 sm:$0xff]  }
  0x14   :  { %1392 = vmatpush1.bf16.msra.mxu0 %v1771_v19  ;;  %1270 = vmatprep.subr.bf16.mxu1 %v1772_v20  ;;  %v234_v60 = vrot.slane %v220_v54, %v2190_v51  ;;  %v1825_v6 = vld [vmem:[%s2674_s1 + $0x3d0] ss:$8 sps:$4 sm:$0xff]   ;;  %v1826_v7 = vld [vmem:[%s2674_s1 + $0xe4] ss:$8 sps:$4 sm:$0xff]   ;;  %v1830_v9 = vld [vmem:[%s2674_s1 + $0xe0] ss:$8 sps:$4 sm:$0xff]  }
  0x15   :  { %1393 = vmatprep.subr.bf16.mxu0 %v1774_v21  ;;  %v235_v59 = vcombine.high %v227_v55, %v227_v55  ;;  %v1828_v8 = vld [vmem:[%s2674_s1 + $0x3e4] ss:$8 sps:$4 sm:$0xff]   ;;  %v1831_v10 = vld [vmem:[%s2674_s1 + $0x3e0] ss:$8 sps:$4 sm:$0xff]   ;;  %v1832_v11 = vld [vmem:[%s2674_s1 + $0xf4] ss:$8 sps:$4 sm:$0xff]   ;;  %v2270_v19 = vrot.slane %v227_v55, %v2190_v51 }
  0x16   :  { %v236_v63 = vcombine.high %v234_v60, %v234_v60  ;;  %v1834_v12 = vld [vmem:[%s2674_s1 + $0x3f4] ss:$8 sps:$4 sm:$0xff]   ;;  %v1836_v13 = vld [vmem:[%s2674_s1 + $0xf0] ss:$8 sps:$4 sm:$0xff]   ;;  %v2255_v14 = vrot.slane %v234_v60, %v2190_v51  ;;  %v1841_v16 = vld [vmem:[%s2674_s1 + $0x104] ss:$8 sps:$4 sm:$0xff]  }
  0x17   :  { %1271 = vmatpush1.bf16.msra.mxu1 %v1776_v22  ;;  %v257_v62 = vrot.slane %v235_v59, %v2190_v51  ;;  %v1837_v15 = vld [vmem:[%s2674_s1 + $0x3f0] ss:$8 sps:$4 sm:$0xff]   ;;  %v1844_v17 = vld [vmem:[%s2674_s1 + $0x404] ss:$8 sps:$4 sm:$0xff]   ;;  %v1839_v18 = vld [vmem:[%s2674_s1 + $0x100] ss:$8 sps:$4 sm:$0xff]  }
  0x18   :  { %1394 = vmatpush1.bf16.msra.mxu0 %v1777_v23  ;;  %1272 = vmatprep.subr.bf16.mxu1 %v1778_v24  ;;  %v2223_v3 = vrot.slane %v236_v63, %v2190_v51  ;;  %v266_v20 = vcombine.high %v2255_v14, %v2255_v14  ;;  %v1842_v21 = vld [vmem:[%s2674_s1 + $0x400] ss:$8 sps:$4 sm:$0xff]   ;;  %v1847_v22 = vld [vmem:[%s2674_s1 + $0x114] ss:$8 sps:$4 sm:$0xff]   ;;  %v1881_v54 = vld [vmem:[%s2674_s1 + $0x170] ss:$8 sps:$4 sm:$0xff]  }
  0x19   :  { %1395 = vmatprep.subr.bf16.mxu0 %v1780_v25  ;;  %1292 = vmatprep.mubr.bf16.mxu1 %v257_v62  ;;  %v1850_v23 = vld [vmem:[%s2674_s1 + $0x414] ss:$8 sps:$4 sm:$0xff]   ;;  %v267_v24 = vcombine.high %v257_v62, %v257_v62  ;;  %v1845_v25 = vld [vmem:[%s2674_s1 + $0x110] ss:$8 sps:$4 sm:$0xff]   ;;  %v1866_v38 = vld [vmem:[%s2674_s1 + $0x440] ss:$8 sps:$4 sm:$0xff]  }
  0x1a   :  { %v268_v5 = vcombine.high %v2223_v3, %v2223_v3  ;;  %v1871_v39 = vld [vmem:[%s2674_s1 + $0x154] ss:$8 sps:$4 sm:$0xff]   ;;  %v2347_v46 = vld.sshfl [vmem:[%s2675_s0 + $0x8] sm:$0x33 pattern:$0x75316420]  ;;  %vm1521_vm4 = vmor %vm1520_vm3, %vm1519_vm2 }
  0x1b   :  { %1273 = vmatpush1.bf16.msra.mxu1 %v1782_v26  ;;  %v1848_v26 = vld [vmem:[%s2674_s1 + $0x410] ss:$8 sps:$4 sm:$0xff]   ;;  %v1874_v40 = vld [vmem:[%s2674_s1 + $0x454] ss:$8 sps:$4 sm:$0xff]   ;;  %v1890_v59 = vld [vmem:[%s2674_s1 + $0x480] ss:$8 sps:$4 sm:$0xff]  }
  0x1c   :  { %1396 = vmatpush1.bf16.msra.mxu0 %v1783_v27  ;;  %1274 = vmatprep.subr.bf16.mxu1 %v1784_v28  ;;  %v1853_v27 = vld [vmem:[%s2674_s1 + $0x124] ss:$8 sps:$4 sm:$0xff]   ;;  %v1886_v52 = vld [vmem:[%s2674_s1 + $0x474] ss:$8 sps:$4 sm:$0xff]   ;;  %v1884_v55 = vld [vmem:[%s2674_s1 + $0x470] ss:$8 sps:$4 sm:$0xff]  }
  0x1d   :  { %1397 = vmatprep.subr.bf16.mxu0 %v1786_v29  ;;  %1415 = vmatprep.mubr.bf16.mxu0 %v268_v5  ;;  %v1856_v28 = vld [vmem:[%s2674_s1 + $0x424] ss:$8 sps:$4 sm:$0xff]   ;;  %v1851_v29 = vld [vmem:[%s2674_s1 + $0x120] ss:$8 sps:$4 sm:$0xff]   ;;  %v1895_v60 = vld [vmem:[%s2674_s1 + $0x194] ss:$8 sps:$4 sm:$0xff]  }
  0x1e   :  { %v1893_v62 = vld [vmem:[%s2674_s1 + $0x190] ss:$8 sps:$4 sm:$0xff]   ;;  %v1907_v5 = vld [vmem:[%s2674_s1 + $0x1b4] ss:$8 sps:$4 sm:$0xff]  }
  0x1f   :  { %1275 = vmatpush1.bf16.msra.mxu1 %v1788_v30  ;;  %v1854_v30 = vld [vmem:[%s2674_s1 + $0x420] ss:$8 sps:$4 sm:$0xff]   ;;  %v1896_v63 = vld [vmem:[%s2674_s1 + $0x490] ss:$8 sps:$4 sm:$0xff]  }
  0x20   :  { %1398 = vmatpush1.bf16.msra.mxu0 %v1789_v31  ;;  %1276 = vmatprep.subr.bf16.mxu1 %v1790_v32  ;;  %v1859_v31 = vld [vmem:[%s2674_s1 + $0x134] ss:$8 sps:$4 sm:$0xff]  }
  0x21   :  { %1399 = vmatprep.subr.bf16.mxu0 %v1792_v33  ;;  %v1862_v32 = vld [vmem:[%s2674_s1 + $0x434] ss:$8 sps:$4 sm:$0xff]   ;;  %v1857_v33 = vld [vmem:[%s2674_s1 + $0x130] ss:$8 sps:$4 sm:$0xff]  }
  0x23   :  { %1277 = vmatpush1.bf16.msra.mxu1 %v1794_v34  ;;  %v1860_v34 = vld [vmem:[%s2674_s1 + $0x430] ss:$8 sps:$4 sm:$0xff]  }
  0x24   :  { %1400 = vmatpush1.bf16.msra.mxu0 %v1795_v35  ;;  %1278 = vmatprep.subr.bf16.mxu1 %v1796_v36  ;;  %v1865_v35 = vld [vmem:[%s2674_s1 + $0x144] ss:$8 sps:$4 sm:$0xff]  }
  0x25   :  { %1401 = vmatprep.subr.bf16.mxu0 %v1798_v37  ;;  %v1868_v36 = vld [vmem:[%s2674_s1 + $0x444] ss:$8 sps:$4 sm:$0xff]   ;;  %v1863_v37 = vld [vmem:[%s2674_s1 + $0x140] ss:$8 sps:$4 sm:$0xff]  }
  0x27   :  { %1279 = vmatpush1.bf16.msra.mxu1 %v1800_v41  ;;  %v1869_v41 = vld [vmem:[%s2674_s1 + $0x150] ss:$8 sps:$4 sm:$0xff]  }
  0x28   :  { %1402 = vmatpush1.bf16.msra.mxu0 %v1801_v42  ;;  %1280 = vmatprep.subr.bf16.mxu1 %v1802_v43  ;;  %v1872_v42 = vld [vmem:[%s2674_s1 + $0x450] ss:$8 sps:$4 sm:$0xff]   ;;  %v1877_v43 = vld [vmem:[%s2674_s1 + $0x164] ss:$8 sps:$4 sm:$0xff]  }
  0x29   :  { %1403 = vmatprep.subr.bf16.mxu0 %v1804_v44  ;;  %v1880_v44 = vld [vmem:[%s2674_s1 + $0x464] ss:$8 sps:$4 sm:$0xff]  }
  0x2b   :  { %1281 = vmatpush1.bf16.msra.mxu1 %v1806_v47  ;;  %v1875_v47 = vld [vmem:[%s2674_s1 + $0x160] ss:$8 sps:$4 sm:$0xff]  }
  0x2c   :  { %1404 = vmatpush1.bf16.msra.mxu0 %v1807_v48  ;;  %1282 = vmatprep.subr.bf16.mxu1 %v1808_v49  ;;  %v1878_v48 = vld [vmem:[%s2674_s1 + $0x460] ss:$8 sps:$4 sm:$0xff]   ;;  %v276_v49 = vcombine.high %v2347_v46, %v2347_v46 }
  0x2d   :  { %1405 = vmatprep.subr.bf16.mxu0 %v1810_v50  ;;  %v1883_v50 = vld [vmem:[%s2674_s1 + $0x174] ss:$8 sps:$4 sm:$0xff]  }
  0x2f   :  { %1283 = vmatpush1.bf16.msra.mxu1 %v1812_v53  ;;  %v2364_v53 = vrot.slane %v276_v49, %v2190_v51  ;;  %v1970_v49 = vld [vmem:[%s2674_s1 + $0x554] ss:$8 sps:$4 sm:$0xff]  }
  0x30   :  { %1406 = vmatpush1.bf16.msra.mxu0 %v1813_v56  ;;  %1284 = vmatprep.subr.bf16.mxu1 %v1814_v57  ;;  %v1889_v56 = vld [vmem:[%s2674_s1 + $0x184] ss:$8 sps:$4 sm:$0xff]  }
  0x31   :  { %1407 = vmatprep.subr.bf16.mxu0 %v1816_v58  ;;  %v1892_v57 = vld [vmem:[%s2674_s1 + $0x484] ss:$8 sps:$4 sm:$0xff]   ;;  %v1887_v58 = vld [vmem:[%s2674_s1 + $0x180] ss:$8 sps:$4 sm:$0xff]  }
  0x33   :  { %1285 = vmatpush1.bf16.msra.mxu1 %v1818_v61  ;;  %v1898_v61 = vld [vmem:[%s2674_s1 + $0x494] ss:$8 sps:$4 sm:$0xff]  }
  0x34   :  { %1408 = vmatpush1.bf16.msra.mxu0 %v1819_v0  ;;  %1286 = vmatprep.subr.bf16.mxu1 %v1820_v1  ;;  %v1901_v0 = vld [vmem:[%s2674_s1 + $0x1a4] ss:$8 sps:$4 sm:$0xff]  }
  0x35   :  { %1409 = vmatprep.subr.bf16.mxu0 %v1822_v2  ;;  %v1904_v1 = vld [vmem:[%s2674_s1 + $0x4a4] ss:$8 sps:$4 sm:$0xff]   ;;  %v1899_v2 = vld [vmem:[%s2674_s1 + $0x1a0] ss:$8 sps:$4 sm:$0xff]  }
  0x37   :  { %1287 = vmatpush1.bf16.msra.mxu1 %v1824_v4  ;;  %v1902_v4 = vld [vmem:[%s2674_s1 + $0x4a0] ss:$8 sps:$4 sm:$0xff]  }
  0x38   :  { %1410 = vmatpush1.bf16.msra.mxu0 %v1825_v6  ;;  %1288 = vmatprep.subr.bf16.mxu1 %v1826_v7  ;;  %v1910_v6 = vld [vmem:[%s2674_s1 + $0x4b4] ss:$8 sps:$4 sm:$0xff]   ;;  %v1905_v7 = vld [vmem:[%s2674_s1 + $0x1b0] ss:$8 sps:$4 sm:$0xff]  }
  0x39   :  { %1411 = vmatprep.subr.bf16.mxu0 %v1828_v8  ;;  %v1908_v8 = vld [vmem:[%s2674_s1 + $0x4b0] ss:$8 sps:$4 sm:$0xff]  }
  0x3b   :  { %1289 = vmatpush1.bf16.msra.mxu1 %v1830_v9  ;;  %v1913_v9 = vld [vmem:[%s2674_s1 + $0x1c4] ss:$8 sps:$4 sm:$0xff]  }
  0x3c   :  { %1412 = vmatpush1.bf16.msra.mxu0 %v1831_v10  ;;  %1290 = vmatprep.subr.bf16.mxu1 %v1832_v11  ;;  %v1916_v10 = vld [vmem:[%s2674_s1 + $0x4c4] ss:$8 sps:$4 sm:$0xff]   ;;  %v1911_v11 = vld [vmem:[%s2674_s1 + $0x1c0] ss:$8 sps:$4 sm:$0xff]  }
  0x3d   :  { %1413 = vmatprep.subr.bf16.mxu0 %v1834_v12  ;;  %v1914_v12 = vld [vmem:[%s2674_s1 + $0x4c0] ss:$8 sps:$4 sm:$0xff]  }
  0x3f   :  { %1291 = vmatpush1.bf16.msra.mxu1 %v1836_v13  ;;  %v1919_v13 = vld [vmem:[%s2674_s1 + $0x1d4] ss:$8 sps:$4 sm:$0xff]  }
  0x40   :  { %1414 = vmatpush1.bf16.msra.mxu0 %v1837_v15  ;;  %1301 = vmatprep.subr.bf16.mxu1 %v1841_v16  ;;  %v1922_v15 = vld [vmem:[%s2674_s1 + $0x4d4] ss:$8 sps:$4 sm:$0xff]   ;;  %v1917_v16 = vld [vmem:[%s2674_s1 + $0x1d0] ss:$8 sps:$4 sm:$0xff]  }
  0x41   :  { %1424 = vmatprep.subr.bf16.mxu0 %v1844_v17  ;;  %v1920_v17 = vld [vmem:[%s2674_s1 + $0x4d0] ss:$8 sps:$4 sm:$0xff]  }
  0x42   :  { %1293 = vmatmul.mubr.bf16.vlgmr.msra.gmra.mrb[0].mxu1 %v2270_v19 }
  0x43   :  { %1416 = vmatmul.mubr.bf16.vlgmr.msra.gmra.mrb[0].mxu0 %v266_v20  ;;  %1302 = vmatpush1.bf16.msra.mxu1 %v1839_v18  ;;  %v1925_v18 = vld [vmem:[%s2674_s1 + $0x1e4] ss:$8 sps:$4 sm:$0xff]  }
  0x44   :  { %1425 = vmatpush1.bf16.msra.mxu0 %v1842_v21  ;;  %1303 = vmatprep.subr.bf16.mxu1 %v1847_v22  ;;  %v1928_v20 = vld [vmem:[%s2674_s1 + $0x4e4] ss:$8 sps:$4 sm:$0xff]   ;;  %v1923_v21 = vld [vmem:[%s2674_s1 + $0x1e0] ss:$8 sps:$4 sm:$0xff]  }
  0x45   :  { %1426 = vmatprep.subr.bf16.mxu0 %v1850_v23  ;;  %1333 = vmatprep.mubr.bf16.mxu1 %v267_v24  ;;  %v1926_v22 = vld [vmem:[%s2674_s1 + $0x4e0] ss:$8 sps:$4 sm:$0xff]   ;;  %v1931_v23 = vld [vmem:[%s2674_s1 + $0x1f4] ss:$8 sps:$4 sm:$0xff]  }
  0x46   :  { %1456 = vmatprep.mubr.bf16.mxu0 %v2364_v53  ;;  %v1934_v24 = vld [vmem:[%s2674_s1 + $0x4f4] ss:$8 sps:$4 sm:$0xff]  }
  0x47   :  { %1304 = vmatpush1.bf16.msra.mxu1 %v1845_v25  ;;  %v1929_v25 = vld [vmem:[%s2674_s1 + $0x1f0] ss:$8 sps:$4 sm:$0xff]  }
  0x48   :  { %1427 = vmatpush1.bf16.msra.mxu0 %v1848_v26  ;;  %1305 = vmatprep.subr.bf16.mxu1 %v1853_v27  ;;  %v1932_v26 = vld [vmem:[%s2674_s1 + $0x4f0] ss:$8 sps:$4 sm:$0xff]   ;;  %v1937_v27 = vld [vmem:[%s2674_s1 + $0x204] ss:$8 sps:$4 sm:$0xff]  }
  0x49   :  { %1428 = vmatprep.subr.bf16.mxu0 %v1856_v28  ;;  %v1940_v28 = vld [vmem:[%s2674_s1 + $0x504] ss:$8 sps:$4 sm:$0xff]  }
  0x4b   :  { %1306 = vmatpush1.bf16.msra.mxu1 %v1851_v29  ;;  %v265_v29 = vcombine.high %v2270_v19, %v2270_v19  ;;  %v1943_v19 = vld [vmem:[%s2674_s1 + $0x214] ss:$8 sps:$4 sm:$0xff]  }
  0x4c   :  { %1429 = vmatpush1.bf16.msra.mxu0 %v1854_v30  ;;  %1307 = vmatprep.subr.bf16.mxu1 %v1859_v31  ;;  %v2479_v30 = vrot.slane %v2347_v46, %v2190_v51  ;;  %v1935_v31 = vld [vmem:[%s2674_s1 + $0x200] ss:$8 sps:$4 sm:$0xff]   ;;  %v1946_v51 = vld [vmem:[%s2674_s1 + $0x514] ss:$8 sps:$4 sm:$0xff]  }
  0x4d   :  { %1430 = vmatprep.subr.bf16.mxu0 %v1862_v32  ;;  %v1938_v32 = vld [vmem:[%s2674_s1 + $0x500] ss:$8 sps:$4 sm:$0xff]  }
  0x4e   :  { %v1959_v46 = vld [vmem:[%s2674_s1 + $0x240] ss:$8 sps:$4 sm:$0xff]  }
  0x4f   :  { %1308 = vmatpush1.bf16.msra.mxu1 %v1857_v33  ;;  %v292_v33 = vcombine.high %v2364_v53, %v2364_v53  ;;  %v1973_v53 = vld [vmem:[%s2674_s1 + $0x264] ss:$8 sps:$4 sm:$0xff]  }
  0x50   :  { %1431 = vmatpush1.bf16.msra.mxu0 %v1860_v34  ;;  %1309 = vmatprep.subr.bf16.mxu1 %v1865_v35  ;;  %v1941_v34 = vld [vmem:[%s2674_s1 + $0x210] ss:$8 sps:$4 sm:$0xff]  }
  0x51   :  { %1432 = vmatprep.subr.bf16.mxu0 %v1868_v36  ;;  %v1944_v35 = vld [vmem:[%s2674_s1 + $0x510] ss:$8 sps:$4 sm:$0xff]   ;;  %v1949_v36 = vld [vmem:[%s2674_s1 + $0x224] ss:$8 sps:$4 sm:$0xff]  }
  0x53   :  { %1310 = vmatpush1.bf16.msra.mxu1 %v1863_v37  ;;  %v1952_v37 = vld [vmem:[%s2674_s1 + $0x524] ss:$8 sps:$4 sm:$0xff]  }
  0x54   :  { %1433 = vmatpush1.bf16.msra.mxu0 %v1866_v38  ;;  %1311 = vmatprep.subr.bf16.mxu1 %v1871_v39  ;;  %v1947_v38 = vld [vmem:[%s2674_s1 + $0x220] ss:$8 sps:$4 sm:$0xff]  }
  0x55   :  { %1434 = vmatprep.subr.bf16.mxu0 %v1874_v40  ;;  %v1950_v39 = vld [vmem:[%s2674_s1 + $0x520] ss:$8 sps:$4 sm:$0xff]   ;;  %v1955_v40 = vld [vmem:[%s2674_s1 + $0x234] ss:$8 sps:$4 sm:$0xff]  }
  0x57   :  { %1312 = vmatpush1.bf16.msra.mxu1 %v1869_v41  ;;  %v1953_v41 = vld [vmem:[%s2674_s1 + $0x230] ss:$8 sps:$4 sm:$0xff]  }
  0x58   :  { %1435 = vmatpush1.bf16.msra.mxu0 %v1872_v42  ;;  %1313 = vmatprep.subr.bf16.mxu1 %v1877_v43  ;;  %v1956_v42 = vld [vmem:[%s2674_s1 + $0x530] ss:$8 sps:$4 sm:$0xff]   ;;  %v1961_v43 = vld [vmem:[%s2674_s1 + $0x244] ss:$8 sps:$4 sm:$0xff]  }
  0x59   :  { %1436 = vmatprep.subr.bf16.mxu0 %v1880_v44  ;;  %v1964_v44 = vld [vmem:[%s2674_s1 + $0x544] ss:$8 sps:$4 sm:$0xff]  }
  0x5b   :  { %1314 = vmatpush1.bf16.msra.mxu1 %v1875_v47  ;;  %v1962_v47 = vld [vmem:[%s2674_s1 + $0x540] ss:$8 sps:$4 sm:$0xff]  }
  0x5c   :  { %1437 = vmatpush1.bf16.msra.mxu0 %v1878_v48  ;;  %1315 = vmatprep.subr.bf16.mxu1 %v1883_v50  ;;  %v1967_v48 = vld [vmem:[%s2674_s1 + $0x254] ss:$8 sps:$4 sm:$0xff]   ;;  %v1965_v50 = vld [vmem:[%s2674_s1 + $0x250] ss:$8 sps:$4 sm:$0xff]  }
  0x5d   :  { %1438 = vmatprep.subr.bf16.mxu0 %v1886_v52  ;;  %v1968_v52 = vld [vmem:[%s2674_s1 + $0x550] ss:$8 sps:$4 sm:$0xff]  }
  0x5f   :  { %1316 = vmatpush1.bf16.msra.mxu1 %v1881_v54  ;;  %v1976_v54 = vld [vmem:[%s2674_s1 + $0x564] ss:$8 sps:$4 sm:$0xff]  }
  0x60   :  { %1439 = vmatpush1.bf16.msra.mxu0 %v1884_v55  ;;  %1317 = vmatprep.subr.bf16.mxu1 %v1889_v56  ;;  %v1971_v55 = vld [vmem:[%s2674_s1 + $0x260] ss:$8 sps:$4 sm:$0xff]  }
  0x61   :  { %1440 = vmatprep.subr.bf16.mxu0 %v1892_v57  ;;  %v1974_v56 = vld [vmem:[%s2674_s1 + $0x560] ss:$8 sps:$4 sm:$0xff]   ;;  %v1979_v57 = vld [vmem:[%s2674_s1 + $0x274] ss:$8 sps:$4 sm:$0xff]  }
  0x63   :  { %1318 = vmatpush1.bf16.msra.mxu1 %v1887_v58  ;;  %v1982_v58 = vld [vmem:[%s2674_s1 + $0x574] ss:$8 sps:$4 sm:$0xff]  }
  0x64   :  { %1441 = vmatpush1.bf16.msra.mxu0 %v1890_v59  ;;  %1319 = vmatprep.subr.bf16.mxu1 %v1895_v60  ;;  %v1977_v59 = vld [vmem:[%s2674_s1 + $0x270] ss:$8 sps:$4 sm:$0xff]  }
  0x65   :  { %1442 = vmatprep.subr.bf16.mxu0 %v1898_v61  ;;  %v1980_v60 = vld [vmem:[%s2674_s1 + $0x570] ss:$8 sps:$4 sm:$0xff]   ;;  %v1985_v61 = vld [vmem:[%s2674_s1 + $0x284] ss:$8 sps:$4 sm:$0xff]  }
  0x67   :  { %1320 = vmatpush1.bf16.msra.mxu1 %v1893_v62  ;;  %v1988_v62 = vld [vmem:[%s2674_s1 + $0x584] ss:$8 sps:$4 sm:$0xff]  }
  0x68   :  { %1443 = vmatpush1.bf16.msra.mxu0 %v1896_v63  ;;  %1321 = vmatprep.subr.bf16.mxu1 %v1901_v0  ;;  %v1983_v63 = vld [vmem:[%s2674_s1 + $0x280] ss:$8 sps:$4 sm:$0xff]  }
  0x69   :  { %1444 = vmatprep.subr.bf16.mxu0 %v1904_v1  ;;  %v1986_v0 = vld [vmem:[%s2674_s1 + $0x580] ss:$8 sps:$4 sm:$0xff]   ;;  %v1991_v1 = vld [vmem:[%s2674_s1 + $0x294] ss:$8 sps:$4 sm:$0xff]  }
  0x6b   :  { %1322 = vmatpush1.bf16.msra.mxu1 %v1899_v2  ;;  %v1994_v2 = vld [vmem:[%s2674_s1 + $0x594] ss:$8 sps:$4 sm:$0xff]  }
  0x6c   :  { %1445 = vmatpush1.bf16.msra.mxu0 %v1902_v4  ;;  %1323 = vmatprep.subr.bf16.mxu1 %v1907_v5  ;;  %v1989_v4 = vld [vmem:[%s2674_s1 + $0x290] ss:$8 sps:$4 sm:$0xff]  }
  0x6d   :  { %1446 = vmatprep.subr.bf16.mxu0 %v1910_v6  ;;  %v1992_v5 = vld [vmem:[%s2674_s1 + $0x590] ss:$8 sps:$4 sm:$0xff]   ;;  %v1997_v6 = vld [vmem:[%s2674_s1 + $0x2a4] ss:$8 sps:$4 sm:$0xff]  }
  0x6f   :  { %1324 = vmatpush1.bf16.msra.mxu1 %v1905_v7  ;;  %v2000_v7 = vld [vmem:[%s2674_s1 + $0x5a4] ss:$8 sps:$4 sm:$0xff]  }
  0x70   :  { %1447 = vmatpush1.bf16.msra.mxu0 %v1908_v8  ;;  %1325 = vmatprep.subr.bf16.mxu1 %v1913_v9  ;;  %v1995_v8 = vld [vmem:[%s2674_s1 + $0x2a0] ss:$8 sps:$4 sm:$0xff]  }
  0x71   :  { %1448 = vmatprep.subr.bf16.mxu0 %v1916_v10  ;;  %v1998_v9 = vld [vmem:[%s2674_s1 + $0x5a0] ss:$8 sps:$4 sm:$0xff]   ;;  %v2003_v10 = vld [vmem:[%s2674_s1 + $0x2b4] ss:$8 sps:$4 sm:$0xff]  }
  0x73   :  { %1326 = vmatpush1.bf16.msra.mxu1 %v1911_v11  ;;  %v2006_v11 = vld [vmem:[%s2674_s1 + $0x5b4] ss:$8 sps:$4 sm:$0xff]  }
  0x74   :  { %1449 = vmatpush1.bf16.msra.mxu0 %v1914_v12  ;;  %1327 = vmatprep.subr.bf16.mxu1 %v1919_v13  ;;  %v2001_v12 = vld [vmem:[%s2674_s1 + $0x2b0] ss:$8 sps:$4 sm:$0xff]  }
  0x75   :  { %1450 = vmatprep.subr.bf16.mxu0 %v1922_v15  ;;  %v2004_v13 = vld [vmem:[%s2674_s1 + $0x5b0] ss:$8 sps:$4 sm:$0xff]   ;;  %v2009_v15 = vld [vmem:[%s2674_s1 + $0x2c4] ss:$8 sps:$4 sm:$0xff]  }
  0x77   :  { %1328 = vmatpush1.bf16.msra.mxu1 %v1917_v16  ;;  %v2012_v16 = vld [vmem:[%s2674_s1 + $0x5c4] ss:$8 sps:$4 sm:$0xff]  }
  0x78   :  { %1451 = vmatpush1.bf16.msra.mxu0 %v1920_v17  ;;  %1329 = vmatprep.subr.bf16.mxu1 %v1925_v18  ;;  %v2007_v17 = vld [vmem:[%s2674_s1 + $0x2c0] ss:$8 sps:$4 sm:$0xff]  }
  0x79   :  { %1452 = vmatprep.subr.bf16.mxu0 %v1928_v20  ;;  %v2010_v18 = vld [vmem:[%s2674_s1 + $0x5c0] ss:$8 sps:$4 sm:$0xff]   ;;  %v2015_v20 = vld [vmem:[%s2674_s1 + $0x2d4] ss:$8 sps:$4 sm:$0xff]  }
  0x7b   :  { %1330 = vmatpush1.bf16.msra.mxu1 %v1923_v21  ;;  %v2018_v21 = vld [vmem:[%s2674_s1 + $0x5d4] ss:$8 sps:$4 sm:$0xff]  }
  0x7c   :  { %1453 = vmatpush1.bf16.msra.mxu0 %v1926_v22  ;;  %1331 = vmatprep.subr.bf16.mxu1 %v1931_v23  ;;  %v205_v22 = vld [vmem:[%s2674_s1 + $0x5e0] sm:$0x11]  ;;  %v2013_v23 = vld [vmem:[%s2674_s1 + $0x2d0] ss:$8 sps:$4 sm:$0xff]  }
  0x7d   :  { %1454 = vmatprep.subr.bf16.mxu0 %v1934_v24  ;;  %v2016_v24 = vld [vmem:[%s2674_s1 + $0x5d0] ss:$8 sps:$4 sm:$0xff]  }
  0x7f   :  { %1332 = vmatpush1.bf16.msra.mxu1 %v1929_v25  ;;  %v2021_v25 = vld [vmem:[%s2674_s1 + $0x2e4] ss:$8 sps:$4 sm:$0xff]  }
  0x80   :  { %1455 = vmatpush1.bf16.msra.mxu0 %v1932_v26  ;;  %1342 = vmatprep.subr.bf16.mxu1 %v1937_v27  ;;  %v1717_v26 = vcombine.high %v205_v22, %v205_v22  ;;  %v1716_v27 = vcombine.low %v205_v22, %v205_v22 }
  0x81   :  { %1465 = vmatprep.subr.bf16.mxu0 %v1940_v28  ;;  %v2019_v28 = vld [vmem:[%s2674_s1 + $0x2e0] ss:$8 sps:$4 sm:$0xff]  }
  0x82   :  { %1334 = vmatmul.mubr.bf16.vlgmr.msra.gmra.mrb[0].mxu1 %v265_v29  ;;  %v1255_v29 = vsel %vm1253_vm1, %v1716_v27, 0 }
  0x83   :  { %1457 = vmatmul.mubr.bf16.vlgmr.msra.gmra.mrb[0].mxu0 %v2479_v30  ;;  %1343 = vmatpush1.bf16.msra.mxu1 %v1935_v31  ;;  %v2026_v31 = vld [vmem:[%s2674_s1 + $0x2f4] ss:$8 sps:$4 sm:$0xff]  }
  0x84   :  { %1466 = vmatpush1.bf16.msra.mxu0 %v1938_v32  ;;  %1344 = vmatprep.subr.bf16.mxu1 %v1943_v19  ;;  %v291_v32 = vcombine.high %v2479_v30, %v2479_v30  ;;  %v2024_v19 = vld [vmem:[%s2674_s1 + $0x2f0] ss:$8 sps:$4 sm:$0xff]  }
  0x85   :  { %1467 = vmatprep.subr.bf16.mxu0 %v1946_v51  ;;  %1719 = vmatprep.mubr.msk.bf16.mxu0 %vm1249_vm0, %v292_v33  ;;  %v210_v51 = vsub.s32 0, %v2175_v45  ;;  %v206_v33 = vld [vmem:[%s2676_s2] sm:$0x3] }
  0x86   :  { %1374 = vmatprep.mubr.bf16.mxu1 %v2223_v3  ;;  %v1958_v3 = vld [vmem:[%s2674_s1 + $0x534] ss:$8 sps:$4 sm:$0xff]  }
  0x87   :  { %1345 = vmatpush1.bf16.msra.mxu1 %v1941_v34  ;;  %v214_v34 = vsub.s32 1, %v2175_v45 }
  0x88   :  { %1468 = vmatpush1.bf16.msra.mxu0 %v1944_v35  ;;  %1346 = vmatprep.subr.bf16.mxu1 %v1949_v36  ;;  %v211_v36 = vrot.slane %v206_v33, %v210_v51 }
  0x89   :  { %1469 = vmatprep.subr.bf16.mxu0 %v1952_v37 }
  0x8b   :  { %1347 = vmatpush1.bf16.msra.mxu1 %v1947_v38  ;;  %v215_v38 = vrot.slane %v206_v33, %v214_v34 }
  0x8c   :  { %1470 = vmatpush1.bf16.msra.mxu0 %v1950_v39  ;;  %1348 = vmatprep.subr.bf16.mxu1 %v1955_v40  ;;  %v2028_v39 = vmov 1983009808  }
  0x8d   :  { %1471 = vmatprep.subr.bf16.mxu0 %v1958_v3  ;;  %v1512_v40 = vunpack.c.l.s4 %v2028_v39 }
  0x8f   :  { %1349 = vmatpush1.bf16.msra.mxu1 %v1953_v41 }
  0x90   :  { %1472 = vmatpush1.bf16.msra.mxu0 %v1956_v42  ;;  %1350 = vmatprep.subr.bf16.mxu1 %v1961_v43 }
  0x91   :  { %1473 = vmatprep.subr.bf16.mxu0 %v1964_v44  ;;  %v1513_v44 = vunpack.c.0.s8 %v1512_v40 }
  0x93   :  { %1351 = vmatpush1.bf16.msra.mxu1 %v1959_v46 }
  0x94   :  { %1474 = vmatpush1.bf16.msra.mxu0 %v1962_v47  ;;  %1352 = vmatprep.subr.bf16.mxu1 %v1967_v48 }
  0x95   :  { %1475 = vmatprep.subr.bf16.mxu0 %v1970_v49 }
  0x97   :  { %1353 = vmatpush1.bf16.msra.mxu1 %v1965_v50 }
  0x98   :  { %1476 = vmatpush1.bf16.msra.mxu0 %v1968_v52  ;;  %1354 = vmatprep.subr.bf16.mxu1 %v1973_v53  ;;  %v1516_v53 = vsub.s32 %v1513_v44, %v2175_v45 }
  0x99   :  { %1477 = vmatprep.subr.bf16.mxu0 %v1976_v54 }
  0x9b   :  { %1355 = vmatpush1.bf16.msra.mxu1 %v1971_v55 }
  0x9c   :  { %1478 = vmatpush1.bf16.msra.mxu0 %v1974_v56  ;;  %1356 = vmatprep.subr.bf16.mxu1 %v1979_v57 }
  0x9d   :  { %1479 = vmatprep.subr.bf16.mxu0 %v1982_v58 }
  0x9f   :  { %1357 = vmatpush1.bf16.msra.mxu1 %v1977_v59 }
  0xa0   :  { %1480 = vmatpush1.bf16.msra.mxu0 %v1980_v60  ;;  %1358 = vmatprep.subr.bf16.mxu1 %v1985_v61 }
  0xa1   :  { %1481 = vmatprep.subr.bf16.mxu0 %v1988_v62 }
  0xa3   :  { %1359 = vmatpush1.bf16.msra.mxu1 %v1983_v63 }
  0xa4   :  { %1482 = vmatpush1.bf16.msra.mxu0 %v1986_v0  ;;  %1360 = vmatprep.subr.bf16.mxu1 %v1991_v1 }
  0xa5   :  { %1483 = vmatprep.subr.bf16.mxu0 %v1994_v2 }
  0xa7   :  { %1361 = vmatpush1.bf16.msra.mxu1 %v1989_v4 }
  0xa8   :  { %1484 = vmatpush1.bf16.msra.mxu0 %v1992_v5  ;;  %1362 = vmatprep.subr.bf16.mxu1 %v1997_v6 }
  0xa9   :  { %1485 = vmatprep.subr.bf16.mxu0 %v2000_v7 }
  0xab   :  { %1363 = vmatpush1.bf16.msra.mxu1 %v1995_v8 }
  0xac   :  { %1486 = vmatpush1.bf16.msra.mxu0 %v1998_v9  ;;  %1364 = vmatprep.subr.bf16.mxu1 %v2003_v10 }
  0xad   :  { %1487 = vmatprep.subr.bf16.mxu0 %v2006_v11 }
  0xaf   :  { %1365 = vmatpush1.bf16.msra.mxu1 %v2001_v12 }
  0xb0   :  { %1488 = vmatpush1.bf16.msra.mxu0 %v2004_v13  ;;  %1366 = vmatprep.subr.bf16.mxu1 %v2009_v15 }
  0xb1   :  { %1489 = vmatprep.subr.bf16.mxu0 %v2012_v16 }
  0xb3   :  { %1367 = vmatpush1.bf16.msra.mxu1 %v2007_v17 }
  0xb4   :  { %1490 = vmatpush1.bf16.msra.mxu0 %v2010_v18  ;;  %1368 = vmatprep.subr.bf16.mxu1 %v2015_v20 }
  0xb5   :  { %1491 = vmatprep.subr.bf16.mxu0 %v2018_v21 }
  0xb7   :  { %1369 = vmatpush1.bf16.msra.mxu1 %v2013_v23 }
  0xb8   :  { %1492 = vmatpush1.bf16.msra.mxu0 %v2016_v24  ;;  %1370 = vmatprep.subr.bf16.mxu1 %v2021_v25 }
  0xb9   :  { %1718 = vmatprep.subr.msk.bf16.mxu0 %vm1253_vm1, %v1717_v26 }
  0xbb   :  { %1371 = vmatpush1.bf16.msra.mxu1 %v2019_v28 }
  0xbc   :  { %1494 = vmatpush1.bf16.msra.mxu0 %v1255_v29  ;;  %1372 = vmatprep.subr.bf16.mxu1 %v2026_v31 }
  0xbf   :  { %1498 = vmatmul.mubr.bf16.vlgmr.msra.gmra.mrb[0].mxu0 %v291_v32  ;;  %1373 = vmatpush1.bf16.msra.mxu1 %v2024_v19 }
  0xc2   :  { %1375 = vmatmul.mubr.bf16.vlgmr.msra.gmra.mrb[0].mxu1 %v2255_v14 }
 0x192   :  { %v1499_v30 = vpop.f32.mrb[0].mxu0 }
 0x193   :  { %v1501_v35 = vpop.f32.mrb[1].mxu0 }
 0x194   :  { %v1503_v37 = vpop.f32.mrb[2].mxu0 }
 0x195   :  { %v1504_v3 = vpop.f32.mrb[3].mxu0  ;;  %v1376_v41 = vpop.f32.mrb[0].mxu1 }
 0x196   :  { %v1720_v42 = vadd.f32 %v1376_v41, %v211_v36  ;;  %v1378_v43 = vpop.f32.mrb[1].mxu1 }
 0x197   :  { %v1722_v14 = vadd.f32 %v1378_v43, %v215_v38  ;;  %v1380_v46 = vpop.f32.mrb[2].mxu1 }
 0x198   :  { %v1721_v47 = vadd.f32 %v1720_v42, %v1499_v30  ;;  %v1381_v48 = vpop.f32.mrb[3].mxu1 }
 0x199   :  { %v1723_v49 = vadd.f32 %v1722_v14, %v1501_v35 }
 0x19a   :  { %v1506_v50 = vmax.f32 %v1721_v47, 0.0 }
 0x19b   :  { %v1507_v52 = vmax.f32 %v1723_v49, 0.0 }
 0x19d   :  { %v1510_v54 = vcombine.low %v1506_v50, %v1507_v52 }
 0x19f   :  { %v1517_v55 = vrot.slane %v1510_v54, %v1516_v53 }
 0x1a1   :  { %1522 = vst.msk [vmem:[%s2677_s3] sm:$0xf] %vm1521_vm4, %v1517_v55 }

</bundles_post_ra>
